<compile_context>
chip_gen: v7x
topology: tpu7x:2x2x1
jax: 0.10.0
libtpu: 0.0.40
codegen_flags: <defaults>
</compile_context>

<pallas_src>
import math

import jax
import jax.numpy as jnp
from jax.experimental import pallas as pl
from jax.experimental.pallas import tpu as pltpu

IN_DIM = 192
HID = 1028           # hidden width from the PyTorch spec
HID_PAD = 1152       # zero-padded to a multiple of 128 lanes (9 vregs/row)
OUT_DIM = 4
OUT_PAD = 128        # lane-dense output slab; real logits are [:, :4]
LN_EPS = 1e-5
INV_N = 1.0 / HID    # LayerNorm normalizes over the 1028 *real* features


def _layernorm_f32(h, gamma, beta):
    # Single-pass sums. Padded lanes of h are exactly zero, so sums over
    # HID_PAD lanes equal sums over the HID real lanes; divide by HID.
    s = jnp.sum(h, axis=-1, keepdims=True)
    s2 = jnp.sum(h * h, axis=-1, keepdims=True)
    mean = s * INV_N
    var = jnp.maximum(s2 * INV_N - mean * mean, 0.0)   # clamp: avoid NaN from cancellation
    inv_std = jax.lax.rsqrt(var + LN_EPS)              # EUP slot
    # gamma/beta are zero in padded lanes -> padded lanes stay exactly 0.
    return (h - mean) * inv_std * gamma + beta


def nn_agent_kernel(
    x_ref,
    w1_ref, b1_ref, g1_ref, be1_ref,
    b2_ref, g2_ref, be2_ref,
    b3_ref, g3_ref, be3_ref,
    b4_ref, b5_ref,
    w2_hbm, w3_hbm, w4_hbm, w5_hbm,
    out_ref,
    w2_buf, w3_buf, w4_buf, w5_buf, dma_sem,
):
    step = pl.program_id(0)

    # Layer-streamed weight DMA: issue all four loads up front (step 0 only;
    # scratch persists across grid steps), wait for each right before use.
    cp2 = pltpu.make_async_copy(w2_hbm, w2_buf, dma_sem.at[0])
    cp3 = pltpu.make_async_copy(w3_hbm, w3_buf, dma_sem.at[1])
    cp4 = pltpu.make_async_copy(w4_hbm, w4_buf, dma_sem.at[2])
    cp5 = pltpu.make_async_copy(w5_hbm, w5_buf, dma_sem.at[3])

    @pl.when(step == 0)
    def _():
        cp2.start()
        cp3.start()
        cp4.start()
        cp5.start()

    # fc1 -> ln1 -> relu   (x arrives already bf16 from the wrapper)
    x = x_ref[...]
    h1 = jnp.dot(x, w1_ref[...], preferred_element_type=jnp.float32) + b1_ref[...]
    x1 = jnp.maximum(_layernorm_f32(h1, g1_ref[...], be1_ref[...]), 0.0
                     ).astype(jnp.bfloat16)

    # fc2 -> ln2 -> relu
    @pl.when(step == 0)
    def _():
        cp2.wait()
    h2 = jnp.dot(x1, w2_buf[...], preferred_element_type=jnp.float32) + b2_ref[...]
    x2 = jnp.maximum(_layernorm_f32(h2, g2_ref[...], be2_ref[...]), 0.0
                     ).astype(jnp.bfloat16)

    # residual add (bf16; both operands already bf16-rounded, fc3 input is bf16 anyway)
    xs = x1 + x2

    # fc3 -> ln3 -> relu
    @pl.when(step == 0)
    def _():
        cp3.wait()
    h3 = jnp.dot(xs, w3_buf[...], preferred_element_type=jnp.float32) + b3_ref[...]
    x3 = jnp.maximum(_layernorm_f32(h3, g3_ref[...], be3_ref[...]), 0.0
                     ).astype(jnp.bfloat16)

    # fc4 -> relu
    @pl.when(step == 0)
    def _():
        cp4.wait()
    x4 = jnp.maximum(
        jnp.dot(x3, w4_buf[...], preferred_element_type=jnp.float32) + b4_ref[...],
        0.0,
    ).astype(jnp.bfloat16)

    # fc5 (logits padded to 128 lanes -> unmasked lane-dense store)
    @pl.when(step == 0)
    def _():
        cp5.wait()
    out_ref[...] = (
        jnp.dot(x4, w5_buf[...], preferred_element_type=jnp.float32) + b5_ref[...]
    )


def _round_up(n, m):
    return (n + m - 1) // m * m


def _choose_config():
    """(batch_tile, vmem_limit_bytes) per TPU generation."""
    try:
        kind = jax.devices()[0].device_kind.lower()
    except Exception:
        kind = ""
    if "v5" in kind or "v6" in kind:
        # 128 MiB physical VMEM: bigger tiles amortize grid-step overhead and
        # per-step MXU weight pushes.
        return 512, 64 << 20
    # v7x (64 MiB VMEM per TC) or unknown: stay conservative.
    return 256, 48 << 20


def _pad_params(params):
    """Zero-pad unpadded f32 params to lane-aligned shapes; weights -> bf16."""
    (w1, b1, g1, be1,
     w2, b2, g2, be2,
     w3, b3, g3, be3,
     w4, b4, w5, b5) = params

    dh = HID_PAD - HID
    do = OUT_PAD - OUT_DIM

    def pad_c(a, n):          # pad trailing columns with zeros
        return jnp.pad(a, ((0, 0), (0, n)))

    def pad_rc(a, r, c):      # pad trailing rows + columns with zeros
        return jnp.pad(a, ((0, r), (0, c)))

    w1p = pad_c(w1, dh).astype(jnp.bfloat16)
    w2p = pad_rc(w2, dh, dh).astype(jnp.bfloat16)
    w3p = pad_rc(w3, dh, dh).astype(jnp.bfloat16)
    w4p = pad_rc(w4, dh, dh).astype(jnp.bfloat16)
    w5p = pad_rc(w5, dh, do).astype(jnp.bfloat16)

    # Biases / LN params stay f32; NOTE gamma is padded with 0 (not 1) so the
    # padded lanes remain identically zero after LayerNorm.
    return (
        w1p, pad_c(b1, dh), pad_c(g1, dh), pad_c(be1, dh),
        w2p, pad_c(b2, dh), pad_c(g2, dh), pad_c(be2, dh),
        w3p, pad_c(b3, dh), pad_c(g3, dh), pad_c(be3, dh),
        w4p, pad_c(b4, dh),
        w5p, pad_c(b5, do),
    )


def nn_agent_forward(x, padded_params, *, block_b=None, vmem_limit_bytes=None):
    """x: (B, 192) float32. padded_params: output of _pad_params. -> (B, 4)."""
    (w1p, b1p, g1p, be1p,
     w2p, b2p, g2p, be2p,
     w3p, b3p, g3p, be3p,
     w4p, b4p, w5p, b5p) = padded_params

    auto_tb, auto_vmem = _choose_config()
    if block_b is None:
        block_b = auto_tb
    if vmem_limit_bytes is None:
        vmem_limit_bytes = auto_vmem

    B = x.shape[0]
    tb = min(block_b, _round_up(B, 8))     # batch tile (sublane-aligned)
    b_pad = _round_up(B, tb)

    x = x.astype(jnp.bfloat16)             # halve input DMA bytes; no in-kernel cast
    if b_pad != B:
        x = jnp.pad(x, ((0, b_pad - B), (0, 0)))

    grid = (b_pad // tb,)

    # Small, VMEM-resident params: fc1 weight + all biases / LN params.
    small = (w1p, b1p, g1p, be1p, b2p, g2p, be2p, b3p, g3p, be3p, b4p, b5p)
    # Big weights stay in HBM; streamed into single-buffered VMEM scratch.
    big = (w2p, w3p, w4p, w5p)

    x_spec = pl.BlockSpec((tb, IN_DIM), lambda i: (i, 0))
    # Constant block index -> these stay resident across batch tiles.
    small_specs = [pl.BlockSpec(p.shape, lambda i: (0, 0)) for p in small]
    big_specs = [pl.BlockSpec(memory_space=pl.ANY) for _ in big]
    out_spec = pl.BlockSpec((tb, OUT_PAD), lambda i: (i, 0))

    out = pl.pallas_call(
        nn_agent_kernel,
        out_shape=jax.ShapeDtypeStruct((b_pad, OUT_PAD), jnp.float32),
        grid=grid,
        in_specs=[x_spec] + small_specs + big_specs,
        out_specs=out_spec,
        scratch_shapes=[
            pltpu.VMEM((HID_PAD, HID_PAD), jnp.bfloat16),   # w2
            pltpu.VMEM((HID_PAD, HID_PAD), jnp.bfloat16),   # w3
            pltpu.VMEM((HID_PAD, HID_PAD), jnp.bfloat16),   # w4
            pltpu.VMEM((HID_PAD, OUT_PAD), jnp.bfloat16),   # w5
            pltpu.SemaphoreType.DMA((4,)),
        ],
        compiler_params=pltpu.CompilerParams(
            # "arbitrary": grid runs sequentially on one TC, which the
            # step==0 weight-DMA guard relies on. (Splitting batch tiles
            # across v7x's 2 TCs would duplicate the 8 MiB weight load and
            # only pays off at large batch.)
            dimension_semantics=("arbitrary",),
            vmem_limit_bytes=vmem_limit_bytes,
        ),
    )(x, *small, *big)
    return out[:B, :OUT_DIM]


def init_params(key):
    """Deterministic init mimicking PyTorch nn.Linear defaults.

    Returns weights already transposed to (in, out); biases / LN params (1, F).
    """
    def linear(key, fan_in, fan_out):
        kw, kb = jax.random.split(key)
        bound = 1.0 / math.sqrt(fan_in)
        w = jax.random.uniform(kw, (fan_in, fan_out), jnp.float32, -bound, bound)
        b = jax.random.uniform(kb, (1, fan_out), jnp.float32, -bound, bound)
        return w, b

    keys = jax.random.split(key, 5)
    w1, b1 = linear(keys[0], IN_DIM, HID)
    w2, b2 = linear(keys[1], HID, HID)
    w3, b3 = linear(keys[2], HID, HID)
    w4, b4 = linear(keys[3], HID, HID)
    w5, b5 = linear(keys[4], HID, OUT_DIM)

    ones = jnp.ones((1, HID), jnp.float32)
    zeros = jnp.zeros((1, HID), jnp.float32)
    # (g, be) = LayerNorm weight/bias, PyTorch default init
    return (
        w1, b1, ones, zeros,
        w2, b2, ones, zeros,
        w3, b3, ones, zeros,
        w4, b4,
        w5, b5,
    )


def reference_forward(x, params):
    """Pure-JAX reference on the *unpadded* params, mirroring the kernel's
    bf16-activation / bf16-weight / f32-LayerNorm arithmetic (also validates
    the padding). Parity with the original f32 PyTorch module is ~1e-2."""
    (w1, b1, g1, be1,
     w2, b2, g2, be2,
     w3, b3, g3, be3,
     w4, b4, w5, b5) = params

    def dot_bf16(a_bf16, w):
        return jnp.dot(a_bf16, w.astype(jnp.bfloat16),
                       preferred_element_type=jnp.float32)

    xb = x.astype(jnp.bfloat16)
    h1 = dot_bf16(xb, w1) + b1
    x1 = jnp.maximum(_layernorm_f32(h1, g1, be1), 0.0).astype(jnp.bfloat16)
    h2 = dot_bf16(x1, w2) + b2
    x2 = jnp.maximum(_layernorm_f32(h2, g2, be2), 0.0).astype(jnp.bfloat16)
    xs = x1 + x2
    h3 = dot_bf16(xs, w3) + b3
    x3 = jnp.maximum(_layernorm_f32(h3, g3, be3), 0.0).astype(jnp.bfloat16)
    x4 = jnp.maximum(dot_bf16(x3, w4) + b4, 0.0).astype(jnp.bfloat16)
    return dot_bf16(x4, w5) + b5


if __name__ == "__main__":
    key = jax.random.PRNGKey(0)
    kx, kp = jax.random.split(key)

    B = 2  # small batch; a 1-D input in PyTorch is unsqueezed to (1, 192)
    # simulate a flattened 2048-board state scaled into [0, 1] like get_action
    x = jax.random.uniform(kx, (B, IN_DIM), jnp.float32, 0.0, 1.0)

    params = init_params(kp)
    padded_params = _pad_params(params)

    out = nn_agent_forward(x, padded_params)
    out = jax.block_until_ready(out)

    ref = reference_forward(x, params)
    assert out.shape == (B, OUT_DIM)
    assert jnp.allclose(out, ref, atol=1e-2, rtol=1e-2), "mismatch vs JAX reference"

    print("KERNEL_OK")
</pallas_src>

<mosaic_0001>
module attributes {stable_mosaic.version = 11 : i64} {
  func.func @nn_agent_kernel(%arg0: i32, %arg1: memref<8x192xbf16, #tpu.memory_space<vmem>>, %arg2: memref<192x1152xbf16, #tpu.memory_space<vmem>>, %arg3: memref<1x1152xf32, #tpu.memory_space<vmem>>, %arg4: memref<1x1152xf32, #tpu.memory_space<vmem>>, %arg5: memref<1x1152xf32, #tpu.memory_space<vmem>>, %arg6: memref<1x1152xf32, #tpu.memory_space<vmem>>, %arg7: memref<1x1152xf32, #tpu.memory_space<vmem>>, %arg8: memref<1x1152xf32, #tpu.memory_space<vmem>>, %arg9: memref<1x1152xf32, #tpu.memory_space<vmem>>, %arg10: memref<1x1152xf32, #tpu.memory_space<vmem>>, %arg11: memref<1x1152xf32, #tpu.memory_space<vmem>>, %arg12: memref<1x1152xf32, #tpu.memory_space<vmem>>, %arg13: memref<1x128xf32, #tpu.memory_space<vmem>>, %arg14: memref<1152x1152xbf16, #tpu.memory_space<any>>, %arg15: memref<1152x1152xbf16, #tpu.memory_space<any>>, %arg16: memref<1152x1152xbf16, #tpu.memory_space<any>>, %arg17: memref<1152x128xbf16, #tpu.memory_space<any>>, %arg18: memref<8x128xf32, #tpu.memory_space<vmem>>, %arg19: memref<1152x1152xbf16, #tpu.memory_space<vmem>>, %arg20: memref<1152x1152xbf16, #tpu.memory_space<vmem>>, %arg21: memref<1152x1152xbf16, #tpu.memory_space<vmem>>, %arg22: memref<1152x128xbf16, #tpu.memory_space<vmem>>, %arg23: memref<4x!tpu.dma_semaphore, #tpu.memory_space<semaphore_mem>>) attributes {dimension_semantics = [#tpu.dimension_semantics<arbitrary>], iteration_bounds = array<i64: 1>, scalar_prefetch = 0 : i64, scratch_operands = 5 : i64, tpu.core_type = #tpu.core_type<tc>, window_params = [{transform_indices = @transform_0, window_bounds = array<i64: 8, 192>}, {pipeline_mode = #tpu.pipeline_mode<synchronous>, transform_indices = @transform_1, window_bounds = array<i64: 192, 1152>}, {pipeline_mode = #tpu.pipeline_mode<synchronous>, transform_indices = @transform_2, window_bounds = array<i64: 1, 1152>}, {pipeline_mode = #tpu.pipeline_mode<synchronous>, transform_indices = @transform_3, window_bounds = array<i64: 1, 1152>}, {pipeline_mode = #tpu.pipeline_mode<synchronous>, transform_indices = @transform_4, window_bounds = array<i64: 1, 1152>}, {pipeline_mode = #tpu.pipeline_mode<synchronous>, transform_indices = @transform_5, window_bounds = array<i64: 1, 1152>}, {pipeline_mode = #tpu.pipeline_mode<synchronous>, transform_indices = @transform_6, window_bounds = array<i64: 1, 1152>}, {pipeline_mode = #tpu.pipeline_mode<synchronous>, transform_indices = @transform_7, window_bounds = array<i64: 1, 1152>}, {pipeline_mode = #tpu.pipeline_mode<synchronous>, transform_indices = @transform_8, window_bounds = array<i64: 1, 1152>}, {pipeline_mode = #tpu.pipeline_mode<synchronous>, transform_indices = @transform_9, window_bounds = array<i64: 1, 1152>}, {pipeline_mode = #tpu.pipeline_mode<synchronous>, transform_indices = @transform_10, window_bounds = array<i64: 1, 1152>}, {pipeline_mode = #tpu.pipeline_mode<synchronous>, transform_indices = @transform_11, window_bounds = array<i64: 1, 1152>}, {pipeline_mode = #tpu.pipeline_mode<synchronous>, transform_indices = @transform_12, window_bounds = array<i64: 1, 128>}, {}, {}, {}, {}, {transform_indices = @transform_17, window_bounds = array<i64: 8, 128>}]} {
    %c0_i32 = arith.constant 0 : i32
    %0 = arith.cmpi eq, %arg0, %c0_i32 : i32
    %1 = arith.extui %0 : i1 to i32
    %c0_i32_0 = arith.constant 0 : i32
    %c1_i32 = arith.constant 1 : i32
    %c2_i32 = arith.constant 2 : i32
    %c3_i32 = arith.constant 3 : i32
    %c0_i32_1 = arith.constant 0 : i32
    %2 = arith.cmpi ne, %1, %c0_i32_1 : i32
    scf.if %2 {
      %133 = tpu.memref_slice %arg23[%c0_i32_0] : memref<4x!tpu.dma_semaphore, #tpu.memory_space<semaphore_mem>> -> memref<1x!tpu.dma_semaphore, #tpu.memory_space<semaphore_mem>>
      %134 = tpu.memref_squeeze %133 : memref<1x!tpu.dma_semaphore, #tpu.memory_space<semaphore_mem>> -> memref<!tpu.dma_semaphore, #tpu.memory_space<semaphore_mem>>
      tpu.enqueue_dma source(%arg14 : memref<1152x1152xbf16, #tpu.memory_space<any>>) target(%arg19 : memref<1152x1152xbf16, #tpu.memory_space<vmem>>) target_semaphore(%134 : memref<!tpu.dma_semaphore, #tpu.memory_space<semaphore_mem>>)
      %135 = tpu.memref_slice %arg23[%c1_i32] : memref<4x!tpu.dma_semaphore, #tpu.memory_space<semaphore_mem>> -> memref<1x!tpu.dma_semaphore, #tpu.memory_space<semaphore_mem>>
      %136 = tpu.memref_squeeze %135 : memref<1x!tpu.dma_semaphore, #tpu.memory_space<semaphore_mem>> -> memref<!tpu.dma_semaphore, #tpu.memory_space<semaphore_mem>>
      tpu.enqueue_dma source(%arg15 : memref<1152x1152xbf16, #tpu.memory_space<any>>) target(%arg20 : memref<1152x1152xbf16, #tpu.memory_space<vmem>>) target_semaphore(%136 : memref<!tpu.dma_semaphore, #tpu.memory_space<semaphore_mem>>)
      %137 = tpu.memref_slice %arg23[%c2_i32] : memref<4x!tpu.dma_semaphore, #tpu.memory_space<semaphore_mem>> -> memref<1x!tpu.dma_semaphore, #tpu.memory_space<semaphore_mem>>
      %138 = tpu.memref_squeeze %137 : memref<1x!tpu.dma_semaphore, #tpu.memory_space<semaphore_mem>> -> memref<!tpu.dma_semaphore, #tpu.memory_space<semaphore_mem>>
      tpu.enqueue_dma source(%arg16 : memref<1152x1152xbf16, #tpu.memory_space<any>>) target(%arg21 : memref<1152x1152xbf16, #tpu.memory_space<vmem>>) target_semaphore(%138 : memref<!tpu.dma_semaphore, #tpu.memory_space<semaphore_mem>>)
      %139 = tpu.memref_slice %arg23[%c3_i32] : memref<4x!tpu.dma_semaphore, #tpu.memory_space<semaphore_mem>> -> memref<1x!tpu.dma_semaphore, #tpu.memory_space<semaphore_mem>>
      %140 = tpu.memref_squeeze %139 : memref<1x!tpu.dma_semaphore, #tpu.memory_space<semaphore_mem>> -> memref<!tpu.dma_semaphore, #tpu.memory_space<semaphore_mem>>
      tpu.enqueue_dma source(%arg17 : memref<1152x128xbf16, #tpu.memory_space<any>>) target(%arg22 : memref<1152x128xbf16, #tpu.memory_space<vmem>>) target_semaphore(%140 : memref<!tpu.dma_semaphore, #tpu.memory_space<semaphore_mem>>)
    } else {
    }
    %c0 = arith.constant 0 : index
    %c0_2 = arith.constant 0 : index
    %3 = vector.load %arg1[%c0, %c0_2] : memref<8x192xbf16, #tpu.memory_space<vmem>>, vector<8x192xbf16>
    %c0_3 = arith.constant 0 : index
    %c0_4 = arith.constant 0 : index
    %4 = vector.load %arg2[%c0_3, %c0_4] : memref<192x1152xbf16, #tpu.memory_space<vmem>>, vector<192x1152xbf16>
    %cst = arith.constant dense<0.000000e+00> : vector<8x1152xf32>
    %5 = tpu.matmul %3, %4, %cst {dimension_numbers = #tpu.dot_dimension_numbers<[1], [0], [0], [1], [0, 0, 1, 1], [], []>} : vector<8x192xbf16>, vector<192x1152xbf16>, vector<8x1152xf32> -> vector<8x1152xf32>
    %c0_5 = arith.constant 0 : index
    %c0_6 = arith.constant 0 : index
    %6 = vector.load %arg3[%c0_5, %c0_6] : memref<1x1152xf32, #tpu.memory_space<vmem>>, vector<1x1152xf32>
    %7 = vector.broadcast %6 : vector<1x1152xf32> to vector<8x1152xf32>
    %8 = arith.addf %5, %7 : vector<8x1152xf32>
    %c0_7 = arith.constant 0 : index
    %c0_8 = arith.constant 0 : index
    %9 = vector.load %arg4[%c0_7, %c0_8] : memref<1x1152xf32, #tpu.memory_space<vmem>>, vector<1x1152xf32>
    %c0_9 = arith.constant 0 : index
    %c0_10 = arith.constant 0 : index
    %10 = vector.load %arg5[%c0_9, %c0_10] : memref<1x1152xf32, #tpu.memory_space<vmem>>, vector<1x1152xf32>
    %cst_11 = arith.constant dense<0.000000e+00> : vector<8xf32>
    %11 = vector.multi_reduction <add>, %8, %cst_11 [1] : vector<8x1152xf32> to vector<8xf32>
    %12 = vector.shape_cast %11 : vector<8xf32> to vector<8x1xf32>
    %13 = arith.mulf %8, %8 : vector<8x1152xf32>
    %cst_12 = arith.constant dense<0.000000e+00> : vector<8xf32>
    %14 = vector.multi_reduction <add>, %13, %cst_12 [1] : vector<8x1152xf32> to vector<8xf32>
    %15 = vector.shape_cast %14 : vector<8xf32> to vector<8x1xf32>
    %cst_13 = arith.constant 9.72762646E-4 : f32
    %16 = vector.broadcast %cst_13 : f32 to vector<8x1xf32>
    %17 = arith.mulf %12, %16 : vector<8x1xf32>
    %cst_14 = arith.constant 9.72762646E-4 : f32
    %18 = vector.broadcast %cst_14 : f32 to vector<8x1xf32>
    %19 = arith.mulf %15, %18 : vector<8x1xf32>
    %20 = arith.mulf %17, %17 : vector<8x1xf32>
    %21 = arith.subf %19, %20 : vector<8x1xf32>
    %cst_15 = arith.constant 0.000000e+00 : f32
    %22 = vector.broadcast %cst_15 : f32 to vector<8x1xf32>
    %23 = arith.maximumf %21, %22 : vector<8x1xf32>
    %cst_16 = arith.constant 9.99999974E-6 : f32
    %24 = vector.broadcast %cst_16 : f32 to vector<8x1xf32>
    %25 = arith.addf %23, %24 : vector<8x1xf32>
    %26 = math.rsqrt %25 : vector<8x1xf32>
    %27 = vector.broadcast %17 : vector<8x1xf32> to vector<8x1152xf32>
    %28 = arith.subf %8, %27 : vector<8x1152xf32>
    %29 = vector.broadcast %26 : vector<8x1xf32> to vector<8x1152xf32>
    %30 = arith.mulf %28, %29 : vector<8x1152xf32>
    %31 = vector.broadcast %9 : vector<1x1152xf32> to vector<8x1152xf32>
    %32 = arith.mulf %30, %31 : vector<8x1152xf32>
    %33 = vector.broadcast %10 : vector<1x1152xf32> to vector<8x1152xf32>
    %34 = arith.addf %32, %33 : vector<8x1152xf32>
    %cst_17 = arith.constant 0.000000e+00 : f32
    %35 = vector.broadcast %cst_17 : f32 to vector<8x1152xf32>
    %36 = arith.maximumf %34, %35 : vector<8x1152xf32>
    %37 = arith.truncf %36 : vector<8x1152xf32> to vector<8x1152xbf16>
    %c0_i32_18 = arith.constant 0 : i32
    %38 = arith.cmpi eq, %arg0, %c0_i32_18 : i32
    %39 = arith.extui %38 : i1 to i32
    %c0_i32_19 = arith.constant 0 : i32
    %c0_i32_20 = arith.constant 0 : i32
    %40 = arith.cmpi ne, %39, %c0_i32_20 : i32
    scf.if %40 {
      %133 = tpu.memref_slice %arg23[%c0_i32_19] : memref<4x!tpu.dma_semaphore, #tpu.memory_space<semaphore_mem>> -> memref<1x!tpu.dma_semaphore, #tpu.memory_space<semaphore_mem>>
      %134 = tpu.memref_squeeze %133 : memref<1x!tpu.dma_semaphore, #tpu.memory_space<semaphore_mem>> -> memref<!tpu.dma_semaphore, #tpu.memory_space<semaphore_mem>>
      tpu.wait_dma2 semaphore(%134 : memref<!tpu.dma_semaphore, #tpu.memory_space<semaphore_mem>>) src(%arg14 : memref<1152x1152xbf16, #tpu.memory_space<any>>) dst(%arg19 : memref<1152x1152xbf16, #tpu.memory_space<vmem>>)
    } else {
    }
    %c0_21 = arith.constant 0 : index
    %c0_22 = arith.constant 0 : index
    %41 = vector.load %arg19[%c0_21, %c0_22] : memref<1152x1152xbf16, #tpu.memory_space<vmem>>, vector<1152x1152xbf16>
    %cst_23 = arith.constant dense<0.000000e+00> : vector<8x1152xf32>
    %42 = tpu.matmul %37, %41, %cst_23 {dimension_numbers = #tpu.dot_dimension_numbers<[1], [0], [0], [1], [0, 0, 1, 1], [], []>} : vector<8x1152xbf16>, vector<1152x1152xbf16>, vector<8x1152xf32> -> vector<8x1152xf32>
    %c0_24 = arith.constant 0 : index
    %c0_25 = arith.constant 0 : index
    %43 = vector.load %arg6[%c0_24, %c0_25] : memref<1x1152xf32, #tpu.memory_space<vmem>>, vector<1x1152xf32>
    %44 = vector.broadcast %43 : vector<1x1152xf32> to vector<8x1152xf32>
    %45 = arith.addf %42, %44 : vector<8x1152xf32>
    %c0_26 = arith.constant 0 : index
    %c0_27 = arith.constant 0 : index
    %46 = vector.load %arg7[%c0_26, %c0_27] : memref<1x1152xf32, #tpu.memory_space<vmem>>, vector<1x1152xf32>
    %c0_28 = arith.constant 0 : index
    %c0_29 = arith.constant 0 : index
    %47 = vector.load %arg8[%c0_28, %c0_29] : memref<1x1152xf32, #tpu.memory_space<vmem>>, vector<1x1152xf32>
    %cst_30 = arith.constant dense<0.000000e+00> : vector<8xf32>
    %48 = vector.multi_reduction <add>, %45, %cst_30 [1] : vector<8x1152xf32> to vector<8xf32>
    %49 = vector.shape_cast %48 : vector<8xf32> to vector<8x1xf32>
    %50 = arith.mulf %45, %45 : vector<8x1152xf32>
    %cst_31 = arith.constant dense<0.000000e+00> : vector<8xf32>
    %51 = vector.multi_reduction <add>, %50, %cst_31 [1] : vector<8x1152xf32> to vector<8xf32>
    %52 = vector.shape_cast %51 : vector<8xf32> to vector<8x1xf32>
    %cst_32 = arith.constant 9.72762646E-4 : f32
    %53 = vector.broadcast %cst_32 : f32 to vector<8x1xf32>
    %54 = arith.mulf %49, %53 : vector<8x1xf32>
    %cst_33 = arith.constant 9.72762646E-4 : f32
    %55 = vector.broadcast %cst_33 : f32 to vector<8x1xf32>
    %56 = arith.mulf %52, %55 : vector<8x1xf32>
    %57 = arith.mulf %54, %54 : vector<8x1xf32>
    %58 = arith.subf %56, %57 : vector<8x1xf32>
    %cst_34 = arith.constant 0.000000e+00 : f32
    %59 = vector.broadcast %cst_34 : f32 to vector<8x1xf32>
    %60 = arith.maximumf %58, %59 : vector<8x1xf32>
    %cst_35 = arith.constant 9.99999974E-6 : f32
    %61 = vector.broadcast %cst_35 : f32 to vector<8x1xf32>
    %62 = arith.addf %60, %61 : vector<8x1xf32>
    %63 = math.rsqrt %62 : vector<8x1xf32>
    %64 = vector.broadcast %54 : vector<8x1xf32> to vector<8x1152xf32>
    %65 = arith.subf %45, %64 : vector<8x1152xf32>
    %66 = vector.broadcast %63 : vector<8x1xf32> to vector<8x1152xf32>
    %67 = arith.mulf %65, %66 : vector<8x1152xf32>
    %68 = vector.broadcast %46 : vector<1x1152xf32> to vector<8x1152xf32>
    %69 = arith.mulf %67, %68 : vector<8x1152xf32>
    %70 = vector.broadcast %47 : vector<1x1152xf32> to vector<8x1152xf32>
    %71 = arith.addf %69, %70 : vector<8x1152xf32>
    %cst_36 = arith.constant 0.000000e+00 : f32
    %72 = vector.broadcast %cst_36 : f32 to vector<8x1152xf32>
    %73 = arith.maximumf %71, %72 : vector<8x1152xf32>
    %74 = arith.truncf %73 : vector<8x1152xf32> to vector<8x1152xbf16>
    %75 = arith.addf %37, %74 : vector<8x1152xbf16>
    %c0_i32_37 = arith.constant 0 : i32
    %76 = arith.cmpi eq, %arg0, %c0_i32_37 : i32
    %77 = arith.extui %76 : i1 to i32
    %c1_i32_38 = arith.constant 1 : i32
    %c0_i32_39 = arith.constant 0 : i32
    %78 = arith.cmpi ne, %77, %c0_i32_39 : i32
    scf.if %78 {
      %133 = tpu.memref_slice %arg23[%c1_i32_38] : memref<4x!tpu.dma_semaphore, #tpu.memory_space<semaphore_mem>> -> memref<1x!tpu.dma_semaphore, #tpu.memory_space<semaphore_mem>>
      %134 = tpu.memref_squeeze %133 : memref<1x!tpu.dma_semaphore, #tpu.memory_space<semaphore_mem>> -> memref<!tpu.dma_semaphore, #tpu.memory_space<semaphore_mem>>
      tpu.wait_dma2 semaphore(%134 : memref<!tpu.dma_semaphore, #tpu.memory_space<semaphore_mem>>) src(%arg15 : memref<1152x1152xbf16, #tpu.memory_space<any>>) dst(%arg20 : memref<1152x1152xbf16, #tpu.memory_space<vmem>>)
    } else {
    }
    %c0_40 = arith.constant 0 : index
    %c0_41 = arith.constant 0 : index
    %79 = vector.load %arg20[%c0_40, %c0_41] : memref<1152x1152xbf16, #tpu.memory_space<vmem>>, vector<1152x1152xbf16>
    %cst_42 = arith.constant dense<0.000000e+00> : vector<8x1152xf32>
    %80 = tpu.matmul %75, %79, %cst_42 {dimension_numbers = #tpu.dot_dimension_numbers<[1], [0], [0], [1], [0, 0, 1, 1], [], []>} : vector<8x1152xbf16>, vector<1152x1152xbf16>, vector<8x1152xf32> -> vector<8x1152xf32>
    %c0_43 = arith.constant 0 : index
    %c0_44 = arith.constant 0 : index
    %81 = vector.load %arg9[%c0_43, %c0_44] : memref<1x1152xf32, #tpu.memory_space<vmem>>, vector<1x1152xf32>
    %82 = vector.broadcast %81 : vector<1x1152xf32> to vector<8x1152xf32>
    %83 = arith.addf %80, %82 : vector<8x1152xf32>
    %c0_45 = arith.constant 0 : index
    %c0_46 = arith.constant 0 : index
    %84 = vector.load %arg10[%c0_45, %c0_46] : memref<1x1152xf32, #tpu.memory_space<vmem>>, vector<1x1152xf32>
    %c0_47 = arith.constant 0 : index
    %c0_48 = arith.constant 0 : index
    %85 = vector.load %arg11[%c0_47, %c0_48] : memref<1x1152xf32, #tpu.memory_space<vmem>>, vector<1x1152xf32>
    %cst_49 = arith.constant dense<0.000000e+00> : vector<8xf32>
    %86 = vector.multi_reduction <add>, %83, %cst_49 [1] : vector<8x1152xf32> to vector<8xf32>
    %87 = vector.shape_cast %86 : vector<8xf32> to vector<8x1xf32>
    %88 = arith.mulf %83, %83 : vector<8x1152xf32>
    %cst_50 = arith.constant dense<0.000000e+00> : vector<8xf32>
    %89 = vector.multi_reduction <add>, %88, %cst_50 [1] : vector<8x1152xf32> to vector<8xf32>
    %90 = vector.shape_cast %89 : vector<8xf32> to vector<8x1xf32>
    %cst_51 = arith.constant 9.72762646E-4 : f32
    %91 = vector.broadcast %cst_51 : f32 to vector<8x1xf32>
    %92 = arith.mulf %87, %91 : vector<8x1xf32>
    %cst_52 = arith.constant 9.72762646E-4 : f32
    %93 = vector.broadcast %cst_52 : f32 to vector<8x1xf32>
    %94 = arith.mulf %90, %93 : vector<8x1xf32>
    %95 = arith.mulf %92, %92 : vector<8x1xf32>
    %96 = arith.subf %94, %95 : vector<8x1xf32>
    %cst_53 = arith.constant 0.000000e+00 : f32
    %97 = vector.broadcast %cst_53 : f32 to vector<8x1xf32>
    %98 = arith.maximumf %96, %97 : vector<8x1xf32>
    %cst_54 = arith.constant 9.99999974E-6 : f32
    %99 = vector.broadcast %cst_54 : f32 to vector<8x1xf32>
    %100 = arith.addf %98, %99 : vector<8x1xf32>
    %101 = math.rsqrt %100 : vector<8x1xf32>
    %102 = vector.broadcast %92 : vector<8x1xf32> to vector<8x1152xf32>
    %103 = arith.subf %83, %102 : vector<8x1152xf32>
    %104 = vector.broadcast %101 : vector<8x1xf32> to vector<8x1152xf32>
    %105 = arith.mulf %103, %104 : vector<8x1152xf32>
    %106 = vector.broadcast %84 : vector<1x1152xf32> to vector<8x1152xf32>
    %107 = arith.mulf %105, %106 : vector<8x1152xf32>
    %108 = vector.broadcast %85 : vector<1x1152xf32> to vector<8x1152xf32>
    %109 = arith.addf %107, %108 : vector<8x1152xf32>
    %cst_55 = arith.constant 0.000000e+00 : f32
    %110 = vector.broadcast %cst_55 : f32 to vector<8x1152xf32>
    %111 = arith.maximumf %109, %110 : vector<8x1152xf32>
    %112 = arith.truncf %111 : vector<8x1152xf32> to vector<8x1152xbf16>
    %c0_i32_56 = arith.constant 0 : i32
    %113 = arith.cmpi eq, %arg0, %c0_i32_56 : i32
    %114 = arith.extui %113 : i1 to i32
    %c2_i32_57 = arith.constant 2 : i32
    %c0_i32_58 = arith.constant 0 : i32
    %115 = arith.cmpi ne, %114, %c0_i32_58 : i32
    scf.if %115 {
      %133 = tpu.memref_slice %arg23[%c2_i32_57] : memref<4x!tpu.dma_semaphore, #tpu.memory_space<semaphore_mem>> -> memref<1x!tpu.dma_semaphore, #tpu.memory_space<semaphore_mem>>
      %134 = tpu.memref_squeeze %133 : memref<1x!tpu.dma_semaphore, #tpu.memory_space<semaphore_mem>> -> memref<!tpu.dma_semaphore, #tpu.memory_space<semaphore_mem>>
      tpu.wait_dma2 semaphore(%134 : memref<!tpu.dma_semaphore, #tpu.memory_space<semaphore_mem>>) src(%arg16 : memref<1152x1152xbf16, #tpu.memory_space<any>>) dst(%arg21 : memref<1152x1152xbf16, #tpu.memory_space<vmem>>)
    } else {
    }
    %c0_59 = arith.constant 0 : index
    %c0_60 = arith.constant 0 : index
    %116 = vector.load %arg21[%c0_59, %c0_60] : memref<1152x1152xbf16, #tpu.memory_space<vmem>>, vector<1152x1152xbf16>
    %cst_61 = arith.constant dense<0.000000e+00> : vector<8x1152xf32>
    %117 = tpu.matmul %112, %116, %cst_61 {dimension_numbers = #tpu.dot_dimension_numbers<[1], [0], [0], [1], [0, 0, 1, 1], [], []>} : vector<8x1152xbf16>, vector<1152x1152xbf16>, vector<8x1152xf32> -> vector<8x1152xf32>
    %c0_62 = arith.constant 0 : index
    %c0_63 = arith.constant 0 : index
    %118 = vector.load %arg12[%c0_62, %c0_63] : memref<1x1152xf32, #tpu.memory_space<vmem>>, vector<1x1152xf32>
    %119 = vector.broadcast %118 : vector<1x1152xf32> to vector<8x1152xf32>
    %120 = arith.addf %117, %119 : vector<8x1152xf32>
    %cst_64 = arith.constant 0.000000e+00 : f32
    %121 = vector.broadcast %cst_64 : f32 to vector<8x1152xf32>
    %122 = arith.maximumf %120, %121 : vector<8x1152xf32>
    %123 = arith.truncf %122 : vector<8x1152xf32> to vector<8x1152xbf16>
    %c0_i32_65 = arith.constant 0 : i32
    %124 = arith.cmpi eq, %arg0, %c0_i32_65 : i32
    %125 = arith.extui %124 : i1 to i32
    %c3_i32_66 = arith.constant 3 : i32
    %c0_i32_67 = arith.constant 0 : i32
    %126 = arith.cmpi ne, %125, %c0_i32_67 : i32
    scf.if %126 {
      %133 = tpu.memref_slice %arg23[%c3_i32_66] : memref<4x!tpu.dma_semaphore, #tpu.memory_space<semaphore_mem>> -> memref<1x!tpu.dma_semaphore, #tpu.memory_space<semaphore_mem>>
      %134 = tpu.memref_squeeze %133 : memref<1x!tpu.dma_semaphore, #tpu.memory_space<semaphore_mem>> -> memref<!tpu.dma_semaphore, #tpu.memory_space<semaphore_mem>>
      tpu.wait_dma2 semaphore(%134 : memref<!tpu.dma_semaphore, #tpu.memory_space<semaphore_mem>>) src(%arg17 : memref<1152x128xbf16, #tpu.memory_space<any>>) dst(%arg22 : memref<1152x128xbf16, #tpu.memory_space<vmem>>)
    } else {
    }
    %c0_68 = arith.constant 0 : index
    %c0_69 = arith.constant 0 : index
    %127 = vector.load %arg22[%c0_68, %c0_69] : memref<1152x128xbf16, #tpu.memory_space<vmem>>, vector<1152x128xbf16>
    %cst_70 = arith.constant dense<0.000000e+00> : vector<8x128xf32>
    %128 = tpu.matmul %123, %127, %cst_70 {dimension_numbers = #tpu.dot_dimension_numbers<[1], [0], [0], [1], [0, 0, 1, 1], [], []>} : vector<8x1152xbf16>, vector<1152x128xbf16>, vector<8x128xf32> -> vector<8x128xf32>
    %c0_71 = arith.constant 0 : index
    %c0_72 = arith.constant 0 : index
    %129 = vector.load %arg13[%c0_71, %c0_72] : memref<1x128xf32, #tpu.memory_space<vmem>>, vector<1x128xf32>
    %130 = vector.broadcast %129 : vector<1x128xf32> to vector<8x128xf32>
    %131 = arith.addf %128, %130 : vector<8x128xf32>
    %c0_73 = arith.constant 0 : index
    %c0_74 = arith.constant 0 : index
    %132 = vector.load %arg18[%c0_73, %c0_74] : memref<8x128xf32, #tpu.memory_space<vmem>>, vector<8x128xf32>
    tpu.vector_store %arg18[%c0_73, %c0_74], %131 {strides = array<i32>} : memref<8x128xf32, #tpu.memory_space<vmem>>, vector<8x128xf32>,
    return
  }
  func.func @transform_0(%arg0: i32) -> (i32, i32) {
    %c0_i32 = arith.constant 0 : i32
    %c0_i32_0 = arith.constant 0 : i32
    return %arg0, %c0_i32 : i32, i32
  }
  func.func @transform_1(%arg0: i32) -> (i32, i32) {
    %c0_i32 = arith.constant 0 : i32
    %c0_i32_0 = arith.constant 0 : i32
    %c0_i32_1 = arith.constant 0 : i32
    return %c0_i32, %c0_i32_0 : i32, i32
  }
  func.func @transform_2(%arg0: i32) -> (i32, i32) {
    %c0_i32 = arith.constant 0 : i32
    %c0_i32_0 = arith.constant 0 : i32
    %c0_i32_1 = arith.constant 0 : i32
    return %c0_i32, %c0_i32_0 : i32, i32
  }
  func.func @transform_3(%arg0: i32) -> (i32, i32) {
    %c0_i32 = arith.constant 0 : i32
    %c0_i32_0 = arith.constant 0 : i32
    %c0_i32_1 = arith.constant 0 : i32
    return %c0_i32, %c0_i32_0 : i32, i32
  }
  func.func @transform_4(%arg0: i32) -> (i32, i32) {
    %c0_i32 = arith.constant 0 : i32
    %c0_i32_0 = arith.constant 0 : i32
    %c0_i32_1 = arith.constant 0 : i32
    return %c0_i32, %c0_i32_0 : i32, i32
  }
  func.func @transform_5(%arg0: i32) -> (i32, i32) {
    %c0_i32 = arith.constant 0 : i32
    %c0_i32_0 = arith.constant 0 : i32
    %c0_i32_1 = arith.constant 0 : i32
    return %c0_i32, %c0_i32_0 : i32, i32
  }
  func.func @transform_6(%arg0: i32) -> (i32, i32) {
    %c0_i32 = arith.constant 0 : i32
    %c0_i32_0 = arith.constant 0 : i32
    %c0_i32_1 = arith.constant 0 : i32
    return %c0_i32, %c0_i32_0 : i32, i32
  }
  func.func @transform_7(%arg0: i32) -> (i32, i32) {
    %c0_i32 = arith.constant 0 : i32
    %c0_i32_0 = arith.constant 0 : i32
    %c0_i32_1 = arith.constant 0 : i32
    return %c0_i32, %c0_i32_0 : i32, i32
  }
  func.func @transform_8(%arg0: i32) -> (i32, i32) {
    %c0_i32 = arith.constant 0 : i32
    %c0_i32_0 = arith.constant 0 : i32
    %c0_i32_1 = arith.constant 0 : i32
    return %c0_i32, %c0_i32_0 : i32, i32
  }
  func.func @transform_9(%arg0: i32) -> (i32, i32) {
    %c0_i32 = arith.constant 0 : i32
    %c0_i32_0 = arith.constant 0 : i32
    %c0_i32_1 = arith.constant 0 : i32
    return %c0_i32, %c0_i32_0 : i32, i32
  }
  func.func @transform_10(%arg0: i32) -> (i32, i32) {
    %c0_i32 = arith.constant 0 : i32
    %c0_i32_0 = arith.constant 0 : i32
    %c0_i32_1 = arith.constant 0 : i32
    return %c0_i32, %c0_i32_0 : i32, i32
  }
  func.func @transform_11(%arg0: i32) -> (i32, i32) {
    %c0_i32 = arith.constant 0 : i32
    %c0_i32_0 = arith.constant 0 : i32
    %c0_i32_1 = arith.constant 0 : i32
    return %c0_i32, %c0_i32_0 : i32, i32
  }
  func.func @transform_12(%arg0: i32) -> (i32, i32) {
    %c0_i32 = arith.constant 0 : i32
    %c0_i32_0 = arith.constant 0 : i32
    %c0_i32_1 = arith.constant 0 : i32
    return %c0_i32, %c0_i32_0 : i32, i32
  }
  func.func @transform_17(%arg0: i32) -> (i32, i32) {
    %c0_i32 = arith.constant 0 : i32
    %c0_i32_0 = arith.constant 0 : i32
    return %arg0, %c0_i32 : i32, i32
  }
}

</mosaic_0001>

<bundles_post_ra>
// kernel: tpu_custom_call.1
= control target key start
LH: loop header
LB: loop body
LE: loop exit
PB: predicated region body
PF: predicated region fallthrough
CT: control target
= control target key end

     0   :  { %s9657_s0 = inlined_call_operand.hbm [shape: bf16[8,192], index: 0, kind: input, shape index: {}]   ;;  %s9658_s1 = inlined_call_operand.hbm [shape: bf16[192,1152], index: 1, kind: input, shape index: {}]   ;;  %s9659_s2 = inlined_call_operand.hbm [shape: f32[1,1152], index: 2, kind: input, shape index: {}]   ;;  %s9660_s3 = inlined_call_operand.hbm [shape: f32[1,1152], index: 3, kind: input, shape index: {}]   ;;  %s9661_s4 = inlined_call_operand.hbm [shape: f32[1,1152], index: 4, kind: input, shape index: {}]   ;;  %s9662_s5 = inlined_call_operand.hbm [shape: f32[1,1152], index: 5, kind: input, shape index: {}]   ;;  %s9663_s6 = inlined_call_operand.hbm [shape: f32[1,1152], index: 6, kind: input, shape index: {}]   ;;  %s9664_s7 = inlined_call_operand.hbm [shape: f32[1,1152], index: 7, kind: input, shape index: {}]   ;;  %s9665_s8 = inlined_call_operand.hbm [shape: f32[1,1152], index: 8, kind: input, shape index: {}]   ;;  %s9666_s9 = inlined_call_operand.hbm [shape: f32[1,1152], index: 9, kind: input, shape index: {}]   ;;  %s9667_s10 = inlined_call_operand.hbm [shape: f32[1,1152], index: 10, kind: input, shape index: {}]   ;;  %s9668_s11 = inlined_call_operand.hbm [shape: f32[1,1152], index: 11, kind: input, shape index: {}]   ;;  %s9669_s12 = inlined_call_operand.hbm [shape: f32[1,128], index: 12, kind: input, shape index: {}]   ;;  %s9670_s13 = inlined_call_operand.hbm [shape: bf16[1152,1152], index: 13, kind: input, shape index: {}]   ;;  %s9671_s14 = inlined_call_operand.hbm [shape: bf16[1152,1152], index: 14, kind: input, shape index: {}]   ;;  %s9672_s15 = inlined_call_operand.hbm [shape: bf16[1152,1152], index: 15, kind: input, shape index: {}]   ;;  %s9673_s16 = inlined_call_operand.hbm [shape: bf16[1152,128], index: 16, kind: input, shape index: {}]   ;;  %s9674_s17 = inlined_call_operand.hbm [shape: f32[8,128], index: 17, kind: output, shape index: {}]  }
   0x1   :  { %9683 = sst [smem:[#allocation51_spill]] %s9657_s0 }
   0x2   :  { %9684 = sst [smem:[#allocation52_spill]] %s9658_s1 }
   0x3   :  { %9685 = sst [smem:[#allocation53_spill]] %s9673_s16 }
   0x4   :  { %9686 = sst [smem:[#allocation54_spill]] %s9674_s17 }
   0x5   :  { %22 = vsyncpa [#allocation8], 0 }
   0x6   :  { %23 = vsyncpa [#allocation11], 0 }
   0x7   :  { %24 = vsyncpa [#allocation14], 0 }
   0x8   :  { %25 = vsyncpa [#allocation17], 0 }
   0x9   :  { %26 = vsyncpa [#allocation20], 0 }
   0xa   :  { %27 = vsyncpa [#allocation23], 0 }
   0xb   :  { %28 = vsyncpa [#allocation26], 0 }
   0xc   :  { %29 = vsyncpa [#allocation9], 0  ;;  %s8734_s24 = smov [#allocation10]   ;;  %s9687_s28 = sld [smem:[#allocation52_spill]] }
   0xd   :  { %s45_s25 = sshll.u32 %s8734_s24, 4  ;;  %s46_s25 = int_to_ptr.vmem [resolvable:$true] %s45_s25 }
  0x12   :  { %s8380_s29 = scalar_lea.hbm %s9687_s28, 13824 }
  0x13   :  { %p8381_p0 = scmp.ne.s32.totalorder %s9687_s28, %s8380_s29  ;;  %p8384_p1 = scmp.lt.u32.totalorder %s8380_s29, %s9687_s28 }
  0x15   :  { %p8386_p2 = pnand %p8384_p1, %p8381_p0 }
  0x17   :  { %8389 = shalt.err (!%p8386_p2)
}
  0x18   :  { %s8390_s1 = scalar_lea.vmem %s46_s25, 13824  ;;  %p8395_p4 = scmp.lt.s32.totalorder %s46_s25, %s46_s25 }
  0x19   :  { %p8391_p3 = scmp.ne.s32.totalorder %s46_s25, %s8390_s1  ;;  %p8396_p5 = scmp.lt.s32.totalorder %s8390_s1, %s8390_s1 }
  0x1b   :  { %p8397_p6 = por %p8396_p5, %p8395_p4 }
  0x1d   :  { %p8398_p7 = pnand %p8397_p6, %p8391_p3 }
  0x1f   :  { %8401 = shalt.err (!%p8398_p7)
}
  0x20   :  { %s8735_s20 = smov 576   ;;  %s8736_s21 = smov 36  }
  0x21   :  { %51 = dma.hbm_to_vmem [thread:$0]  %s9687_s28, 13824, %s46_s25, [#allocation11], %s8735_s20, %s8735_s20, %s8736_s21  }
  0x22   :  { %s8737_s24 = smov [#allocation13]   ;;  %s8738_s27 = smov [#allocation16]  }
  0x23   :  { %s68_s26 = sshll.u32 %s8737_s24, 4  ;;  %s88_s29 = sshll.u32 %s8738_s27, 4  ;;  %s69_s26 = int_to_ptr.vmem [resolvable:$true] %s68_s26  ;;  %s89_s29 = int_to_ptr.vmem [resolvable:$true] %s88_s29 }
  0x24   :  { %s8402_s18 = scalar_lea.hbm %s9660_s3, 144 }
  0x25   :  { %p8403_p8 = scmp.ne.s32.totalorder %s9660_s3, %s8402_s18  ;;  %p8406_p9 = scmp.lt.u32.totalorder %s8402_s18, %s9660_s3 }
  0x27   :  { %p8408_p10 = pnand %p8406_p9, %p8403_p8 }
  0x29   :  { %8411 = shalt.err (!%p8408_p10)
}
  0x2a   :  { %s8412_s25 = scalar_lea.vmem %s69_s26, 144  ;;  %s8416_s28 = scalar_lea.vmem %s69_s26, 160 }
  0x2b   :  { %p8413_p11 = scmp.ne.s32.totalorder %s69_s26, %s8412_s25  ;;  %p8417_p12 = scmp.lt.s32.totalorder %s69_s26, %s69_s26 }
  0x2c   :  { %p8418_p13 = scmp.lt.s32.totalorder %s8416_s28, %s8412_s25 }
  0x2e   :  { %p8419_p0 = por %p8418_p13, %p8417_p12 }
  0x30   :  { %p8420_p1 = pnand %p8419_p0, %p8413_p11 }
  0x32   :  { %8423 = shalt.err (!%p8420_p1)
}
  0x33   :  { %71 = dma.hbm_to_vmem [thread:$0]  %s9660_s3, 144, %s69_s26, [#allocation14]  }
  0x34   :  { %s8424_s16 = scalar_lea.hbm %s9662_s5, 144 }
  0x35   :  { %p8425_p2 = scmp.ne.s32.totalorder %s9662_s5, %s8424_s16  ;;  %p8428_p3 = scmp.lt.u32.totalorder %s8424_s16, %s9662_s5 }
  0x37   :  { %p8430_p4 = pnand %p8428_p3, %p8425_p2 }
  0x39   :  { %8433 = shalt.err (!%p8430_p4)
}
  0x3a   :  { %s8434_s30 = scalar_lea.vmem %s89_s29, 144  ;;  %s8438_s18 = scalar_lea.vmem %s89_s29, 160 }
  0x3b   :  { %p8435_p5 = scmp.ne.s32.totalorder %s89_s29, %s8434_s30  ;;  %p8439_p6 = scmp.lt.s32.totalorder %s89_s29, %s89_s29 }
  0x3c   :  { %p8440_p7 = scmp.lt.s32.totalorder %s8438_s18, %s8434_s30 }
  0x3e   :  { %p8441_p8 = por %p8440_p7, %p8439_p6 }
  0x40   :  { %p8442_p9 = pnand %p8441_p8, %p8435_p5 }
  0x42   :  { %8445 = shalt.err (!%p8442_p9)
}
  0x43   :  { %91 = dma.hbm_to_vmem [thread:$0]  %s9662_s5, 144, %s89_s29, [#allocation17]  }
  0x44   :  { %s8739_s19 = smov [#allocation19]   ;;  %s8740_s25 = smov [#allocation22]  }
  0x45   :  { %s108_s1 = sshll.u32 %s8739_s19, 4  ;;  %s128_s28 = sshll.u32 %s8740_s25, 4  ;;  %s109_s1 = int_to_ptr.vmem [resolvable:$true] %s108_s1  ;;  %s129_s28 = int_to_ptr.vmem [resolvable:$true] %s128_s28 }
  0x46   :  { %s8446_s22 = scalar_lea.hbm %s9664_s7, 144 }
  0x47   :  { %p8447_p10 = scmp.ne.s32.totalorder %s9664_s7, %s8446_s22  ;;  %p8450_p11 = scmp.lt.u32.totalorder %s8446_s22, %s9664_s7 }
  0x49   :  { %p8452_p12 = pnand %p8450_p11, %p8447_p10 }
  0x4b   :  { %8455 = shalt.err (!%p8452_p12)
}
  0x4c   :  { %s8456_s5 = scalar_lea.vmem %s109_s1, 144  ;;  %s8460_s29 = scalar_lea.vmem %s109_s1, 160 }
  0x4d   :  { %p8457_p13 = scmp.ne.s32.totalorder %s109_s1, %s8456_s5  ;;  %p8461_p0 = scmp.lt.s32.totalorder %s109_s1, %s109_s1 }
  0x4e   :  { %p8462_p1 = scmp.lt.s32.totalorder %s8460_s29, %s8456_s5 }
  0x50   :  { %p8463_p2 = por %p8462_p1, %p8461_p0 }
  0x52   :  { %p8464_p3 = pnand %p8463_p2, %p8457_p13 }
  0x54   :  { %8467 = shalt.err (!%p8464_p3)
}
  0x55   :  { %111 = dma.hbm_to_vmem [thread:$0]  %s9664_s7, 144, %s109_s1, [#allocation20]  }
  0x56   :  { %s8468_s3 = scalar_lea.hbm %s9666_s9, 144 }
  0x57   :  { %p8469_p4 = scmp.ne.s32.totalorder %s9666_s9, %s8468_s3  ;;  %p8472_p5 = scmp.lt.u32.totalorder %s8468_s3, %s9666_s9 }
  0x59   :  { %p8474_p6 = pnand %p8472_p5, %p8469_p4 }
  0x5b   :  { %8477 = shalt.err (!%p8474_p6)
}
  0x5c   :  { %s8478_s21 = scalar_lea.vmem %s129_s28, 144  ;;  %s8482_s22 = scalar_lea.vmem %s129_s28, 160 }
  0x5d   :  { %p8479_p7 = scmp.ne.s32.totalorder %s129_s28, %s8478_s21  ;;  %p8483_p8 = scmp.lt.s32.totalorder %s129_s28, %s129_s28 }
  0x5e   :  { %p8484_p9 = scmp.lt.s32.totalorder %s8482_s22, %s8478_s21 }
  0x60   :  { %p8485_p10 = por %p8484_p9, %p8483_p8 }
  0x62   :  { %p8486_p11 = pnand %p8485_p10, %p8479_p7 }
  0x64   :  { %8489 = shalt.err (!%p8486_p11)
}
  0x65   :  { %131 = dma.hbm_to_vmem [thread:$0]  %s9666_s9, 144, %s129_s28, [#allocation23]  }
  0x66   :  { %s8741_s23 = smov [#allocation25]   ;;  %s8742_s17 = smov [#allocation7]  }
  0x67   :  { %s148_s16 = sshll.u32 %s8741_s23, 4  ;;  %s36_s24 = sshll.u32 %s8742_s17, 4  ;;  %s149_s16 = int_to_ptr.vmem [resolvable:$true] %s148_s16  ;;  %s37_s24 = int_to_ptr.vmem [resolvable:$true] %s36_s24 }
  0x68   :  { %s8490_s27 = scalar_lea.hbm %s9668_s11, 144 }
  0x69   :  { %p8491_p12 = scmp.ne.s32.totalorder %s9668_s11, %s8490_s27  ;;  %p8494_p13 = scmp.lt.u32.totalorder %s8490_s27, %s9668_s11 }
  0x6b   :  { %p8496_p0 = pnand %p8494_p13, %p8491_p12 }
  0x6d   :  { %8499 = shalt.err (!%p8496_p0)
}
  0x6e   :  { %s8500_s9 = scalar_lea.vmem %s149_s16, 144  ;;  %s8504_s28 = scalar_lea.vmem %s149_s16, 160 }
  0x6f   :  { %p8501_p1 = scmp.ne.s32.totalorder %s149_s16, %s8500_s9  ;;  %p8505_p2 = scmp.lt.s32.totalorder %s149_s16, %s149_s16 }
  0x70   :  { %p8506_p3 = scmp.lt.s32.totalorder %s8504_s28, %s8500_s9 }
  0x72   :  { %p8507_p4 = por %p8506_p3, %p8505_p2 }
  0x74   :  { %p8508_p5 = pnand %p8507_p4, %p8501_p1 }
  0x76   :  { %8511 = shalt.err (!%p8508_p5)
}
  0x77   :  { %151 = dma.hbm_to_vmem [thread:$0]  %s9668_s11, 144, %s149_s16, [#allocation26]  }
  0x78   :  { %s9688_s21 = sld [smem:[#allocation51_spill]] }
  0x7e   :  { %s8512_s22 = scalar_lea.hbm %s9688_s21, 128 }
  0x7f   :  { %p8513_p6 = scmp.ne.s32.totalorder %s9688_s21, %s8512_s22  ;;  %p8516_p7 = scmp.lt.u32.totalorder %s8512_s22, %s9688_s21 }
  0x81   :  { %p8518_p8 = pnand %p8516_p7, %p8513_p6 }
  0x83   :  { %8521 = shalt.err (!%p8518_p8)
}
  0x84   :  { %s8522_s5 = scalar_lea.vmem %s37_s24, 128  ;;  %p8527_p10 = scmp.lt.s32.totalorder %s37_s24, %s37_s24 }
  0x85   :  { %p8523_p9 = scmp.ne.s32.totalorder %s37_s24, %s8522_s5  ;;  %p8528_p11 = scmp.lt.s32.totalorder %s8522_s5, %s8522_s5 }
  0x87   :  { %p8529_p12 = por %p8528_p11, %p8527_p10 }
  0x89   :  { %p8530_p13 = pnand %p8529_p12, %p8523_p9 }
  0x8b   :  { %8533 = shalt.err (!%p8530_p13)
}
  0x8c   :  { %39 = dma.hbm_to_vmem [thread:$0]  %s9688_s21, 128, %s37_s24, [#allocation8]  }
  0x8d   :  { %s8743_s29 = smov [#allocation12]   ;;  %s8744_s0 = smov [#allocation15]  }
  0x8e   :  { %s58_s27 = sshll.u32 %s8743_s29, 4  ;;  %s78_s30 = sshll.u32 %s8744_s0, 4  ;;  %s59_s27 = int_to_ptr.vmem [resolvable:$true] %s58_s27  ;;  %s79_s30 = int_to_ptr.vmem [resolvable:$true] %s78_s30 }
  0x8f   :  { %s8534_s9 = scalar_lea.hbm %s9659_s2, 144 }
  0x90   :  { %p8535_p0 = scmp.ne.s32.totalorder %s9659_s2, %s8534_s9  ;;  %p8538_p1 = scmp.lt.u32.totalorder %s8534_s9, %s9659_s2 }
  0x92   :  { %p8540_p2 = pnand %p8538_p1, %p8535_p0 }
  0x94   :  { %8543 = shalt.err (!%p8540_p2)
}
  0x95   :  { %s8544_s24 = scalar_lea.vmem %s59_s27, 144  ;;  %s8548_s20 = scalar_lea.vmem %s59_s27, 160 }
  0x96   :  { %p8545_p3 = scmp.ne.s32.totalorder %s59_s27, %s8544_s24  ;;  %p8549_p4 = scmp.lt.s32.totalorder %s59_s27, %s59_s27 }
  0x97   :  { %p8550_p5 = scmp.lt.s32.totalorder %s8548_s20, %s8544_s24 }
  0x99   :  { %p8551_p6 = por %p8550_p5, %p8549_p4 }
  0x9b   :  { %p8552_p7 = pnand %p8551_p6, %p8545_p3 }
  0x9d   :  { %8555 = shalt.err (!%p8552_p7)
}
  0x9e   :  { %61 = dma.hbm_to_vmem [thread:$0]  %s9659_s2, 144, %s59_s27, [#allocation11]  }
  0x9f   :  { %s8556_s23 = scalar_lea.hbm %s9661_s4, 144 }
  0xa0   :  { %p8557_p8 = scmp.ne.s32.totalorder %s9661_s4, %s8556_s23  ;;  %p8560_p9 = scmp.lt.u32.totalorder %s8556_s23, %s9661_s4 }
  0xa2   :  { %p8562_p10 = pnand %p8560_p9, %p8557_p8 }
  0xa4   :  { %8565 = shalt.err (!%p8562_p10)
}
  0xa5   :  { %s8566_s29 = scalar_lea.vmem %s79_s30, 144  ;;  %s8570_s0 = scalar_lea.vmem %s79_s30, 160 }
  0xa6   :  { %p8567_p11 = scmp.ne.s32.totalorder %s79_s30, %s8566_s29  ;;  %p8571_p12 = scmp.lt.s32.totalorder %s79_s30, %s79_s30 }
  0xa7   :  { %p8572_p13 = scmp.lt.s32.totalorder %s8570_s0, %s8566_s29 }
  0xa9   :  { %p8573_p0 = por %p8572_p13, %p8571_p12 }
  0xab   :  { %p8574_p1 = pnand %p8573_p0, %p8567_p11 }
  0xad   :  { %8577 = shalt.err (!%p8574_p1)
}
  0xae   :  { %81 = dma.hbm_to_vmem [thread:$0]  %s9661_s4, 144, %s79_s30, [#allocation14]  }
  0xaf   :  { %s8745_s18 = smov [#allocation18]   ;;  %s8746_s9 = smov [#allocation21]  }
  0xb0   :  { %s98_s3 = sshll.u32 %s8745_s18, 4  ;;  %s118_s28 = sshll.u32 %s8746_s9, 4  ;;  %s99_s3 = int_to_ptr.vmem [resolvable:$true] %s98_s3  ;;  %s119_s28 = int_to_ptr.vmem [resolvable:$true] %s118_s28 }
  0xb1   :  { %s8578_s25 = scalar_lea.hbm %s9663_s6, 144 }
  0xb2   :  { %p8579_p2 = scmp.ne.s32.totalorder %s9663_s6, %s8578_s25  ;;  %p8582_p3 = scmp.lt.u32.totalorder %s8578_s25, %s9663_s6 }
  0xb4   :  { %p8584_p4 = pnand %p8582_p3, %p8579_p2 }
  0xb6   :  { %8587 = shalt.err (!%p8584_p4)
}
  0xb7   :  { %s8588_s4 = scalar_lea.vmem %s99_s3, 144  ;;  %s8592_s30 = scalar_lea.vmem %s99_s3, 160 }
  0xb8   :  { %p8589_p5 = scmp.ne.s32.totalorder %s99_s3, %s8588_s4  ;;  %p8593_p6 = scmp.lt.s32.totalorder %s99_s3, %s99_s3 }
  0xb9   :  { %p8594_p7 = scmp.lt.s32.totalorder %s8592_s30, %s8588_s4 }
  0xbb   :  { %p8595_p8 = por %p8594_p7, %p8593_p6 }
  0xbd   :  { %p8596_p9 = pnand %p8595_p8, %p8589_p5 }
  0xbf   :  { %8599 = shalt.err (!%p8596_p9)
}
  0xc0   :  { %101 = dma.hbm_to_vmem [thread:$0]  %s9663_s6, 144, %s99_s3, [#allocation17]  }
  0xc1   :  { %s8600_s5 = scalar_lea.hbm %s9665_s8, 144 }
  0xc2   :  { %p8601_p10 = scmp.ne.s32.totalorder %s9665_s8, %s8600_s5  ;;  %p8604_p11 = scmp.lt.u32.totalorder %s8600_s5, %s9665_s8 }
  0xc4   :  { %p8606_p12 = pnand %p8604_p11, %p8601_p10 }
  0xc6   :  { %8609 = shalt.err (!%p8606_p12)
}
  0xc7   :  { %s8610_s2 = scalar_lea.vmem %s119_s28, 144  ;;  %s8614_s27 = scalar_lea.vmem %s119_s28, 160 }
  0xc8   :  { %p8611_p13 = scmp.ne.s32.totalorder %s119_s28, %s8610_s2  ;;  %p8615_p0 = scmp.lt.s32.totalorder %s119_s28, %s119_s28 }
  0xc9   :  { %p8616_p1 = scmp.lt.s32.totalorder %s8614_s27, %s8610_s2 }
  0xcb   :  { %p8617_p2 = por %p8616_p1, %p8615_p0 }
  0xcd   :  { %p8618_p3 = pnand %p8617_p2, %p8611_p13 }
  0xcf   :  { %8621 = shalt.err (!%p8618_p3)
}
  0xd0   :  { %121 = dma.hbm_to_vmem [thread:$0]  %s9665_s8, 144, %s119_s28, [#allocation20]  }
  0xd1   :  { %s8747_s3 = smov [#allocation24]   ;;  %s8748_s26 = smov [#allocation27]  }
  0xd2   :  { %s138_s9 = sshll.u32 %s8747_s3, 4  ;;  %s158_s19 = sshll.u32 %s8748_s26, 4  ;;  %s139_s9 = int_to_ptr.vmem [resolvable:$true] %s138_s9  ;;  %s159_s19 = int_to_ptr.vmem [resolvable:$true] %s158_s19 }
  0xd3   :  { %s8622_s20 = scalar_lea.hbm %s9667_s10, 144 }
  0xd4   :  { %p8623_p4 = scmp.ne.s32.totalorder %s9667_s10, %s8622_s20  ;;  %p8626_p5 = scmp.lt.u32.totalorder %s8622_s20, %s9667_s10 }
  0xd6   :  { %p8628_p6 = pnand %p8626_p5, %p8623_p4 }
  0xd8   :  { %8631 = shalt.err (!%p8628_p6)
}
  0xd9   :  { %s8632_s8 = scalar_lea.vmem %s139_s9, 144  ;;  %s8636_s28 = scalar_lea.vmem %s139_s9, 160 }
  0xda   :  { %p8633_p7 = scmp.ne.s32.totalorder %s139_s9, %s8632_s8  ;;  %p8637_p8 = scmp.lt.s32.totalorder %s139_s9, %s139_s9 }
  0xdb   :  { %p8638_p9 = scmp.lt.s32.totalorder %s8636_s28, %s8632_s8 }
  0xdd   :  { %p8639_p10 = por %p8638_p9, %p8637_p8 }
  0xdf   :  { %p8640_p11 = pnand %p8639_p10, %p8633_p7 }
  0xe1   :  { %8643 = shalt.err (!%p8640_p11)
}
  0xe2   :  { %141 = dma.hbm_to_vmem [thread:$0]  %s9667_s10, 144, %s139_s9, [#allocation23]  }
  0xe3   :  { %s8644_s5 = scalar_lea.hbm %s9669_s12, 16 }
  0xe4   :  { %p8645_p12 = scmp.ne.s32.totalorder %s9669_s12, %s8644_s5  ;;  %p8648_p13 = scmp.lt.u32.totalorder %s8644_s5, %s9669_s12 }
  0xe6   :  { %p8650_p0 = pnand %p8648_p13, %p8645_p12 }
  0xe8   :  { %8653 = shalt.err (!%p8650_p0)
}
  0xe9   :  { %s8654_s2 = scalar_lea.vmem %s159_s19, 16  ;;  %s8658_s27 = scalar_lea.vmem %s159_s19, 32 }
  0xea   :  { %p8655_p1 = scmp.ne.s32.totalorder %s159_s19, %s8654_s2  ;;  %p8659_p2 = scmp.lt.s32.totalorder %s159_s19, %s159_s19 }
  0xeb   :  { %p8660_p3 = scmp.lt.s32.totalorder %s8658_s27, %s8654_s2 }
  0xed   :  { %p8661_p4 = por %p8660_p3, %p8659_p2 }
  0xef   :  { %p8662_p5 = pnand %p8661_p4, %p8655_p1 }
  0xf1   :  { %8665 = shalt.err (!%p8662_p5)
}
  0xf2   :  { %161 = dma.hbm_to_vmem [thread:$0]  %s9669_s12, 16, %s159_s19, [#allocation26]  }
  0xf3   :  { %8710 = dma.done.wait [#allocation8], 128  }
  0xf4   :  { %8711 = vsyncadd [#allocation8], 4294967168 }
  0xf5   :  { %8712 = dma.done.wait [#allocation11], 13968  }
  0xf6   :  { %8713 = vsyncadd [#allocation11], 4294953328 }
  0xf7   :  { %8714 = dma.done.wait [#allocation14], 288  }
  0xf8   :  { %8715 = vsyncadd [#allocation14], 4294967008 }
  0xf9   :  { %8716 = dma.done.wait [#allocation17], 288  }
  0xfa   :  { %8717 = vsyncadd [#allocation17], 4294967008 }
  0xfb   :  { %8718 = dma.done.wait [#allocation20], 288  }
  0xfc   :  { %8719 = vsyncadd [#allocation20], 4294967008 }
  0xfd   :  { %8720 = dma.done.wait [#allocation23], 288  }
  0xfe   :  { %8721 = vsyncadd [#allocation23], 4294967008 }
  0xff   :  { %8722 = dma.done.wait [#allocation26], 160  }
 0x100   :  { %8723 = vsyncadd [#allocation26], 4294967136 }
 0x101   :  { %s210_s18 = sld [smem:[#allocation0]]   ;;  %s8749_s3 = smov [#allocation2]  }
 0x102   :  { %s218_s9 = sshll.u32 %s8749_s3, 4  ;;  %s8750_s26 = smov 1152   ;;  %s219_s9 = int_to_ptr.vmem [resolvable:$true] %s218_s9 }
 0x103   :  { %222 = sst [smem:[#allocation30]] %s8750_s26  ;;  %s8751_s12 = smov 9  }
 0x104   :  { %224 = sst [smem:[#allocation30 + $0x1]] %s8750_s26  ;;  %s8752_s19 = smov 64  }
 0x105   :  { %226 = sst [smem:[#allocation30 + $0x2]] %s8751_s12  ;;  %s8753_s24 = smov 128  }
 0x106   :  { %228 = sst [smem:[#allocation30 + $0x3]] %s8752_s19  ;;  %s8754_s21 = smov 2  }
 0x107   :  { %s7360_s25 = sshll.u32 %s210_s18, 26  ;;  %230 = sst [smem:[#allocation30 + $0x4]] %s8753_s24 }
 0x108   :  { %s9021_s20 = sadd.s32 134217728, %s7360_s25  ;;  %232 = sst [smem:[#allocation30 + $0x5]] %s8754_s21 }
 0x109   :  { %s8755_s22 = smov 576   ;;  %236 = sst [smem:[#allocation30 + $0x7]] %s8752_s19 }
 0x10a   :  { %234 = sst [smem:[#allocation30 + $0x6]] %s8755_s22  ;;  %s8756_s4 = smov 4  }
 0x10b   :  { %238 = sst [smem:[#allocation30 + $0x8]] %s8756_s4  ;;  %s8757_s30 = smov [#allocation6]  }
 0x10c   :  { %s8758_s8 = smov [#allocation29]   ;;  %s8759_s1 = smov [#allocation3]  }
 0x10d   :  { %240 = dma.general %s9670_s13, 82944, %s219_s9, %s8757_s30, %s8758_s8, [#allocation30], %s9021_s20, 0  }
 0x10e   :  { %257 = sst [smem:[#allocation32]] %s8750_s26  ;;  %s253_s23 = sshll.u32 %s8759_s1, 4  ;;  %s254_s23 = int_to_ptr.vmem [resolvable:$true] %s253_s23 }
 0x10f   :  { %259 = sst [smem:[#allocation32 + $0x1]] %s8750_s26  ;;  %s8760_s13 = smov [#allocation6 + $0x1]  }
 0x110   :  { %261 = sst [smem:[#allocation32 + $0x2]] %s8751_s12  ;;  %s8761_s17 = smov [#allocation31]  }
 0x111   :  { %263 = sst [smem:[#allocation32 + $0x3]] %s8752_s19  ;;  %s8762_s16 = smov [#allocation4]  }
 0x112   :  { %265 = sst [smem:[#allocation32 + $0x4]] %s8753_s24  ;;  %s288_s29 = sshll.u32 %s8762_s16, 4  ;;  %s289_s29 = int_to_ptr.vmem [resolvable:$true] %s288_s29 }
 0x113   :  { %267 = sst [smem:[#allocation32 + $0x5]] %s8754_s21  ;;  %s8763_s0 = smov [#allocation5]  }
 0x114   :  { %269 = sst [smem:[#allocation32 + $0x6]] %s8755_s22  ;;  %s319_s2 = sshll.u32 %s8763_s0, 4  ;;  %s320_s2 = int_to_ptr.vmem [resolvable:$true] %s319_s2 }
 0x115   :  { %271 = sst [smem:[#allocation32 + $0x7]] %s8752_s19  ;;  %s8765_s27 = smov [#allocation33]  }
 0x116   :  { %273 = sst [smem:[#allocation32 + $0x8]] %s8756_s4 }
 0x117   :  { %275 = dma.general %s9671_s14, 82944, %s254_s23, %s8760_s13, %s8761_s17, [#allocation32], %s9021_s20, 0  }
 0x118   :  { %292 = sst [smem:[#allocation34]] %s8750_s26  ;;  %s8764_s14 = smov [#allocation6 + $0x2]  }
 0x119   :  { %294 = sst [smem:[#allocation34 + $0x1]] %s8750_s26 }
 0x11a   :  { %296 = sst [smem:[#allocation34 + $0x2]] %s8751_s12 }
 0x11b   :  { %298 = sst [smem:[#allocation34 + $0x3]] %s8752_s19 }
 0x11c   :  { %300 = sst [smem:[#allocation34 + $0x4]] %s8753_s24 }
 0x11d   :  { %302 = sst [smem:[#allocation34 + $0x5]] %s8754_s21 }
 0x11e   :  { %304 = sst [smem:[#allocation34 + $0x6]] %s8755_s22 }
 0x11f   :  { %306 = sst [smem:[#allocation34 + $0x7]] %s8752_s19 }
 0x120   :  { %308 = sst [smem:[#allocation34 + $0x8]] %s8756_s4 }
 0x121   :  { %310 = dma.general %s9672_s15, 82944, %s289_s29, %s8764_s14, %s8765_s27, [#allocation34], %s9021_s20, 0  }
 0x122   :  { %s9689_s9 = sld [smem:[#allocation53_spill]] }
 0x128   :  { %s8666_s26 = scalar_lea.hbm %s9689_s9, 9216 }
 0x129   :  { %p8667_p6 = scmp.ne.s32.totalorder %s9689_s9, %s8666_s26  ;;  %p8670_p7 = scmp.lt.u32.totalorder %s8666_s26, %s9689_s9 }
 0x12b   :  { %p8672_p8 = pnand %p8670_p7, %p8667_p6 }
 0x12d   :  { %8675 = shalt.err (!%p8672_p8)  }
 0x12e   :  { %s8676_s19 = scalar_lea.vmem %s320_s2, 9216  ;;  %p8681_p10 = scmp.lt.s32.totalorder %s320_s2, %s320_s2 }
 0x12f   :  { %p8677_p9 = scmp.ne.s32.totalorder %s320_s2, %s8676_s19  ;;  %p8682_p11 = scmp.lt.s32.totalorder %s8676_s19, %s8676_s19 }
 0x131   :  { %p8683_p12 = por %p8682_p11, %p8681_p10 }
 0x133   :  { %p8684_p13 = pnand %p8683_p12, %p8677_p9 }
 0x135   :  { %8687 = shalt.err (!%p8684_p13)  }
 0x136   :  { %322 = dma.hbm_to_vmem [thread:$0]  %s9689_s9, 9216, %s320_s2, [#allocation6 + $0x3]  ;;  %v8216_v0 = vld [vmem:[#allocation10 + $0x4] ss:$36 sps:$4 sm:$0xff]   ;;  %v8219_v2 = vld [vmem:[#allocation10 + $0xc] ss:$36 sps:$4 sm:$0xff]  }
 0x137   :  { %v8218_v1 = vld [vmem:[#allocation10] ss:$36 sps:$4 sm:$0xff]   ;;  %1055 = vmatprep.subr.bf16.mxu0 %v8216_v0  ;;  %v8221_v3 = vld [vmem:[#allocation10 + $0x4c] ss:$36 sps:$4 sm:$0xff]   ;;  %1096 = vmatprep.subr.bf16.mxu1 %v8219_v2  ;;  %v8225_v6 = vld [vmem:[#allocation10 + $0x54] ss:$36 sps:$4 sm:$0xff]  }
 0x138   :  { %1056 = vmatpush1.bf16.msra.mxu0 %v8218_v1  ;;  %v8223_v4 = vld [vmem:[#allocation10 + $0x8] ss:$36 sps:$4 sm:$0xff]   ;;  %v8227_v7 = vld [vmem:[#allocation10 + $0x94] ss:$36 sps:$4 sm:$0xff]   ;;  %v8231_v10 = vld [vmem:[#allocation10 + $0x9c] ss:$36 sps:$4 sm:$0xff]  }
 0x139   :  { %v8224_v5 = vld [vmem:[#allocation10 + $0x48] ss:$36 sps:$4 sm:$0xff]   ;;  %1057 = vmatprep.subr.bf16.mxu0 %v8221_v3  ;;  %1097 = vmatpush1.bf16.msra.mxu1 %v8223_v4  ;;  %v8229_v8 = vld [vmem:[#allocation10 + $0x50] ss:$36 sps:$4 sm:$0xff]   ;;  %v8233_v11 = vld [vmem:[#allocation10 + $0xdc] ss:$36 sps:$4 sm:$0xff]  }
 0x13a   :  { %1098 = vmatprep.subr.bf16.mxu1 %v8225_v6  ;;  %v8230_v9 = vld [vmem:[#allocation10 + $0x90] ss:$36 sps:$4 sm:$0xff]   ;;  %v8235_v12 = vld [vmem:[#allocation10 + $0x98] ss:$36 sps:$4 sm:$0xff]   ;;  %v8237_v13 = vld [vmem:[#allocation10 + $0xe4] ss:$36 sps:$4 sm:$0xff]  }
 0x13b   :  { %v8236_v14 = vld [vmem:[#allocation10 + $0xd8] ss:$36 sps:$4 sm:$0xff]   ;;  %v8239_v15 = vld [vmem:[#allocation10 + $0x124] ss:$36 sps:$4 sm:$0xff]   ;;  %v8243_v17 = vld [vmem:[#allocation10 + $0x12c] ss:$36 sps:$4 sm:$0xff]  }
 0x13c   :  { %1058 = vmatpush1.bf16.msra.mxu0 %v8224_v5  ;;  %v8241_v16 = vld [vmem:[#allocation10 + $0xe0] ss:$36 sps:$4 sm:$0xff]   ;;  %v8245_v19 = vld [vmem:[#allocation10 + $0x16c] ss:$36 sps:$4 sm:$0xff]   ;;  %v8249_v21 = vld [vmem:[#allocation10 + $0x174] ss:$36 sps:$4 sm:$0xff]  }
 0x13d   :  { %1059 = vmatprep.subr.bf16.mxu0 %v8227_v7  ;;  %1099 = vmatpush1.bf16.msra.mxu1 %v8229_v8  ;;  %v8242_v18 = vld [vmem:[#allocation10 + $0x120] ss:$36 sps:$4 sm:$0xff]   ;;  %v8247_v20 = vld [vmem:[#allocation10 + $0x128] ss:$36 sps:$4 sm:$0xff]   ;;  %v8251_v23 = vld [vmem:[#allocation10 + $0x1b4] ss:$36 sps:$4 sm:$0xff]  }
 0x13e   :  { %1100 = vmatprep.subr.bf16.mxu1 %v8231_v10  ;;  %v8248_v22 = vld [vmem:[#allocation10 + $0x168] ss:$36 sps:$4 sm:$0xff]   ;;  %v8253_v24 = vld [vmem:[#allocation10 + $0x170] ss:$36 sps:$4 sm:$0xff]   ;;  %v8255_v25 = vld [vmem:[#allocation10 + $0x1bc] ss:$36 sps:$4 sm:$0xff]  }
 0x13f   :  { %v8254_v26 = vld [vmem:[#allocation10 + $0x1b0] ss:$36 sps:$4 sm:$0xff]   ;;  %v8257_v27 = vld [vmem:[#allocation10 + $0x1fc] ss:$36 sps:$4 sm:$0xff]   ;;  %v8261_v29 = vld [vmem:[#allocation10 + $0x204] ss:$36 sps:$4 sm:$0xff]  }
 0x140   :  { %1060 = vmatpush1.bf16.msra.mxu0 %v8230_v9  ;;  %v8259_v28 = vld [vmem:[#allocation10 + $0x1b8] ss:$36 sps:$4 sm:$0xff]   ;;  %v8263_v31 = vld [vmem:[#allocation10 + $0x244] ss:$36 sps:$4 sm:$0xff]   ;;  %v8267_v33 = vld [vmem:[#allocation10 + $0x24c] ss:$36 sps:$4 sm:$0xff]  }
 0x141   :  { %1061 = vmatprep.subr.bf16.mxu0 %v8233_v11  ;;  %1101 = vmatpush1.bf16.msra.mxu1 %v8235_v12  ;;  %v8260_v30 = vld [vmem:[#allocation10 + $0x1f8] ss:$36 sps:$4 sm:$0xff]   ;;  %v8265_v32 = vld [vmem:[#allocation10 + $0x200] ss:$36 sps:$4 sm:$0xff]   ;;  %vm1051_vm0 = vcmask 523264  }
 0x142   :  { %1102 = vmatprep.subr.bf16.mxu1 %v8237_v13  ;;  %v323_v34 = vld [vmem:[#allocation7] sm:$0xff]  ;;  %v8266_v35 = vld [vmem:[#allocation10 + $0x240] ss:$36 sps:$4 sm:$0xff]   ;;  %v8269_v37 = vld [vmem:[#allocation10 + $0x28c] ss:$36 sps:$4 sm:$0xff]  }
 0x143   :  { %v9069_v36 = vcombine.high %v323_v34, %v323_v34  ;;  %v8271_v38 = vld [vmem:[#allocation10 + $0x248] ss:$36 sps:$4 sm:$0xff]   ;;  %v8273_v39 = vld [vmem:[#allocation10 + $0x294] ss:$36 sps:$4 sm:$0xff]   ;;  %v8279_v43 = vld [vmem:[#allocation10 + $0x2dc] ss:$36 sps:$4 sm:$0xff]   ;;  %v9075_v51 = vcombine.low %v323_v34, %v323_v34 }
 0x144   :  { %1062 = vmatpush1.bf16.msra.mxu0 %v8236_v14  ;;  %v8272_v40 = vld [vmem:[#allocation10 + $0x288] ss:$36 sps:$4 sm:$0xff]   ;;  %v8275_v41 = vld [vmem:[#allocation10 + $0x2d4] ss:$36 sps:$4 sm:$0xff]   ;;  %v8281_v45 = vld [vmem:[#allocation10 + $0x31c] ss:$36 sps:$4 sm:$0xff]  }
 0x145   :  { %1063 = vmatprep.subr.bf16.mxu0 %v8239_v15  ;;  %1103 = vmatpush1.bf16.msra.mxu1 %v8241_v16  ;;  %v8277_v42 = vld [vmem:[#allocation10 + $0x290] ss:$36 sps:$4 sm:$0xff]   ;;  %v8283_v46 = vld [vmem:[#allocation10 + $0x2d8] ss:$36 sps:$4 sm:$0xff]   ;;  %v8286_v47 = vld [vmem:[#allocation10 + $0x324] ss:$36 sps:$4 sm:$0xff]  }
 0x146   :  { %1104 = vmatprep.subr.bf16.mxu1 %v8243_v17  ;;  %7477 = vmatprep.mubr.msk.bf16.mxu0 %vm1051_vm0, %v9069_v36  ;;  %v8278_v44 = vld [vmem:[#allocation10 + $0x2d0] ss:$36 sps:$4 sm:$0xff]   ;;  %v8284_v48 = vld [vmem:[#allocation10 + $0x318] ss:$36 sps:$4 sm:$0xff]   ;;  %v8289_v50 = vld [vmem:[#allocation10 + $0x320] ss:$36 sps:$4 sm:$0xff]  }
 0x147   :  { %7478 = vmatprep.mubr.msk.bf16.mxu1 %vm1051_vm0, %v9069_v36  ;;  %v8292_v49 = vld [vmem:[#allocation10 + $0x14] ss:$36 sps:$4 sm:$0xff]   ;;  %v8298_v52 = vld [vmem:[#allocation10 + $0x1c] ss:$36 sps:$4 sm:$0xff]   ;;  %v8304_v56 = vld [vmem:[#allocation10 + $0x64] ss:$36 sps:$4 sm:$0xff]  }
 0x148   :  { %1064 = vmatpush1.bf16.msra.mxu0 %v8242_v18  ;;  %v8290_v53 = vld [vmem:[#allocation10 + $0x10] ss:$36 sps:$4 sm:$0xff]   ;;  %v8295_v54 = vld [vmem:[#allocation10 + $0x5c] ss:$36 sps:$4 sm:$0xff]   ;;  %v8301_v58 = vld [vmem:[#allocation10 + $0xa4] ss:$36 sps:$4 sm:$0xff]  }
 0x149   :  { %1065 = vmatprep.subr.bf16.mxu0 %v8245_v19  ;;  %1105 = vmatpush1.bf16.msra.mxu1 %v8247_v20  ;;  %v8296_v55 = vld [vmem:[#allocation10 + $0x18] ss:$36 sps:$4 sm:$0xff]   ;;  %v8302_v59 = vld [vmem:[#allocation10 + $0x60] ss:$36 sps:$4 sm:$0xff]   ;;  %v8310_v60 = vld [vmem:[#allocation10 + $0xac] ss:$36 sps:$4 sm:$0xff]  }
 0x14a   :  { %1106 = vmatprep.subr.bf16.mxu1 %v8249_v21  ;;  %v8293_v57 = vld [vmem:[#allocation10 + $0x58] ss:$36 sps:$4 sm:$0xff]   ;;  %v8299_v61 = vld [vmem:[#allocation10 + $0xa0] ss:$36 sps:$4 sm:$0xff]   ;;  %v8307_v62 = vld [vmem:[#allocation10 + $0xec] ss:$36 sps:$4 sm:$0xff]  }
 0x14b   :  { %v8308_v63 = vld [vmem:[#allocation10 + $0xa8] ss:$36 sps:$4 sm:$0xff]   ;;  %v8316_v0 = vld [vmem:[#allocation10 + $0xf4] ss:$36 sps:$4 sm:$0xff]   ;;  %v8322_v4 = vld [vmem:[#allocation10 + $0x13c] ss:$36 sps:$4 sm:$0xff]  }
 0x14c   :  { %1066 = vmatpush1.bf16.msra.mxu0 %v8248_v22  ;;  %v8305_v1 = vld [vmem:[#allocation10 + $0xe8] ss:$36 sps:$4 sm:$0xff]   ;;  %v8313_v2 = vld [vmem:[#allocation10 + $0x134] ss:$36 sps:$4 sm:$0xff]   ;;  %v8319_v6 = vld [vmem:[#allocation10 + $0x17c] ss:$36 sps:$4 sm:$0xff]  }
 0x14d   :  { %1067 = vmatprep.subr.bf16.mxu0 %v8251_v23  ;;  %1107 = vmatpush1.bf16.msra.mxu1 %v8253_v24  ;;  %v8314_v3 = vld [vmem:[#allocation10 + $0xf0] ss:$36 sps:$4 sm:$0xff]   ;;  %v8320_v7 = vld [vmem:[#allocation10 + $0x138] ss:$36 sps:$4 sm:$0xff]   ;;  %v8328_v8 = vld [vmem:[#allocation10 + $0x184] ss:$36 sps:$4 sm:$0xff]  }
 0x14e   :  { %1108 = vmatprep.subr.bf16.mxu1 %v8255_v25  ;;  %v8311_v5 = vld [vmem:[#allocation10 + $0x130] ss:$36 sps:$4 sm:$0xff]   ;;  %v8317_v9 = vld [vmem:[#allocation10 + $0x178] ss:$36 sps:$4 sm:$0xff]   ;;  %v8325_v10 = vld [vmem:[#allocation10 + $0x1c4] ss:$36 sps:$4 sm:$0xff]  }
 0x14f   :  { %v8326_v11 = vld [vmem:[#allocation10 + $0x180] ss:$36 sps:$4 sm:$0xff]   ;;  %v8334_v12 = vld [vmem:[#allocation10 + $0x1cc] ss:$36 sps:$4 sm:$0xff]   ;;  %v8340_v16 = vld [vmem:[#allocation10 + $0x214] ss:$36 sps:$4 sm:$0xff]  }
 0x150   :  { %1068 = vmatpush1.bf16.msra.mxu0 %v8254_v26  ;;  %v8323_v13 = vld [vmem:[#allocation10 + $0x1c0] ss:$36 sps:$4 sm:$0xff]   ;;  %v8331_v14 = vld [vmem:[#allocation10 + $0x20c] ss:$36 sps:$4 sm:$0xff]   ;;  %v8337_v18 = vld [vmem:[#allocation10 + $0x254] ss:$36 sps:$4 sm:$0xff]  }
 0x151   :  { %1069 = vmatprep.subr.bf16.mxu0 %v8257_v27  ;;  %1109 = vmatpush1.bf16.msra.mxu1 %v8259_v28  ;;  %v8332_v15 = vld [vmem:[#allocation10 + $0x1c8] ss:$36 sps:$4 sm:$0xff]   ;;  %v8338_v19 = vld [vmem:[#allocation10 + $0x210] ss:$36 sps:$4 sm:$0xff]   ;;  %v8346_v20 = vld [vmem:[#allocation10 + $0x25c] ss:$36 sps:$4 sm:$0xff]  }
 0x152   :  { %1110 = vmatprep.subr.bf16.mxu1 %v8261_v29  ;;  %v8329_v17 = vld [vmem:[#allocation10 + $0x208] ss:$36 sps:$4 sm:$0xff]   ;;  %v8335_v21 = vld [vmem:[#allocation10 + $0x250] ss:$36 sps:$4 sm:$0xff]   ;;  %v8343_v22 = vld [vmem:[#allocation10 + $0x29c] ss:$36 sps:$4 sm:$0xff]  }
 0x153   :  { %v8344_v23 = vld [vmem:[#allocation10 + $0x258] ss:$36 sps:$4 sm:$0xff]   ;;  %v8352_v24 = vld [vmem:[#allocation10 + $0x2a4] ss:$36 sps:$4 sm:$0xff]   ;;  %v8358_v28 = vld [vmem:[#allocation10 + $0x2ec] ss:$36 sps:$4 sm:$0xff]  }
 0x154   :  { %1070 = vmatpush1.bf16.msra.mxu0 %v8260_v30  ;;  %v8341_v25 = vld [vmem:[#allocation10 + $0x298] ss:$36 sps:$4 sm:$0xff]   ;;  %v8349_v26 = vld [vmem:[#allocation10 + $0x2e4] ss:$36 sps:$4 sm:$0xff]   ;;  %v8355_v30 = vld [vmem:[#allocation10 + $0x32c] ss:$36 sps:$4 sm:$0xff]  }
 0x155   :  { %1071 = vmatprep.subr.bf16.mxu0 %v8263_v31  ;;  %1111 = vmatpush1.bf16.msra.mxu1 %v8265_v32  ;;  %v8350_v27 = vld [vmem:[#allocation10 + $0x2a0] ss:$36 sps:$4 sm:$0xff]   ;;  %v8356_v31 = vld [vmem:[#allocation10 + $0x2e8] ss:$36 sps:$4 sm:$0xff]   ;;  %v8361_v32 = vld [vmem:[#allocation10 + $0x334] ss:$36 sps:$4 sm:$0xff]  }
 0x156   :  { %1112 = vmatprep.subr.bf16.mxu1 %v8267_v33  ;;  %v8347_v29 = vld [vmem:[#allocation10 + $0x2e0] ss:$36 sps:$4 sm:$0xff]   ;;  %v8353_v33 = vld [vmem:[#allocation10 + $0x328] ss:$36 sps:$4 sm:$0xff]   ;;  %v8359_v34 = vld [vmem:[#allocation10 + $0x330] ss:$36 sps:$4 sm:$0xff]  }
 0x158   :  { %1072 = vmatpush1.bf16.msra.mxu0 %v8266_v35  ;;  %v8362_v35 = vld [vmem:[#allocation10 + $0x20] ss:$36 sps:$4 sm:$0xff]  }
 0x159   :  { %1073 = vmatprep.subr.bf16.mxu0 %v8269_v37  ;;  %1113 = vmatpush1.bf16.msra.mxu1 %v8271_v38  ;;  %v9681_v37 = vmov 0   ;;  %v8363_v38 = vld [vmem:[#allocation10 + $0x68] ss:$36 sps:$4 sm:$0xff]  }
 0x15a   :  { %1114 = vmatprep.subr.bf16.mxu1 %v8273_v39  ;;  %v8364_v39 = vld [vmem:[#allocation10 + $0xb0] ss:$36 sps:$4 sm:$0xff]  }
 0x15c   :  { %1074 = vmatpush1.bf16.msra.mxu0 %v8272_v40  ;;  %v8365_v40 = vld [vmem:[#allocation10 + $0xf8] ss:$36 sps:$4 sm:$0xff]  }
 0x15d   :  { %1075 = vmatprep.subr.bf16.mxu0 %v8275_v41  ;;  %1115 = vmatpush1.bf16.msra.mxu1 %v8277_v42  ;;  %v8366_v41 = vld [vmem:[#allocation10 + $0x140] ss:$36 sps:$4 sm:$0xff]   ;;  %v8367_v42 = vld [vmem:[#allocation10 + $0x188] ss:$36 sps:$4 sm:$0xff]  }
 0x15e   :  { %1116 = vmatprep.subr.bf16.mxu1 %v8279_v43  ;;  %v8369_v43 = vld [vmem:[#allocation10 + $0x218] ss:$36 sps:$4 sm:$0xff]  }
 0x160   :  { %1076 = vmatpush1.bf16.msra.mxu0 %v8278_v44  ;;  %v8370_v44 = vld [vmem:[#allocation10 + $0x260] ss:$36 sps:$4 sm:$0xff]  }
 0x161   :  { %1077 = vmatprep.subr.bf16.mxu0 %v8281_v45  ;;  %1117 = vmatpush1.bf16.msra.mxu1 %v8283_v46  ;;  %v8371_v45 = vld [vmem:[#allocation10 + $0x2a8] ss:$36 sps:$4 sm:$0xff]   ;;  %v8372_v46 = vld [vmem:[#allocation10 + $0x2f0] ss:$36 sps:$4 sm:$0xff]  }
 0x162   :  { %1118 = vmatprep.subr.bf16.mxu1 %v8286_v47  ;;  %v8373_v47 = vld [vmem:[#allocation10 + $0x338] ss:$36 sps:$4 sm:$0xff]  }
 0x164   :  { %1078 = vmatpush1.bf16.msra.mxu0 %v8284_v48 }
 0x165   :  { %1137 = vmatprep.subr.bf16.mxu0 %v8292_v49  ;;  %1119 = vmatpush1.bf16.msra.mxu1 %v8289_v50 }
 0x166   :  { %1178 = vmatprep.subr.bf16.mxu1 %v8298_v52 }
 0x167   :  { %1088 = vmatmul.mubr.bf16.vlgmr.msra.gmra.mrb[0].mxu0 %v9075_v51 }
 0x168   :  { %1138 = vmatpush1.bf16.msra.mxu0 %v8290_v53  ;;  %7479 = vmatprep.mubr.msk.bf16.mxu0 %vm1051_vm0, %v9069_v36 }
 0x169   :  { %1129 = vmatmul.mubr.bf16.vlgmr.msra.gmra.mrb[0].mxu1 %v9075_v51  ;;  %1139 = vmatprep.subr.bf16.mxu0 %v8295_v54 }
 0x16a   :  { %1179 = vmatpush1.bf16.msra.mxu1 %v8296_v55  ;;  %7480 = vmatprep.mubr.msk.bf16.mxu1 %vm1051_vm0, %v9069_v36 }
 0x16b   :  { %1180 = vmatprep.subr.bf16.mxu1 %v8304_v56 }
 0x16c   :  { %1140 = vmatpush1.bf16.msra.mxu0 %v8293_v57 }
 0x16d   :  { %1141 = vmatprep.subr.bf16.mxu0 %v8301_v58 }
 0x16e   :  { %1181 = vmatpush1.bf16.msra.mxu1 %v8302_v59 }
 0x16f   :  { %1182 = vmatprep.subr.bf16.mxu1 %v8310_v60 }
 0x170   :  { %1142 = vmatpush1.bf16.msra.mxu0 %v8299_v61 }
 0x171   :  { %1143 = vmatprep.subr.bf16.mxu0 %v8307_v62 }
 0x172   :  { %1183 = vmatpush1.bf16.msra.mxu1 %v8308_v63 }
 0x173   :  { %1184 = vmatprep.subr.bf16.mxu1 %v8316_v0 }
 0x174   :  { %1144 = vmatpush1.bf16.msra.mxu0 %v8305_v1  ;;  %v448_v1 = vlaneseq }
 0x175   :  { %1145 = vmatprep.subr.bf16.mxu0 %v8313_v2 }
 0x176   :  { %1185 = vmatpush1.bf16.msra.mxu1 %v8314_v3  ;;  %v449_v2 = vshrl.u32 %v448_v1, 7 }
 0x177   :  { %1186 = vmatprep.subr.bf16.mxu1 %v8322_v4  ;;  %v444_v4 = vld [vmem:[#allocation12] sm:$0xff] }
 0x178   :  { %1146 = vmatpush1.bf16.msra.mxu0 %v8311_v5  ;;  %v9100_v3 = vsub.s32 0, %v449_v2 }
 0x179   :  { %1147 = vmatprep.subr.bf16.mxu0 %v8319_v6 }
 0x17a   :  { %1187 = vmatpush1.bf16.msra.mxu1 %v8320_v7  ;;  %v451_v5 = vrot.slane %v444_v4, %v9100_v3  ;;  %v9106_v7 = vsub.s32 2, %v449_v2 }
 0x17b   :  { %1188 = vmatprep.subr.bf16.mxu1 %v8328_v8  ;;  %v9108_v8 = vsub.s32 3, %v449_v2 }
 0x17c   :  { %1148 = vmatpush1.bf16.msra.mxu0 %v8317_v9 }
 0x17d   :  { %1149 = vmatprep.subr.bf16.mxu0 %v8325_v10 }
 0x17e   :  { %1189 = vmatpush1.bf16.msra.mxu1 %v8326_v11  ;;  %v459_v11 = vrot.slane %v444_v4, %v9106_v7 }
 0x17f   :  { %1190 = vmatprep.subr.bf16.mxu1 %v8334_v12  ;;  %v9115_v12 = vsub.s32 4, %v449_v2 }
 0x180   :  { %1150 = vmatpush1.bf16.msra.mxu0 %v8323_v13  ;;  %v463_v13 = vrot.slane %v444_v4, %v9108_v8 }
 0x181   :  { %1151 = vmatprep.subr.bf16.mxu0 %v8331_v14 }
 0x182   :  { %1191 = vmatpush1.bf16.msra.mxu1 %v8332_v15 }
 0x183   :  { %1192 = vmatprep.subr.bf16.mxu1 %v8340_v16 }
 0x184   :  { %1152 = vmatpush1.bf16.msra.mxu0 %v8329_v17 }
 0x185   :  { %1153 = vmatprep.subr.bf16.mxu0 %v8337_v18  ;;  %v467_v18 = vrot.slane %v444_v4, %v9115_v12 }
 0x186   :  { %1193 = vmatpush1.bf16.msra.mxu1 %v8338_v19  ;;  %v9127_v19 = vsub.s32 5, %v449_v2 }
 0x187   :  { %1194 = vmatprep.subr.bf16.mxu1 %v8346_v20 }
 0x188   :  { %1154 = vmatpush1.bf16.msra.mxu0 %v8335_v21 }
 0x189   :  { %1155 = vmatprep.subr.bf16.mxu0 %v8343_v22 }
 0x18a   :  { %1195 = vmatpush1.bf16.msra.mxu1 %v8344_v23 }
 0x18b   :  { %1196 = vmatprep.subr.bf16.mxu1 %v8352_v24 }
 0x18c   :  { %1156 = vmatpush1.bf16.msra.mxu0 %v8341_v25  ;;  %v471_v25 = vrot.slane %v444_v4, %v9127_v19 }
 0x18d   :  { %1157 = vmatprep.subr.bf16.mxu0 %v8349_v26  ;;  %v9137_v26 = vsub.s32 6, %v449_v2 }
 0x18e   :  { %1197 = vmatpush1.bf16.msra.mxu1 %v8350_v27 }
 0x18f   :  { %1198 = vmatprep.subr.bf16.mxu1 %v8358_v28 }
 0x190   :  { %1158 = vmatpush1.bf16.msra.mxu0 %v8347_v29 }
 0x191   :  { %1159 = vmatprep.subr.bf16.mxu0 %v8355_v30  ;;  %v9142_v30 = vsub.s32 7, %v449_v2 }
 0x192   :  { %1199 = vmatpush1.bf16.msra.mxu1 %v8356_v31 }
 0x193   :  { %1200 = vmatprep.subr.bf16.mxu1 %v8361_v32 }
 0x194   :  { %1160 = vmatpush1.bf16.msra.mxu0 %v8353_v33 }
 0x195   :  { %1219 = vmatprep.subr.bf16.mxu0 %v9681_v37 }
 0x196   :  { %1201 = vmatpush1.bf16.msra.mxu1 %v8359_v34  ;;  %v475_v34 = vrot.slane %v444_v4, %v9137_v26 }
 0x197   :  { %1170 = vmatmul.mubr.bf16.vlgmr.msra.gmra.mrb[4].mxu0 %v9075_v51 }
 0x198   :  { %1220 = vmatpush1.bf16.msra.mxu0 %v8362_v35  ;;  %7481 = vmatprep.mubr.msk.bf16.mxu0 %vm1051_vm0, %v9069_v36  ;;  %v8368_v36 = vld [vmem:[#allocation10 + $0x1d0] ss:$36 sps:$4 sm:$0xff]  }
 0x199   :  { %1211 = vmatmul.mubr.bf16.vlgmr.msra.gmra.mrb[4].mxu1 %v9075_v51  ;;  %1221 = vmatprep.subr.bf16.mxu0 %v9681_v37 }
 0x19c   :  { %1222 = vmatpush1.bf16.msra.mxu0 %v8363_v38  ;;  %v479_v38 = vrot.slane %v444_v4, %v9142_v30 }
 0x19d   :  { %1223 = vmatprep.subr.bf16.mxu0 %v9681_v37 }
 0x1a0   :  { %1224 = vmatpush1.bf16.msra.mxu0 %v8364_v39 }
 0x1a1   :  { %1225 = vmatprep.subr.bf16.mxu0 %v9681_v37 }
 0x1a4   :  { %1226 = vmatpush1.bf16.msra.mxu0 %v8365_v40 }
 0x1a5   :  { %1227 = vmatprep.subr.bf16.mxu0 %v9681_v37 }
 0x1a8   :  { %1228 = vmatpush1.bf16.msra.mxu0 %v8366_v41 }
 0x1a9   :  { %1229 = vmatprep.subr.bf16.mxu0 %v9681_v37 }
 0x1ac   :  { %1230 = vmatpush1.bf16.msra.mxu0 %v8367_v42 }
 0x1ad   :  { %1231 = vmatprep.subr.bf16.mxu0 %v9681_v37 }
 0x1b0   :  { %1232 = vmatpush1.bf16.msra.mxu0 %v8368_v36 }
 0x1b1   :  { %1233 = vmatprep.subr.bf16.mxu0 %v9681_v37 }
 0x1b4   :  { %1234 = vmatpush1.bf16.msra.mxu0 %v8369_v43 }
 0x1b5   :  { %1235 = vmatprep.subr.bf16.mxu0 %v9681_v37 }
 0x1b8   :  { %1236 = vmatpush1.bf16.msra.mxu0 %v8370_v44 }
 0x1b9   :  { %1237 = vmatprep.subr.bf16.mxu0 %v9681_v37 }
 0x1bc   :  { %1238 = vmatpush1.bf16.msra.mxu0 %v8371_v45 }
 0x1bd   :  { %1239 = vmatprep.subr.bf16.mxu0 %v9681_v37 }
 0x1c0   :  { %1240 = vmatpush1.bf16.msra.mxu0 %v8372_v46  ;;  %v7366_v46 = vld [vmem:[#allocation12 + $0x8] ss:$0 sm:$0xff] }
 0x1c1   :  { %1241 = vmatprep.subr.bf16.mxu0 %v9681_v37 }
 0x1c4   :  { %1242 = vmatpush1.bf16.msra.mxu0 %v8373_v47 }
 0x1c7   :  { %1252 = vmatmul.mubr.bf16.vlgmr.msra.gmra.mrb[8].mxu0 %v9075_v51  ;;  %v9102_v51 = vsub.s32 1, %v449_v2 }
 0x1c9   :  { %v455_v6 = vrot.slane %v444_v4, %v9102_v51 }
 0x23a   :  { %v1089_v48 = vpop.f32.mrb[0].mxu0 }
 0x23b   :  { %v1091_v49 = vpop.f32.mrb[1].mxu0  ;;  %v9110_v9 = vadd.f32 %v1089_v48, %v451_v5  ;;  %v1259_v5 = vld [vmem:[#allocation13] sm:$0xff] }
 0x23c   :  { %v1093_v50 = vpop.f32.mrb[2].mxu0  ;;  %v1130_v52 = vpop.f32.mrb[0].mxu1  ;;  %v9112_v10 = vadd.f32 %v1091_v49, %v455_v6  ;;  %v1261_v6 = vld [vmem:[#allocation15] sm:$0xff] }
 0x23d   :  { %v1094_v53 = vpop.f32.mrb[3].mxu0  ;;  %v1132_v54 = vpop.f32.mrb[1].mxu1  ;;  %v1273_v14 = vmul.f32 %v9110_v9, %v9110_v9  ;;  %v9124_v17 = vadd.f32 %v1130_v52, %v459_v11  ;;  %v1322_v11 = vrot.slane %v1259_v5, %v9100_v3 }
 0x23e   :  { %v1134_v55 = vpop.f32.mrb[2].mxu1  ;;  %v1263_v15 = vadd.f32 %v9112_v10, %v9110_v9  ;;  %v1274_v16 = vmul.f32 %v9112_v10, %v9112_v10  ;;  %v9132_v23 = vadd.f32 %v1132_v54, %v463_v13  ;;  %v1378_v13 = vrot.slane %v1261_v6, %v9100_v3 }
 0x23f   :  { %v1135_v56 = vpop.f32.mrb[3].mxu1  ;;  %v1275_v22 = vmul.f32 %v9124_v17, %v9124_v17 }
 0x240   :  { %v1282_v20 = vadd.f32 %v1274_v16, %v1273_v14  ;;  %v1264_v21 = vadd.f32 %v1263_v15, %v9124_v17  ;;  %v1276_v29 = vmul.f32 %v9132_v23, %v9132_v23  ;;  %v1326_v14 = vrot.slane %v1259_v5, %v9102_v51 }
 0x241   :  { %v1382_v15 = vrot.slane %v1261_v6, %v9102_v51  ;;  %v1330_v16 = vrot.slane %v1259_v5, %v9106_v7 }
 0x242   :  { %v1283_v27 = vadd.f32 %v1282_v20, %v1275_v22  ;;  %v1265_v28 = vadd.f32 %v1264_v21, %v9132_v23  ;;  %v1334_v20 = vrot.slane %v1259_v5, %v9108_v8  ;;  %v1390_v21 = vrot.slane %v1261_v6, %v9108_v8 }
 0x243   :  { %v1338_v22 = vrot.slane %v1259_v5, %v9115_v12 }
 0x244   :  { %v1284_v35 = vadd.f32 %v1283_v27, %v1276_v29  ;;  %v1342_v27 = vrot.slane %v1259_v5, %v9127_v19  ;;  %v1346_v29 = vrot.slane %v1259_v5, %v9137_v26 }
 0x26a   :  { %v1171_v57 = vpop.f32.mrb[4].mxu0 }
 0x26b   :  { %v1173_v58 = vpop.f32.mrb[5].mxu0  ;;  %v9134_v24 = vadd.f32 %v1171_v57, %v467_v18  ;;  %v1386_v18 = vrot.slane %v1261_v6, %v9106_v7 }
 0x26c   :  { %v1175_v59 = vpop.f32.mrb[6].mxu0  ;;  %v1212_v60 = vpop.f32.mrb[4].mxu1  ;;  %v9147_v33 = vadd.f32 %v1173_v58, %v471_v25  ;;  %v1394_v25 = vrot.slane %v1261_v6, %v9115_v12 }
 0x26d   :  { %v1176_v61 = vpop.f32.mrb[7].mxu0  ;;  %v1214_v62 = vpop.f32.mrb[5].mxu1  ;;  %v1266_v31 = vadd.f32 %v1265_v28, %v9134_v24  ;;  %v1277_v32 = vmul.f32 %v9134_v24, %v9134_v24  ;;  %v9154_v42 = vadd.f32 %v1212_v60, %v475_v34  ;;  %v1398_v28 = vrot.slane %v1261_v6, %v9127_v19 }
 0x26e   :  { %v1216_v63 = vpop.f32.mrb[6].mxu1  ;;  %v1278_v41 = vmul.f32 %v9147_v33, %v9147_v33  ;;  %v9158_v44 = vadd.f32 %v1214_v62, %v479_v38  ;;  %v1406_v34 = vrot.slane %v1261_v6, %v9142_v30 }
 0x26f   :  { %v1217_v0 = vpop.f32.mrb[7].mxu1  ;;  %v1285_v39 = vadd.f32 %v1284_v35, %v1277_v32  ;;  %v1267_v40 = vadd.f32 %v1266_v31, %v9147_v33  ;;  %v1279_v43 = vmul.f32 %v9154_v42, %v9154_v42  ;;  %v1402_v31 = vrot.slane %v1261_v6, %v9137_v26 }
 0x270   :  { %v1280_v48 = vmul.f32 %v9158_v44, %v9158_v44  ;;  %v1350_v32 = vrot.slane %v1259_v5, %v9142_v30 }
 0x271   :  { %v1286_v36 = vadd.f32 %v1285_v39, %v1278_v41  ;;  %v1268_v45 = vadd.f32 %v1267_v40, %v9154_v42 }
 0x273   :  { %v1269_v52 = vadd.f32 %v1268_v45, %v9158_v44  ;;  %v1287_v53 = vadd.f32 %v1286_v36, %v1279_v43 }
 0x275   :  { %v1288_v58 = vadd.f32 %v1287_v53, %v1280_v48  ;;  %v7482_v53 = vld [vmem:[#allocation13 + $0x8] ss:$0 sm:$0xff] }
 0x29a   :  { %v1253_v47 = vpop.f32.mrb[8].mxu0 }
 0x29b   :  { %v1254_v49 = vadd.f32 %v7366_v46, %v1253_v47  ;;  %v1255_v50 = vpop.f32.mrb[9].mxu0 }
 0x29c   :  { %v1256_v54 = vpop.f32.mrb[10].mxu0 }
 0x29d   :  { %v1257_v55 = vpop.f32.mrb[11].mxu0  ;;  %v1270_v56 = vadd.f32 %v1269_v52, %v1254_v49  ;;  %v1281_v57 = vmul.f32 %v1254_v49, %v1254_v49 }
 0x29f   :  { %1271 = vadd.xlane.f32.xlu0 %v1270_v56  ;;  %v1289_v59 = vadd.f32 %v1288_v58, %v1281_v57  ;;  %v7483_v58 = vld [vmem:[#allocation15 + $0x8] ss:$0 sm:$0xff] }
 0x2a3   :  { %1290 = vadd.xlane.f32.xlu0 %v1289_v59 }
 0x32c   :  { %v1272_v60 = vpop.xlane.xlu0 %1271 }
 0x32d   :  { %v1292_v61 = vmul.f32 0.00097276265, %v1272_v60 }
 0x32f   :  { %v1294_v63 = vmul.f32 %v1292_v61, %v1292_v61  ;;  %v1299_v35 = vsub.f32 %v9110_v9, %v1292_v61  ;;  %v1300_v38 = vsub.f32 %v9112_v10, %v1292_v61  ;;  %v1301_v39 = vsub.f32 %v9124_v17, %v1292_v61 }
 0x330   :  { %v1291_v62 = vpop.xlane.xlu0 %1290  ;;  %v1302_v40 = vsub.f32 %v9132_v23, %v1292_v61  ;;  %v1303_v41 = vsub.f32 %v9134_v24, %v1292_v61  ;;  %v1304_v43 = vsub.f32 %v9147_v33, %v1292_v61  ;;  %v1305_v45 = vsub.f32 %v9154_v42, %v1292_v61 }
 0x331   :  { %v1293_v0 = vmul.f32 0.00097276265, %v1291_v62  ;;  %v1306_v46 = vsub.f32 %v9158_v44, %v1292_v61  ;;  %v1307_v47 = vsub.f32 %v1254_v49, %v1292_v61 }
 0x333   :  { %v1295_v1 = vsub.f32 %v1293_v0, %v1294_v63 }
 0x335   :  { %v1296_v2 = vmax.f32 %v1295_v1, 0.0 }
 0x337   :  { %v1297_v4 = vadd.f32 1e-05, %v1296_v2 }
 0x339   :  { %8374 = vrsqrt.f32 %v1297_v4 }
 0x343   :  { %v8375_v36 = vpop.eup %8374 }
 0x344   :  { %v1308_v48 = vmul.f32 %v8375_v36, %v1299_v35  ;;  %v1309_v50 = vmul.f32 %v8375_v36, %v1300_v38  ;;  %v1310_v52 = vmul.f32 %v8375_v36, %v1301_v39  ;;  %v1311_v9 = vmul.f32 %v8375_v36, %v1302_v40 }
 0x345   :  { %v1312_v10 = vmul.f32 %v8375_v36, %v1303_v41  ;;  %v1313_v54 = vmul.f32 %v8375_v36, %v1304_v43  ;;  %v1314_v17 = vmul.f32 %v8375_v36, %v1305_v45  ;;  %v1315_v55 = vmul.f32 %v8375_v36, %v1306_v46 }
 0x346   :  { %v1316_v23 = vmul.f32 %v8375_v36, %v1307_v47  ;;  %v1364_v56 = vmul.f32 %v1322_v11, %v1308_v48  ;;  %v1365_v24 = vmul.f32 %v1326_v14, %v1309_v50  ;;  %v1366_v57 = vmul.f32 %v1330_v16, %v1310_v52 }
 0x347   :  { %v1367_v33 = vmul.f32 %v1334_v20, %v1311_v9  ;;  %v1368_v59 = vmul.f32 %v1338_v22, %v1312_v10  ;;  %v1369_v42 = vmul.f32 %v1342_v27, %v1313_v54  ;;  %v1370_v60 = vmul.f32 %v1346_v29, %v1314_v17 }
 0x348   :  { %v1371_v44 = vmul.f32 %v1350_v32, %v1315_v55  ;;  %v1372_v49 = vmul.f32 %v7482_v53, %v1316_v23  ;;  %v1420_v61 = vadd.f32 %v1378_v13, %v1364_v56  ;;  %v1421_v62 = vadd.f32 %v1382_v15, %v1365_v24 }
 0x349   :  { %v1422_v63 = vadd.f32 %v1386_v18, %v1366_v57  ;;  %v1423_v0 = vadd.f32 %v1390_v21, %v1367_v33  ;;  %v1424_v1 = vadd.f32 %v1394_v25, %v1368_v59  ;;  %v1425_v2 = vadd.f32 %v1398_v28, %v1369_v42 }
 0x34a   :  { %v1426_v4 = vadd.f32 %v1402_v31, %v1370_v60  ;;  %v1427_v5 = vadd.f32 %v1406_v34, %v1371_v44  ;;  %v1428_v6 = vadd.f32 %v7483_v58, %v1372_v49  ;;  %v1429_v35 = vmax.f32 %v1420_v61, 0.0 }
 0x34b   :  { %v1430_v11 = vmax.f32 %v1421_v62, 0.0  ;;  %v1431_v14 = vmax.f32 %v1422_v63, 0.0  ;;  %v1432_v16 = vmax.f32 %v1423_v0, 0.0  ;;  %v1433_v38 = vmax.f32 %v1424_v1, 0.0 }
 0x34c   :  { %v1434_v20 = vmax.f32 %v1425_v2, 0.0  ;;  %v1435_v22 = vmax.f32 %v1426_v4, 0.0  ;;  %v1436_v27 = vmax.f32 %v1427_v5, 0.0  ;;  %v1437_v29 = vmax.f32 %v1428_v6, 0.0 }
 0x34d   :  { %v9188_v32 = vpack.c.bf16 %v1429_v35, %v1429_v35  ;;  %v9190_v13 = vpack.c.bf16 %v1430_v11, %v1430_v11  ;;  %v9192_v15 = vpack.c.bf16 %v1431_v14, %v1431_v14  ;;  %v9194_v18 = vpack.c.bf16 %v1432_v16, %v1432_v16 }
 0x34e   :  { %v9196_v21 = vpack.c.bf16 %v1433_v38, %v1433_v38  ;;  %v9198_v25 = vpack.c.bf16 %v1434_v20, %v1434_v20  ;;  %v9200_v28 = vpack.c.bf16 %v1435_v22, %v1435_v22  ;;  %v9202_v31 = vpack.c.bf16 %v1436_v27, %v1436_v27 }
 0x34f   :  { %v9204_v34 = vpack.c.bf16 %v1437_v29, %v1437_v29 }
 0x350   :  { %8724 = dma.done.wait [#allocation6], 82944 }
 0x351   :  { %8725 = vsyncadd [#allocation6], 4294884352  ;;  %2183 = vmatprep.mubr.bf16.mxu1 %v9190_v13  ;;  %2388 = vmatprep.mubr.bf16.mxu0 %v9190_v13  ;;  %v1455_v39 = vld [vmem:[#allocation2 + $0x8] sm:$0xff]  ;;  %v1457_v40 = vld [vmem:[#allocation2 + $0x18] sm:$0xff]  ;;  %vm8768_vm1 = vmmov 0  }
 0x352   :  { %v1454_v41 = vld [vmem:[#allocation2] sm:$0xff]  ;;  %2151 = vmatprep.subr.bf16.mxu1 %v1455_v39  ;;  %2356 = vmatprep.subr.bf16.mxu0 %v1457_v40  ;;  %v1456_v36 = vld [vmem:[#allocation2 + $0x10] sm:$0xff]  ;;  %v1463_v46 = vld [vmem:[#allocation2 + $0x48] sm:$0xff] }
 0x353   :  { %v1464_v43 = vld [vmem:[#allocation2 + $0x50] sm:$0xff]  ;;  %v1466_v45 = vld [vmem:[#allocation2 + $0x60] sm:$0xff]  ;;  %2152 = vmatpush1.bf16.msra.mxu1 %v1454_v41  ;;  %2357 = vmatpush1.bf16.msra.mxu0 %v1456_v36  ;;  %v1465_v47 = vld [vmem:[#allocation2 + $0x58] sm:$0xff] }
 0x354   :  { %2153 = vmatprep.subr.bf16.mxu1 %v1464_v43  ;;  %2358 = vmatprep.subr.bf16.mxu0 %v1466_v45  ;;  %v1473_v48 = vld [vmem:[#allocation2 + $0x98] sm:$0xff]  ;;  %v1475_v50 = vld [vmem:[#allocation2 + $0xa8] sm:$0xff]  ;;  %v1472_v52 = vld [vmem:[#allocation2 + $0x90] sm:$0xff] }
 0x355   :  { %v1474_v9 = vld [vmem:[#allocation2 + $0xa0] sm:$0xff]  ;;  %v1484_v10 = vld [vmem:[#allocation2 + $0xf0] sm:$0xff]  ;;  %v1481_v54 = vld [vmem:[#allocation2 + $0xd8] sm:$0xff] }
 0x356   :  { %v1482_v53 = vld [vmem:[#allocation2 + $0xe0] sm:$0xff]  ;;  %v1483_v17 = vld [vmem:[#allocation2 + $0xe8] sm:$0xff]  ;;  %v1493_v23 = vld [vmem:[#allocation2 + $0x138] sm:$0xff] }
 0x357   :  { %2154 = vmatpush1.bf16.msra.mxu1 %v1463_v46  ;;  %2359 = vmatpush1.bf16.msra.mxu0 %v1465_v47  ;;  %v1491_v55 = vld [vmem:[#allocation2 + $0x128] sm:$0xff]  ;;  %v1490_v56 = vld [vmem:[#allocation2 + $0x120] sm:$0xff]  ;;  %v1492_v24 = vld [vmem:[#allocation2 + $0x130] sm:$0xff] }
 0x358   :  { %2155 = vmatprep.subr.bf16.mxu1 %v1473_v48  ;;  %2360 = vmatprep.subr.bf16.mxu0 %v1475_v50  ;;  %v1500_v57 = vld [vmem:[#allocation2 + $0x170] sm:$0xff]  ;;  %v1502_v58 = vld [vmem:[#allocation2 + $0x180] sm:$0xff]  ;;  %v1499_v33 = vld [vmem:[#allocation2 + $0x168] sm:$0xff] }
 0x359   :  { %v1501_v59 = vld [vmem:[#allocation2 + $0x178] sm:$0xff]  ;;  %v1511_v60 = vld [vmem:[#allocation2 + $0x1c8] sm:$0xff]  ;;  %v1508_v44 = vld [vmem:[#allocation2 + $0x1b0] sm:$0xff] }
 0x35a   :  { %v1509_v42 = vld [vmem:[#allocation2 + $0x1b8] sm:$0xff]  ;;  %v1510_v49 = vld [vmem:[#allocation2 + $0x1c0] sm:$0xff]  ;;  %v1520_v62 = vld [vmem:[#allocation2 + $0x210] sm:$0xff] }
 0x35b   :  { %2156 = vmatpush1.bf16.msra.mxu1 %v1472_v52  ;;  %2361 = vmatpush1.bf16.msra.mxu0 %v1474_v9  ;;  %v1518_v61 = vld [vmem:[#allocation2 + $0x200] sm:$0xff]  ;;  %v1517_v63 = vld [vmem:[#allocation2 + $0x1f8] sm:$0xff]  ;;  %v1519_v0 = vld [vmem:[#allocation2 + $0x208] sm:$0xff] }
 0x35c   :  { %2157 = vmatprep.subr.bf16.mxu1 %v1482_v53  ;;  %2362 = vmatprep.subr.bf16.mxu0 %v1484_v10  ;;  %v1527_v1 = vld [vmem:[#allocation2 + $0x248] sm:$0xff]  ;;  %v1529_v2 = vld [vmem:[#allocation2 + $0x258] sm:$0xff]  ;;  %v1526_v4 = vld [vmem:[#allocation2 + $0x240] sm:$0xff] }
 0x35d   :  { %v1528_v5 = vld [vmem:[#allocation2 + $0x250] sm:$0xff]  ;;  %v1538_v35 = vld [vmem:[#allocation2 + $0x2a0] sm:$0xff]  ;;  %v1535_v11 = vld [vmem:[#allocation2 + $0x288] sm:$0xff] }
 0x35e   :  { %v1536_v6 = vld [vmem:[#allocation2 + $0x290] sm:$0xff]  ;;  %v1537_v14 = vld [vmem:[#allocation2 + $0x298] sm:$0xff]  ;;  %v1547_v38 = vld [vmem:[#allocation2 + $0x2e8] sm:$0xff] }
 0x35f   :  { %2158 = vmatpush1.bf16.msra.mxu1 %v1481_v54  ;;  %2363 = vmatpush1.bf16.msra.mxu0 %v1483_v17  ;;  %v1545_v16 = vld [vmem:[#allocation2 + $0x2d8] sm:$0xff]  ;;  %v1544_v20 = vld [vmem:[#allocation2 + $0x2d0] sm:$0xff]  ;;  %v1546_v22 = vld [vmem:[#allocation2 + $0x2e0] sm:$0xff] }
 0x360   :  { %2159 = vmatprep.subr.bf16.mxu1 %v1491_v55  ;;  %2364 = vmatprep.subr.bf16.mxu0 %v1493_v23  ;;  %v1554_v27 = vld [vmem:[#allocation2 + $0x320] sm:$0xff]  ;;  %v1556_v29 = vld [vmem:[#allocation2 + $0x330] sm:$0xff]  ;;  %v1553_v39 = vld [vmem:[#allocation2 + $0x318] sm:$0xff] }
 0x361   :  { %v1555_v40 = vld [vmem:[#allocation2 + $0x328] sm:$0xff]  ;;  %v1565_v36 = vld [vmem:[#allocation2 + $0x378] sm:$0xff]  ;;  %v1562_v43 = vld [vmem:[#allocation2 + $0x360] sm:$0xff] }
 0x362   :  { %v1563_v41 = vld [vmem:[#allocation2 + $0x368] sm:$0xff]  ;;  %v1564_v45 = vld [vmem:[#allocation2 + $0x370] sm:$0xff]  ;;  %v1574_v47 = vld [vmem:[#allocation2 + $0x3c0] sm:$0xff] }
 0x363   :  { %2160 = vmatpush1.bf16.msra.mxu1 %v1490_v56  ;;  %2365 = vmatpush1.bf16.msra.mxu0 %v1492_v24  ;;  %v1572_v46 = vld [vmem:[#allocation2 + $0x3b0] sm:$0xff]  ;;  %v1571_v48 = vld [vmem:[#allocation2 + $0x3a8] sm:$0xff]  ;;  %v1573_v50 = vld [vmem:[#allocation2 + $0x3b8] sm:$0xff] }
 0x364   :  { %2161 = vmatprep.subr.bf16.mxu1 %v1500_v57  ;;  %2366 = vmatprep.subr.bf16.mxu0 %v1502_v58  ;;  %v1581_v52 = vld [vmem:[#allocation2 + $0x3f8] sm:$0xff]  ;;  %v1583_v9 = vld [vmem:[#allocation2 + $0x408] sm:$0xff]  ;;  %v1580_v53 = vld [vmem:[#allocation2 + $0x3f0] sm:$0xff] }
 0x365   :  { %v1582_v10 = vld [vmem:[#allocation2 + $0x400] sm:$0xff]  ;;  %v1592_v17 = vld [vmem:[#allocation2 + $0x450] sm:$0xff]  ;;  %v1589_v55 = vld [vmem:[#allocation2 + $0x438] sm:$0xff] }
 0x366   :  { %v1590_v54 = vld [vmem:[#allocation2 + $0x440] sm:$0xff]  ;;  %v1591_v23 = vld [vmem:[#allocation2 + $0x448] sm:$0xff]  ;;  %v1601_v24 = vld [vmem:[#allocation2 + $0x498] sm:$0xff] }
 0x367   :  { %2162 = vmatpush1.bf16.msra.mxu1 %v1499_v33  ;;  %2367 = vmatpush1.bf16.msra.mxu0 %v1501_v59  ;;  %v1599_v56 = vld [vmem:[#allocation2 + $0x488] sm:$0xff]  ;;  %v1598_v57 = vld [vmem:[#allocation2 + $0x480] sm:$0xff]  ;;  %v1600_v58 = vld [vmem:[#allocation2 + $0x490] sm:$0xff] }
 0x368   :  { %2163 = vmatprep.subr.bf16.mxu1 %v1509_v42  ;;  %2368 = vmatprep.subr.bf16.mxu0 %v1511_v60  ;;  %v1608_v33 = vld [vmem:[#allocation2 + $0x4d0] sm:$0xff]  ;;  %v1610_v59 = vld [vmem:[#allocation2 + $0x4e0] sm:$0xff]  ;;  %v1607_v42 = vld [vmem:[#allocation2 + $0x4c8] sm:$0xff] }
 0x369   :  { %v1609_v60 = vld [vmem:[#allocation2 + $0x4d8] sm:$0xff] }
 0x36b   :  { %2164 = vmatpush1.bf16.msra.mxu1 %v1508_v44  ;;  %2369 = vmatpush1.bf16.msra.mxu0 %v1510_v49  ;;  %v1617_v44 = vld [vmem:[#allocation2 + $0x518] sm:$0xff]  ;;  %v1619_v49 = vld [vmem:[#allocation2 + $0x528] sm:$0xff] }
 0x36c   :  { %2165 = vmatprep.subr.bf16.mxu1 %v1518_v61  ;;  %2370 = vmatprep.subr.bf16.mxu0 %v1520_v62  ;;  %v1616_v61 = vld [vmem:[#allocation2 + $0x510] sm:$0xff]  ;;  %v1618_v62 = vld [vmem:[#allocation2 + $0x520] sm:$0xff] }
 0x36f   :  { %2166 = vmatpush1.bf16.msra.mxu1 %v1517_v63  ;;  %2371 = vmatpush1.bf16.msra.mxu0 %v1519_v0  ;;  %v1626_v63 = vld [vmem:[#allocation2 + $0x560] sm:$0xff]  ;;  %v1628_v0 = vld [vmem:[#allocation2 + $0x570] sm:$0xff] }
 0x370   :  { %2167 = vmatprep.subr.bf16.mxu1 %v1527_v1  ;;  %2372 = vmatprep.subr.bf16.mxu0 %v1529_v2  ;;  %v1625_v1 = vld [vmem:[#allocation2 + $0x558] sm:$0xff]  ;;  %v1627_v2 = vld [vmem:[#allocation2 + $0x568] sm:$0xff] }
 0x373   :  { %2168 = vmatpush1.bf16.msra.mxu1 %v1526_v4  ;;  %2373 = vmatpush1.bf16.msra.mxu0 %v1528_v5  ;;  %v1635_v4 = vld [vmem:[#allocation2 + $0x5a8] sm:$0xff]  ;;  %v1637_v5 = vld [vmem:[#allocation2 + $0x5b8] sm:$0xff] }
 0x374   :  { %2169 = vmatprep.subr.bf16.mxu1 %v1536_v6  ;;  %2374 = vmatprep.subr.bf16.mxu0 %v1538_v35  ;;  %v1634_v6 = vld [vmem:[#allocation2 + $0x5a0] sm:$0xff]  ;;  %v1636_v35 = vld [vmem:[#allocation2 + $0x5b0] sm:$0xff] }
 0x377   :  { %2170 = vmatpush1.bf16.msra.mxu1 %v1535_v11  ;;  %2375 = vmatpush1.bf16.msra.mxu0 %v1537_v14  ;;  %v1644_v11 = vld [vmem:[#allocation2 + $0x5f0] sm:$0xff]  ;;  %v1646_v14 = vld [vmem:[#allocation2 + $0x600] sm:$0xff] }
 0x378   :  { %2171 = vmatprep.subr.bf16.mxu1 %v1545_v16  ;;  %2376 = vmatprep.subr.bf16.mxu0 %v1547_v38  ;;  %v1643_v16 = vld [vmem:[#allocation2 + $0x5e8] sm:$0xff]  ;;  %v1645_v38 = vld [vmem:[#allocation2 + $0x5f8] sm:$0xff] }
 0x37b   :  { %2172 = vmatpush1.bf16.msra.mxu1 %v1544_v20  ;;  %2377 = vmatpush1.bf16.msra.mxu0 %v1546_v22  ;;  %v1653_v20 = vld [vmem:[#allocation2 + $0x638] sm:$0xff]  ;;  %v1655_v22 = vld [vmem:[#allocation2 + $0x648] sm:$0xff] }
 0x37c   :  { %2173 = vmatprep.subr.bf16.mxu1 %v1554_v27  ;;  %2378 = vmatprep.subr.bf16.mxu0 %v1556_v29  ;;  %v1652_v27 = vld [vmem:[#allocation2 + $0x630] sm:$0xff]  ;;  %v1654_v29 = vld [vmem:[#allocation2 + $0x640] sm:$0xff] }
 0x37f   :  { %2174 = vmatpush1.bf16.msra.mxu1 %v1553_v39  ;;  %2379 = vmatpush1.bf16.msra.mxu0 %v1555_v40  ;;  %v1662_v39 = vld [vmem:[#allocation2 + $0x680] sm:$0xff]  ;;  %v1664_v40 = vld [vmem:[#allocation2 + $0x690] sm:$0xff] }
 0x380   :  { %2175 = vmatprep.subr.bf16.mxu1 %v1563_v41  ;;  %2380 = vmatprep.subr.bf16.mxu0 %v1565_v36  ;;  %v1661_v41 = vld [vmem:[#allocation2 + $0x678] sm:$0xff]  ;;  %v1663_v36 = vld [vmem:[#allocation2 + $0x688] sm:$0xff] }
 0x383   :  { %2176 = vmatpush1.bf16.msra.mxu1 %v1562_v43  ;;  %2381 = vmatpush1.bf16.msra.mxu0 %v1564_v45  ;;  %v1671_v43 = vld [vmem:[#allocation2 + $0x6c8] sm:$0xff]  ;;  %v1673_v45 = vld [vmem:[#allocation2 + $0x6d8] sm:$0xff] }
 0x384   :  { %2177 = vmatprep.subr.bf16.mxu1 %v1572_v46  ;;  %2382 = vmatprep.subr.bf16.mxu0 %v1574_v47  ;;  %v1670_v46 = vld [vmem:[#allocation2 + $0x6c0] sm:$0xff]  ;;  %v1672_v47 = vld [vmem:[#allocation2 + $0x6d0] sm:$0xff] }
 0x387   :  { %2178 = vmatpush1.bf16.msra.mxu1 %v1571_v48  ;;  %2383 = vmatpush1.bf16.msra.mxu0 %v1573_v50  ;;  %v1680_v48 = vld [vmem:[#allocation2 + $0x710] sm:$0xff]  ;;  %v1682_v50 = vld [vmem:[#allocation2 + $0x720] sm:$0xff] }
 0x388   :  { %2179 = vmatprep.subr.bf16.mxu1 %v1581_v52  ;;  %2384 = vmatprep.subr.bf16.mxu0 %v1583_v9  ;;  %v1679_v52 = vld [vmem:[#allocation2 + $0x708] sm:$0xff]  ;;  %v1681_v9 = vld [vmem:[#allocation2 + $0x718] sm:$0xff] }
 0x38b   :  { %2180 = vmatpush1.bf16.msra.mxu1 %v1580_v53  ;;  %2385 = vmatpush1.bf16.msra.mxu0 %v1582_v10  ;;  %v1689_v53 = vld [vmem:[#allocation2 + $0x758] sm:$0xff]  ;;  %v1691_v10 = vld [vmem:[#allocation2 + $0x768] sm:$0xff] }
 0x38c   :  { %2181 = vmatprep.subr.bf16.mxu1 %v1590_v54  ;;  %2386 = vmatprep.subr.bf16.mxu0 %v1592_v17  ;;  %v1688_v54 = vld [vmem:[#allocation2 + $0x750] sm:$0xff]  ;;  %v1690_v17 = vld [vmem:[#allocation2 + $0x760] sm:$0xff] }
 0x38f   :  { %2182 = vmatpush1.bf16.msra.mxu1 %v1589_v55  ;;  %2387 = vmatpush1.bf16.msra.mxu0 %v1591_v23  ;;  %v1698_v55 = vld [vmem:[#allocation2 + $0x7a0] sm:$0xff]  ;;  %v1700_v23 = vld [vmem:[#allocation2 + $0x7b0] sm:$0xff] }
 0x390   :  { %2192 = vmatprep.subr.bf16.mxu1 %v1599_v56  ;;  %2397 = vmatprep.subr.bf16.mxu0 %v1601_v24  ;;  %v1697_v56 = vld [vmem:[#allocation2 + $0x798] sm:$0xff]  ;;  %v1699_v24 = vld [vmem:[#allocation2 + $0x7a8] sm:$0xff] }
 0x392   :  { %2184 = vmatmul.mubr.bf16.vlgmr.msra.gmra.mrb[8].mxu1 %v9188_v32  ;;  %2389 = vmatmul.mubr.bf16.vlgmr.msra.gmra.mrb[12].mxu0 %v9188_v32 }
 0x393   :  { %2193 = vmatpush1.bf16.msra.mxu1 %v1598_v57  ;;  %2398 = vmatpush1.bf16.msra.mxu0 %v1600_v58  ;;  %v1707_v57 = vld [vmem:[#allocation2 + $0x7e8] sm:$0xff]  ;;  %v1709_v58 = vld [vmem:[#allocation2 + $0x7f8] sm:$0xff] }
 0x394   :  { %2194 = vmatprep.subr.bf16.mxu1 %v1608_v33  ;;  %2399 = vmatprep.subr.bf16.mxu0 %v1610_v59  ;;  %v1706_v33 = vld [vmem:[#allocation2 + $0x7e0] sm:$0xff]  ;;  %v1708_v59 = vld [vmem:[#allocation2 + $0x7f0] sm:$0xff] }
 0x395   :  { %2224 = vmatprep.mubr.bf16.mxu1 %v9194_v18  ;;  %2429 = vmatprep.mubr.bf16.mxu0 %v9194_v18 }
 0x397   :  { %2195 = vmatpush1.bf16.msra.mxu1 %v1607_v42  ;;  %2400 = vmatpush1.bf16.msra.mxu0 %v1609_v60  ;;  %v1716_v42 = vld [vmem:[#allocation2 + $0x830] sm:$0xff]  ;;  %v1718_v60 = vld [vmem:[#allocation2 + $0x840] sm:$0xff] }
 0x398   :  { %2196 = vmatprep.subr.bf16.mxu1 %v1617_v44  ;;  %2401 = vmatprep.subr.bf16.mxu0 %v1619_v49  ;;  %v1715_v44 = vld [vmem:[#allocation2 + $0x828] sm:$0xff]  ;;  %v1717_v49 = vld [vmem:[#allocation2 + $0x838] sm:$0xff] }
 0x39b   :  { %2197 = vmatpush1.bf16.msra.mxu1 %v1616_v61  ;;  %2402 = vmatpush1.bf16.msra.mxu0 %v1618_v62  ;;  %v1725_v61 = vld [vmem:[#allocation2 + $0x878] sm:$0xff]  ;;  %v1727_v62 = vld [vmem:[#allocation2 + $0x888] sm:$0xff] }
 0x39c   :  { %2198 = vmatprep.subr.bf16.mxu1 %v1626_v63  ;;  %2403 = vmatprep.subr.bf16.mxu0 %v1628_v0  ;;  %v1724_v63 = vld [vmem:[#allocation2 + $0x870] sm:$0xff]  ;;  %v1726_v0 = vld [vmem:[#allocation2 + $0x880] sm:$0xff] }
 0x39f   :  { %2199 = vmatpush1.bf16.msra.mxu1 %v1625_v1  ;;  %2404 = vmatpush1.bf16.msra.mxu0 %v1627_v2  ;;  %v1734_v1 = vld [vmem:[#allocation2 + $0x8c0] sm:$0xff]  ;;  %v1736_v2 = vld [vmem:[#allocation2 + $0x8d0] sm:$0xff] }
 0x3a0   :  { %2200 = vmatprep.subr.bf16.mxu1 %v1635_v4  ;;  %2405 = vmatprep.subr.bf16.mxu0 %v1637_v5  ;;  %v1733_v4 = vld [vmem:[#allocation2 + $0x8b8] sm:$0xff]  ;;  %v1735_v5 = vld [vmem:[#allocation2 + $0x8c8] sm:$0xff] }
 0x3a3   :  { %2201 = vmatpush1.bf16.msra.mxu1 %v1634_v6  ;;  %2406 = vmatpush1.bf16.msra.mxu0 %v1636_v35  ;;  %v1743_v6 = vld [vmem:[#allocation2 + $0x908] sm:$0xff]  ;;  %v1745_v35 = vld [vmem:[#allocation2 + $0x918] sm:$0xff] }
 0x3a4   :  { %2202 = vmatprep.subr.bf16.mxu1 %v1644_v11  ;;  %2407 = vmatprep.subr.bf16.mxu0 %v1646_v14  ;;  %v1742_v11 = vld [vmem:[#allocation2 + $0x900] sm:$0xff]  ;;  %v1744_v14 = vld [vmem:[#allocation2 + $0x910] sm:$0xff] }
 0x3a7   :  { %2203 = vmatpush1.bf16.msra.mxu1 %v1643_v16  ;;  %2408 = vmatpush1.bf16.msra.mxu0 %v1645_v38  ;;  %v1752_v16 = vld [vmem:[#allocation2 + $0x950] sm:$0xff]  ;;  %v1754_v38 = vld [vmem:[#allocation2 + $0x960] sm:$0xff] }
 0x3a8   :  { %2204 = vmatprep.subr.bf16.mxu1 %v1653_v20  ;;  %2409 = vmatprep.subr.bf16.mxu0 %v1655_v22  ;;  %v1751_v20 = vld [vmem:[#allocation2 + $0x948] sm:$0xff]  ;;  %v1753_v22 = vld [vmem:[#allocation2 + $0x958] sm:$0xff] }
 0x3ab   :  { %2205 = vmatpush1.bf16.msra.mxu1 %v1652_v27  ;;  %2410 = vmatpush1.bf16.msra.mxu0 %v1654_v29  ;;  %v1761_v27 = vld [vmem:[#allocation2 + $0x998] sm:$0xff]  ;;  %v1763_v29 = vld [vmem:[#allocation2 + $0x9a8] sm:$0xff] }
 0x3ac   :  { %2206 = vmatprep.subr.bf16.mxu1 %v1662_v39  ;;  %2411 = vmatprep.subr.bf16.mxu0 %v1664_v40  ;;  %v1760_v39 = vld [vmem:[#allocation2 + $0x990] sm:$0xff]  ;;  %v1762_v40 = vld [vmem:[#allocation2 + $0x9a0] sm:$0xff] }
 0x3af   :  { %2207 = vmatpush1.bf16.msra.mxu1 %v1661_v41  ;;  %2412 = vmatpush1.bf16.msra.mxu0 %v1663_v36  ;;  %v1770_v41 = vld [vmem:[#allocation2 + $0x9e0] sm:$0xff]  ;;  %v1772_v36 = vld [vmem:[#allocation2 + $0x9f0] sm:$0xff] }
 0x3b0   :  { %2208 = vmatprep.subr.bf16.mxu1 %v1671_v43  ;;  %2413 = vmatprep.subr.bf16.mxu0 %v1673_v45  ;;  %v1769_v43 = vld [vmem:[#allocation2 + $0x9d8] sm:$0xff]  ;;  %v1771_v45 = vld [vmem:[#allocation2 + $0x9e8] sm:$0xff] }
 0x3b3   :  { %2209 = vmatpush1.bf16.msra.mxu1 %v1670_v46  ;;  %2414 = vmatpush1.bf16.msra.mxu0 %v1672_v47  ;;  %v1779_v46 = vld [vmem:[#allocation2 + $0xa28] sm:$0xff]  ;;  %v1781_v47 = vld [vmem:[#allocation2 + $0xa38] sm:$0xff] }
 0x3b4   :  { %2210 = vmatprep.subr.bf16.mxu1 %v1680_v48  ;;  %2415 = vmatprep.subr.bf16.mxu0 %v1682_v50  ;;  %v1778_v48 = vld [vmem:[#allocation2 + $0xa20] sm:$0xff]  ;;  %v1780_v50 = vld [vmem:[#allocation2 + $0xa30] sm:$0xff] }
 0x3b7   :  { %2211 = vmatpush1.bf16.msra.mxu1 %v1679_v52  ;;  %2416 = vmatpush1.bf16.msra.mxu0 %v1681_v9  ;;  %v1788_v52 = vld [vmem:[#allocation2 + $0xa70] sm:$0xff]  ;;  %v1790_v9 = vld [vmem:[#allocation2 + $0xa80] sm:$0xff] }
 0x3b8   :  { %2212 = vmatprep.subr.bf16.mxu1 %v1689_v53  ;;  %2417 = vmatprep.subr.bf16.mxu0 %v1691_v10  ;;  %v1787_v53 = vld [vmem:[#allocation2 + $0xa68] sm:$0xff]  ;;  %v1789_v10 = vld [vmem:[#allocation2 + $0xa78] sm:$0xff] }
 0x3bb   :  { %2213 = vmatpush1.bf16.msra.mxu1 %v1688_v54  ;;  %2418 = vmatpush1.bf16.msra.mxu0 %v1690_v17  ;;  %v1797_v54 = vld [vmem:[#allocation2 + $0xab8] sm:$0xff]  ;;  %v1799_v17 = vld [vmem:[#allocation2 + $0xac8] sm:$0xff] }
 0x3bc   :  { %2214 = vmatprep.subr.bf16.mxu1 %v1698_v55  ;;  %2419 = vmatprep.subr.bf16.mxu0 %v1700_v23  ;;  %v1796_v55 = vld [vmem:[#allocation2 + $0xab0] sm:$0xff]  ;;  %v1798_v23 = vld [vmem:[#allocation2 + $0xac0] sm:$0xff] }
 0x3bf   :  { %2215 = vmatpush1.bf16.msra.mxu1 %v1697_v56  ;;  %2420 = vmatpush1.bf16.msra.mxu0 %v1699_v24  ;;  %v1806_v56 = vld [vmem:[#allocation2 + $0xb00] sm:$0xff]  ;;  %v1808_v24 = vld [vmem:[#allocation2 + $0xb10] sm:$0xff] }
 0x3c0   :  { %2216 = vmatprep.subr.bf16.mxu1 %v1707_v57  ;;  %2421 = vmatprep.subr.bf16.mxu0 %v1709_v58  ;;  %v1805_v57 = vld [vmem:[#allocation2 + $0xaf8] sm:$0xff]  ;;  %v1807_v58 = vld [vmem:[#allocation2 + $0xb08] sm:$0xff] }
 0x3c3   :  { %2217 = vmatpush1.bf16.msra.mxu1 %v1706_v33  ;;  %2422 = vmatpush1.bf16.msra.mxu0 %v1708_v59  ;;  %v1815_v33 = vld [vmem:[#allocation2 + $0xb48] sm:$0xff]  ;;  %v1817_v59 = vld [vmem:[#allocation2 + $0xb58] sm:$0xff] }
 0x3c4   :  { %2218 = vmatprep.subr.bf16.mxu1 %v1716_v42  ;;  %2423 = vmatprep.subr.bf16.mxu0 %v1718_v60  ;;  %v1814_v42 = vld [vmem:[#allocation2 + $0xb40] sm:$0xff]  ;;  %v1816_v60 = vld [vmem:[#allocation2 + $0xb50] sm:$0xff] }
 0x3c7   :  { %2219 = vmatpush1.bf16.msra.mxu1 %v1715_v44  ;;  %2424 = vmatpush1.bf16.msra.mxu0 %v1717_v49  ;;  %v1824_v44 = vld [vmem:[#allocation2 + $0xb90] sm:$0xff]  ;;  %v1826_v49 = vld [vmem:[#allocation2 + $0xba0] sm:$0xff] }
 0x3c8   :  { %2220 = vmatprep.subr.bf16.mxu1 %v1725_v61  ;;  %2425 = vmatprep.subr.bf16.mxu0 %v1727_v62  ;;  %v1823_v61 = vld [vmem:[#allocation2 + $0xb88] sm:$0xff]  ;;  %v1825_v62 = vld [vmem:[#allocation2 + $0xb98] sm:$0xff] }
 0x3cb   :  { %2221 = vmatpush1.bf16.msra.mxu1 %v1724_v63  ;;  %2426 = vmatpush1.bf16.msra.mxu0 %v1726_v0  ;;  %v1833_v63 = vld [vmem:[#allocation2 + $0xbd8] sm:$0xff]  ;;  %v1835_v0 = vld [vmem:[#allocation2 + $0xbe8] sm:$0xff] }
 0x3cc   :  { %2222 = vmatprep.subr.bf16.mxu1 %v1734_v1  ;;  %2427 = vmatprep.subr.bf16.mxu0 %v1736_v2  ;;  %v1832_v1 = vld [vmem:[#allocation2 + $0xbd0] sm:$0xff]  ;;  %v1834_v2 = vld [vmem:[#allocation2 + $0xbe0] sm:$0xff] }
 0x3cf   :  { %2223 = vmatpush1.bf16.msra.mxu1 %v1733_v4  ;;  %2428 = vmatpush1.bf16.msra.mxu0 %v1735_v5  ;;  %v1842_v4 = vld [vmem:[#allocation2 + $0xc20] sm:$0xff]  ;;  %v1844_v5 = vld [vmem:[#allocation2 + $0xc30] sm:$0xff] }
 0x3d0   :  { %2233 = vmatprep.subr.bf16.mxu1 %v1743_v6  ;;  %2438 = vmatprep.subr.bf16.mxu0 %v1745_v35  ;;  %v1841_v6 = vld [vmem:[#allocation2 + $0xc18] sm:$0xff]  ;;  %v1843_v35 = vld [vmem:[#allocation2 + $0xc28] sm:$0xff] }
 0x3d2   :  { %2225 = vmatmul.mubr.bf16.vlgmr.msra.gmra.mrb[8].mxu1 %v9192_v15  ;;  %2430 = vmatmul.mubr.bf16.vlgmr.msra.gmra.mrb[12].mxu0 %v9192_v15 }
 0x3d3   :  { %2234 = vmatpush1.bf16.msra.mxu1 %v1742_v11  ;;  %2439 = vmatpush1.bf16.msra.mxu0 %v1744_v14  ;;  %v1851_v11 = vld [vmem:[#allocation2 + $0xc68] sm:$0xff]  ;;  %v1853_v14 = vld [vmem:[#allocation2 + $0xc78] sm:$0xff] }
 0x3d4   :  { %2235 = vmatprep.subr.bf16.mxu1 %v1752_v16  ;;  %2440 = vmatprep.subr.bf16.mxu0 %v1754_v38  ;;  %v1850_v16 = vld [vmem:[#allocation2 + $0xc60] sm:$0xff]  ;;  %v1852_v38 = vld [vmem:[#allocation2 + $0xc70] sm:$0xff] }
 0x3d5   :  { %2265 = vmatprep.mubr.bf16.mxu1 %v9198_v25  ;;  %2470 = vmatprep.mubr.bf16.mxu0 %v9198_v25 }
 0x3d7   :  { %2236 = vmatpush1.bf16.msra.mxu1 %v1751_v20  ;;  %2441 = vmatpush1.bf16.msra.mxu0 %v1753_v22  ;;  %v1860_v20 = vld [vmem:[#allocation2 + $0xcb0] sm:$0xff]  ;;  %v1862_v22 = vld [vmem:[#allocation2 + $0xcc0] sm:$0xff] }
 0x3d8   :  { %2237 = vmatprep.subr.bf16.mxu1 %v1761_v27  ;;  %2442 = vmatprep.subr.bf16.mxu0 %v1763_v29  ;;  %v1859_v27 = vld [vmem:[#allocation2 + $0xca8] sm:$0xff]  ;;  %v1861_v29 = vld [vmem:[#allocation2 + $0xcb8] sm:$0xff] }
 0x3db   :  { %2238 = vmatpush1.bf16.msra.mxu1 %v1760_v39  ;;  %2443 = vmatpush1.bf16.msra.mxu0 %v1762_v40  ;;  %v1869_v39 = vld [vmem:[#allocation2 + $0xcf8] sm:$0xff]  ;;  %v1871_v40 = vld [vmem:[#allocation2 + $0xd08] sm:$0xff] }
 0x3dc   :  { %2239 = vmatprep.subr.bf16.mxu1 %v1770_v41  ;;  %2444 = vmatprep.subr.bf16.mxu0 %v1772_v36  ;;  %v1868_v41 = vld [vmem:[#allocation2 + $0xcf0] sm:$0xff]  ;;  %v1870_v36 = vld [vmem:[#allocation2 + $0xd00] sm:$0xff] }
 0x3df   :  { %2240 = vmatpush1.bf16.msra.mxu1 %v1769_v43  ;;  %2445 = vmatpush1.bf16.msra.mxu0 %v1771_v45  ;;  %v1878_v43 = vld [vmem:[#allocation2 + $0xd40] sm:$0xff]  ;;  %v1880_v45 = vld [vmem:[#allocation2 + $0xd50] sm:$0xff] }
 0x3e0   :  { %2241 = vmatprep.subr.bf16.mxu1 %v1779_v46  ;;  %2446 = vmatprep.subr.bf16.mxu0 %v1781_v47  ;;  %v1877_v46 = vld [vmem:[#allocation2 + $0xd38] sm:$0xff]  ;;  %v1879_v47 = vld [vmem:[#allocation2 + $0xd48] sm:$0xff] }
 0x3e3   :  { %2242 = vmatpush1.bf16.msra.mxu1 %v1778_v48  ;;  %2447 = vmatpush1.bf16.msra.mxu0 %v1780_v50  ;;  %v1887_v48 = vld [vmem:[#allocation2 + $0xd88] sm:$0xff]  ;;  %v1889_v50 = vld [vmem:[#allocation2 + $0xd98] sm:$0xff] }
 0x3e4   :  { %2243 = vmatprep.subr.bf16.mxu1 %v1788_v52  ;;  %2448 = vmatprep.subr.bf16.mxu0 %v1790_v9  ;;  %v1886_v52 = vld [vmem:[#allocation2 + $0xd80] sm:$0xff]  ;;  %v1888_v9 = vld [vmem:[#allocation2 + $0xd90] sm:$0xff] }
 0x3e7   :  { %2244 = vmatpush1.bf16.msra.mxu1 %v1787_v53  ;;  %2449 = vmatpush1.bf16.msra.mxu0 %v1789_v10  ;;  %v1896_v53 = vld [vmem:[#allocation2 + $0xdd0] sm:$0xff]  ;;  %v1898_v10 = vld [vmem:[#allocation2 + $0xde0] sm:$0xff] }
 0x3e8   :  { %2245 = vmatprep.subr.bf16.mxu1 %v1797_v54  ;;  %2450 = vmatprep.subr.bf16.mxu0 %v1799_v17  ;;  %v1895_v54 = vld [vmem:[#allocation2 + $0xdc8] sm:$0xff]  ;;  %v1897_v17 = vld [vmem:[#allocation2 + $0xdd8] sm:$0xff] }
 0x3eb   :  { %2246 = vmatpush1.bf16.msra.mxu1 %v1796_v55  ;;  %2451 = vmatpush1.bf16.msra.mxu0 %v1798_v23  ;;  %v1905_v55 = vld [vmem:[#allocation2 + $0xe18] sm:$0xff]  ;;  %v1907_v23 = vld [vmem:[#allocation2 + $0xe28] sm:$0xff] }
 0x3ec   :  { %2247 = vmatprep.subr.bf16.mxu1 %v1806_v56  ;;  %2452 = vmatprep.subr.bf16.mxu0 %v1808_v24  ;;  %v1904_v56 = vld [vmem:[#allocation2 + $0xe10] sm:$0xff]  ;;  %v1906_v24 = vld [vmem:[#allocation2 + $0xe20] sm:$0xff] }
 0x3ef   :  { %2248 = vmatpush1.bf16.msra.mxu1 %v1805_v57  ;;  %2453 = vmatpush1.bf16.msra.mxu0 %v1807_v58  ;;  %v1914_v57 = vld [vmem:[#allocation2 + $0xe60] sm:$0xff]  ;;  %v1916_v58 = vld [vmem:[#allocation2 + $0xe70] sm:$0xff] }
 0x3f0   :  { %2249 = vmatprep.subr.bf16.mxu1 %v1815_v33  ;;  %2454 = vmatprep.subr.bf16.mxu0 %v1817_v59  ;;  %v1913_v33 = vld [vmem:[#allocation2 + $0xe58] sm:$0xff]  ;;  %v1915_v59 = vld [vmem:[#allocation2 + $0xe68] sm:$0xff] }
 0x3f3   :  { %2250 = vmatpush1.bf16.msra.mxu1 %v1814_v42  ;;  %2455 = vmatpush1.bf16.msra.mxu0 %v1816_v60  ;;  %v1923_v42 = vld [vmem:[#allocation2 + $0xea8] sm:$0xff]  ;;  %v1925_v60 = vld [vmem:[#allocation2 + $0xeb8] sm:$0xff] }
 0x3f4   :  { %2251 = vmatprep.subr.bf16.mxu1 %v1824_v44  ;;  %2456 = vmatprep.subr.bf16.mxu0 %v1826_v49  ;;  %v1922_v44 = vld [vmem:[#allocation2 + $0xea0] sm:$0xff]  ;;  %v1924_v49 = vld [vmem:[#allocation2 + $0xeb0] sm:$0xff] }
 0x3f7   :  { %2252 = vmatpush1.bf16.msra.mxu1 %v1823_v61  ;;  %2457 = vmatpush1.bf16.msra.mxu0 %v1825_v62  ;;  %v1932_v61 = vld [vmem:[#allocation2 + $0xef0] sm:$0xff]  ;;  %v1934_v62 = vld [vmem:[#allocation2 + $0xf00] sm:$0xff] }
 0x3f8   :  { %2253 = vmatprep.subr.bf16.mxu1 %v1833_v63  ;;  %2458 = vmatprep.subr.bf16.mxu0 %v1835_v0  ;;  %v1931_v63 = vld [vmem:[#allocation2 + $0xee8] sm:$0xff]  ;;  %v1933_v0 = vld [vmem:[#allocation2 + $0xef8] sm:$0xff] }
 0x3fb   :  { %2254 = vmatpush1.bf16.msra.mxu1 %v1832_v1  ;;  %2459 = vmatpush1.bf16.msra.mxu0 %v1834_v2  ;;  %v1941_v1 = vld [vmem:[#allocation2 + $0xf38] sm:$0xff]  ;;  %v1943_v2 = vld [vmem:[#allocation2 + $0xf48] sm:$0xff] }
 0x3fc   :  { %2255 = vmatprep.subr.bf16.mxu1 %v1842_v4  ;;  %2460 = vmatprep.subr.bf16.mxu0 %v1844_v5  ;;  %v1940_v4 = vld [vmem:[#allocation2 + $0xf30] sm:$0xff]  ;;  %v1942_v5 = vld [vmem:[#allocation2 + $0xf40] sm:$0xff] }
 0x3ff   :  { %2256 = vmatpush1.bf16.msra.mxu1 %v1841_v6  ;;  %2461 = vmatpush1.bf16.msra.mxu0 %v1843_v35  ;;  %v1950_v6 = vld [vmem:[#allocation2 + $0xf80] sm:$0xff]  ;;  %v1952_v35 = vld [vmem:[#allocation2 + $0xf90] sm:$0xff] }
 0x400   :  { %2257 = vmatprep.subr.bf16.mxu1 %v1851_v11  ;;  %2462 = vmatprep.subr.bf16.mxu0 %v1853_v14  ;;  %v1949_v11 = vld [vmem:[#allocation2 + $0xf78] sm:$0xff]  ;;  %v1951_v14 = vld [vmem:[#allocation2 + $0xf88] sm:$0xff] }
 0x403   :  { %2258 = vmatpush1.bf16.msra.mxu1 %v1850_v16  ;;  %2463 = vmatpush1.bf16.msra.mxu0 %v1852_v38  ;;  %v1959_v16 = vld [vmem:[#allocation2 + $0xfc8] sm:$0xff]  ;;  %v1961_v38 = vld [vmem:[#allocation2 + $0xfd8] sm:$0xff] }
 0x404   :  { %2259 = vmatprep.subr.bf16.mxu1 %v1860_v20  ;;  %2464 = vmatprep.subr.bf16.mxu0 %v1862_v22  ;;  %v1958_v20 = vld [vmem:[#allocation2 + $0xfc0] sm:$0xff]  ;;  %v1960_v22 = vld [vmem:[#allocation2 + $0xfd0] sm:$0xff] }
 0x407   :  { %2260 = vmatpush1.bf16.msra.mxu1 %v1859_v27  ;;  %2465 = vmatpush1.bf16.msra.mxu0 %v1861_v29  ;;  %v1968_v27 = vld [vmem:[#allocation2 + $0x1010] sm:$0xff]  ;;  %v1970_v29 = vld [vmem:[#allocation2 + $0x1020] sm:$0xff] }
 0x408   :  { %2261 = vmatprep.subr.bf16.mxu1 %v1869_v39  ;;  %2466 = vmatprep.subr.bf16.mxu0 %v1871_v40  ;;  %v1967_v39 = vld [vmem:[#allocation2 + $0x1008] sm:$0xff]  ;;  %v1969_v40 = vld [vmem:[#allocation2 + $0x1018] sm:$0xff] }
 0x40b   :  { %2262 = vmatpush1.bf16.msra.mxu1 %v1868_v41  ;;  %2467 = vmatpush1.bf16.msra.mxu0 %v1870_v36  ;;  %v1977_v41 = vld [vmem:[#allocation2 + $0x1058] sm:$0xff]  ;;  %v1979_v36 = vld [vmem:[#allocation2 + $0x1068] sm:$0xff] }
 0x40c   :  { %2263 = vmatprep.subr.bf16.mxu1 %v1878_v43  ;;  %2468 = vmatprep.subr.bf16.mxu0 %v1880_v45  ;;  %v1976_v43 = vld [vmem:[#allocation2 + $0x1050] sm:$0xff]  ;;  %v1978_v45 = vld [vmem:[#allocation2 + $0x1060] sm:$0xff] }
 0x40f   :  { %2264 = vmatpush1.bf16.msra.mxu1 %v1877_v46  ;;  %2469 = vmatpush1.bf16.msra.mxu0 %v1879_v47  ;;  %v1986_v46 = vld [vmem:[#allocation2 + $0x10a0] sm:$0xff]  ;;  %v1988_v47 = vld [vmem:[#allocation2 + $0x10b0] sm:$0xff] }
 0x410   :  { %2274 = vmatprep.subr.bf16.mxu1 %v1887_v48  ;;  %2479 = vmatprep.subr.bf16.mxu0 %v1889_v50  ;;  %v1985_v48 = vld [vmem:[#allocation2 + $0x1098] sm:$0xff]  ;;  %v1987_v50 = vld [vmem:[#allocation2 + $0x10a8] sm:$0xff] }
 0x412   :  { %2266 = vmatmul.mubr.bf16.vlgmr.msra.gmra.mrb[8].mxu1 %v9196_v21  ;;  %2471 = vmatmul.mubr.bf16.vlgmr.msra.gmra.mrb[12].mxu0 %v9196_v21 }
 0x413   :  { %2275 = vmatpush1.bf16.msra.mxu1 %v1886_v52  ;;  %2480 = vmatpush1.bf16.msra.mxu0 %v1888_v9  ;;  %v1995_v52 = vld [vmem:[#allocation2 + $0x10e8] sm:$0xff]  ;;  %v1997_v9 = vld [vmem:[#allocation2 + $0x10f8] sm:$0xff] }
 0x414   :  { %2276 = vmatprep.subr.bf16.mxu1 %v1896_v53  ;;  %2481 = vmatprep.subr.bf16.mxu0 %v1898_v10  ;;  %v1994_v53 = vld [vmem:[#allocation2 + $0x10e0] sm:$0xff]  ;;  %v1996_v10 = vld [vmem:[#allocation2 + $0x10f0] sm:$0xff] }
 0x415   :  { %2306 = vmatprep.mubr.bf16.mxu1 %v9202_v31  ;;  %2511 = vmatprep.mubr.bf16.mxu0 %v9202_v31 }
 0x417   :  { %2277 = vmatpush1.bf16.msra.mxu1 %v1895_v54  ;;  %2482 = vmatpush1.bf16.msra.mxu0 %v1897_v17  ;;  %v2004_v54 = vld [vmem:[#allocation2 + $0x1130] sm:$0xff]  ;;  %v2006_v17 = vld [vmem:[#allocation2 + $0x1140] sm:$0xff] }
 0x418   :  { %2278 = vmatprep.subr.bf16.mxu1 %v1905_v55  ;;  %2483 = vmatprep.subr.bf16.mxu0 %v1907_v23  ;;  %v2003_v55 = vld [vmem:[#allocation2 + $0x1128] sm:$0xff]  ;;  %v2005_v23 = vld [vmem:[#allocation2 + $0x1138] sm:$0xff] }
 0x41b   :  { %2279 = vmatpush1.bf16.msra.mxu1 %v1904_v56  ;;  %2484 = vmatpush1.bf16.msra.mxu0 %v1906_v24  ;;  %v2013_v56 = vld [vmem:[#allocation2 + $0x1178] sm:$0xff]  ;;  %v2015_v24 = vld [vmem:[#allocation2 + $0x1188] sm:$0xff] }
 0x41c   :  { %2280 = vmatprep.subr.bf16.mxu1 %v1914_v57  ;;  %2485 = vmatprep.subr.bf16.mxu0 %v1916_v58  ;;  %v2012_v57 = vld [vmem:[#allocation2 + $0x1170] sm:$0xff]  ;;  %v2014_v58 = vld [vmem:[#allocation2 + $0x1180] sm:$0xff] }
 0x41f   :  { %2281 = vmatpush1.bf16.msra.mxu1 %v1913_v33  ;;  %2486 = vmatpush1.bf16.msra.mxu0 %v1915_v59  ;;  %v2022_v33 = vld [vmem:[#allocation2 + $0x11c0] sm:$0xff]  ;;  %v2024_v59 = vld [vmem:[#allocation2 + $0x11d0] sm:$0xff] }
 0x420   :  { %2282 = vmatprep.subr.bf16.mxu1 %v1923_v42  ;;  %2487 = vmatprep.subr.bf16.mxu0 %v1925_v60  ;;  %v2021_v42 = vld [vmem:[#allocation2 + $0x11b8] sm:$0xff]  ;;  %v2023_v60 = vld [vmem:[#allocation2 + $0x11c8] sm:$0xff] }
 0x423   :  { %2283 = vmatpush1.bf16.msra.mxu1 %v1922_v44  ;;  %2488 = vmatpush1.bf16.msra.mxu0 %v1924_v49  ;;  %v2031_v44 = vld [vmem:[#allocation2 + $0x1208] sm:$0xff]  ;;  %v2033_v49 = vld [vmem:[#allocation2 + $0x1218] sm:$0xff] }
 0x424   :  { %2284 = vmatprep.subr.bf16.mxu1 %v1932_v61  ;;  %2489 = vmatprep.subr.bf16.mxu0 %v1934_v62  ;;  %v2030_v61 = vld [vmem:[#allocation2 + $0x1200] sm:$0xff]  ;;  %v2032_v62 = vld [vmem:[#allocation2 + $0x1210] sm:$0xff] }
 0x427   :  { %2285 = vmatpush1.bf16.msra.mxu1 %v1931_v63  ;;  %2490 = vmatpush1.bf16.msra.mxu0 %v1933_v0  ;;  %v2040_v63 = vld [vmem:[#allocation2 + $0x1250] sm:$0xff]  ;;  %v2042_v0 = vld [vmem:[#allocation2 + $0x1260] sm:$0xff] }
 0x428   :  { %2286 = vmatprep.subr.bf16.mxu1 %v1941_v1  ;;  %2491 = vmatprep.subr.bf16.mxu0 %v1943_v2  ;;  %v2039_v1 = vld [vmem:[#allocation2 + $0x1248] sm:$0xff]  ;;  %v2041_v2 = vld [vmem:[#allocation2 + $0x1258] sm:$0xff] }
 0x42b   :  { %2287 = vmatpush1.bf16.msra.mxu1 %v1940_v4  ;;  %2492 = vmatpush1.bf16.msra.mxu0 %v1942_v5  ;;  %v2049_v4 = vld [vmem:[#allocation2 + $0x1298] sm:$0xff]  ;;  %v2051_v5 = vld [vmem:[#allocation2 + $0x12a8] sm:$0xff] }
 0x42c   :  { %2288 = vmatprep.subr.bf16.mxu1 %v1950_v6  ;;  %2493 = vmatprep.subr.bf16.mxu0 %v1952_v35  ;;  %v2048_v6 = vld [vmem:[#allocation2 + $0x1290] sm:$0xff]  ;;  %v2050_v35 = vld [vmem:[#allocation2 + $0x12a0] sm:$0xff] }
 0x42f   :  { %2289 = vmatpush1.bf16.msra.mxu1 %v1949_v11  ;;  %2494 = vmatpush1.bf16.msra.mxu0 %v1951_v14  ;;  %v2058_v11 = vld [vmem:[#allocation2 + $0x12e0] sm:$0xff]  ;;  %v2060_v14 = vld [vmem:[#allocation2 + $0x12f0] sm:$0xff] }
 0x430   :  { %2290 = vmatprep.subr.bf16.mxu1 %v1959_v16  ;;  %2495 = vmatprep.subr.bf16.mxu0 %v1961_v38  ;;  %v2057_v16 = vld [vmem:[#allocation2 + $0x12d8] sm:$0xff]  ;;  %v2059_v38 = vld [vmem:[#allocation2 + $0x12e8] sm:$0xff] }
 0x433   :  { %2291 = vmatpush1.bf16.msra.mxu1 %v1958_v20  ;;  %2496 = vmatpush1.bf16.msra.mxu0 %v1960_v22  ;;  %v2067_v20 = vld [vmem:[#allocation2 + $0x1328] sm:$0xff]  ;;  %v2069_v22 = vld [vmem:[#allocation2 + $0x1338] sm:$0xff] }
 0x434   :  { %2292 = vmatprep.subr.bf16.mxu1 %v1968_v27  ;;  %2497 = vmatprep.subr.bf16.mxu0 %v1970_v29  ;;  %v2066_v27 = vld [vmem:[#allocation2 + $0x1320] sm:$0xff]  ;;  %v2068_v29 = vld [vmem:[#allocation2 + $0x1330] sm:$0xff] }
 0x437   :  { %2293 = vmatpush1.bf16.msra.mxu1 %v1967_v39  ;;  %2498 = vmatpush1.bf16.msra.mxu0 %v1969_v40  ;;  %v2076_v39 = vld [vmem:[#allocation2 + $0x1370] sm:$0xff]  ;;  %v2078_v40 = vld [vmem:[#allocation2 + $0x1380] sm:$0xff] }
 0x438   :  { %2294 = vmatprep.subr.bf16.mxu1 %v1977_v41  ;;  %2499 = vmatprep.subr.bf16.mxu0 %v1979_v36  ;;  %v2075_v41 = vld [vmem:[#allocation2 + $0x1368] sm:$0xff]  ;;  %v2077_v36 = vld [vmem:[#allocation2 + $0x1378] sm:$0xff] }
 0x43b   :  { %2295 = vmatpush1.bf16.msra.mxu1 %v1976_v43  ;;  %2500 = vmatpush1.bf16.msra.mxu0 %v1978_v45  ;;  %v2085_v43 = vld [vmem:[#allocation2 + $0x13b8] sm:$0xff]  ;;  %v2087_v45 = vld [vmem:[#allocation2 + $0x13c8] sm:$0xff] }
 0x43c   :  { %2296 = vmatprep.subr.bf16.mxu1 %v1986_v46  ;;  %2501 = vmatprep.subr.bf16.mxu0 %v1988_v47  ;;  %v2084_v46 = vld [vmem:[#allocation2 + $0x13b0] sm:$0xff]  ;;  %v2086_v47 = vld [vmem:[#allocation2 + $0x13c0] sm:$0xff] }
 0x43f   :  { %2297 = vmatpush1.bf16.msra.mxu1 %v1985_v48  ;;  %2502 = vmatpush1.bf16.msra.mxu0 %v1987_v50  ;;  %v2094_v48 = vld [vmem:[#allocation2 + $0x1400] sm:$0xff]  ;;  %v2096_v50 = vld [vmem:[#allocation2 + $0x1410] sm:$0xff] }
 0x440   :  { %2298 = vmatprep.subr.bf16.mxu1 %v1995_v52  ;;  %2503 = vmatprep.subr.bf16.mxu0 %v1997_v9  ;;  %v2093_v52 = vld [vmem:[#allocation2 + $0x13f8] sm:$0xff]  ;;  %v2095_v9 = vld [vmem:[#allocation2 + $0x1408] sm:$0xff] }
 0x443   :  { %2299 = vmatpush1.bf16.msra.mxu1 %v1994_v53  ;;  %2504 = vmatpush1.bf16.msra.mxu0 %v1996_v10  ;;  %v1459_v53 = vld [vmem:[#allocation2 + $0x28] sm:$0xff]  ;;  %v1461_v10 = vld [vmem:[#allocation2 + $0x38] sm:$0xff] }
 0x444   :  { %2300 = vmatprep.subr.bf16.mxu1 %v2004_v54  ;;  %2505 = vmatprep.subr.bf16.mxu0 %v2006_v17  ;;  %v1458_v54 = vld [vmem:[#allocation2 + $0x20] sm:$0xff]  ;;  %v1460_v17 = vld [vmem:[#allocation2 + $0x30] sm:$0xff] }
 0x447   :  { %2301 = vmatpush1.bf16.msra.mxu1 %v2003_v55  ;;  %2506 = vmatpush1.bf16.msra.mxu0 %v2005_v23  ;;  %v1468_v55 = vld [vmem:[#allocation2 + $0x70] sm:$0xff]  ;;  %v1470_v23 = vld [vmem:[#allocation2 + $0x80] sm:$0xff] }
 0x448   :  { %2302 = vmatprep.subr.bf16.mxu1 %v2013_v56  ;;  %2507 = vmatprep.subr.bf16.mxu0 %v2015_v24  ;;  %v1467_v56 = vld [vmem:[#allocation2 + $0x68] sm:$0xff]  ;;  %v1469_v24 = vld [vmem:[#allocation2 + $0x78] sm:$0xff] }
 0x44b   :  { %2303 = vmatpush1.bf16.msra.mxu1 %v2012_v57  ;;  %2508 = vmatpush1.bf16.msra.mxu0 %v2014_v58  ;;  %v1477_v57 = vld [vmem:[#allocation2 + $0xb8] sm:$0xff]  ;;  %v1479_v58 = vld [vmem:[#allocation2 + $0xc8] sm:$0xff] }
 0x44c   :  { %2304 = vmatprep.subr.bf16.mxu1 %v2022_v33  ;;  %2509 = vmatprep.subr.bf16.mxu0 %v2024_v59  ;;  %v1476_v33 = vld [vmem:[#allocation2 + $0xb0] sm:$0xff]  ;;  %v1478_v59 = vld [vmem:[#allocation2 + $0xc0] sm:$0xff] }
 0x44f   :  { %2305 = vmatpush1.bf16.msra.mxu1 %v2021_v42  ;;  %2510 = vmatpush1.bf16.msra.mxu0 %v2023_v60  ;;  %v1486_v42 = vld [vmem:[#allocation2 + $0x100] sm:$0xff]  ;;  %v1488_v60 = vld [vmem:[#allocation2 + $0x110] sm:$0xff] }
 0x450   :  { %2315 = vmatprep.subr.bf16.mxu1 %v2031_v44  ;;  %2520 = vmatprep.subr.bf16.mxu0 %v2033_v49  ;;  %v1485_v44 = vld [vmem:[#allocation2 + $0xf8] sm:$0xff]  ;;  %v1487_v49 = vld [vmem:[#allocation2 + $0x108] sm:$0xff] }
 0x452   :  { %2307 = vmatmul.mubr.bf16.vlgmr.msra.gmra.mrb[8].mxu1 %v9200_v28  ;;  %2512 = vmatmul.mubr.bf16.vlgmr.msra.gmra.mrb[12].mxu0 %v9200_v28 }
 0x453   :  { %2316 = vmatpush1.bf16.msra.mxu1 %v2030_v61  ;;  %2521 = vmatpush1.bf16.msra.mxu0 %v2032_v62  ;;  %v1495_v61 = vld [vmem:[#allocation2 + $0x148] sm:$0xff]  ;;  %v1497_v62 = vld [vmem:[#allocation2 + $0x158] sm:$0xff] }
 0x454   :  { %2317 = vmatprep.subr.bf16.mxu1 %v2040_v63  ;;  %2522 = vmatprep.subr.bf16.mxu0 %v2042_v0  ;;  %v1494_v63 = vld [vmem:[#allocation2 + $0x140] sm:$0xff]  ;;  %v1496_v0 = vld [vmem:[#allocation2 + $0x150] sm:$0xff] }
 0x455   :  { %2347 = vmatprep.mubr.bf16.mxu1 %v9681_v37  ;;  %2552 = vmatprep.mubr.bf16.mxu0 %v9681_v37 }
 0x457   :  { %2318 = vmatpush1.bf16.msra.mxu1 %v2039_v1  ;;  %2523 = vmatpush1.bf16.msra.mxu0 %v2041_v2  ;;  %v1504_v1 = vld [vmem:[#allocation2 + $0x190] sm:$0xff]  ;;  %v1506_v2 = vld [vmem:[#allocation2 + $0x1a0] sm:$0xff] }
 0x458   :  { %2319 = vmatprep.subr.bf16.mxu1 %v2049_v4  ;;  %2524 = vmatprep.subr.bf16.mxu0 %v2051_v5  ;;  %v1503_v4 = vld [vmem:[#allocation2 + $0x188] sm:$0xff]  ;;  %v1505_v5 = vld [vmem:[#allocation2 + $0x198] sm:$0xff] }
 0x45b   :  { %2320 = vmatpush1.bf16.msra.mxu1 %v2048_v6  ;;  %2525 = vmatpush1.bf16.msra.mxu0 %v2050_v35  ;;  %v1513_v6 = vld [vmem:[#allocation2 + $0x1d8] sm:$0xff]  ;;  %v1515_v35 = vld [vmem:[#allocation2 + $0x1e8] sm:$0xff] }
 0x45c   :  { %2321 = vmatprep.subr.bf16.mxu1 %v2058_v11  ;;  %2526 = vmatprep.subr.bf16.mxu0 %v2060_v14  ;;  %v1512_v11 = vld [vmem:[#allocation2 + $0x1d0] sm:$0xff]  ;;  %v1514_v14 = vld [vmem:[#allocation2 + $0x1e0] sm:$0xff] }
 0x45f   :  { %2322 = vmatpush1.bf16.msra.mxu1 %v2057_v16  ;;  %2527 = vmatpush1.bf16.msra.mxu0 %v2059_v38  ;;  %v1522_v16 = vld [vmem:[#allocation2 + $0x220] sm:$0xff]  ;;  %v1524_v38 = vld [vmem:[#allocation2 + $0x230] sm:$0xff] }
 0x460   :  { %2323 = vmatprep.subr.bf16.mxu1 %v2067_v20  ;;  %2528 = vmatprep.subr.bf16.mxu0 %v2069_v22  ;;  %v1521_v20 = vld [vmem:[#allocation2 + $0x218] sm:$0xff]  ;;  %v1523_v22 = vld [vmem:[#allocation2 + $0x228] sm:$0xff] }
 0x463   :  { %2324 = vmatpush1.bf16.msra.mxu1 %v2066_v27  ;;  %2529 = vmatpush1.bf16.msra.mxu0 %v2068_v29  ;;  %v1531_v27 = vld [vmem:[#allocation2 + $0x268] sm:$0xff]  ;;  %v1533_v29 = vld [vmem:[#allocation2 + $0x278] sm:$0xff] }
 0x464   :  { %2325 = vmatprep.subr.bf16.mxu1 %v2076_v39  ;;  %2530 = vmatprep.subr.bf16.mxu0 %v2078_v40  ;;  %v1530_v39 = vld [vmem:[#allocation2 + $0x260] sm:$0xff]  ;;  %v1532_v40 = vld [vmem:[#allocation2 + $0x270] sm:$0xff] }
 0x467   :  { %2326 = vmatpush1.bf16.msra.mxu1 %v2075_v41  ;;  %2531 = vmatpush1.bf16.msra.mxu0 %v2077_v36  ;;  %v1540_v41 = vld [vmem:[#allocation2 + $0x2b0] sm:$0xff]  ;;  %v1542_v36 = vld [vmem:[#allocation2 + $0x2c0] sm:$0xff] }
 0x468   :  { %2327 = vmatprep.subr.bf16.mxu1 %v2085_v43  ;;  %2532 = vmatprep.subr.bf16.mxu0 %v2087_v45  ;;  %v1539_v43 = vld [vmem:[#allocation2 + $0x2a8] sm:$0xff]  ;;  %v1541_v45 = vld [vmem:[#allocation2 + $0x2b8] sm:$0xff] }
 0x46b   :  { %2328 = vmatpush1.bf16.msra.mxu1 %v2084_v46  ;;  %2533 = vmatpush1.bf16.msra.mxu0 %v2086_v47  ;;  %v1549_v46 = vld [vmem:[#allocation2 + $0x2f8] sm:$0xff]  ;;  %v1551_v47 = vld [vmem:[#allocation2 + $0x308] sm:$0xff] }
 0x46c   :  { %2329 = vmatprep.subr.bf16.mxu1 %v2094_v48  ;;  %2534 = vmatprep.subr.bf16.mxu0 %v2096_v50  ;;  %v1548_v48 = vld [vmem:[#allocation2 + $0x2f0] sm:$0xff]  ;;  %v1550_v50 = vld [vmem:[#allocation2 + $0x300] sm:$0xff] }
 0x46f   :  { %2330 = vmatpush1.bf16.msra.mxu1 %v2093_v52  ;;  %2535 = vmatpush1.bf16.msra.mxu0 %v2095_v9  ;;  %v1558_v52 = vld [vmem:[#allocation2 + $0x340] sm:$0xff]  ;;  %v1560_v9 = vld [vmem:[#allocation2 + $0x350] sm:$0xff] }
 0x470   :  { %2561 = vmatprep.subr.bf16.mxu1 %v1459_v53  ;;  %2766 = vmatprep.subr.bf16.mxu0 %v1461_v10  ;;  %v1557_v53 = vld [vmem:[#allocation2 + $0x338] sm:$0xff]  ;;  %v1559_v10 = vld [vmem:[#allocation2 + $0x348] sm:$0xff] }
 0x472   :  { %2348 = vmatmul.mubr.bf16.vlgmr.msra.gmra.mrb[8].mxu1 %v9204_v34  ;;  %2553 = vmatmul.mubr.bf16.vlgmr.msra.gmra.mrb[12].mxu0 %v9204_v34 }
 0x473   :  { %2562 = vmatpush1.bf16.msra.mxu1 %v1458_v54  ;;  %2767 = vmatpush1.bf16.msra.mxu0 %v1460_v17  ;;  %v1567_v54 = vld [vmem:[#allocation2 + $0x388] sm:$0xff]  ;;  %v1569_v17 = vld [vmem:[#allocation2 + $0x398] sm:$0xff] }
 0x474   :  { %2563 = vmatprep.subr.bf16.mxu1 %v1468_v55  ;;  %2768 = vmatprep.subr.bf16.mxu0 %v1470_v23  ;;  %v1566_v55 = vld [vmem:[#allocation2 + $0x380] sm:$0xff]  ;;  %v1568_v23 = vld [vmem:[#allocation2 + $0x390] sm:$0xff] }
 0x475   :  { %2593 = vmatprep.mubr.bf16.mxu1 %v9190_v13  ;;  %2798 = vmatprep.mubr.bf16.mxu0 %v9190_v13 }
 0x477   :  { %2564 = vmatpush1.bf16.msra.mxu1 %v1467_v56  ;;  %2769 = vmatpush1.bf16.msra.mxu0 %v1469_v24  ;;  %v1576_v56 = vld [vmem:[#allocation2 + $0x3d0] sm:$0xff]  ;;  %v1578_v24 = vld [vmem:[#allocation2 + $0x3e0] sm:$0xff] }
 0x478   :  { %2565 = vmatprep.subr.bf16.mxu1 %v1477_v57  ;;  %2770 = vmatprep.subr.bf16.mxu0 %v1479_v58  ;;  %v1575_v57 = vld [vmem:[#allocation2 + $0x3c8] sm:$0xff]  ;;  %v1577_v58 = vld [vmem:[#allocation2 + $0x3d8] sm:$0xff] }
 0x47b   :  { %2566 = vmatpush1.bf16.msra.mxu1 %v1476_v33  ;;  %2771 = vmatpush1.bf16.msra.mxu0 %v1478_v59  ;;  %v1585_v33 = vld [vmem:[#allocation2 + $0x418] sm:$0xff]  ;;  %v1587_v59 = vld [vmem:[#allocation2 + $0x428] sm:$0xff] }
 0x47c   :  { %2567 = vmatprep.subr.bf16.mxu1 %v1486_v42  ;;  %2772 = vmatprep.subr.bf16.mxu0 %v1488_v60  ;;  %v1584_v42 = vld [vmem:[#allocation2 + $0x410] sm:$0xff]  ;;  %v1586_v60 = vld [vmem:[#allocation2 + $0x420] sm:$0xff] }
 0x47f   :  { %2568 = vmatpush1.bf16.msra.mxu1 %v1485_v44  ;;  %2773 = vmatpush1.bf16.msra.mxu0 %v1487_v49  ;;  %v1594_v44 = vld [vmem:[#allocation2 + $0x460] sm:$0xff]  ;;  %v1596_v49 = vld [vmem:[#allocation2 + $0x470] sm:$0xff] }
 0x480   :  { %2569 = vmatprep.subr.bf16.mxu1 %v1495_v61  ;;  %2774 = vmatprep.subr.bf16.mxu0 %v1497_v62  ;;  %v1593_v61 = vld [vmem:[#allocation2 + $0x458] sm:$0xff]  ;;  %v1595_v62 = vld [vmem:[#allocation2 + $0x468] sm:$0xff] }
 0x483   :  { %2570 = vmatpush1.bf16.msra.mxu1 %v1494_v63  ;;  %2775 = vmatpush1.bf16.msra.mxu0 %v1496_v0  ;;  %v1603_v63 = vld [vmem:[#allocation2 + $0x4a8] sm:$0xff]  ;;  %v1605_v0 = vld [vmem:[#allocation2 + $0x4b8] sm:$0xff] }
 0x484   :  { %2571 = vmatprep.subr.bf16.mxu1 %v1504_v1  ;;  %2776 = vmatprep.subr.bf16.mxu0 %v1506_v2  ;;  %v1602_v1 = vld [vmem:[#allocation2 + $0x4a0] sm:$0xff]  ;;  %v1604_v2 = vld [vmem:[#allocation2 + $0x4b0] sm:$0xff] }
 0x487   :  { %2572 = vmatpush1.bf16.msra.mxu1 %v1503_v4  ;;  %2777 = vmatpush1.bf16.msra.mxu0 %v1505_v5  ;;  %v1612_v4 = vld [vmem:[#allocation2 + $0x4f0] sm:$0xff]  ;;  %v1614_v5 = vld [vmem:[#allocation2 + $0x500] sm:$0xff] }
 0x488   :  { %2573 = vmatprep.subr.bf16.mxu1 %v1513_v6  ;;  %2778 = vmatprep.subr.bf16.mxu0 %v1515_v35  ;;  %v1611_v6 = vld [vmem:[#allocation2 + $0x4e8] sm:$0xff]  ;;  %v1613_v35 = vld [vmem:[#allocation2 + $0x4f8] sm:$0xff] }
 0x48b   :  { %2574 = vmatpush1.bf16.msra.mxu1 %v1512_v11  ;;  %2779 = vmatpush1.bf16.msra.mxu0 %v1514_v14  ;;  %v1621_v11 = vld [vmem:[#allocation2 + $0x538] sm:$0xff]  ;;  %v1623_v14 = vld [vmem:[#allocation2 + $0x548] sm:$0xff] }
 0x48c   :  { %2575 = vmatprep.subr.bf16.mxu1 %v1522_v16  ;;  %2780 = vmatprep.subr.bf16.mxu0 %v1524_v38  ;;  %v1620_v16 = vld [vmem:[#allocation2 + $0x530] sm:$0xff]  ;;  %v1622_v38 = vld [vmem:[#allocation2 + $0x540] sm:$0xff] }
 0x48f   :  { %2576 = vmatpush1.bf16.msra.mxu1 %v1521_v20  ;;  %2781 = vmatpush1.bf16.msra.mxu0 %v1523_v22  ;;  %v1630_v20 = vld [vmem:[#allocation2 + $0x580] sm:$0xff]  ;;  %v1632_v22 = vld [vmem:[#allocation2 + $0x590] sm:$0xff] }
 0x490   :  { %2577 = vmatprep.subr.bf16.mxu1 %v1531_v27  ;;  %2782 = vmatprep.subr.bf16.mxu0 %v1533_v29  ;;  %v1629_v27 = vld [vmem:[#allocation2 + $0x578] sm:$0xff]  ;;  %v1631_v29 = vld [vmem:[#allocation2 + $0x588] sm:$0xff] }
 0x493   :  { %2578 = vmatpush1.bf16.msra.mxu1 %v1530_v39  ;;  %2783 = vmatpush1.bf16.msra.mxu0 %v1532_v40  ;;  %v1639_v39 = vld [vmem:[#allocation2 + $0x5c8] sm:$0xff]  ;;  %v1641_v40 = vld [vmem:[#allocation2 + $0x5d8] sm:$0xff] }
 0x494   :  { %2579 = vmatprep.subr.bf16.mxu1 %v1540_v41  ;;  %2784 = vmatprep.subr.bf16.mxu0 %v1542_v36  ;;  %v1638_v41 = vld [vmem:[#allocation2 + $0x5c0] sm:$0xff]  ;;  %v1640_v36 = vld [vmem:[#allocation2 + $0x5d0] sm:$0xff] }
 0x497   :  { %2580 = vmatpush1.bf16.msra.mxu1 %v1539_v43  ;;  %2785 = vmatpush1.bf16.msra.mxu0 %v1541_v45  ;;  %v1648_v43 = vld [vmem:[#allocation2 + $0x610] sm:$0xff]  ;;  %v1650_v45 = vld [vmem:[#allocation2 + $0x620] sm:$0xff] }
 0x498   :  { %2581 = vmatprep.subr.bf16.mxu1 %v1549_v46  ;;  %2786 = vmatprep.subr.bf16.mxu0 %v1551_v47  ;;  %v1647_v46 = vld [vmem:[#allocation2 + $0x608] sm:$0xff]  ;;  %v1649_v47 = vld [vmem:[#allocation2 + $0x618] sm:$0xff] }
 0x49b   :  { %2582 = vmatpush1.bf16.msra.mxu1 %v1548_v48  ;;  %2787 = vmatpush1.bf16.msra.mxu0 %v1550_v50  ;;  %v1657_v48 = vld [vmem:[#allocation2 + $0x658] sm:$0xff]  ;;  %v1659_v50 = vld [vmem:[#allocation2 + $0x668] sm:$0xff] }
 0x49c   :  { %2583 = vmatprep.subr.bf16.mxu1 %v1558_v52  ;;  %2788 = vmatprep.subr.bf16.mxu0 %v1560_v9  ;;  %v1656_v52 = vld [vmem:[#allocation2 + $0x650] sm:$0xff]  ;;  %v1658_v9 = vld [vmem:[#allocation2 + $0x660] sm:$0xff] }
 0x49f   :  { %2584 = vmatpush1.bf16.msra.mxu1 %v1557_v53  ;;  %2789 = vmatpush1.bf16.msra.mxu0 %v1559_v10  ;;  %v1666_v53 = vld [vmem:[#allocation2 + $0x6a0] sm:$0xff]  ;;  %v1668_v10 = vld [vmem:[#allocation2 + $0x6b0] sm:$0xff] }
 0x4a0   :  { %2585 = vmatprep.subr.bf16.mxu1 %v1567_v54  ;;  %2790 = vmatprep.subr.bf16.mxu0 %v1569_v17  ;;  %v1665_v54 = vld [vmem:[#allocation2 + $0x698] sm:$0xff]  ;;  %v1667_v17 = vld [vmem:[#allocation2 + $0x6a8] sm:$0xff] }
 0x4a3   :  { %2586 = vmatpush1.bf16.msra.mxu1 %v1566_v55  ;;  %2791 = vmatpush1.bf16.msra.mxu0 %v1568_v23  ;;  %v1675_v55 = vld [vmem:[#allocation2 + $0x6e8] sm:$0xff]  ;;  %v1677_v23 = vld [vmem:[#allocation2 + $0x6f8] sm:$0xff] }
 0x4a4   :  { %2587 = vmatprep.subr.bf16.mxu1 %v1576_v56  ;;  %2792 = vmatprep.subr.bf16.mxu0 %v1578_v24  ;;  %v1674_v56 = vld [vmem:[#allocation2 + $0x6e0] sm:$0xff]  ;;  %v1676_v24 = vld [vmem:[#allocation2 + $0x6f0] sm:$0xff] }
 0x4a7   :  { %2588 = vmatpush1.bf16.msra.mxu1 %v1575_v57  ;;  %2793 = vmatpush1.bf16.msra.mxu0 %v1577_v58  ;;  %v1684_v57 = vld [vmem:[#allocation2 + $0x730] sm:$0xff]  ;;  %v1686_v58 = vld [vmem:[#allocation2 + $0x740] sm:$0xff] }
 0x4a8   :  { %2589 = vmatprep.subr.bf16.mxu1 %v1585_v33  ;;  %2794 = vmatprep.subr.bf16.mxu0 %v1587_v59  ;;  %v1683_v33 = vld [vmem:[#allocation2 + $0x728] sm:$0xff]  ;;  %v1685_v59 = vld [vmem:[#allocation2 + $0x738] sm:$0xff] }
 0x4ab   :  { %2590 = vmatpush1.bf16.msra.mxu1 %v1584_v42  ;;  %2795 = vmatpush1.bf16.msra.mxu0 %v1586_v60  ;;  %v1693_v42 = vld [vmem:[#allocation2 + $0x778] sm:$0xff]  ;;  %v1695_v60 = vld [vmem:[#allocation2 + $0x788] sm:$0xff] }
 0x4ac   :  { %2591 = vmatprep.subr.bf16.mxu1 %v1594_v44  ;;  %2796 = vmatprep.subr.bf16.mxu0 %v1596_v49  ;;  %v1692_v44 = vld [vmem:[#allocation2 + $0x770] sm:$0xff]  ;;  %v1694_v49 = vld [vmem:[#allocation2 + $0x780] sm:$0xff] }
 0x4af   :  { %2592 = vmatpush1.bf16.msra.mxu1 %v1593_v61  ;;  %2797 = vmatpush1.bf16.msra.mxu0 %v1595_v62  ;;  %v1702_v61 = vld [vmem:[#allocation2 + $0x7c0] sm:$0xff]  ;;  %v1704_v62 = vld [vmem:[#allocation2 + $0x7d0] sm:$0xff] }
 0x4b0   :  { %2602 = vmatprep.subr.bf16.mxu1 %v1603_v63  ;;  %2807 = vmatprep.subr.bf16.mxu0 %v1605_v0  ;;  %v1701_v63 = vld [vmem:[#allocation2 + $0x7b8] sm:$0xff]  ;;  %v1703_v0 = vld [vmem:[#allocation2 + $0x7c8] sm:$0xff] }
 0x4b2   :  { %2594 = vmatmul.mubr.bf16.vlgmr.msra.gmra.mrb[12].mxu1 %v9188_v32  ;;  %2799 = vmatmul.mubr.bf16.vlgmr.msra.gmra.mrb[16].mxu0 %v9188_v32 }
 0x4b3   :  { %2603 = vmatpush1.bf16.msra.mxu1 %v1602_v1  ;;  %2808 = vmatpush1.bf16.msra.mxu0 %v1604_v2  ;;  %v1711_v1 = vld [vmem:[#allocation2 + $0x808] sm:$0xff]  ;;  %v1713_v2 = vld [vmem:[#allocation2 + $0x818] sm:$0xff] }
 0x4b4   :  { %2604 = vmatprep.subr.bf16.mxu1 %v1612_v4  ;;  %2809 = vmatprep.subr.bf16.mxu0 %v1614_v5  ;;  %v1710_v4 = vld [vmem:[#allocation2 + $0x800] sm:$0xff]  ;;  %v1712_v5 = vld [vmem:[#allocation2 + $0x810] sm:$0xff] }
 0x4b5   :  { %2634 = vmatprep.mubr.bf16.mxu1 %v9194_v18  ;;  %2839 = vmatprep.mubr.bf16.mxu0 %v9194_v18 }
 0x4b7   :  { %2605 = vmatpush1.bf16.msra.mxu1 %v1611_v6  ;;  %2810 = vmatpush1.bf16.msra.mxu0 %v1613_v35  ;;  %v1720_v6 = vld [vmem:[#allocation2 + $0x850] sm:$0xff]  ;;  %v1722_v35 = vld [vmem:[#allocation2 + $0x860] sm:$0xff] }
 0x4b8   :  { %2606 = vmatprep.subr.bf16.mxu1 %v1621_v11  ;;  %2811 = vmatprep.subr.bf16.mxu0 %v1623_v14  ;;  %v1719_v11 = vld [vmem:[#allocation2 + $0x848] sm:$0xff]  ;;  %v1721_v14 = vld [vmem:[#allocation2 + $0x858] sm:$0xff] }
 0x4bb   :  { %2607 = vmatpush1.bf16.msra.mxu1 %v1620_v16  ;;  %2812 = vmatpush1.bf16.msra.mxu0 %v1622_v38  ;;  %v1729_v16 = vld [vmem:[#allocation2 + $0x898] sm:$0xff]  ;;  %v1731_v38 = vld [vmem:[#allocation2 + $0x8a8] sm:$0xff] }
 0x4bc   :  { %2608 = vmatprep.subr.bf16.mxu1 %v1630_v20  ;;  %2813 = vmatprep.subr.bf16.mxu0 %v1632_v22  ;;  %v1728_v20 = vld [vmem:[#allocation2 + $0x890] sm:$0xff]  ;;  %v1730_v22 = vld [vmem:[#allocation2 + $0x8a0] sm:$0xff] }
 0x4bf   :  { %2609 = vmatpush1.bf16.msra.mxu1 %v1629_v27  ;;  %2814 = vmatpush1.bf16.msra.mxu0 %v1631_v29  ;;  %v1738_v27 = vld [vmem:[#allocation2 + $0x8e0] sm:$0xff]  ;;  %v1740_v29 = vld [vmem:[#allocation2 + $0x8f0] sm:$0xff] }
 0x4c0   :  { %2610 = vmatprep.subr.bf16.mxu1 %v1639_v39  ;;  %2815 = vmatprep.subr.bf16.mxu0 %v1641_v40  ;;  %v1737_v39 = vld [vmem:[#allocation2 + $0x8d8] sm:$0xff]  ;;  %v1739_v40 = vld [vmem:[#allocation2 + $0x8e8] sm:$0xff] }
 0x4c3   :  { %2611 = vmatpush1.bf16.msra.mxu1 %v1638_v41  ;;  %2816 = vmatpush1.bf16.msra.mxu0 %v1640_v36  ;;  %v1747_v41 = vld [vmem:[#allocation2 + $0x928] sm:$0xff]  ;;  %v1749_v36 = vld [vmem:[#allocation2 + $0x938] sm:$0xff] }
 0x4c4   :  { %2612 = vmatprep.subr.bf16.mxu1 %v1648_v43  ;;  %2817 = vmatprep.subr.bf16.mxu0 %v1650_v45  ;;  %v1746_v43 = vld [vmem:[#allocation2 + $0x920] sm:$0xff]  ;;  %v1748_v45 = vld [vmem:[#allocation2 + $0x930] sm:$0xff] }
 0x4c7   :  { %2613 = vmatpush1.bf16.msra.mxu1 %v1647_v46  ;;  %2818 = vmatpush1.bf16.msra.mxu0 %v1649_v47  ;;  %v1756_v46 = vld [vmem:[#allocation2 + $0x970] sm:$0xff]  ;;  %v1758_v47 = vld [vmem:[#allocation2 + $0x980] sm:$0xff] }
 0x4c8   :  { %2614 = vmatprep.subr.bf16.mxu1 %v1657_v48  ;;  %2819 = vmatprep.subr.bf16.mxu0 %v1659_v50  ;;  %v1755_v48 = vld [vmem:[#allocation2 + $0x968] sm:$0xff]  ;;  %v1757_v50 = vld [vmem:[#allocation2 + $0x978] sm:$0xff] }
 0x4cb   :  { %2615 = vmatpush1.bf16.msra.mxu1 %v1656_v52  ;;  %2820 = vmatpush1.bf16.msra.mxu0 %v1658_v9  ;;  %v1765_v52 = vld [vmem:[#allocation2 + $0x9b8] sm:$0xff]  ;;  %v1767_v9 = vld [vmem:[#allocation2 + $0x9c8] sm:$0xff] }
 0x4cc   :  { %2616 = vmatprep.subr.bf16.mxu1 %v1666_v53  ;;  %2821 = vmatprep.subr.bf16.mxu0 %v1668_v10  ;;  %v1764_v53 = vld [vmem:[#allocation2 + $0x9b0] sm:$0xff]  ;;  %v1766_v10 = vld [vmem:[#allocation2 + $0x9c0] sm:$0xff] }
 0x4cf   :  { %2617 = vmatpush1.bf16.msra.mxu1 %v1665_v54  ;;  %2822 = vmatpush1.bf16.msra.mxu0 %v1667_v17  ;;  %v1774_v54 = vld [vmem:[#allocation2 + $0xa00] sm:$0xff]  ;;  %v1776_v17 = vld [vmem:[#allocation2 + $0xa10] sm:$0xff] }
 0x4d0   :  { %2618 = vmatprep.subr.bf16.mxu1 %v1675_v55  ;;  %2823 = vmatprep.subr.bf16.mxu0 %v1677_v23  ;;  %v1773_v55 = vld [vmem:[#allocation2 + $0x9f8] sm:$0xff]  ;;  %v1775_v23 = vld [vmem:[#allocation2 + $0xa08] sm:$0xff] }
 0x4d3   :  { %2619 = vmatpush1.bf16.msra.mxu1 %v1674_v56  ;;  %2824 = vmatpush1.bf16.msra.mxu0 %v1676_v24  ;;  %v1783_v56 = vld [vmem:[#allocation2 + $0xa48] sm:$0xff]  ;;  %v1785_v24 = vld [vmem:[#allocation2 + $0xa58] sm:$0xff] }
 0x4d4   :  { %2620 = vmatprep.subr.bf16.mxu1 %v1684_v57  ;;  %2825 = vmatprep.subr.bf16.mxu0 %v1686_v58  ;;  %v1782_v57 = vld [vmem:[#allocation2 + $0xa40] sm:$0xff]  ;;  %v1784_v58 = vld [vmem:[#allocation2 + $0xa50] sm:$0xff] }
 0x4d7   :  { %2621 = vmatpush1.bf16.msra.mxu1 %v1683_v33  ;;  %2826 = vmatpush1.bf16.msra.mxu0 %v1685_v59  ;;  %v1792_v33 = vld [vmem:[#allocation2 + $0xa90] sm:$0xff]  ;;  %v1794_v59 = vld [vmem:[#allocation2 + $0xaa0] sm:$0xff] }
 0x4d8   :  { %2622 = vmatprep.subr.bf16.mxu1 %v1693_v42  ;;  %2827 = vmatprep.subr.bf16.mxu0 %v1695_v60  ;;  %v1791_v42 = vld [vmem:[#allocation2 + $0xa88] sm:$0xff]  ;;  %v1793_v60 = vld [vmem:[#allocation2 + $0xa98] sm:$0xff] }
 0x4db   :  { %2623 = vmatpush1.bf16.msra.mxu1 %v1692_v44  ;;  %2828 = vmatpush1.bf16.msra.mxu0 %v1694_v49  ;;  %v1801_v44 = vld [vmem:[#allocation2 + $0xad8] sm:$0xff]  ;;  %v1803_v49 = vld [vmem:[#allocation2 + $0xae8] sm:$0xff] }
 0x4dc   :  { %2624 = vmatprep.subr.bf16.mxu1 %v1702_v61  ;;  %2829 = vmatprep.subr.bf16.mxu0 %v1704_v62  ;;  %v1800_v61 = vld [vmem:[#allocation2 + $0xad0] sm:$0xff]  ;;  %v1802_v62 = vld [vmem:[#allocation2 + $0xae0] sm:$0xff] }
 0x4df   :  { %2625 = vmatpush1.bf16.msra.mxu1 %v1701_v63  ;;  %2830 = vmatpush1.bf16.msra.mxu0 %v1703_v0  ;;  %v1810_v63 = vld [vmem:[#allocation2 + $0xb20] sm:$0xff]  ;;  %v1812_v0 = vld [vmem:[#allocation2 + $0xb30] sm:$0xff] }
 0x4e0   :  { %2626 = vmatprep.subr.bf16.mxu1 %v1711_v1  ;;  %2831 = vmatprep.subr.bf16.mxu0 %v1713_v2  ;;  %v1809_v1 = vld [vmem:[#allocation2 + $0xb18] sm:$0xff]  ;;  %v1811_v2 = vld [vmem:[#allocation2 + $0xb28] sm:$0xff] }
 0x4e3   :  { %2627 = vmatpush1.bf16.msra.mxu1 %v1710_v4  ;;  %2832 = vmatpush1.bf16.msra.mxu0 %v1712_v5  ;;  %v1819_v4 = vld [vmem:[#allocation2 + $0xb68] sm:$0xff]  ;;  %v1821_v5 = vld [vmem:[#allocation2 + $0xb78] sm:$0xff] }
 0x4e4   :  { %2628 = vmatprep.subr.bf16.mxu1 %v1720_v6  ;;  %2833 = vmatprep.subr.bf16.mxu0 %v1722_v35  ;;  %v1818_v6 = vld [vmem:[#allocation2 + $0xb60] sm:$0xff]  ;;  %v1820_v35 = vld [vmem:[#allocation2 + $0xb70] sm:$0xff] }
 0x4e7   :  { %2629 = vmatpush1.bf16.msra.mxu1 %v1719_v11  ;;  %2834 = vmatpush1.bf16.msra.mxu0 %v1721_v14  ;;  %v1828_v11 = vld [vmem:[#allocation2 + $0xbb0] sm:$0xff]  ;;  %v1830_v14 = vld [vmem:[#allocation2 + $0xbc0] sm:$0xff] }
 0x4e8   :  { %2630 = vmatprep.subr.bf16.mxu1 %v1729_v16  ;;  %2835 = vmatprep.subr.bf16.mxu0 %v1731_v38  ;;  %v1827_v16 = vld [vmem:[#allocation2 + $0xba8] sm:$0xff]  ;;  %v1829_v38 = vld [vmem:[#allocation2 + $0xbb8] sm:$0xff] }
 0x4eb   :  { %2631 = vmatpush1.bf16.msra.mxu1 %v1728_v20  ;;  %2836 = vmatpush1.bf16.msra.mxu0 %v1730_v22  ;;  %v1837_v20 = vld [vmem:[#allocation2 + $0xbf8] sm:$0xff]  ;;  %v1839_v22 = vld [vmem:[#allocation2 + $0xc08] sm:$0xff] }
 0x4ec   :  { %2632 = vmatprep.subr.bf16.mxu1 %v1738_v27  ;;  %2837 = vmatprep.subr.bf16.mxu0 %v1740_v29  ;;  %v1836_v27 = vld [vmem:[#allocation2 + $0xbf0] sm:$0xff]  ;;  %v1838_v29 = vld [vmem:[#allocation2 + $0xc00] sm:$0xff] }
 0x4ef   :  { %2633 = vmatpush1.bf16.msra.mxu1 %v1737_v39  ;;  %2838 = vmatpush1.bf16.msra.mxu0 %v1739_v40  ;;  %v1846_v39 = vld [vmem:[#allocation2 + $0xc40] sm:$0xff]  ;;  %v1848_v40 = vld [vmem:[#allocation2 + $0xc50] sm:$0xff] }
 0x4f0   :  { %2643 = vmatprep.subr.bf16.mxu1 %v1747_v41  ;;  %2848 = vmatprep.subr.bf16.mxu0 %v1749_v36  ;;  %v1845_v41 = vld [vmem:[#allocation2 + $0xc38] sm:$0xff]  ;;  %v1847_v36 = vld [vmem:[#allocation2 + $0xc48] sm:$0xff] }
 0x4f2   :  { %2635 = vmatmul.mubr.bf16.vlgmr.msra.gmra.mrb[12].mxu1 %v9192_v15  ;;  %2840 = vmatmul.mubr.bf16.vlgmr.msra.gmra.mrb[16].mxu0 %v9192_v15 }
 0x4f3   :  { %2644 = vmatpush1.bf16.msra.mxu1 %v1746_v43  ;;  %2849 = vmatpush1.bf16.msra.mxu0 %v1748_v45  ;;  %v1855_v43 = vld [vmem:[#allocation2 + $0xc88] sm:$0xff]  ;;  %v1857_v45 = vld [vmem:[#allocation2 + $0xc98] sm:$0xff] }
 0x4f4   :  { %2645 = vmatprep.subr.bf16.mxu1 %v1756_v46  ;;  %2850 = vmatprep.subr.bf16.mxu0 %v1758_v47  ;;  %v1854_v46 = vld [vmem:[#allocation2 + $0xc80] sm:$0xff]  ;;  %v1856_v47 = vld [vmem:[#allocation2 + $0xc90] sm:$0xff] }
 0x4f5   :  { %2675 = vmatprep.mubr.bf16.mxu1 %v9198_v25  ;;  %2880 = vmatprep.mubr.bf16.mxu0 %v9198_v25 }
 0x4f7   :  { %2646 = vmatpush1.bf16.msra.mxu1 %v1755_v48  ;;  %2851 = vmatpush1.bf16.msra.mxu0 %v1757_v50  ;;  %v1864_v48 = vld [vmem:[#allocation2 + $0xcd0] sm:$0xff]  ;;  %v1866_v50 = vld [vmem:[#allocation2 + $0xce0] sm:$0xff] }
 0x4f8   :  { %2647 = vmatprep.subr.bf16.mxu1 %v1765_v52  ;;  %2852 = vmatprep.subr.bf16.mxu0 %v1767_v9  ;;  %v1863_v52 = vld [vmem:[#allocation2 + $0xcc8] sm:$0xff]  ;;  %v1865_v9 = vld [vmem:[#allocation2 + $0xcd8] sm:$0xff] }
 0x4fb   :  { %2648 = vmatpush1.bf16.msra.mxu1 %v1764_v53  ;;  %2853 = vmatpush1.bf16.msra.mxu0 %v1766_v10  ;;  %v1873_v53 = vld [vmem:[#allocation2 + $0xd18] sm:$0xff]  ;;  %v1875_v10 = vld [vmem:[#allocation2 + $0xd28] sm:$0xff] }
 0x4fc   :  { %2649 = vmatprep.subr.bf16.mxu1 %v1774_v54  ;;  %2854 = vmatprep.subr.bf16.mxu0 %v1776_v17  ;;  %v1872_v54 = vld [vmem:[#allocation2 + $0xd10] sm:$0xff]  ;;  %v1874_v17 = vld [vmem:[#allocation2 + $0xd20] sm:$0xff] }
 0x4ff   :  { %2650 = vmatpush1.bf16.msra.mxu1 %v1773_v55  ;;  %2855 = vmatpush1.bf16.msra.mxu0 %v1775_v23  ;;  %v1882_v55 = vld [vmem:[#allocation2 + $0xd60] sm:$0xff]  ;;  %v1884_v23 = vld [vmem:[#allocation2 + $0xd70] sm:$0xff] }
 0x500   :  { %2651 = vmatprep.subr.bf16.mxu1 %v1783_v56  ;;  %2856 = vmatprep.subr.bf16.mxu0 %v1785_v24  ;;  %v1881_v56 = vld [vmem:[#allocation2 + $0xd58] sm:$0xff]  ;;  %v1883_v24 = vld [vmem:[#allocation2 + $0xd68] sm:$0xff] }
 0x503   :  { %2652 = vmatpush1.bf16.msra.mxu1 %v1782_v57  ;;  %2857 = vmatpush1.bf16.msra.mxu0 %v1784_v58  ;;  %v1891_v57 = vld [vmem:[#allocation2 + $0xda8] sm:$0xff]  ;;  %v1893_v58 = vld [vmem:[#allocation2 + $0xdb8] sm:$0xff] }
 0x504   :  { %2653 = vmatprep.subr.bf16.mxu1 %v1792_v33  ;;  %2858 = vmatprep.subr.bf16.mxu0 %v1794_v59  ;;  %v1890_v33 = vld [vmem:[#allocation2 + $0xda0] sm:$0xff]  ;;  %v1892_v59 = vld [vmem:[#allocation2 + $0xdb0] sm:$0xff] }
 0x507   :  { %2654 = vmatpush1.bf16.msra.mxu1 %v1791_v42  ;;  %2859 = vmatpush1.bf16.msra.mxu0 %v1793_v60  ;;  %v1900_v42 = vld [vmem:[#allocation2 + $0xdf0] sm:$0xff]  ;;  %v1902_v60 = vld [vmem:[#allocation2 + $0xe00] sm:$0xff] }
 0x508   :  { %2655 = vmatprep.subr.bf16.mxu1 %v1801_v44  ;;  %2860 = vmatprep.subr.bf16.mxu0 %v1803_v49  ;;  %v1899_v44 = vld [vmem:[#allocation2 + $0xde8] sm:$0xff]  ;;  %v1901_v49 = vld [vmem:[#allocation2 + $0xdf8] sm:$0xff] }
 0x50b   :  { %2656 = vmatpush1.bf16.msra.mxu1 %v1800_v61  ;;  %2861 = vmatpush1.bf16.msra.mxu0 %v1802_v62  ;;  %v1909_v61 = vld [vmem:[#allocation2 + $0xe38] sm:$0xff]  ;;  %v1911_v62 = vld [vmem:[#allocation2 + $0xe48] sm:$0xff] }
 0x50c   :  { %2657 = vmatprep.subr.bf16.mxu1 %v1810_v63  ;;  %2862 = vmatprep.subr.bf16.mxu0 %v1812_v0  ;;  %v1908_v63 = vld [vmem:[#allocation2 + $0xe30] sm:$0xff]  ;;  %v1910_v0 = vld [vmem:[#allocation2 + $0xe40] sm:$0xff] }
 0x50f   :  { %2658 = vmatpush1.bf16.msra.mxu1 %v1809_v1  ;;  %2863 = vmatpush1.bf16.msra.mxu0 %v1811_v2  ;;  %v1918_v1 = vld [vmem:[#allocation2 + $0xe80] sm:$0xff]  ;;  %v1920_v2 = vld [vmem:[#allocation2 + $0xe90] sm:$0xff] }
 0x510   :  { %2659 = vmatprep.subr.bf16.mxu1 %v1819_v4  ;;  %2864 = vmatprep.subr.bf16.mxu0 %v1821_v5  ;;  %v1917_v4 = vld [vmem:[#allocation2 + $0xe78] sm:$0xff]  ;;  %v1919_v5 = vld [vmem:[#allocation2 + $0xe88] sm:$0xff] }
 0x513   :  { %2660 = vmatpush1.bf16.msra.mxu1 %v1818_v6  ;;  %2865 = vmatpush1.bf16.msra.mxu0 %v1820_v35  ;;  %v1927_v6 = vld [vmem:[#allocation2 + $0xec8] sm:$0xff]  ;;  %v1929_v35 = vld [vmem:[#allocation2 + $0xed8] sm:$0xff] }
 0x514   :  { %2661 = vmatprep.subr.bf16.mxu1 %v1828_v11  ;;  %2866 = vmatprep.subr.bf16.mxu0 %v1830_v14  ;;  %v1926_v11 = vld [vmem:[#allocation2 + $0xec0] sm:$0xff]  ;;  %v1928_v14 = vld [vmem:[#allocation2 + $0xed0] sm:$0xff] }
 0x517   :  { %2662 = vmatpush1.bf16.msra.mxu1 %v1827_v16  ;;  %2867 = vmatpush1.bf16.msra.mxu0 %v1829_v38  ;;  %v1936_v16 = vld [vmem:[#allocation2 + $0xf10] sm:$0xff]  ;;  %v1938_v38 = vld [vmem:[#allocation2 + $0xf20] sm:$0xff] }
 0x518   :  { %2663 = vmatprep.subr.bf16.mxu1 %v1837_v20  ;;  %2868 = vmatprep.subr.bf16.mxu0 %v1839_v22  ;;  %v1935_v20 = vld [vmem:[#allocation2 + $0xf08] sm:$0xff]  ;;  %v1937_v22 = vld [vmem:[#allocation2 + $0xf18] sm:$0xff] }
 0x51b   :  { %2664 = vmatpush1.bf16.msra.mxu1 %v1836_v27  ;;  %2869 = vmatpush1.bf16.msra.mxu0 %v1838_v29 }
 0x51c   :  { %2665 = vmatprep.subr.bf16.mxu1 %v1846_v39  ;;  %2870 = vmatprep.subr.bf16.mxu0 %v1848_v40  ;;  %v1945_v39 = vld [vmem:[#allocation2 + $0xf58] sm:$0xff]  ;;  %v1947_v40 = vld [vmem:[#allocation2 + $0xf68] sm:$0xff] }
 0x51f   :  { %2666 = vmatpush1.bf16.msra.mxu1 %v1845_v41  ;;  %2871 = vmatpush1.bf16.msra.mxu0 %v1847_v36 }
 0x520   :  { %2667 = vmatprep.subr.bf16.mxu1 %v1855_v43  ;;  %2872 = vmatprep.subr.bf16.mxu0 %v1857_v45 }
 0x523   :  { %2668 = vmatpush1.bf16.msra.mxu1 %v1854_v46  ;;  %2873 = vmatpush1.bf16.msra.mxu0 %v1856_v47 }
 0x524   :  { %2669 = vmatprep.subr.bf16.mxu1 %v1864_v48  ;;  %2874 = vmatprep.subr.bf16.mxu0 %v1866_v50  ;;  %v1944_v48 = vld [vmem:[#allocation2 + $0xf50] sm:$0xff]  ;;  %v1946_v50 = vld [vmem:[#allocation2 + $0xf60] sm:$0xff] }
 0x527   :  { %2670 = vmatpush1.bf16.msra.mxu1 %v1863_v52  ;;  %2875 = vmatpush1.bf16.msra.mxu0 %v1865_v9  ;;  %v1954_v52 = vld [vmem:[#allocation2 + $0xfa0] sm:$0xff]  ;;  %v1956_v9 = vld [vmem:[#allocation2 + $0xfb0] sm:$0xff] }
 0x528   :  { %2671 = vmatprep.subr.bf16.mxu1 %v1873_v53  ;;  %2876 = vmatprep.subr.bf16.mxu0 %v1875_v10  ;;  %v1953_v53 = vld [vmem:[#allocation2 + $0xf98] sm:$0xff]  ;;  %v1955_v10 = vld [vmem:[#allocation2 + $0xfa8] sm:$0xff] }
 0x52b   :  { %2672 = vmatpush1.bf16.msra.mxu1 %v1872_v54  ;;  %2877 = vmatpush1.bf16.msra.mxu0 %v1874_v17  ;;  %v1963_v54 = vld [vmem:[#allocation2 + $0xfe8] sm:$0xff]  ;;  %v1965_v17 = vld [vmem:[#allocation2 + $0xff8] sm:$0xff] }
 0x52c   :  { %2673 = vmatprep.subr.bf16.mxu1 %v1882_v55  ;;  %2878 = vmatprep.subr.bf16.mxu0 %v1884_v23  ;;  %v1962_v55 = vld [vmem:[#allocation2 + $0xfe0] sm:$0xff]  ;;  %v1964_v23 = vld [vmem:[#allocation2 + $0xff0] sm:$0xff] }
 0x52f   :  { %2674 = vmatpush1.bf16.msra.mxu1 %v1881_v56  ;;  %2879 = vmatpush1.bf16.msra.mxu0 %v1883_v24  ;;  %v1972_v56 = vld [vmem:[#allocation2 + $0x1030] sm:$0xff]  ;;  %v1974_v24 = vld [vmem:[#allocation2 + $0x1040] sm:$0xff] }
 0x530   :  { %2684 = vmatprep.subr.bf16.mxu1 %v1891_v57  ;;  %2889 = vmatprep.subr.bf16.mxu0 %v1893_v58  ;;  %v1971_v57 = vld [vmem:[#allocation2 + $0x1028] sm:$0xff]  ;;  %v1973_v58 = vld [vmem:[#allocation2 + $0x1038] sm:$0xff] }
 0x532   :  { %2676 = vmatmul.mubr.bf16.vlgmr.msra.gmra.mrb[12].mxu1 %v9196_v21  ;;  %2881 = vmatmul.mubr.bf16.vlgmr.msra.gmra.mrb[16].mxu0 %v9196_v21 }
 0x533   :  { %2685 = vmatpush1.bf16.msra.mxu1 %v1890_v33  ;;  %2890 = vmatpush1.bf16.msra.mxu0 %v1892_v59  ;;  %v1981_v33 = vld [vmem:[#allocation2 + $0x1078] sm:$0xff]  ;;  %v1983_v59 = vld [vmem:[#allocation2 + $0x1088] sm:$0xff] }
 0x534   :  { %2686 = vmatprep.subr.bf16.mxu1 %v1900_v42  ;;  %2891 = vmatprep.subr.bf16.mxu0 %v1902_v60  ;;  %v1980_v42 = vld [vmem:[#allocation2 + $0x1070] sm:$0xff]  ;;  %v1982_v60 = vld [vmem:[#allocation2 + $0x1080] sm:$0xff] }
 0x535   :  { %2716 = vmatprep.mubr.bf16.mxu1 %v9202_v31  ;;  %2921 = vmatprep.mubr.bf16.mxu0 %v9202_v31 }
 0x537   :  { %2687 = vmatpush1.bf16.msra.mxu1 %v1899_v44  ;;  %2892 = vmatpush1.bf16.msra.mxu0 %v1901_v49  ;;  %v1990_v44 = vld [vmem:[#allocation2 + $0x10c0] sm:$0xff]  ;;  %v1992_v49 = vld [vmem:[#allocation2 + $0x10d0] sm:$0xff] }
 0x538   :  { %2688 = vmatprep.subr.bf16.mxu1 %v1909_v61  ;;  %2893 = vmatprep.subr.bf16.mxu0 %v1911_v62  ;;  %v1989_v61 = vld [vmem:[#allocation2 + $0x10b8] sm:$0xff]  ;;  %v1991_v62 = vld [vmem:[#allocation2 + $0x10c8] sm:$0xff] }
 0x53b   :  { %2689 = vmatpush1.bf16.msra.mxu1 %v1908_v63  ;;  %2894 = vmatpush1.bf16.msra.mxu0 %v1910_v0  ;;  %v1999_v63 = vld [vmem:[#allocation2 + $0x1108] sm:$0xff]  ;;  %v2001_v0 = vld [vmem:[#allocation2 + $0x1118] sm:$0xff] }
 0x53c   :  { %2690 = vmatprep.subr.bf16.mxu1 %v1918_v1  ;;  %2895 = vmatprep.subr.bf16.mxu0 %v1920_v2  ;;  %v1998_v1 = vld [vmem:[#allocation2 + $0x1100] sm:$0xff]  ;;  %v2000_v2 = vld [vmem:[#allocation2 + $0x1110] sm:$0xff] }
 0x53f   :  { %2691 = vmatpush1.bf16.msra.mxu1 %v1917_v4  ;;  %2896 = vmatpush1.bf16.msra.mxu0 %v1919_v5  ;;  %v2008_v4 = vld [vmem:[#allocation2 + $0x1150] sm:$0xff]  ;;  %v2010_v5 = vld [vmem:[#allocation2 + $0x1160] sm:$0xff] }
 0x540   :  { %2692 = vmatprep.subr.bf16.mxu1 %v1927_v6  ;;  %2897 = vmatprep.subr.bf16.mxu0 %v1929_v35  ;;  %v2007_v6 = vld [vmem:[#allocation2 + $0x1148] sm:$0xff]  ;;  %v2009_v35 = vld [vmem:[#allocation2 + $0x1158] sm:$0xff] }
 0x543   :  { %2693 = vmatpush1.bf16.msra.mxu1 %v1926_v11  ;;  %2898 = vmatpush1.bf16.msra.mxu0 %v1928_v14  ;;  %v2017_v11 = vld [vmem:[#allocation2 + $0x1198] sm:$0xff]  ;;  %v2019_v14 = vld [vmem:[#allocation2 + $0x11a8] sm:$0xff] }
 0x544   :  { %2694 = vmatprep.subr.bf16.mxu1 %v1936_v16  ;;  %2899 = vmatprep.subr.bf16.mxu0 %v1938_v38  ;;  %v2016_v16 = vld [vmem:[#allocation2 + $0x1190] sm:$0xff]  ;;  %v2018_v38 = vld [vmem:[#allocation2 + $0x11a0] sm:$0xff] }
 0x545   :  { %v9240_v27 = vpop.f32.mrb[8].mxu1  ;;  %v9242_v29 = vpop.f32.mrb[12].mxu0 }
 0x546   :  { %v9244_v41 = vpop.f32.mrb[9].mxu1  ;;  %v9246_v36 = vpop.f32.mrb[13].mxu0 }
 0x547   :  { %v2353_v43 = vpop.f32.mrb[10].mxu1  ;;  %v2558_v45 = vpop.f32.mrb[14].mxu0  ;;  %2695 = vmatpush1.bf16.msra.mxu1 %v1935_v20  ;;  %2900 = vmatpush1.bf16.msra.mxu0 %v1937_v22  ;;  %v2026_v20 = vld [vmem:[#allocation2 + $0x11e0] sm:$0xff]  ;;  %v2028_v22 = vld [vmem:[#allocation2 + $0x11f0] sm:$0xff] }
 0x548   :  { %v2354_v46 = vpop.f32.mrb[11].mxu1  ;;  %v2559_v47 = vpop.f32.mrb[15].mxu0  ;;  %2696 = vmatprep.subr.bf16.mxu1 %v1945_v39  ;;  %2901 = vmatprep.subr.bf16.mxu0 %v1947_v40  ;;  %v2025_v39 = vld [vmem:[#allocation2 + $0x11d8] sm:$0xff]  ;;  %v2027_v40 = vld [vmem:[#allocation2 + $0x11e8] sm:$0xff] }
 0x549   :  { %v2035_v43 = vld [vmem:[#allocation2 + $0x1228] sm:$0xff]  ;;  %v2037_v45 = vld [vmem:[#allocation2 + $0x1238] sm:$0xff]  ;;  %v2034_v46 = vld [vmem:[#allocation2 + $0x1220] sm:$0xff] }
 0x54a   :  { %v2036_v47 = vld [vmem:[#allocation2 + $0x1230] sm:$0xff] }
 0x54b   :  { %2697 = vmatpush1.bf16.msra.mxu1 %v1944_v48  ;;  %2902 = vmatpush1.bf16.msra.mxu0 %v1946_v50  ;;  %v2044_v48 = vld [vmem:[#allocation2 + $0x1270] sm:$0xff]  ;;  %v2046_v50 = vld [vmem:[#allocation2 + $0x1280] sm:$0xff] }
 0x54c   :  { %2698 = vmatprep.subr.bf16.mxu1 %v1954_v52  ;;  %2903 = vmatprep.subr.bf16.mxu0 %v1956_v9  ;;  %v2043_v52 = vld [vmem:[#allocation2 + $0x1268] sm:$0xff]  ;;  %v2045_v9 = vld [vmem:[#allocation2 + $0x1278] sm:$0xff] }
 0x54f   :  { %2699 = vmatpush1.bf16.msra.mxu1 %v1953_v53  ;;  %2904 = vmatpush1.bf16.msra.mxu0 %v1955_v10  ;;  %v2053_v53 = vld [vmem:[#allocation2 + $0x12b8] sm:$0xff]  ;;  %v2055_v10 = vld [vmem:[#allocation2 + $0x12c8] sm:$0xff] }
 0x550   :  { %2700 = vmatprep.subr.bf16.mxu1 %v1963_v54  ;;  %2905 = vmatprep.subr.bf16.mxu0 %v1965_v17  ;;  %v2052_v54 = vld [vmem:[#allocation2 + $0x12b0] sm:$0xff]  ;;  %v2054_v17 = vld [vmem:[#allocation2 + $0x12c0] sm:$0xff] }
 0x553   :  { %2701 = vmatpush1.bf16.msra.mxu1 %v1962_v55  ;;  %2906 = vmatpush1.bf16.msra.mxu0 %v1964_v23  ;;  %v2062_v55 = vld [vmem:[#allocation2 + $0x1300] sm:$0xff]  ;;  %v2064_v23 = vld [vmem:[#allocation2 + $0x1310] sm:$0xff] }
 0x554   :  { %2702 = vmatprep.subr.bf16.mxu1 %v1972_v56  ;;  %2907 = vmatprep.subr.bf16.mxu0 %v1974_v24  ;;  %v2061_v56 = vld [vmem:[#allocation2 + $0x12f8] sm:$0xff]  ;;  %v2063_v24 = vld [vmem:[#allocation2 + $0x1308] sm:$0xff] }
 0x557   :  { %2703 = vmatpush1.bf16.msra.mxu1 %v1971_v57  ;;  %2908 = vmatpush1.bf16.msra.mxu0 %v1973_v58  ;;  %v2071_v57 = vld [vmem:[#allocation2 + $0x1348] sm:$0xff]  ;;  %v2073_v58 = vld [vmem:[#allocation2 + $0x1358] sm:$0xff] }
 0x558   :  { %2704 = vmatprep.subr.bf16.mxu1 %v1981_v33  ;;  %2909 = vmatprep.subr.bf16.mxu0 %v1983_v59  ;;  %v2070_v33 = vld [vmem:[#allocation2 + $0x1340] sm:$0xff]  ;;  %v2072_v59 = vld [vmem:[#allocation2 + $0x1350] sm:$0xff] }
 0x55b   :  { %2705 = vmatpush1.bf16.msra.mxu1 %v1980_v42  ;;  %2910 = vmatpush1.bf16.msra.mxu0 %v1982_v60  ;;  %v2080_v42 = vld [vmem:[#allocation2 + $0x1390] sm:$0xff]  ;;  %v2082_v60 = vld [vmem:[#allocation2 + $0x13a0] sm:$0xff] }
 0x55c   :  { %2706 = vmatprep.subr.bf16.mxu1 %v1990_v44  ;;  %2911 = vmatprep.subr.bf16.mxu0 %v1992_v49  ;;  %v2079_v44 = vld [vmem:[#allocation2 + $0x1388] sm:$0xff]  ;;  %v2081_v49 = vld [vmem:[#allocation2 + $0x1398] sm:$0xff] }
 0x55f   :  { %2707 = vmatpush1.bf16.msra.mxu1 %v1989_v61  ;;  %2912 = vmatpush1.bf16.msra.mxu0 %v1991_v62  ;;  %v2089_v61 = vld [vmem:[#allocation2 + $0x13d8] sm:$0xff]  ;;  %v2091_v62 = vld [vmem:[#allocation2 + $0x13e8] sm:$0xff] }
 0x560   :  { %2708 = vmatprep.subr.bf16.mxu1 %v1999_v63  ;;  %2913 = vmatprep.subr.bf16.mxu0 %v2001_v0  ;;  %v2088_v63 = vld [vmem:[#allocation2 + $0x13d0] sm:$0xff]  ;;  %v2090_v0 = vld [vmem:[#allocation2 + $0x13e0] sm:$0xff] }
 0x563   :  { %2709 = vmatpush1.bf16.msra.mxu1 %v1998_v1  ;;  %2914 = vmatpush1.bf16.msra.mxu0 %v2000_v2  ;;  %v2098_v1 = vld [vmem:[#allocation2 + $0x1420] sm:$0xff]  ;;  %v2100_v2 = vld [vmem:[#allocation2 + $0x1430] sm:$0xff] }
 0x564   :  { %2710 = vmatprep.subr.bf16.mxu1 %v2008_v4  ;;  %2915 = vmatprep.subr.bf16.mxu0 %v2010_v5  ;;  %v2097_v4 = vld [vmem:[#allocation2 + $0x1418] sm:$0xff]  ;;  %v2099_v5 = vld [vmem:[#allocation2 + $0x1428] sm:$0xff] }
 0x567   :  { %2711 = vmatpush1.bf16.msra.mxu1 %v2007_v6  ;;  %2916 = vmatpush1.bf16.msra.mxu0 %v2009_v35  ;;  %v1534_v6 = vld [vmem:[#allocation2 + $0x280] sm:$0xff] }
 0x568   :  { %2712 = vmatprep.subr.bf16.mxu1 %v2017_v11  ;;  %2917 = vmatprep.subr.bf16.mxu0 %v2019_v14  ;;  %v1822_v35 = vld [vmem:[#allocation2 + $0xb80] sm:$0xff]  ;;  %v1543_v14 = vld [vmem:[#allocation2 + $0x2c8] sm:$0xff] }
 0x569   :  { %v1462_v11 = vld [vmem:[#allocation2 + $0x40] sm:$0xff] }
 0x56b   :  { %2713 = vmatpush1.bf16.msra.mxu1 %v2016_v16  ;;  %2918 = vmatpush1.bf16.msra.mxu0 %v2018_v38  ;;  %v1750_v16 = vld [vmem:[#allocation2 + $0x940] sm:$0xff]  ;;  %v1831_v38 = vld [vmem:[#allocation2 + $0xbc8] sm:$0xff] }
 0x56c   :  { %2714 = vmatprep.subr.bf16.mxu1 %v2026_v20  ;;  %2919 = vmatprep.subr.bf16.mxu0 %v2028_v22  ;;  %v1471_v20 = vld [vmem:[#allocation2 + $0x88] sm:$0xff]  ;;  %v1552_v22 = vld [vmem:[#allocation2 + $0x310] sm:$0xff] }
 0x56f   :  { %2715 = vmatpush1.bf16.msra.mxu1 %v2025_v39  ;;  %2920 = vmatpush1.bf16.msra.mxu0 %v2027_v40  ;;  %v1759_v39 = vld [vmem:[#allocation2 + $0x988] sm:$0xff]  ;;  %v1840_v40 = vld [vmem:[#allocation2 + $0xc10] sm:$0xff] }
 0x570   :  { %2725 = vmatprep.subr.bf16.mxu1 %v2035_v43  ;;  %2930 = vmatprep.subr.bf16.mxu0 %v2037_v45  ;;  %v1480_v43 = vld [vmem:[#allocation2 + $0xd0] sm:$0xff]  ;;  %v1561_v45 = vld [vmem:[#allocation2 + $0x358] sm:$0xff] }
 0x572   :  { %2717 = vmatmul.mubr.bf16.vlgmr.msra.gmra.mrb[12].mxu1 %v9200_v28  ;;  %2922 = vmatmul.mubr.bf16.vlgmr.msra.gmra.mrb[16].mxu0 %v9200_v28 }
 0x573   :  { %2726 = vmatpush1.bf16.msra.mxu1 %v2034_v46  ;;  %2931 = vmatpush1.bf16.msra.mxu0 %v2036_v47  ;;  %v1768_v46 = vld [vmem:[#allocation2 + $0x9d0] sm:$0xff]  ;;  %v1849_v47 = vld [vmem:[#allocation2 + $0xc58] sm:$0xff] }
 0x574   :  { %2727 = vmatprep.subr.bf16.mxu1 %v2044_v48  ;;  %2932 = vmatprep.subr.bf16.mxu0 %v2046_v50  ;;  %v1489_v48 = vld [vmem:[#allocation2 + $0x118] sm:$0xff]  ;;  %v1570_v50 = vld [vmem:[#allocation2 + $0x3a0] sm:$0xff] }
 0x575   :  { %2757 = vmatprep.mubr.bf16.mxu1 %v9681_v37  ;;  %2962 = vmatprep.mubr.bf16.mxu0 %v9681_v37 }
 0x577   :  { %2728 = vmatpush1.bf16.msra.mxu1 %v2043_v52  ;;  %2933 = vmatpush1.bf16.msra.mxu0 %v2045_v9  ;;  %v1777_v52 = vld [vmem:[#allocation2 + $0xa18] sm:$0xff]  ;;  %v1858_v9 = vld [vmem:[#allocation2 + $0xca0] sm:$0xff] }
 0x578   :  { %2729 = vmatprep.subr.bf16.mxu1 %v2053_v53  ;;  %2934 = vmatprep.subr.bf16.mxu0 %v2055_v10  ;;  %v1498_v53 = vld [vmem:[#allocation2 + $0x160] sm:$0xff]  ;;  %v1579_v10 = vld [vmem:[#allocation2 + $0x3e8] sm:$0xff] }
 0x57b   :  { %2730 = vmatpush1.bf16.msra.mxu1 %v2052_v54  ;;  %2935 = vmatpush1.bf16.msra.mxu0 %v2054_v17  ;;  %v1786_v54 = vld [vmem:[#allocation2 + $0xa60] sm:$0xff]  ;;  %v1867_v17 = vld [vmem:[#allocation2 + $0xce8] sm:$0xff] }
 0x57c   :  { %2731 = vmatprep.subr.bf16.mxu1 %v2062_v55  ;;  %2936 = vmatprep.subr.bf16.mxu0 %v2064_v23  ;;  %v1507_v55 = vld [vmem:[#allocation2 + $0x1a8] sm:$0xff]  ;;  %v1588_v23 = vld [vmem:[#allocation2 + $0x430] sm:$0xff] }
 0x57f   :  { %2732 = vmatpush1.bf16.msra.mxu1 %v2061_v56  ;;  %2937 = vmatpush1.bf16.msra.mxu0 %v2063_v24  ;;  %v1795_v56 = vld [vmem:[#allocation2 + $0xaa8] sm:$0xff]  ;;  %v1876_v24 = vld [vmem:[#allocation2 + $0xd30] sm:$0xff] }
 0x580   :  { %2733 = vmatprep.subr.bf16.mxu1 %v2071_v57  ;;  %2938 = vmatprep.subr.bf16.mxu0 %v2073_v58  ;;  %v1516_v57 = vld [vmem:[#allocation2 + $0x1f0] sm:$0xff]  ;;  %v1597_v58 = vld [vmem:[#allocation2 + $0x478] sm:$0xff] }
 0x583   :  { %2734 = vmatpush1.bf16.msra.mxu1 %v2070_v33  ;;  %2939 = vmatpush1.bf16.msra.mxu0 %v2072_v59  ;;  %v1804_v33 = vld [vmem:[#allocation2 + $0xaf0] sm:$0xff]  ;;  %v1885_v59 = vld [vmem:[#allocation2 + $0xd78] sm:$0xff] }
 0x584   :  { %2735 = vmatprep.subr.bf16.mxu1 %v2080_v42  ;;  %2940 = vmatprep.subr.bf16.mxu0 %v2082_v60  ;;  %v1525_v42 = vld [vmem:[#allocation2 + $0x238] sm:$0xff]  ;;  %v1678_v60 = vld [vmem:[#allocation2 + $0x700] sm:$0xff] }
 0x587   :  { %2736 = vmatpush1.bf16.msra.mxu1 %v2079_v44  ;;  %2941 = vmatpush1.bf16.msra.mxu0 %v2081_v49  ;;  %v1813_v44 = vld [vmem:[#allocation2 + $0xb38] sm:$0xff]  ;;  %v1606_v49 = vld [vmem:[#allocation2 + $0x4c0] sm:$0xff] }
 0x588   :  { %2737 = vmatprep.subr.bf16.mxu1 %v2089_v61  ;;  %2942 = vmatprep.subr.bf16.mxu0 %v2091_v62  ;;  %v1687_v61 = vld [vmem:[#allocation2 + $0x748] sm:$0xff]  ;;  %v9679_v62 = vmov 0.0  }
 0x58b   :  { %2738 = vmatpush1.bf16.msra.mxu1 %v2088_v63  ;;  %2943 = vmatpush1.bf16.msra.mxu0 %v2090_v0  ;;  %v2038_v63 = vld [vmem:[#allocation2 + $0x1240] sm:$0xff]  ;;  %v1615_v0 = vld [vmem:[#allocation2 + $0x508] sm:$0xff] }
 0x58c   :  { %2739 = vmatprep.subr.bf16.mxu1 %v2098_v1  ;;  %2944 = vmatprep.subr.bf16.mxu0 %v2100_v2  ;;  %v1696_v1 = vld [vmem:[#allocation2 + $0x790] sm:$0xff]  ;;  %v2047_v2 = vld [vmem:[#allocation2 + $0x1288] sm:$0xff] }
 0x58f   :  { %2740 = vmatpush1.bf16.msra.mxu1 %v2097_v4  ;;  %2945 = vmatpush1.bf16.msra.mxu0 %v2099_v5  ;;  %v1624_v4 = vld [vmem:[#allocation2 + $0x550] sm:$0xff]  ;;  %v1705_v5 = vld [vmem:[#allocation2 + $0x7d8] sm:$0xff] }
 0x590   :  { %7496 = vmatprep.subr.bf16.mxu1 %v1534_v6  ;;  %7540 = vmatprep.subr.bf16.mxu0 %v1822_v35  ;;  %v2056_v6 = vld [vmem:[#allocation2 + $0x12d0] sm:$0xff]  ;;  %v1633_v35 = vld [vmem:[#allocation2 + $0x598] sm:$0xff] }
 0x592   :  { %2758 = vmatmul.mubr.bf16.vlgmr.msra.gmra.mrb[12].mxu1 %v9204_v34  ;;  %2963 = vmatmul.mubr.bf16.vlgmr.msra.gmra.mrb[16].mxu0 %v9204_v34 }
 0x593   :  { %7497 = vmatpush3.bf16.msra.mxu1 %v1462_v11  ;;  %3003 = vmatprep.mubr.bf16.mxu1 %v9190_v13  ;;  %v1714_v11 = vld [vmem:[#allocation2 + $0x820] sm:$0xff] }
 0x594   :  { %7498 = vmatprep.subr.bf16.mxu1 %v1543_v14  ;;  %7541 = vmatpush3.bf16.msra.mxu0 %v1750_v16  ;;  %v2065_v14 = vld [vmem:[#allocation2 + $0x1318] sm:$0xff]  ;;  %v1642_v16 = vld [vmem:[#allocation2 + $0x5e0] sm:$0xff] }
 0x595   :  { %7542 = vmatprep.subr.bf16.mxu0 %v1831_v38  ;;  %3083 = vmatprep.mubr.bf16.mxu0 %v9198_v25  ;;  %v1723_v38 = vld [vmem:[#allocation2 + $0x868] sm:$0xff] }
 0x597   :  { %7499 = vmatpush3.bf16.msra.mxu1 %v1471_v20  ;;  %v2074_v20 = vld [vmem:[#allocation2 + $0x1360] sm:$0xff] }
 0x598   :  { %7500 = vmatprep.subr.bf16.mxu1 %v1552_v22  ;;  %7543 = vmatpush3.bf16.msra.mxu0 %v1759_v39  ;;  %v1651_v22 = vld [vmem:[#allocation2 + $0x628] sm:$0xff]  ;;  %v1732_v39 = vld [vmem:[#allocation2 + $0x8b0] sm:$0xff] }
 0x599   :  { %7544 = vmatprep.subr.bf16.mxu0 %v1840_v40  ;;  %v2083_v40 = vld [vmem:[#allocation2 + $0x13a8] sm:$0xff] }
 0x59b   :  { %7501 = vmatpush3.bf16.msra.mxu1 %v1480_v43  ;;  %v1660_v43 = vld [vmem:[#allocation2 + $0x670] sm:$0xff] }
 0x59c   :  { %7502 = vmatprep.subr.bf16.mxu1 %v1561_v45  ;;  %7545 = vmatpush3.bf16.msra.mxu0 %v1768_v46  ;;  %v1741_v45 = vld [vmem:[#allocation2 + $0x8f8] sm:$0xff]  ;;  %v2092_v46 = vld [vmem:[#allocation2 + $0x13f0] sm:$0xff] }
 0x59d   :  { %7546 = vmatprep.subr.bf16.mxu0 %v1849_v47  ;;  %v1669_v47 = vld [vmem:[#allocation2 + $0x6b8] sm:$0xff] }
 0x59f   :  { %7503 = vmatpush3.bf16.msra.mxu1 %v1489_v48  ;;  %v1966_v48 = vld [vmem:[#allocation2 + $0x1000] sm:$0xff] }
 0x5a0   :  { %7504 = vmatprep.subr.bf16.mxu1 %v1570_v50  ;;  %7547 = vmatpush3.bf16.msra.mxu0 %v1777_v52  ;;  %v2101_v50 = vld [vmem:[#allocation2 + $0x1438] sm:$0xff]  ;;  %v1894_v52 = vld [vmem:[#allocation2 + $0xdc0] sm:$0xff] }
 0x5a1   :  { %7548 = vmatprep.subr.bf16.mxu0 %v1858_v9  ;;  %v1975_v9 = vld [vmem:[#allocation2 + $0x1048] sm:$0xff] }
 0x5a3   :  { %7505 = vmatpush3.bf16.msra.mxu1 %v1498_v53  ;;  %v1903_v53 = vld [vmem:[#allocation2 + $0xe08] sm:$0xff] }
 0x5a4   :  { %7506 = vmatprep.subr.bf16.mxu1 %v1579_v10  ;;  %7549 = vmatpush3.bf16.msra.mxu0 %v1786_v54  ;;  %v1984_v10 = vld [vmem:[#allocation2 + $0x1090] sm:$0xff] }
 0x5a5   :  { %7550 = vmatprep.subr.bf16.mxu0 %v1867_v17  ;;  %v1912_v54 = vld [vmem:[#allocation2 + $0xe50] sm:$0xff]  ;;  %v1993_v17 = vld [vmem:[#allocation2 + $0x10d8] sm:$0xff] }
 0x5a7   :  { %7507 = vmatpush3.bf16.msra.mxu1 %v1507_v55  ;;  %v1921_v55 = vld [vmem:[#allocation2 + $0xe98] sm:$0xff] }
 0x5a8   :  { %7508 = vmatprep.subr.bf16.mxu1 %v1588_v23  ;;  %7551 = vmatpush3.bf16.msra.mxu0 %v1795_v56  ;;  %v2002_v23 = vld [vmem:[#allocation2 + $0x1120] sm:$0xff] }
 0x5a9   :  { %7552 = vmatprep.subr.bf16.mxu0 %v1876_v24  ;;  %v1930_v56 = vld [vmem:[#allocation2 + $0xee0] sm:$0xff]  ;;  %v2011_v24 = vld [vmem:[#allocation2 + $0x1168] sm:$0xff] }
 0x5ab   :  { %7509 = vmatpush3.bf16.msra.mxu1 %v1516_v57  ;;  %v1939_v57 = vld [vmem:[#allocation2 + $0xf28] sm:$0xff] }
 0x5ac   :  { %7510 = vmatprep.subr.bf16.mxu1 %v1597_v58  ;;  %7553 = vmatpush3.bf16.msra.mxu0 %v1804_v33  ;;  %v2020_v58 = vld [vmem:[#allocation2 + $0x11b0] sm:$0xff] }
 0x5ad   :  { %7554 = vmatprep.subr.bf16.mxu0 %v1885_v59  ;;  %v1948_v33 = vld [vmem:[#allocation2 + $0xf70] sm:$0xff]  ;;  %v2029_v59 = vld [vmem:[#allocation2 + $0x11f8] sm:$0xff] }
 0x5af   :  { %7511 = vmatpush3.bf16.msra.mxu1 %v1525_v42  ;;  %v1957_v42 = vld [vmem:[#allocation2 + $0xfb8] sm:$0xff] }
 0x5b0   :  { %7518 = vmatprep.subr.bf16.mxu1 %v1678_v60  ;;  %7555 = vmatpush3.bf16.msra.mxu0 %v1813_v44 }
 0x5b1   :  { %7884 = vmatprep.subr.bf16.mxu0 %v9679_v62 }
 0x5b2   :  { %3004 = vmatmul.mubr.bf16.vlgmr.msra.gmra.mrb[16].mxu1 %v9188_v32 }
 0x5b3   :  { %7519 = vmatpush3.bf16.msra.mxu1 %v1606_v49  ;;  %3043 = vmatprep.mubr.bf16.mxu1 %v9194_v18 }
 0x5b4   :  { %7520 = vmatprep.subr.bf16.mxu1 %v1687_v61  ;;  %3084 = vmatmul.mubr.bf16.vlgmr.msra.gmra.mrb[20].mxu0 %v9196_v21 }
 0x5b5   :  { %7885 = vmatpush3.bf16.msra.mxu0 %v2038_v63  ;;  %7900 = vmatprep.mubr.msk.bf16.mxu0 %vm8768_vm1, %v9679_v62 }
 0x5b6   :  { %7886 = vmatprep.subr.bf16.mxu0 %v9679_v62 }
 0x5b7   :  { %7521 = vmatpush3.bf16.msra.mxu1 %v1615_v0 }
 0x5b8   :  { %7522 = vmatprep.subr.bf16.mxu1 %v1696_v1 }
 0x5b9   :  { %7887 = vmatpush3.bf16.msra.mxu0 %v2047_v2 }
 0x5ba   :  { %7888 = vmatprep.subr.bf16.mxu0 %v9679_v62 }
 0x5bb   :  { %7523 = vmatpush3.bf16.msra.mxu1 %v1624_v4 }
 0x5bc   :  { %7524 = vmatprep.subr.bf16.mxu1 %v1705_v5 }
 0x5bd   :  { %7889 = vmatpush3.bf16.msra.mxu0 %v2056_v6 }
 0x5be   :  { %7890 = vmatprep.subr.bf16.mxu0 %v9679_v62 }
 0x5bf   :  { %7525 = vmatpush3.bf16.msra.mxu1 %v1633_v35 }
 0x5c0   :  { %7526 = vmatprep.subr.bf16.mxu1 %v1714_v11 }
 0x5c1   :  { %7891 = vmatpush3.bf16.msra.mxu0 %v2065_v14 }
 0x5c2   :  { %7892 = vmatprep.subr.bf16.mxu0 %v9679_v62 }
 0x5c3   :  { %7527 = vmatpush3.bf16.msra.mxu1 %v1642_v16 }
 0x5c4   :  { %7528 = vmatprep.subr.bf16.mxu1 %v1723_v38 }
 0x5c5   :  { %7893 = vmatpush3.bf16.msra.mxu0 %v2074_v20 }
 0x5c6   :  { %7894 = vmatprep.subr.bf16.mxu0 %v9679_v62 }
 0x5c7   :  { %7529 = vmatpush3.bf16.msra.mxu1 %v1651_v22 }
 0x5c8   :  { %7530 = vmatprep.subr.bf16.mxu1 %v1732_v39  ;;  %v7484_v39 = vld [vmem:[#allocation16 + $0x8] ss:$0 sm:$0xff] }
 0x5c9   :  { %7895 = vmatpush3.bf16.msra.mxu0 %v2083_v40 }
 0x5ca   :  { %7896 = vmatprep.subr.bf16.mxu0 %v9679_v62 }
 0x5cb   :  { %7531 = vmatpush3.bf16.msra.mxu1 %v1660_v43 }
 0x5cc   :  { %7532 = vmatprep.subr.bf16.mxu1 %v1741_v45 }
 0x5cd   :  { %7897 = vmatpush3.bf16.msra.mxu0 %v2092_v46 }
 0x5ce   :  { %7898 = vmatprep.subr.bf16.mxu0 %v9679_v62 }
 0x5cf   :  { %7533 = vmatpush3.bf16.msra.mxu1 %v1669_v47 }
 0x5d0   :  { %7562 = vmatprep.subr.bf16.mxu1 %v1966_v48 }
 0x5d1   :  { %7899 = vmatpush3.bf16.msra.mxu0 %v2101_v50 }
 0x5d2   :  { %3044 = vmatmul.mubr.bf16.vlgmr.msra.gmra.mrb[20].mxu1 %v9192_v15 }
 0x5d3   :  { %7563 = vmatpush3.bf16.msra.mxu1 %v1894_v52  ;;  %3123 = vmatprep.mubr.bf16.mxu1 %v9202_v31 }
 0x5d4   :  { %7564 = vmatprep.subr.bf16.mxu1 %v1975_v9  ;;  %7901 = vmatmul.mubr.bf16.vlgmr.msra.gmra.mrb[24].mxu0 %v9204_v34 }
 0x5d7   :  { %7565 = vmatpush3.bf16.msra.mxu1 %v1903_v53 }
 0x5d8   :  { %7566 = vmatprep.subr.bf16.mxu1 %v1984_v10  ;;  %v2102_v10 = vld [vmem:[#allocation16] sm:$0xff] }
 0x5db   :  { %7567 = vmatpush3.bf16.msra.mxu1 %v1912_v54 }
 0x5dc   :  { %7568 = vmatprep.subr.bf16.mxu1 %v1993_v17 }
 0x5df   :  { %7569 = vmatpush3.bf16.msra.mxu1 %v1921_v55  ;;  %v2109_v55 = vrot.slane %v2102_v10, %v9100_v3 }
 0x5e0   :  { %7570 = vmatprep.subr.bf16.mxu1 %v2002_v23  ;;  %v2113_v23 = vrot.slane %v2102_v10, %v9102_v51 }
 0x5e3   :  { %7571 = vmatpush3.bf16.msra.mxu1 %v1930_v56  ;;  %v9278_v56 = vadd.f32 %v9240_v27, %v2109_v55  ;;  %v2121_v27 = vrot.slane %v2102_v10, %v9108_v8 }
 0x5e4   :  { %7572 = vmatprep.subr.bf16.mxu1 %v2011_v24  ;;  %v9281_v24 = vadd.f32 %v9244_v41, %v2113_v23 }
 0x5e7   :  { %7573 = vmatpush3.bf16.msra.mxu1 %v1939_v57  ;;  %v2117_v57 = vrot.slane %v2102_v10, %v9106_v7 }
 0x5e8   :  { %7574 = vmatprep.subr.bf16.mxu1 %v2020_v58  ;;  %v3185_v58 = vmul.f32 %v9278_v56, %v9278_v56 }
 0x5eb   :  { %7575 = vmatpush3.bf16.msra.mxu1 %v1948_v33  ;;  %v3175_v33 = vadd.f32 %v9281_v24, %v9278_v56 }
 0x5ec   :  { %7576 = vmatprep.subr.bf16.mxu1 %v2029_v59  ;;  %v3186_v59 = vmul.f32 %v9281_v24, %v9281_v24 }
 0x5ee   :  { %v3194_v41 = vadd.f32 %v3186_v59, %v3185_v58 }
 0x5ef   :  { %7577 = vmatpush3.bf16.msra.mxu1 %v1957_v42  ;;  %v9291_v42 = vadd.f32 %v9242_v29, %v2117_v57 }
 0x5f2   :  { %3124 = vmatmul.mubr.bf16.vlgmr.msra.gmra.mrb[24].mxu1 %v9200_v28 }
 0x665   :  { %v2759_v60 = vpop.f32.mrb[12].mxu1  ;;  %v2964_v44 = vpop.f32.mrb[16].mxu0 }
 0x666   :  { %v2761_v49 = vpop.f32.mrb[13].mxu1  ;;  %v9273_v61 = vpop.f32.mrb[17].mxu0 }
 0x667   :  { %v2763_v63 = vpop.f32.mrb[14].mxu1  ;;  %v2968_v0 = vpop.f32.mrb[18].mxu0 }
 0x668   :  { %v2764_v1 = vpop.f32.mrb[15].mxu1  ;;  %v2969_v2 = vpop.f32.mrb[19].mxu0  ;;  %v2125_v63 = vrot.slane %v2102_v10, %v9115_v12  ;;  %v3176_v0 = vadd.f32 %v9291_v42, %v3175_v33 }
 0x669   :  { %v3187_v1 = vmul.f32 %v9291_v42, %v9291_v42  ;;  %v9299_v2 = vadd.f32 %v9246_v36, %v2121_v27  ;;  %v2133_v36 = vrot.slane %v2102_v10, %v9137_v26 }
 0x66b   :  { %v3177_v29 = vadd.f32 %v9299_v2, %v3176_v0 }
 0x685   :  { %v7512_v4 = vpop.f32.mrb[16].mxu1 }
 0x686   :  { %v7513_v5 = vpop.f32.mrb[17].mxu1 }
 0x687   :  { %v7514_v6 = vadd.f32 %v7513_v5, %v7512_v4  ;;  %v7515_v35 = vpop.f32.mrb[18].mxu1  ;;  %v7556_v11 = vpop.f32.mrb[20].mxu0  ;;  %v9301_v4 = vadd.f32 %v2759_v60, %v2125_v63  ;;  %v2129_v5 = vrot.slane %v2102_v10, %v9127_v19 }
 0x688   :  { %v7516_v14 = vpop.f32.mrb[19].mxu1  ;;  %v7557_v16 = vpop.f32.mrb[21].mxu0  ;;  %v3188_v35 = vmul.f32 %v9299_v2, %v9299_v2 }
 0x689   :  { %v7558_v38 = vadd.f32 %v7557_v16, %v7556_v11  ;;  %v7559_v20 = vpop.f32.mrb[22].mxu0  ;;  %v3006_v45 = vadd.f32 %v7514_v6, %v7484_v39  ;;  %v3195_v6 = vadd.f32 %v3194_v41, %v3187_v1  ;;  %v3178_v11 = vadd.f32 %v9301_v4, %v3177_v29 }
 0x68a   :  { %v7560_v22 = vpop.f32.mrb[23].mxu0  ;;  %v3189_v14 = vmul.f32 %v9301_v4, %v9301_v4  ;;  %v9310_v16 = vadd.f32 %v2761_v49, %v2129_v5  ;;  %v9316_v39 = vadd.f32 %v2964_v44, %v2133_v36 }
 0x68c   :  { %v3179_v20 = vadd.f32 %v9310_v16, %v3178_v11  ;;  %v3190_v22 = vmul.f32 %v9310_v16, %v9310_v16 }
 0x68e   :  { %v3180_v49 = vadd.f32 %v9316_v39, %v3179_v20 }
 0x6a5   :  { %v7534_v40 = vpop.f32.mrb[20].mxu1 }
 0x6a6   :  { %v7535_v43 = vpop.f32.mrb[21].mxu1 }
 0x6a7   :  { %v7536_v46 = vadd.f32 %v7535_v43, %v7534_v40  ;;  %v7537_v47 = vpop.f32.mrb[22].mxu1  ;;  %v3165_v48 = vpop.f32.mrb[24].mxu0  ;;  %v2137_v40 = vrot.slane %v2102_v10, %v9142_v30 }
 0x6a8   :  { %v7538_v50 = vpop.f32.mrb[23].mxu1  ;;  %v7902_v52 = vpop.f32.mrb[25].mxu0 }
 0x6a9   :  { %v3046_v9 = vadd.f32 %v7536_v46, %v3006_v45  ;;  %v3168_v53 = vpop.f32.mrb[26].mxu0 }
 0x6aa   :  { %v7903_v54 = vpop.f32.mrb[27].mxu0  ;;  %v7971_v53 = vadd.f32 %v9273_v61, %v2137_v40  ;;  %v3171_v61 = vld [vmem:[#allocation18] sm:$0xff] }
 0x6ab   :  { %v3086_v17 = vadd.f32 %v7558_v38, %v3046_v9  ;;  %v3196_v38 = vadd.f32 %v3195_v6, %v3188_v35  ;;  %v3191_v9 = vmul.f32 %v9316_v39, %v9316_v39  ;;  %v3238_v35 = vrot.slane %v3171_v61, %v9102_v51 }
 0x6ac   :  { %v3181_v23 = vadd.f32 %v7971_v53, %v3180_v49  ;;  %v3192_v57 = vmul.f32 %v7971_v53, %v7971_v53  ;;  %v3242_v11 = vrot.slane %v3171_v61, %v9106_v7  ;;  %v3254_v36 = vrot.slane %v3171_v61, %v9127_v19 }
 0x6ad   :  { %v3197_v60 = vadd.f32 %v3196_v38, %v3189_v14  ;;  %v3246_v14 = vrot.slane %v3171_v61, %v9108_v8  ;;  %v3250_v38 = vrot.slane %v3171_v61, %v9115_v12  ;;  %v3262_v20 = vrot.slane %v3171_v61, %v9142_v30 }
 0x6af   :  { %v3198_v46 = vadd.f32 %v3197_v60, %v3190_v22  ;;  %v3258_v60 = vrot.slane %v3171_v61, %v9137_v26 }
 0x6b1   :  { %v3199_v44 = vadd.f32 %v3198_v46, %v3191_v9 }
 0x6b3   :  { %v3200_v33 = vadd.f32 %v3199_v44, %v3192_v57 }
 0x6c5   :  { %v7578_v43 = vpop.f32.mrb[24].mxu1 }
 0x6c6   :  { %v7579_v45 = vpop.f32.mrb[25].mxu1 }
 0x6c7   :  { %v7580_v47 = vadd.f32 %v7579_v45, %v7578_v43  ;;  %v7581_v50 = vpop.f32.mrb[26].mxu1 }
 0x6c8   :  { %v7582_v52 = vpop.f32.mrb[27].mxu1 }
 0x6c9   :  { %v3126_v54 = vadd.f32 %v7580_v47, %v3086_v17  ;;  %v3234_v17 = vrot.slane %v3171_v61, %v9100_v3 }
 0x6cb   :  { %v3166_v55 = vadd.f32 %v3165_v48, %v3126_v54  ;;  %v3173_v48 = vld [vmem:[#allocation19] sm:$0xff] }
 0x6cc   :  { %v3290_v22 = vrot.slane %v3173_v48, %v9100_v3  ;;  %v3294_v40 = vrot.slane %v3173_v48, %v9102_v51  ;;  %v3298_v43 = vrot.slane %v3173_v48, %v9106_v7  ;;  %v3302_v45 = vrot.slane %v3173_v48, %v9108_v8 }
 0x6cd   :  { %v3182_v58 = vadd.f32 %v3181_v23, %v3166_v55  ;;  %v3193_v10 = vmul.f32 %v3166_v55, %v3166_v55  ;;  %v3306_v46 = vrot.slane %v3173_v48, %v9115_v12  ;;  %v3310_v50 = vrot.slane %v3173_v48, %v9127_v19 }
 0x6ce   :  { %v3314_v49 = vrot.slane %v3173_v48, %v9137_v26  ;;  %v3318_v52 = vrot.slane %v3173_v48, %v9142_v30  ;;  %v7486_v48 = vld [vmem:[#allocation19 + $0x8] ss:$0 sm:$0xff] }
 0x6cf   :  { %3183 = vadd.xlane.f32.xlu0 %v3182_v58  ;;  %v3201_v59 = vadd.f32 %v3200_v33, %v3193_v10 }
 0x6d3   :  { %3202 = vadd.xlane.f32.xlu0 %v3201_v59 }
 0x75c   :  { %v3184_v27 = vpop.xlane.xlu0 %3183 }
 0x75d   :  { %v3204_v63 = vmul.f32 0.00097276265, %v3184_v27 }
 0x75f   :  { %v3206_v0 = vmul.f32 %v3204_v63, %v3204_v63  ;;  %v3211_v47 = vsub.f32 %v9278_v56, %v3204_v63  ;;  %v3212_v9 = vsub.f32 %v9281_v24, %v3204_v63  ;;  %v3213_v54 = vsub.f32 %v9291_v42, %v3204_v63 }
 0x760   :  { %v3203_v41 = vpop.xlane.xlu0 %3202  ;;  %v3214_v23 = vsub.f32 %v9299_v2, %v3204_v63  ;;  %v3215_v44 = vsub.f32 %v9301_v4, %v3204_v63  ;;  %v3216_v58 = vsub.f32 %v9310_v16, %v3204_v63  ;;  %v3217_v10 = vsub.f32 %v9316_v39, %v3204_v63 }
 0x761   :  { %v3205_v1 = vmul.f32 0.00097276265, %v3203_v41  ;;  %v3218_v56 = vsub.f32 %v7971_v53, %v3204_v63  ;;  %v3219_v33 = vsub.f32 %v3166_v55, %v3204_v63 }
 0x763   :  { %v3207_v5 = vsub.f32 %v3205_v1, %v3206_v0  ;;  %v7485_v1 = vld [vmem:[#allocation18 + $0x8] ss:$0 sm:$0xff] }
 0x765   :  { %v3208_v29 = vmax.f32 %v3207_v5, 0.0 }
 0x767   :  { %v3209_v6 = vadd.f32 1e-05, %v3208_v29 }
 0x769   :  { %8376 = vrsqrt.f32 %v3209_v6 }
 0x773   :  { %v8377_v57 = vpop.eup %8376 }
 0x774   :  { %v3220_v59 = vmul.f32 %v8377_v57, %v3211_v47  ;;  %v3221_v27 = vmul.f32 %v8377_v57, %v3212_v9  ;;  %v3222_v41 = vmul.f32 %v8377_v57, %v3213_v54  ;;  %v3223_v0 = vmul.f32 %v8377_v57, %v3214_v23 }
 0x775   :  { %v3224_v5 = vmul.f32 %v8377_v57, %v3215_v44  ;;  %v3225_v24 = vmul.f32 %v8377_v57, %v3216_v58  ;;  %v3226_v29 = vmul.f32 %v8377_v57, %v3217_v10  ;;  %v3227_v42 = vmul.f32 %v8377_v57, %v3218_v56 }
 0x776   :  { %v3228_v6 = vmul.f32 %v8377_v57, %v3219_v33  ;;  %v3276_v2 = vmul.f32 %v3234_v17, %v3220_v59  ;;  %v3277_v61 = vmul.f32 %v3238_v35, %v3221_v27  ;;  %v3278_v4 = vmul.f32 %v3242_v11, %v3222_v41 }
 0x777   :  { %v3279_v62 = vmul.f32 %v3246_v14, %v3223_v0  ;;  %v3280_v16 = vmul.f32 %v3250_v38, %v3224_v5  ;;  %v3281_v37 = vmul.f32 %v3254_v36, %v3225_v24  ;;  %v3282_v39 = vmul.f32 %v3258_v60, %v3226_v29 }
 0x778   :  { %v3283_v53 = vmul.f32 %v3262_v20, %v3227_v42  ;;  %v3284_v55 = vmul.f32 %v7485_v1, %v3228_v6  ;;  %v3332_v63 = vadd.f32 %v3290_v22, %v3276_v2  ;;  %v3333_v47 = vadd.f32 %v3294_v40, %v3277_v61 }
 0x779   :  { %v3334_v9 = vadd.f32 %v3298_v43, %v3278_v4  ;;  %v3335_v54 = vadd.f32 %v3302_v45, %v3279_v62  ;;  %v3336_v23 = vadd.f32 %v3306_v46, %v3280_v16  ;;  %v3337_v44 = vadd.f32 %v3310_v50, %v3281_v37 }
 0x77a   :  { %v3338_v58 = vadd.f32 %v3314_v49, %v3282_v39  ;;  %v3339_v10 = vadd.f32 %v3318_v52, %v3283_v53  ;;  %v3340_v56 = vadd.f32 %v7486_v48, %v3284_v55  ;;  %v3341_v57 = vmax.f32 %v3332_v63, 0.0 }
 0x77b   :  { %v3342_v17 = vmax.f32 %v3333_v47, 0.0  ;;  %v3343_v35 = vmax.f32 %v3334_v9, 0.0  ;;  %v3344_v11 = vmax.f32 %v3335_v54, 0.0  ;;  %v3345_v33 = vmax.f32 %v3336_v23, 0.0 }
 0x77c   :  { %v3346_v14 = vmax.f32 %v3337_v44, 0.0  ;;  %v3347_v38 = vmax.f32 %v3338_v58, 0.0  ;;  %v3348_v36 = vmax.f32 %v3339_v10, 0.0  ;;  %v3349_v60 = vmax.f32 %v3340_v56, 0.0 }
 0x77d   :  { %v3350_v20 = vpack.c.bf16 %v3341_v57, %v3341_v57  ;;  %v3351_v59 = vpack.c.bf16 %v3342_v17, %v3342_v17  ;;  %v3352_v22 = vpack.c.bf16 %v3343_v35, %v3343_v35  ;;  %v3353_v40 = vpack.c.bf16 %v3344_v11, %v3344_v11 }
 0x77e   :  { %v3354_v43 = vpack.c.bf16 %v3345_v33, %v3345_v33  ;;  %v3355_v62 = vpack.c.bf16 %v3346_v14, %v3346_v14  ;;  %v3356_v45 = vpack.c.bf16 %v3347_v38, %v3347_v38  ;;  %v3357_v37 = vpack.c.bf16 %v3348_v36, %v3348_v36 }
 0x77f   :  { %v3358_v46 = vpack.c.bf16 %v3349_v60, %v3349_v60  ;;  %v9347_v50 = vadd.bf16 %v3350_v20, %v9188_v32  ;;  %v9350_v49 = vadd.bf16 %v3351_v59, %v9190_v13  ;;  %v9353_v52 = vadd.bf16 %v3352_v22, %v9192_v15 }
 0x780   :  { %v9356_v27 = vadd.bf16 %v3353_v40, %v9194_v18  ;;  %v9359_v41 = vadd.bf16 %v3354_v43, %v9196_v21  ;;  %v9362_v0 = vadd.bf16 %v3355_v62, %v9198_v25  ;;  %v9365_v1 = vadd.bf16 %v3356_v45, %v9200_v28 }
 0x781   :  { %v9368_v32 = vadd.bf16 %v3357_v37, %v9202_v31  ;;  %v9371_v13 = vadd.bf16 %v3358_v46, %v9204_v34 }
 0x782   :  { %8726 = dma.done.wait [#allocation6 + $0x1], 82944 }
 0x783   :  { %8727 = vsyncadd [#allocation6 + $0x1], 4294884352  ;;  %4105 = vmatprep.mubr.bf16.mxu1 %v9350_v49  ;;  %4310 = vmatprep.mubr.bf16.mxu0 %v9350_v49  ;;  %v3377_v15 = vld [vmem:[#allocation3 + $0x8] sm:$0xff]  ;;  %v3379_v18 = vld [vmem:[#allocation3 + $0x18] sm:$0xff] }
 0x784   :  { %v3376_v21 = vld [vmem:[#allocation3] sm:$0xff]  ;;  %4073 = vmatprep.subr.bf16.mxu1 %v3377_v15  ;;  %4278 = vmatprep.subr.bf16.mxu0 %v3379_v18  ;;  %v3378_v25 = vld [vmem:[#allocation3 + $0x10] sm:$0xff]  ;;  %v3385_v31 = vld [vmem:[#allocation3 + $0x48] sm:$0xff] }
 0x785   :  { %v3386_v28 = vld [vmem:[#allocation3 + $0x50] sm:$0xff]  ;;  %v3388_v5 = vld [vmem:[#allocation3 + $0x60] sm:$0xff]  ;;  %4074 = vmatpush1.bf16.msra.mxu1 %v3376_v21  ;;  %4279 = vmatpush1.bf16.msra.mxu0 %v3378_v25  ;;  %v3387_v34 = vld [vmem:[#allocation3 + $0x58] sm:$0xff] }
 0x786   :  { %4075 = vmatprep.subr.bf16.mxu1 %v3386_v28  ;;  %4280 = vmatprep.subr.bf16.mxu0 %v3388_v5  ;;  %v3395_v24 = vld [vmem:[#allocation3 + $0x98] sm:$0xff]  ;;  %v3397_v29 = vld [vmem:[#allocation3 + $0xa8] sm:$0xff]  ;;  %v3394_v42 = vld [vmem:[#allocation3 + $0x90] sm:$0xff] }
 0x787   :  { %v3396_v6 = vld [vmem:[#allocation3 + $0xa0] sm:$0xff]  ;;  %v3406_v61 = vld [vmem:[#allocation3 + $0xf0] sm:$0xff]  ;;  %v3403_v4 = vld [vmem:[#allocation3 + $0xd8] sm:$0xff] }
 0x788   :  { %v3404_v2 = vld [vmem:[#allocation3 + $0xe0] sm:$0xff]  ;;  %v3405_v48 = vld [vmem:[#allocation3 + $0xe8] sm:$0xff]  ;;  %v3415_v39 = vld [vmem:[#allocation3 + $0x138] sm:$0xff] }
 0x789   :  { %4076 = vmatpush1.bf16.msra.mxu1 %v3385_v31  ;;  %4281 = vmatpush1.bf16.msra.mxu0 %v3387_v34  ;;  %v3413_v16 = vld [vmem:[#allocation3 + $0x128] sm:$0xff]  ;;  %v3412_v53 = vld [vmem:[#allocation3 + $0x120] sm:$0xff]  ;;  %v3414_v55 = vld [vmem:[#allocation3 + $0x130] sm:$0xff] }
 0x78a   :  { %4077 = vmatprep.subr.bf16.mxu1 %v3395_v24  ;;  %4282 = vmatprep.subr.bf16.mxu0 %v3397_v29  ;;  %v3422_v63 = vld [vmem:[#allocation3 + $0x170] sm:$0xff]  ;;  %v3424_v47 = vld [vmem:[#allocation3 + $0x180] sm:$0xff]  ;;  %v3421_v9 = vld [vmem:[#allocation3 + $0x168] sm:$0xff] }
 0x78b   :  { %v3423_v54 = vld [vmem:[#allocation3 + $0x178] sm:$0xff]  ;;  %v3433_v44 = vld [vmem:[#allocation3 + $0x1c8] sm:$0xff]  ;;  %v3430_v58 = vld [vmem:[#allocation3 + $0x1b0] sm:$0xff] }
 0x78c   :  { %v3431_v23 = vld [vmem:[#allocation3 + $0x1b8] sm:$0xff]  ;;  %v3432_v10 = vld [vmem:[#allocation3 + $0x1c0] sm:$0xff]  ;;  %v3442_v57 = vld [vmem:[#allocation3 + $0x210] sm:$0xff] }
 0x78d   :  { %4078 = vmatpush1.bf16.msra.mxu1 %v3394_v42  ;;  %4283 = vmatpush1.bf16.msra.mxu0 %v3396_v6  ;;  %v3440_v56 = vld [vmem:[#allocation3 + $0x200] sm:$0xff]  ;;  %v3439_v17 = vld [vmem:[#allocation3 + $0x1f8] sm:$0xff]  ;;  %v3441_v35 = vld [vmem:[#allocation3 + $0x208] sm:$0xff] }
 0x78e   :  { %4079 = vmatprep.subr.bf16.mxu1 %v3404_v2  ;;  %4284 = vmatprep.subr.bf16.mxu0 %v3406_v61  ;;  %v3449_v11 = vld [vmem:[#allocation3 + $0x248] sm:$0xff]  ;;  %v3451_v33 = vld [vmem:[#allocation3 + $0x258] sm:$0xff]  ;;  %v3448_v14 = vld [vmem:[#allocation3 + $0x240] sm:$0xff] }
 0x78f   :  { %v3450_v38 = vld [vmem:[#allocation3 + $0x250] sm:$0xff]  ;;  %v3460_v60 = vld [vmem:[#allocation3 + $0x2a0] sm:$0xff]  ;;  %v3457_v20 = vld [vmem:[#allocation3 + $0x288] sm:$0xff] }
 0x790   :  { %v3458_v36 = vld [vmem:[#allocation3 + $0x290] sm:$0xff]  ;;  %v3459_v59 = vld [vmem:[#allocation3 + $0x298] sm:$0xff]  ;;  %v3469_v40 = vld [vmem:[#allocation3 + $0x2e8] sm:$0xff] }
 0x791   :  { %4080 = vmatpush1.bf16.msra.mxu1 %v3403_v4  ;;  %4285 = vmatpush1.bf16.msra.mxu0 %v3405_v48  ;;  %v3467_v22 = vld [vmem:[#allocation3 + $0x2d8] sm:$0xff]  ;;  %v3466_v43 = vld [vmem:[#allocation3 + $0x2d0] sm:$0xff]  ;;  %v3468_v62 = vld [vmem:[#allocation3 + $0x2e0] sm:$0xff] }
 0x792   :  { %4081 = vmatprep.subr.bf16.mxu1 %v3413_v16  ;;  %4286 = vmatprep.subr.bf16.mxu0 %v3415_v39  ;;  %v3476_v45 = vld [vmem:[#allocation3 + $0x320] sm:$0xff]  ;;  %v3478_v37 = vld [vmem:[#allocation3 + $0x330] sm:$0xff]  ;;  %v3475_v46 = vld [vmem:[#allocation3 + $0x318] sm:$0xff] }
 0x793   :  { %v3477_v15 = vld [vmem:[#allocation3 + $0x328] sm:$0xff]  ;;  %v3487_v21 = vld [vmem:[#allocation3 + $0x378] sm:$0xff]  ;;  %v3484_v25 = vld [vmem:[#allocation3 + $0x360] sm:$0xff] }
 0x794   :  { %v3485_v18 = vld [vmem:[#allocation3 + $0x368] sm:$0xff]  ;;  %v3486_v28 = vld [vmem:[#allocation3 + $0x370] sm:$0xff]  ;;  %v3496_v31 = vld [vmem:[#allocation3 + $0x3c0] sm:$0xff] }
 0x795   :  { %4082 = vmatpush1.bf16.msra.mxu1 %v3412_v53  ;;  %4287 = vmatpush1.bf16.msra.mxu0 %v3414_v55  ;;  %v3494_v5 = vld [vmem:[#allocation3 + $0x3b0] sm:$0xff]  ;;  %v3493_v34 = vld [vmem:[#allocation3 + $0x3a8] sm:$0xff]  ;;  %v3495_v24 = vld [vmem:[#allocation3 + $0x3b8] sm:$0xff] }
 0x796   :  { %4083 = vmatprep.subr.bf16.mxu1 %v3422_v63  ;;  %4288 = vmatprep.subr.bf16.mxu0 %v3424_v47  ;;  %v3503_v29 = vld [vmem:[#allocation3 + $0x3f8] sm:$0xff]  ;;  %v3505_v42 = vld [vmem:[#allocation3 + $0x408] sm:$0xff]  ;;  %v3502_v6 = vld [vmem:[#allocation3 + $0x3f0] sm:$0xff] }
 0x797   :  { %v3504_v2 = vld [vmem:[#allocation3 + $0x400] sm:$0xff]  ;;  %v3514_v4 = vld [vmem:[#allocation3 + $0x450] sm:$0xff]  ;;  %v3511_v48 = vld [vmem:[#allocation3 + $0x438] sm:$0xff] }
 0x798   :  { %v3512_v61 = vld [vmem:[#allocation3 + $0x440] sm:$0xff]  ;;  %v3513_v16 = vld [vmem:[#allocation3 + $0x448] sm:$0xff]  ;;  %v3523_v53 = vld [vmem:[#allocation3 + $0x498] sm:$0xff] }
 0x799   :  { %4084 = vmatpush1.bf16.msra.mxu1 %v3421_v9  ;;  %4289 = vmatpush1.bf16.msra.mxu0 %v3423_v54  ;;  %v3521_v39 = vld [vmem:[#allocation3 + $0x488] sm:$0xff]  ;;  %v3520_v55 = vld [vmem:[#allocation3 + $0x480] sm:$0xff]  ;;  %v3522_v63 = vld [vmem:[#allocation3 + $0x490] sm:$0xff] }
 0x79a   :  { %4085 = vmatprep.subr.bf16.mxu1 %v3431_v23  ;;  %4290 = vmatprep.subr.bf16.mxu0 %v3433_v44  ;;  %v3530_v47 = vld [vmem:[#allocation3 + $0x4d0] sm:$0xff]  ;;  %v3532_v9 = vld [vmem:[#allocation3 + $0x4e0] sm:$0xff]  ;;  %v3529_v54 = vld [vmem:[#allocation3 + $0x4c8] sm:$0xff] }
 0x79b   :  { %v3531_v23 = vld [vmem:[#allocation3 + $0x4d8] sm:$0xff] }
 0x79c   :  { %v3539_v44 = vld [vmem:[#allocation3 + $0x518] sm:$0xff] }
 0x79d   :  { %4086 = vmatpush1.bf16.msra.mxu1 %v3430_v58  ;;  %4291 = vmatpush1.bf16.msra.mxu0 %v3432_v10  ;;  %v3541_v58 = vld [vmem:[#allocation3 + $0x528] sm:$0xff]  ;;  %v3538_v10 = vld [vmem:[#allocation3 + $0x510] sm:$0xff] }
 0x79e   :  { %4087 = vmatprep.subr.bf16.mxu1 %v3440_v56  ;;  %4292 = vmatprep.subr.bf16.mxu0 %v3442_v57  ;;  %v3540_v56 = vld [vmem:[#allocation3 + $0x520] sm:$0xff] }
 0x79f   :  { %v3548_v57 = vld [vmem:[#allocation3 + $0x560] sm:$0xff] }
 0x7a1   :  { %4088 = vmatpush1.bf16.msra.mxu1 %v3439_v17  ;;  %4293 = vmatpush1.bf16.msra.mxu0 %v3441_v35  ;;  %v3550_v17 = vld [vmem:[#allocation3 + $0x570] sm:$0xff]  ;;  %v3547_v35 = vld [vmem:[#allocation3 + $0x558] sm:$0xff] }
 0x7a2   :  { %4089 = vmatprep.subr.bf16.mxu1 %v3449_v11  ;;  %4294 = vmatprep.subr.bf16.mxu0 %v3451_v33  ;;  %v3549_v11 = vld [vmem:[#allocation3 + $0x568] sm:$0xff] }
 0x7a3   :  { %v3557_v33 = vld [vmem:[#allocation3 + $0x5a8] sm:$0xff] }
 0x7a5   :  { %4090 = vmatpush1.bf16.msra.mxu1 %v3448_v14  ;;  %4295 = vmatpush1.bf16.msra.mxu0 %v3450_v38  ;;  %v3559_v14 = vld [vmem:[#allocation3 + $0x5b8] sm:$0xff]  ;;  %v3556_v38 = vld [vmem:[#allocation3 + $0x5a0] sm:$0xff] }
 0x7a6   :  { %4091 = vmatprep.subr.bf16.mxu1 %v3458_v36  ;;  %4296 = vmatprep.subr.bf16.mxu0 %v3460_v60  ;;  %v3558_v36 = vld [vmem:[#allocation3 + $0x5b0] sm:$0xff] }
 0x7a7   :  { %v3566_v60 = vld [vmem:[#allocation3 + $0x5f0] sm:$0xff] }
 0x7a9   :  { %4092 = vmatpush1.bf16.msra.mxu1 %v3457_v20  ;;  %4297 = vmatpush1.bf16.msra.mxu0 %v3459_v59  ;;  %v3568_v20 = vld [vmem:[#allocation3 + $0x600] sm:$0xff]  ;;  %v3565_v59 = vld [vmem:[#allocation3 + $0x5e8] sm:$0xff] }
 0x7aa   :  { %4093 = vmatprep.subr.bf16.mxu1 %v3467_v22  ;;  %4298 = vmatprep.subr.bf16.mxu0 %v3469_v40  ;;  %v3567_v22 = vld [vmem:[#allocation3 + $0x5f8] sm:$0xff] }
 0x7ab   :  { %v3575_v40 = vld [vmem:[#allocation3 + $0x638] sm:$0xff] }
 0x7ad   :  { %4094 = vmatpush1.bf16.msra.mxu1 %v3466_v43  ;;  %4299 = vmatpush1.bf16.msra.mxu0 %v3468_v62  ;;  %v3577_v43 = vld [vmem:[#allocation3 + $0x648] sm:$0xff]  ;;  %v3574_v62 = vld [vmem:[#allocation3 + $0x630] sm:$0xff] }
 0x7ae   :  { %4095 = vmatprep.subr.bf16.mxu1 %v3476_v45  ;;  %4300 = vmatprep.subr.bf16.mxu0 %v3478_v37  ;;  %v3576_v45 = vld [vmem:[#allocation3 + $0x640] sm:$0xff] }
 0x7af   :  { %v3584_v37 = vld [vmem:[#allocation3 + $0x680] sm:$0xff] }
 0x7b1   :  { %4096 = vmatpush1.bf16.msra.mxu1 %v3475_v46  ;;  %4301 = vmatpush1.bf16.msra.mxu0 %v3477_v15  ;;  %v3586_v46 = vld [vmem:[#allocation3 + $0x690] sm:$0xff]  ;;  %v3583_v15 = vld [vmem:[#allocation3 + $0x678] sm:$0xff] }
 0x7b2   :  { %4097 = vmatprep.subr.bf16.mxu1 %v3485_v18  ;;  %4302 = vmatprep.subr.bf16.mxu0 %v3487_v21  ;;  %v3585_v18 = vld [vmem:[#allocation3 + $0x688] sm:$0xff] }
 0x7b3   :  { %v3593_v21 = vld [vmem:[#allocation3 + $0x6c8] sm:$0xff] }
 0x7b5   :  { %4098 = vmatpush1.bf16.msra.mxu1 %v3484_v25  ;;  %4303 = vmatpush1.bf16.msra.mxu0 %v3486_v28  ;;  %v3595_v25 = vld [vmem:[#allocation3 + $0x6d8] sm:$0xff]  ;;  %v3592_v28 = vld [vmem:[#allocation3 + $0x6c0] sm:$0xff] }
 0x7b6   :  { %4099 = vmatprep.subr.bf16.mxu1 %v3494_v5  ;;  %4304 = vmatprep.subr.bf16.mxu0 %v3496_v31  ;;  %v3594_v5 = vld [vmem:[#allocation3 + $0x6d0] sm:$0xff] }
 0x7b7   :  { %v3602_v31 = vld [vmem:[#allocation3 + $0x710] sm:$0xff] }
 0x7b9   :  { %4100 = vmatpush1.bf16.msra.mxu1 %v3493_v34  ;;  %4305 = vmatpush1.bf16.msra.mxu0 %v3495_v24  ;;  %v3604_v34 = vld [vmem:[#allocation3 + $0x720] sm:$0xff]  ;;  %v3601_v24 = vld [vmem:[#allocation3 + $0x708] sm:$0xff] }
 0x7ba   :  { %4101 = vmatprep.subr.bf16.mxu1 %v3503_v29  ;;  %4306 = vmatprep.subr.bf16.mxu0 %v3505_v42  ;;  %v3603_v29 = vld [vmem:[#allocation3 + $0x718] sm:$0xff] }
 0x7bb   :  { %v3611_v42 = vld [vmem:[#allocation3 + $0x758] sm:$0xff] }
 0x7bd   :  { %4102 = vmatpush1.bf16.msra.mxu1 %v3502_v6  ;;  %4307 = vmatpush1.bf16.msra.mxu0 %v3504_v2  ;;  %v3613_v6 = vld [vmem:[#allocation3 + $0x768] sm:$0xff]  ;;  %v3610_v2 = vld [vmem:[#allocation3 + $0x750] sm:$0xff] }
 0x7be   :  { %4103 = vmatprep.subr.bf16.mxu1 %v3512_v61  ;;  %4308 = vmatprep.subr.bf16.mxu0 %v3514_v4  ;;  %v3612_v61 = vld [vmem:[#allocation3 + $0x760] sm:$0xff] }
 0x7bf   :  { %v3620_v4 = vld [vmem:[#allocation3 + $0x7a0] sm:$0xff] }
 0x7c1   :  { %4104 = vmatpush1.bf16.msra.mxu1 %v3511_v48  ;;  %4309 = vmatpush1.bf16.msra.mxu0 %v3513_v16  ;;  %v3622_v48 = vld [vmem:[#allocation3 + $0x7b0] sm:$0xff]  ;;  %v3619_v16 = vld [vmem:[#allocation3 + $0x798] sm:$0xff] }
 0x7c2   :  { %4114 = vmatprep.subr.bf16.mxu1 %v3521_v39  ;;  %4319 = vmatprep.subr.bf16.mxu0 %v3523_v53  ;;  %v3621_v39 = vld [vmem:[#allocation3 + $0x7a8] sm:$0xff] }
 0x7c3   :  { %v3629_v53 = vld [vmem:[#allocation3 + $0x7e8] sm:$0xff] }
 0x7c4   :  { %4106 = vmatmul.mubr.bf16.vlgmr.msra.gmra.mrb[28].mxu1 %v9347_v50  ;;  %4311 = vmatmul.mubr.bf16.vlgmr.msra.gmra.mrb[28].mxu0 %v9347_v50 }
 0x7c5   :  { %4115 = vmatpush1.bf16.msra.mxu1 %v3520_v55  ;;  %4320 = vmatpush1.bf16.msra.mxu0 %v3522_v63  ;;  %v3631_v55 = vld [vmem:[#allocation3 + $0x7f8] sm:$0xff]  ;;  %v3628_v63 = vld [vmem:[#allocation3 + $0x7e0] sm:$0xff] }
 0x7c6   :  { %4116 = vmatprep.subr.bf16.mxu1 %v3530_v47  ;;  %4321 = vmatprep.subr.bf16.mxu0 %v3532_v9  ;;  %v3630_v47 = vld [vmem:[#allocation3 + $0x7f0] sm:$0xff] }
 0x7c7   :  { %4146 = vmatprep.mubr.bf16.mxu1 %v9356_v27  ;;  %4351 = vmatprep.mubr.bf16.mxu0 %v9356_v27  ;;  %v3638_v9 = vld [vmem:[#allocation3 + $0x830] sm:$0xff] }
 0x7c9   :  { %4117 = vmatpush1.bf16.msra.mxu1 %v3529_v54  ;;  %4322 = vmatpush1.bf16.msra.mxu0 %v3531_v23  ;;  %v3640_v54 = vld [vmem:[#allocation3 + $0x840] sm:$0xff]  ;;  %v3637_v23 = vld [vmem:[#allocation3 + $0x828] sm:$0xff] }
 0x7ca   :  { %4118 = vmatprep.subr.bf16.mxu1 %v3539_v44  ;;  %4323 = vmatprep.subr.bf16.mxu0 %v3541_v58  ;;  %v3639_v44 = vld [vmem:[#allocation3 + $0x838] sm:$0xff] }
 0x7cb   :  { %v3647_v58 = vld [vmem:[#allocation3 + $0x878] sm:$0xff] }
 0x7cd   :  { %4119 = vmatpush1.bf16.msra.mxu1 %v3538_v10  ;;  %4324 = vmatpush1.bf16.msra.mxu0 %v3540_v56  ;;  %v3649_v10 = vld [vmem:[#allocation3 + $0x888] sm:$0xff]  ;;  %v3646_v56 = vld [vmem:[#allocation3 + $0x870] sm:$0xff] }
 0x7ce   :  { %4120 = vmatprep.subr.bf16.mxu1 %v3548_v57  ;;  %4325 = vmatprep.subr.bf16.mxu0 %v3550_v17  ;;  %v3648_v57 = vld [vmem:[#allocation3 + $0x880] sm:$0xff] }
 0x7cf   :  { %v3656_v17 = vld [vmem:[#allocation3 + $0x8c0] sm:$0xff] }
 0x7d1   :  { %4121 = vmatpush1.bf16.msra.mxu1 %v3547_v35  ;;  %4326 = vmatpush1.bf16.msra.mxu0 %v3549_v11  ;;  %v3658_v35 = vld [vmem:[#allocation3 + $0x8d0] sm:$0xff]  ;;  %v3655_v11 = vld [vmem:[#allocation3 + $0x8b8] sm:$0xff] }
 0x7d2   :  { %4122 = vmatprep.subr.bf16.mxu1 %v3557_v33  ;;  %4327 = vmatprep.subr.bf16.mxu0 %v3559_v14  ;;  %v3657_v33 = vld [vmem:[#allocation3 + $0x8c8] sm:$0xff] }
 0x7d3   :  { %v3665_v14 = vld [vmem:[#allocation3 + $0x908] sm:$0xff] }
 0x7d5   :  { %4123 = vmatpush1.bf16.msra.mxu1 %v3556_v38  ;;  %4328 = vmatpush1.bf16.msra.mxu0 %v3558_v36  ;;  %v3667_v38 = vld [vmem:[#allocation3 + $0x918] sm:$0xff]  ;;  %v3664_v36 = vld [vmem:[#allocation3 + $0x900] sm:$0xff] }
 0x7d6   :  { %4124 = vmatprep.subr.bf16.mxu1 %v3566_v60  ;;  %4329 = vmatprep.subr.bf16.mxu0 %v3568_v20  ;;  %v3666_v60 = vld [vmem:[#allocation3 + $0x910] sm:$0xff] }
 0x7d7   :  { %v3674_v20 = vld [vmem:[#allocation3 + $0x950] sm:$0xff] }
 0x7d9   :  { %4125 = vmatpush1.bf16.msra.mxu1 %v3565_v59  ;;  %4330 = vmatpush1.bf16.msra.mxu0 %v3567_v22  ;;  %v3676_v59 = vld [vmem:[#allocation3 + $0x960] sm:$0xff]  ;;  %v3673_v22 = vld [vmem:[#allocation3 + $0x948] sm:$0xff] }
 0x7da   :  { %4126 = vmatprep.subr.bf16.mxu1 %v3575_v40  ;;  %4331 = vmatprep.subr.bf16.mxu0 %v3577_v43  ;;  %v3675_v40 = vld [vmem:[#allocation3 + $0x958] sm:$0xff] }
 0x7db   :  { %v3683_v43 = vld [vmem:[#allocation3 + $0x998] sm:$0xff] }
 0x7dd   :  { %4127 = vmatpush1.bf16.msra.mxu1 %v3574_v62  ;;  %4332 = vmatpush1.bf16.msra.mxu0 %v3576_v45  ;;  %v3685_v62 = vld [vmem:[#allocation3 + $0x9a8] sm:$0xff]  ;;  %v3682_v45 = vld [vmem:[#allocation3 + $0x990] sm:$0xff] }
 0x7de   :  { %4128 = vmatprep.subr.bf16.mxu1 %v3584_v37  ;;  %4333 = vmatprep.subr.bf16.mxu0 %v3586_v46  ;;  %v3684_v37 = vld [vmem:[#allocation3 + $0x9a0] sm:$0xff] }
 0x7df   :  { %v3692_v46 = vld [vmem:[#allocation3 + $0x9e0] sm:$0xff] }
 0x7e1   :  { %4129 = vmatpush1.bf16.msra.mxu1 %v3583_v15  ;;  %4334 = vmatpush1.bf16.msra.mxu0 %v3585_v18  ;;  %v3694_v15 = vld [vmem:[#allocation3 + $0x9f0] sm:$0xff]  ;;  %v3691_v18 = vld [vmem:[#allocation3 + $0x9d8] sm:$0xff] }
 0x7e2   :  { %4130 = vmatprep.subr.bf16.mxu1 %v3593_v21  ;;  %4335 = vmatprep.subr.bf16.mxu0 %v3595_v25  ;;  %v3693_v21 = vld [vmem:[#allocation3 + $0x9e8] sm:$0xff] }
 0x7e3   :  { %v3701_v25 = vld [vmem:[#allocation3 + $0xa28] sm:$0xff] }
 0x7e5   :  { %4131 = vmatpush1.bf16.msra.mxu1 %v3592_v28  ;;  %4336 = vmatpush1.bf16.msra.mxu0 %v3594_v5  ;;  %v3703_v28 = vld [vmem:[#allocation3 + $0xa38] sm:$0xff]  ;;  %v3700_v5 = vld [vmem:[#allocation3 + $0xa20] sm:$0xff] }
 0x7e6   :  { %4132 = vmatprep.subr.bf16.mxu1 %v3602_v31  ;;  %4337 = vmatprep.subr.bf16.mxu0 %v3604_v34  ;;  %v3702_v31 = vld [vmem:[#allocation3 + $0xa30] sm:$0xff] }
 0x7e7   :  { %v3710_v34 = vld [vmem:[#allocation3 + $0xa70] sm:$0xff] }
 0x7e9   :  { %4133 = vmatpush1.bf16.msra.mxu1 %v3601_v24  ;;  %4338 = vmatpush1.bf16.msra.mxu0 %v3603_v29  ;;  %v3712_v24 = vld [vmem:[#allocation3 + $0xa80] sm:$0xff]  ;;  %v3709_v29 = vld [vmem:[#allocation3 + $0xa68] sm:$0xff] }
 0x7ea   :  { %4134 = vmatprep.subr.bf16.mxu1 %v3611_v42  ;;  %4339 = vmatprep.subr.bf16.mxu0 %v3613_v6  ;;  %v3711_v42 = vld [vmem:[#allocation3 + $0xa78] sm:$0xff] }
 0x7eb   :  { %v3719_v6 = vld [vmem:[#allocation3 + $0xab8] sm:$0xff] }
 0x7ed   :  { %4135 = vmatpush1.bf16.msra.mxu1 %v3610_v2  ;;  %4340 = vmatpush1.bf16.msra.mxu0 %v3612_v61  ;;  %v3721_v2 = vld [vmem:[#allocation3 + $0xac8] sm:$0xff]  ;;  %v3718_v61 = vld [vmem:[#allocation3 + $0xab0] sm:$0xff] }
 0x7ee   :  { %4136 = vmatprep.subr.bf16.mxu1 %v3620_v4  ;;  %4341 = vmatprep.subr.bf16.mxu0 %v3622_v48  ;;  %v3720_v4 = vld [vmem:[#allocation3 + $0xac0] sm:$0xff] }
 0x7ef   :  { %v3728_v48 = vld [vmem:[#allocation3 + $0xb00] sm:$0xff] }
 0x7f1   :  { %4137 = vmatpush1.bf16.msra.mxu1 %v3619_v16  ;;  %4342 = vmatpush1.bf16.msra.mxu0 %v3621_v39  ;;  %v3730_v16 = vld [vmem:[#allocation3 + $0xb10] sm:$0xff]  ;;  %v3727_v39 = vld [vmem:[#allocation3 + $0xaf8] sm:$0xff] }
 0x7f2   :  { %4138 = vmatprep.subr.bf16.mxu1 %v3629_v53  ;;  %4343 = vmatprep.subr.bf16.mxu0 %v3631_v55  ;;  %v3729_v53 = vld [vmem:[#allocation3 + $0xb08] sm:$0xff] }
 0x7f3   :  { %v3737_v55 = vld [vmem:[#allocation3 + $0xb48] sm:$0xff] }
 0x7f5   :  { %4139 = vmatpush1.bf16.msra.mxu1 %v3628_v63  ;;  %4344 = vmatpush1.bf16.msra.mxu0 %v3630_v47  ;;  %v3739_v63 = vld [vmem:[#allocation3 + $0xb58] sm:$0xff]  ;;  %v3736_v47 = vld [vmem:[#allocation3 + $0xb40] sm:$0xff] }
 0x7f6   :  { %4140 = vmatprep.subr.bf16.mxu1 %v3638_v9  ;;  %4345 = vmatprep.subr.bf16.mxu0 %v3640_v54  ;;  %v3738_v9 = vld [vmem:[#allocation3 + $0xb50] sm:$0xff] }
 0x7f7   :  { %v3746_v54 = vld [vmem:[#allocation3 + $0xb90] sm:$0xff] }
 0x7f9   :  { %4141 = vmatpush1.bf16.msra.mxu1 %v3637_v23  ;;  %4346 = vmatpush1.bf16.msra.mxu0 %v3639_v44  ;;  %v3748_v23 = vld [vmem:[#allocation3 + $0xba0] sm:$0xff]  ;;  %v3745_v44 = vld [vmem:[#allocation3 + $0xb88] sm:$0xff] }
 0x7fa   :  { %4142 = vmatprep.subr.bf16.mxu1 %v3647_v58  ;;  %4347 = vmatprep.subr.bf16.mxu0 %v3649_v10  ;;  %v3747_v58 = vld [vmem:[#allocation3 + $0xb98] sm:$0xff] }
 0x7fb   :  { %v3755_v10 = vld [vmem:[#allocation3 + $0xbd8] sm:$0xff] }
 0x7fd   :  { %4143 = vmatpush1.bf16.msra.mxu1 %v3646_v56  ;;  %4348 = vmatpush1.bf16.msra.mxu0 %v3648_v57  ;;  %v3757_v56 = vld [vmem:[#allocation3 + $0xbe8] sm:$0xff]  ;;  %v3754_v57 = vld [vmem:[#allocation3 + $0xbd0] sm:$0xff] }
 0x7fe   :  { %4144 = vmatprep.subr.bf16.mxu1 %v3656_v17  ;;  %4349 = vmatprep.subr.bf16.mxu0 %v3658_v35  ;;  %v3756_v17 = vld [vmem:[#allocation3 + $0xbe0] sm:$0xff] }
 0x7ff   :  { %v3764_v35 = vld [vmem:[#allocation3 + $0xc20] sm:$0xff] }
 0x801   :  { %4145 = vmatpush1.bf16.msra.mxu1 %v3655_v11  ;;  %4350 = vmatpush1.bf16.msra.mxu0 %v3657_v33  ;;  %v3766_v11 = vld [vmem:[#allocation3 + $0xc30] sm:$0xff]  ;;  %v3763_v33 = vld [vmem:[#allocation3 + $0xc18] sm:$0xff] }
 0x802   :  { %4155 = vmatprep.subr.bf16.mxu1 %v3665_v14  ;;  %4360 = vmatprep.subr.bf16.mxu0 %v3667_v38  ;;  %v3765_v14 = vld [vmem:[#allocation3 + $0xc28] sm:$0xff] }
 0x803   :  { %v3773_v38 = vld [vmem:[#allocation3 + $0xc68] sm:$0xff] }
 0x804   :  { %4147 = vmatmul.mubr.bf16.vlgmr.msra.gmra.mrb[28].mxu1 %v9353_v52  ;;  %4352 = vmatmul.mubr.bf16.vlgmr.msra.gmra.mrb[28].mxu0 %v9353_v52 }
 0x805   :  { %4156 = vmatpush1.bf16.msra.mxu1 %v3664_v36  ;;  %4361 = vmatpush1.bf16.msra.mxu0 %v3666_v60  ;;  %v3775_v36 = vld [vmem:[#allocation3 + $0xc78] sm:$0xff]  ;;  %v3772_v60 = vld [vmem:[#allocation3 + $0xc60] sm:$0xff] }
 0x806   :  { %4157 = vmatprep.subr.bf16.mxu1 %v3674_v20  ;;  %4362 = vmatprep.subr.bf16.mxu0 %v3676_v59  ;;  %v3774_v20 = vld [vmem:[#allocation3 + $0xc70] sm:$0xff] }
 0x807   :  { %4187 = vmatprep.mubr.bf16.mxu1 %v9362_v0  ;;  %4392 = vmatprep.mubr.bf16.mxu0 %v9362_v0  ;;  %v3782_v59 = vld [vmem:[#allocation3 + $0xcb0] sm:$0xff] }
 0x809   :  { %4158 = vmatpush1.bf16.msra.mxu1 %v3673_v22  ;;  %4363 = vmatpush1.bf16.msra.mxu0 %v3675_v40  ;;  %v3784_v22 = vld [vmem:[#allocation3 + $0xcc0] sm:$0xff]  ;;  %v3781_v40 = vld [vmem:[#allocation3 + $0xca8] sm:$0xff] }
 0x80a   :  { %4159 = vmatprep.subr.bf16.mxu1 %v3683_v43  ;;  %4364 = vmatprep.subr.bf16.mxu0 %v3685_v62  ;;  %v3783_v43 = vld [vmem:[#allocation3 + $0xcb8] sm:$0xff] }
 0x80b   :  { %v3791_v62 = vld [vmem:[#allocation3 + $0xcf8] sm:$0xff] }
 0x80d   :  { %4160 = vmatpush1.bf16.msra.mxu1 %v3682_v45  ;;  %4365 = vmatpush1.bf16.msra.mxu0 %v3684_v37  ;;  %v3793_v45 = vld [vmem:[#allocation3 + $0xd08] sm:$0xff]  ;;  %v3790_v37 = vld [vmem:[#allocation3 + $0xcf0] sm:$0xff] }
 0x80e   :  { %4161 = vmatprep.subr.bf16.mxu1 %v3692_v46  ;;  %4366 = vmatprep.subr.bf16.mxu0 %v3694_v15  ;;  %v3792_v46 = vld [vmem:[#allocation3 + $0xd00] sm:$0xff] }
 0x80f   :  { %v3800_v15 = vld [vmem:[#allocation3 + $0xd40] sm:$0xff] }
 0x811   :  { %4162 = vmatpush1.bf16.msra.mxu1 %v3691_v18  ;;  %4367 = vmatpush1.bf16.msra.mxu0 %v3693_v21  ;;  %v3802_v18 = vld [vmem:[#allocation3 + $0xd50] sm:$0xff]  ;;  %v3799_v21 = vld [vmem:[#allocation3 + $0xd38] sm:$0xff] }
 0x812   :  { %4163 = vmatprep.subr.bf16.mxu1 %v3701_v25  ;;  %4368 = vmatprep.subr.bf16.mxu0 %v3703_v28  ;;  %v3801_v25 = vld [vmem:[#allocation3 + $0xd48] sm:$0xff] }
 0x813   :  { %v3809_v28 = vld [vmem:[#allocation3 + $0xd88] sm:$0xff] }
 0x815   :  { %4164 = vmatpush1.bf16.msra.mxu1 %v3700_v5  ;;  %4369 = vmatpush1.bf16.msra.mxu0 %v3702_v31  ;;  %v3811_v5 = vld [vmem:[#allocation3 + $0xd98] sm:$0xff]  ;;  %v3808_v31 = vld [vmem:[#allocation3 + $0xd80] sm:$0xff] }
 0x816   :  { %4165 = vmatprep.subr.bf16.mxu1 %v3710_v34  ;;  %4370 = vmatprep.subr.bf16.mxu0 %v3712_v24  ;;  %v3810_v34 = vld [vmem:[#allocation3 + $0xd90] sm:$0xff] }
 0x817   :  { %v3818_v24 = vld [vmem:[#allocation3 + $0xdd0] sm:$0xff] }
 0x819   :  { %4166 = vmatpush1.bf16.msra.mxu1 %v3709_v29  ;;  %4371 = vmatpush1.bf16.msra.mxu0 %v3711_v42  ;;  %v3820_v29 = vld [vmem:[#allocation3 + $0xde0] sm:$0xff]  ;;  %v3817_v42 = vld [vmem:[#allocation3 + $0xdc8] sm:$0xff] }
 0x81a   :  { %4167 = vmatprep.subr.bf16.mxu1 %v3719_v6  ;;  %4372 = vmatprep.subr.bf16.mxu0 %v3721_v2  ;;  %v3819_v6 = vld [vmem:[#allocation3 + $0xdd8] sm:$0xff] }
 0x81b   :  { %v3827_v2 = vld [vmem:[#allocation3 + $0xe18] sm:$0xff] }
 0x81d   :  { %4168 = vmatpush1.bf16.msra.mxu1 %v3718_v61  ;;  %4373 = vmatpush1.bf16.msra.mxu0 %v3720_v4  ;;  %v3829_v61 = vld [vmem:[#allocation3 + $0xe28] sm:$0xff]  ;;  %v3826_v4 = vld [vmem:[#allocation3 + $0xe10] sm:$0xff] }
 0x81e   :  { %4169 = vmatprep.subr.bf16.mxu1 %v3728_v48  ;;  %4374 = vmatprep.subr.bf16.mxu0 %v3730_v16  ;;  %v3828_v48 = vld [vmem:[#allocation3 + $0xe20] sm:$0xff] }
 0x81f   :  { %v3836_v16 = vld [vmem:[#allocation3 + $0xe60] sm:$0xff] }
 0x821   :  { %4170 = vmatpush1.bf16.msra.mxu1 %v3727_v39  ;;  %4375 = vmatpush1.bf16.msra.mxu0 %v3729_v53  ;;  %v3838_v39 = vld [vmem:[#allocation3 + $0xe70] sm:$0xff]  ;;  %v3835_v53 = vld [vmem:[#allocation3 + $0xe58] sm:$0xff] }
 0x822   :  { %4171 = vmatprep.subr.bf16.mxu1 %v3737_v55  ;;  %4376 = vmatprep.subr.bf16.mxu0 %v3739_v63  ;;  %v3837_v55 = vld [vmem:[#allocation3 + $0xe68] sm:$0xff] }
 0x823   :  { %v3845_v63 = vld [vmem:[#allocation3 + $0xea8] sm:$0xff] }
 0x825   :  { %4172 = vmatpush1.bf16.msra.mxu1 %v3736_v47  ;;  %4377 = vmatpush1.bf16.msra.mxu0 %v3738_v9  ;;  %v3847_v47 = vld [vmem:[#allocation3 + $0xeb8] sm:$0xff]  ;;  %v3844_v9 = vld [vmem:[#allocation3 + $0xea0] sm:$0xff] }
 0x826   :  { %4173 = vmatprep.subr.bf16.mxu1 %v3746_v54  ;;  %4378 = vmatprep.subr.bf16.mxu0 %v3748_v23  ;;  %v3846_v54 = vld [vmem:[#allocation3 + $0xeb0] sm:$0xff] }
 0x827   :  { %v3854_v23 = vld [vmem:[#allocation3 + $0xef0] sm:$0xff] }
 0x829   :  { %4174 = vmatpush1.bf16.msra.mxu1 %v3745_v44  ;;  %4379 = vmatpush1.bf16.msra.mxu0 %v3747_v58  ;;  %v3856_v44 = vld [vmem:[#allocation3 + $0xf00] sm:$0xff]  ;;  %v3853_v58 = vld [vmem:[#allocation3 + $0xee8] sm:$0xff] }
 0x82a   :  { %4175 = vmatprep.subr.bf16.mxu1 %v3755_v10  ;;  %4380 = vmatprep.subr.bf16.mxu0 %v3757_v56  ;;  %v3855_v10 = vld [vmem:[#allocation3 + $0xef8] sm:$0xff] }
 0x82b   :  { %v3863_v56 = vld [vmem:[#allocation3 + $0xf38] sm:$0xff] }
 0x82d   :  { %4176 = vmatpush1.bf16.msra.mxu1 %v3754_v57  ;;  %4381 = vmatpush1.bf16.msra.mxu0 %v3756_v17  ;;  %v3865_v57 = vld [vmem:[#allocation3 + $0xf48] sm:$0xff]  ;;  %v3862_v17 = vld [vmem:[#allocation3 + $0xf30] sm:$0xff] }
 0x82e   :  { %4177 = vmatprep.subr.bf16.mxu1 %v3764_v35  ;;  %4382 = vmatprep.subr.bf16.mxu0 %v3766_v11  ;;  %v3864_v35 = vld [vmem:[#allocation3 + $0xf40] sm:$0xff] }
 0x82f   :  { %v3872_v11 = vld [vmem:[#allocation3 + $0xf80] sm:$0xff] }
 0x831   :  { %4178 = vmatpush1.bf16.msra.mxu1 %v3763_v33  ;;  %4383 = vmatpush1.bf16.msra.mxu0 %v3765_v14  ;;  %v3874_v33 = vld [vmem:[#allocation3 + $0xf90] sm:$0xff]  ;;  %v3871_v14 = vld [vmem:[#allocation3 + $0xf78] sm:$0xff] }
 0x832   :  { %4179 = vmatprep.subr.bf16.mxu1 %v3773_v38  ;;  %4384 = vmatprep.subr.bf16.mxu0 %v3775_v36  ;;  %v3873_v38 = vld [vmem:[#allocation3 + $0xf88] sm:$0xff] }
 0x833   :  { %v3881_v36 = vld [vmem:[#allocation3 + $0xfc8] sm:$0xff] }
 0x835   :  { %4180 = vmatpush1.bf16.msra.mxu1 %v3772_v60  ;;  %4385 = vmatpush1.bf16.msra.mxu0 %v3774_v20  ;;  %v3883_v60 = vld [vmem:[#allocation3 + $0xfd8] sm:$0xff]  ;;  %v3880_v20 = vld [vmem:[#allocation3 + $0xfc0] sm:$0xff] }
 0x836   :  { %4181 = vmatprep.subr.bf16.mxu1 %v3782_v59  ;;  %4386 = vmatprep.subr.bf16.mxu0 %v3784_v22  ;;  %v3882_v59 = vld [vmem:[#allocation3 + $0xfd0] sm:$0xff] }
 0x837   :  { %v3890_v22 = vld [vmem:[#allocation3 + $0x1010] sm:$0xff] }
 0x839   :  { %4182 = vmatpush1.bf16.msra.mxu1 %v3781_v40  ;;  %4387 = vmatpush1.bf16.msra.mxu0 %v3783_v43  ;;  %v3892_v40 = vld [vmem:[#allocation3 + $0x1020] sm:$0xff]  ;;  %v3889_v43 = vld [vmem:[#allocation3 + $0x1008] sm:$0xff] }
 0x83a   :  { %4183 = vmatprep.subr.bf16.mxu1 %v3791_v62  ;;  %4388 = vmatprep.subr.bf16.mxu0 %v3793_v45  ;;  %v3891_v62 = vld [vmem:[#allocation3 + $0x1018] sm:$0xff] }
 0x83b   :  { %v3899_v45 = vld [vmem:[#allocation3 + $0x1058] sm:$0xff] }
 0x83d   :  { %4184 = vmatpush1.bf16.msra.mxu1 %v3790_v37  ;;  %4389 = vmatpush1.bf16.msra.mxu0 %v3792_v46  ;;  %v3901_v37 = vld [vmem:[#allocation3 + $0x1068] sm:$0xff]  ;;  %v3898_v46 = vld [vmem:[#allocation3 + $0x1050] sm:$0xff] }
 0x83e   :  { %4185 = vmatprep.subr.bf16.mxu1 %v3800_v15  ;;  %4390 = vmatprep.subr.bf16.mxu0 %v3802_v18  ;;  %v3900_v15 = vld [vmem:[#allocation3 + $0x1060] sm:$0xff] }
 0x83f   :  { %v3908_v18 = vld [vmem:[#allocation3 + $0x10a0] sm:$0xff] }
 0x841   :  { %4186 = vmatpush1.bf16.msra.mxu1 %v3799_v21  ;;  %4391 = vmatpush1.bf16.msra.mxu0 %v3801_v25  ;;  %v3910_v21 = vld [vmem:[#allocation3 + $0x10b0] sm:$0xff]  ;;  %v3907_v25 = vld [vmem:[#allocation3 + $0x1098] sm:$0xff] }
 0x842   :  { %4196 = vmatprep.subr.bf16.mxu1 %v3809_v28  ;;  %4401 = vmatprep.subr.bf16.mxu0 %v3811_v5  ;;  %v3909_v28 = vld [vmem:[#allocation3 + $0x10a8] sm:$0xff] }
 0x843   :  { %v3917_v5 = vld [vmem:[#allocation3 + $0x10e8] sm:$0xff] }
 0x844   :  { %4188 = vmatmul.mubr.bf16.vlgmr.msra.gmra.mrb[28].mxu1 %v9359_v41  ;;  %4393 = vmatmul.mubr.bf16.vlgmr.msra.gmra.mrb[28].mxu0 %v9359_v41 }
 0x845   :  { %4197 = vmatpush1.bf16.msra.mxu1 %v3808_v31  ;;  %4402 = vmatpush1.bf16.msra.mxu0 %v3810_v34  ;;  %v3919_v31 = vld [vmem:[#allocation3 + $0x10f8] sm:$0xff]  ;;  %v3916_v34 = vld [vmem:[#allocation3 + $0x10e0] sm:$0xff] }
 0x846   :  { %4198 = vmatprep.subr.bf16.mxu1 %v3818_v24  ;;  %4403 = vmatprep.subr.bf16.mxu0 %v3820_v29  ;;  %v3918_v24 = vld [vmem:[#allocation3 + $0x10f0] sm:$0xff] }
 0x847   :  { %4228 = vmatprep.mubr.bf16.mxu1 %v9368_v32  ;;  %4433 = vmatprep.mubr.bf16.mxu0 %v9368_v32  ;;  %v3926_v29 = vld [vmem:[#allocation3 + $0x1130] sm:$0xff] }
 0x849   :  { %4199 = vmatpush1.bf16.msra.mxu1 %v3817_v42  ;;  %4404 = vmatpush1.bf16.msra.mxu0 %v3819_v6  ;;  %v3928_v42 = vld [vmem:[#allocation3 + $0x1140] sm:$0xff]  ;;  %v3925_v6 = vld [vmem:[#allocation3 + $0x1128] sm:$0xff] }
 0x84a   :  { %4200 = vmatprep.subr.bf16.mxu1 %v3827_v2  ;;  %4405 = vmatprep.subr.bf16.mxu0 %v3829_v61  ;;  %v3927_v2 = vld [vmem:[#allocation3 + $0x1138] sm:$0xff] }
 0x84b   :  { %v3935_v61 = vld [vmem:[#allocation3 + $0x1178] sm:$0xff] }
 0x84d   :  { %4201 = vmatpush1.bf16.msra.mxu1 %v3826_v4  ;;  %4406 = vmatpush1.bf16.msra.mxu0 %v3828_v48  ;;  %v3937_v4 = vld [vmem:[#allocation3 + $0x1188] sm:$0xff]  ;;  %v3934_v48 = vld [vmem:[#allocation3 + $0x1170] sm:$0xff] }
 0x84e   :  { %4202 = vmatprep.subr.bf16.mxu1 %v3836_v16  ;;  %4407 = vmatprep.subr.bf16.mxu0 %v3838_v39  ;;  %v3936_v16 = vld [vmem:[#allocation3 + $0x1180] sm:$0xff] }
 0x84f   :  { %v3944_v39 = vld [vmem:[#allocation3 + $0x11c0] sm:$0xff] }
 0x851   :  { %4203 = vmatpush1.bf16.msra.mxu1 %v3835_v53  ;;  %4408 = vmatpush1.bf16.msra.mxu0 %v3837_v55  ;;  %v3946_v53 = vld [vmem:[#allocation3 + $0x11d0] sm:$0xff]  ;;  %v3943_v55 = vld [vmem:[#allocation3 + $0x11b8] sm:$0xff] }
 0x852   :  { %4204 = vmatprep.subr.bf16.mxu1 %v3845_v63  ;;  %4409 = vmatprep.subr.bf16.mxu0 %v3847_v47  ;;  %v3945_v63 = vld [vmem:[#allocation3 + $0x11c8] sm:$0xff] }
 0x853   :  { %v3953_v47 = vld [vmem:[#allocation3 + $0x1208] sm:$0xff] }
 0x855   :  { %4205 = vmatpush1.bf16.msra.mxu1 %v3844_v9  ;;  %4410 = vmatpush1.bf16.msra.mxu0 %v3846_v54  ;;  %v3955_v9 = vld [vmem:[#allocation3 + $0x1218] sm:$0xff]  ;;  %v3952_v54 = vld [vmem:[#allocation3 + $0x1200] sm:$0xff] }
 0x856   :  { %4206 = vmatprep.subr.bf16.mxu1 %v3854_v23  ;;  %4411 = vmatprep.subr.bf16.mxu0 %v3856_v44  ;;  %v3954_v23 = vld [vmem:[#allocation3 + $0x1210] sm:$0xff] }
 0x857   :  { %v3962_v44 = vld [vmem:[#allocation3 + $0x1250] sm:$0xff] }
 0x859   :  { %4207 = vmatpush1.bf16.msra.mxu1 %v3853_v58  ;;  %4412 = vmatpush1.bf16.msra.mxu0 %v3855_v10  ;;  %v3964_v58 = vld [vmem:[#allocation3 + $0x1260] sm:$0xff]  ;;  %v3961_v10 = vld [vmem:[#allocation3 + $0x1248] sm:$0xff] }
 0x85a   :  { %4208 = vmatprep.subr.bf16.mxu1 %v3863_v56  ;;  %4413 = vmatprep.subr.bf16.mxu0 %v3865_v57  ;;  %v3963_v56 = vld [vmem:[#allocation3 + $0x1258] sm:$0xff] }
 0x85b   :  { %v3971_v57 = vld [vmem:[#allocation3 + $0x1298] sm:$0xff] }
 0x85d   :  { %4209 = vmatpush1.bf16.msra.mxu1 %v3862_v17  ;;  %4414 = vmatpush1.bf16.msra.mxu0 %v3864_v35  ;;  %v3973_v17 = vld [vmem:[#allocation3 + $0x12a8] sm:$0xff]  ;;  %v9690_v35 = vmov 0  }
 0x85e   :  { %4210 = vmatprep.subr.bf16.mxu1 %v3872_v11  ;;  %4415 = vmatprep.subr.bf16.mxu0 %v3874_v33  ;;  %v3970_v11 = vld [vmem:[#allocation3 + $0x1290] sm:$0xff]  ;;  %v3972_v33 = vld [vmem:[#allocation3 + $0x12a0] sm:$0xff] }
 0x861   :  { %4211 = vmatpush1.bf16.msra.mxu1 %v3871_v14  ;;  %4416 = vmatpush1.bf16.msra.mxu0 %v3873_v38  ;;  %v3980_v14 = vld [vmem:[#allocation3 + $0x12e0] sm:$0xff]  ;;  %v3982_v38 = vld [vmem:[#allocation3 + $0x12f0] sm:$0xff] }
 0x862   :  { %4212 = vmatprep.subr.bf16.mxu1 %v3881_v36  ;;  %4417 = vmatprep.subr.bf16.mxu0 %v3883_v60  ;;  %v3979_v36 = vld [vmem:[#allocation3 + $0x12d8] sm:$0xff]  ;;  %v3981_v60 = vld [vmem:[#allocation3 + $0x12e8] sm:$0xff] }
 0x865   :  { %4213 = vmatpush1.bf16.msra.mxu1 %v3880_v20  ;;  %4418 = vmatpush1.bf16.msra.mxu0 %v3882_v59  ;;  %v3989_v20 = vld [vmem:[#allocation3 + $0x1328] sm:$0xff]  ;;  %v3991_v59 = vld [vmem:[#allocation3 + $0x1338] sm:$0xff] }
 0x866   :  { %4214 = vmatprep.subr.bf16.mxu1 %v3890_v22  ;;  %4419 = vmatprep.subr.bf16.mxu0 %v3892_v40  ;;  %v3988_v22 = vld [vmem:[#allocation3 + $0x1320] sm:$0xff]  ;;  %v3990_v40 = vld [vmem:[#allocation3 + $0x1330] sm:$0xff] }
 0x869   :  { %4215 = vmatpush1.bf16.msra.mxu1 %v3889_v43  ;;  %4420 = vmatpush1.bf16.msra.mxu0 %v3891_v62  ;;  %v3998_v43 = vld [vmem:[#allocation3 + $0x1370] sm:$0xff]  ;;  %v4000_v62 = vld [vmem:[#allocation3 + $0x1380] sm:$0xff] }
 0x86a   :  { %4216 = vmatprep.subr.bf16.mxu1 %v3899_v45  ;;  %4421 = vmatprep.subr.bf16.mxu0 %v3901_v37  ;;  %v3997_v45 = vld [vmem:[#allocation3 + $0x1368] sm:$0xff]  ;;  %v3999_v37 = vld [vmem:[#allocation3 + $0x1378] sm:$0xff] }
 0x86d   :  { %4217 = vmatpush1.bf16.msra.mxu1 %v3898_v46  ;;  %4422 = vmatpush1.bf16.msra.mxu0 %v3900_v15  ;;  %v4007_v46 = vld [vmem:[#allocation3 + $0x13b8] sm:$0xff]  ;;  %v4009_v15 = vld [vmem:[#allocation3 + $0x13c8] sm:$0xff] }
 0x86e   :  { %4218 = vmatprep.subr.bf16.mxu1 %v3908_v18  ;;  %4423 = vmatprep.subr.bf16.mxu0 %v3910_v21  ;;  %v4006_v18 = vld [vmem:[#allocation3 + $0x13b0] sm:$0xff]  ;;  %v4008_v21 = vld [vmem:[#allocation3 + $0x13c0] sm:$0xff] }
 0x871   :  { %4219 = vmatpush1.bf16.msra.mxu1 %v3907_v25  ;;  %4424 = vmatpush1.bf16.msra.mxu0 %v3909_v28  ;;  %v4016_v25 = vld [vmem:[#allocation3 + $0x1400] sm:$0xff]  ;;  %v4018_v28 = vld [vmem:[#allocation3 + $0x1410] sm:$0xff] }
 0x872   :  { %4220 = vmatprep.subr.bf16.mxu1 %v3917_v5  ;;  %4425 = vmatprep.subr.bf16.mxu0 %v3919_v31  ;;  %v4015_v5 = vld [vmem:[#allocation3 + $0x13f8] sm:$0xff]  ;;  %v4017_v31 = vld [vmem:[#allocation3 + $0x1408] sm:$0xff] }
 0x875   :  { %4221 = vmatpush1.bf16.msra.mxu1 %v3916_v34  ;;  %4426 = vmatpush1.bf16.msra.mxu0 %v3918_v24  ;;  %v3381_v34 = vld [vmem:[#allocation3 + $0x28] sm:$0xff]  ;;  %v3383_v24 = vld [vmem:[#allocation3 + $0x38] sm:$0xff] }
 0x876   :  { %4222 = vmatprep.subr.bf16.mxu1 %v3926_v29  ;;  %4427 = vmatprep.subr.bf16.mxu0 %v3928_v42  ;;  %v3380_v29 = vld [vmem:[#allocation3 + $0x20] sm:$0xff]  ;;  %v3382_v42 = vld [vmem:[#allocation3 + $0x30] sm:$0xff] }
 0x879   :  { %4223 = vmatpush1.bf16.msra.mxu1 %v3925_v6  ;;  %4428 = vmatpush1.bf16.msra.mxu0 %v3927_v2  ;;  %v3390_v6 = vld [vmem:[#allocation3 + $0x70] sm:$0xff]  ;;  %v3392_v2 = vld [vmem:[#allocation3 + $0x80] sm:$0xff] }
 0x87a   :  { %4224 = vmatprep.subr.bf16.mxu1 %v3935_v61  ;;  %4429 = vmatprep.subr.bf16.mxu0 %v3937_v4  ;;  %v3389_v61 = vld [vmem:[#allocation3 + $0x68] sm:$0xff]  ;;  %v3391_v4 = vld [vmem:[#allocation3 + $0x78] sm:$0xff] }
 0x87d   :  { %4225 = vmatpush1.bf16.msra.mxu1 %v3934_v48  ;;  %4430 = vmatpush1.bf16.msra.mxu0 %v3936_v16  ;;  %v3399_v48 = vld [vmem:[#allocation3 + $0xb8] sm:$0xff]  ;;  %v3401_v16 = vld [vmem:[#allocation3 + $0xc8] sm:$0xff] }
 0x87e   :  { %4226 = vmatprep.subr.bf16.mxu1 %v3944_v39  ;;  %4431 = vmatprep.subr.bf16.mxu0 %v3946_v53  ;;  %v3398_v39 = vld [vmem:[#allocation3 + $0xb0] sm:$0xff]  ;;  %v3400_v53 = vld [vmem:[#allocation3 + $0xc0] sm:$0xff] }
 0x881   :  { %4227 = vmatpush1.bf16.msra.mxu1 %v3943_v55  ;;  %4432 = vmatpush1.bf16.msra.mxu0 %v3945_v63  ;;  %v3408_v55 = vld [vmem:[#allocation3 + $0x100] sm:$0xff]  ;;  %v3410_v63 = vld [vmem:[#allocation3 + $0x110] sm:$0xff] }
 0x882   :  { %4237 = vmatprep.subr.bf16.mxu1 %v3953_v47  ;;  %4442 = vmatprep.subr.bf16.mxu0 %v3955_v9  ;;  %v3407_v47 = vld [vmem:[#allocation3 + $0xf8] sm:$0xff]  ;;  %v3409_v9 = vld [vmem:[#allocation3 + $0x108] sm:$0xff] }
 0x884   :  { %4229 = vmatmul.mubr.bf16.vlgmr.msra.gmra.mrb[28].mxu1 %v9365_v1  ;;  %4434 = vmatmul.mubr.bf16.vlgmr.msra.gmra.mrb[28].mxu0 %v9365_v1 }
 0x885   :  { %4238 = vmatpush1.bf16.msra.mxu1 %v3952_v54  ;;  %4443 = vmatpush1.bf16.msra.mxu0 %v3954_v23  ;;  %v3417_v54 = vld [vmem:[#allocation3 + $0x148] sm:$0xff]  ;;  %v3419_v23 = vld [vmem:[#allocation3 + $0x158] sm:$0xff] }
 0x886   :  { %4239 = vmatprep.subr.bf16.mxu1 %v3962_v44  ;;  %4444 = vmatprep.subr.bf16.mxu0 %v3964_v58  ;;  %v3416_v44 = vld [vmem:[#allocation3 + $0x140] sm:$0xff]  ;;  %v3418_v58 = vld [vmem:[#allocation3 + $0x150] sm:$0xff] }
 0x887   :  { %4269 = vmatprep.mubr.bf16.mxu1 %v9690_v35  ;;  %4474 = vmatprep.mubr.bf16.mxu0 %v9690_v35 }
 0x889   :  { %4240 = vmatpush1.bf16.msra.mxu1 %v3961_v10  ;;  %4445 = vmatpush1.bf16.msra.mxu0 %v3963_v56  ;;  %v3426_v10 = vld [vmem:[#allocation3 + $0x190] sm:$0xff]  ;;  %v3428_v56 = vld [vmem:[#allocation3 + $0x1a0] sm:$0xff] }
 0x88a   :  { %4241 = vmatprep.subr.bf16.mxu1 %v3971_v57  ;;  %4446 = vmatprep.subr.bf16.mxu0 %v3973_v17  ;;  %v3425_v57 = vld [vmem:[#allocation3 + $0x188] sm:$0xff]  ;;  %v3427_v17 = vld [vmem:[#allocation3 + $0x198] sm:$0xff] }
 0x88d   :  { %4242 = vmatpush1.bf16.msra.mxu1 %v3970_v11  ;;  %4447 = vmatpush1.bf16.msra.mxu0 %v3972_v33  ;;  %v3435_v11 = vld [vmem:[#allocation3 + $0x1d8] sm:$0xff]  ;;  %v3437_v33 = vld [vmem:[#allocation3 + $0x1e8] sm:$0xff] }
 0x88e   :  { %4243 = vmatprep.subr.bf16.mxu1 %v3980_v14  ;;  %4448 = vmatprep.subr.bf16.mxu0 %v3982_v38  ;;  %v3434_v14 = vld [vmem:[#allocation3 + $0x1d0] sm:$0xff]  ;;  %v3436_v38 = vld [vmem:[#allocation3 + $0x1e0] sm:$0xff] }
 0x891   :  { %4244 = vmatpush1.bf16.msra.mxu1 %v3979_v36  ;;  %4449 = vmatpush1.bf16.msra.mxu0 %v3981_v60  ;;  %v3444_v36 = vld [vmem:[#allocation3 + $0x220] sm:$0xff]  ;;  %v3446_v60 = vld [vmem:[#allocation3 + $0x230] sm:$0xff] }
 0x892   :  { %4245 = vmatprep.subr.bf16.mxu1 %v3989_v20  ;;  %4450 = vmatprep.subr.bf16.mxu0 %v3991_v59  ;;  %v3443_v20 = vld [vmem:[#allocation3 + $0x218] sm:$0xff]  ;;  %v3445_v59 = vld [vmem:[#allocation3 + $0x228] sm:$0xff] }
 0x895   :  { %4246 = vmatpush1.bf16.msra.mxu1 %v3988_v22  ;;  %4451 = vmatpush1.bf16.msra.mxu0 %v3990_v40  ;;  %v3453_v22 = vld [vmem:[#allocation3 + $0x268] sm:$0xff]  ;;  %v3455_v40 = vld [vmem:[#allocation3 + $0x278] sm:$0xff] }
 0x896   :  { %4247 = vmatprep.subr.bf16.mxu1 %v3998_v43  ;;  %4452 = vmatprep.subr.bf16.mxu0 %v4000_v62  ;;  %v3452_v43 = vld [vmem:[#allocation3 + $0x260] sm:$0xff]  ;;  %v3454_v62 = vld [vmem:[#allocation3 + $0x270] sm:$0xff] }
 0x899   :  { %4248 = vmatpush1.bf16.msra.mxu1 %v3997_v45  ;;  %4453 = vmatpush1.bf16.msra.mxu0 %v3999_v37  ;;  %v3462_v45 = vld [vmem:[#allocation3 + $0x2b0] sm:$0xff]  ;;  %v3464_v37 = vld [vmem:[#allocation3 + $0x2c0] sm:$0xff] }
 0x89a   :  { %4249 = vmatprep.subr.bf16.mxu1 %v4007_v46  ;;  %4454 = vmatprep.subr.bf16.mxu0 %v4009_v15  ;;  %v3461_v46 = vld [vmem:[#allocation3 + $0x2a8] sm:$0xff]  ;;  %v3463_v15 = vld [vmem:[#allocation3 + $0x2b8] sm:$0xff] }
 0x89d   :  { %4250 = vmatpush1.bf16.msra.mxu1 %v4006_v18  ;;  %4455 = vmatpush1.bf16.msra.mxu0 %v4008_v21  ;;  %v3471_v18 = vld [vmem:[#allocation3 + $0x2f8] sm:$0xff]  ;;  %v3473_v21 = vld [vmem:[#allocation3 + $0x308] sm:$0xff] }
 0x89e   :  { %4251 = vmatprep.subr.bf16.mxu1 %v4016_v25  ;;  %4456 = vmatprep.subr.bf16.mxu0 %v4018_v28  ;;  %v3470_v25 = vld [vmem:[#allocation3 + $0x2f0] sm:$0xff]  ;;  %v3472_v28 = vld [vmem:[#allocation3 + $0x300] sm:$0xff] }
 0x8a1   :  { %4252 = vmatpush1.bf16.msra.mxu1 %v4015_v5  ;;  %4457 = vmatpush1.bf16.msra.mxu0 %v4017_v31  ;;  %v3480_v5 = vld [vmem:[#allocation3 + $0x340] sm:$0xff]  ;;  %v3482_v31 = vld [vmem:[#allocation3 + $0x350] sm:$0xff] }
 0x8a2   :  { %4483 = vmatprep.subr.bf16.mxu1 %v3381_v34  ;;  %4688 = vmatprep.subr.bf16.mxu0 %v3383_v24  ;;  %v3479_v34 = vld [vmem:[#allocation3 + $0x338] sm:$0xff]  ;;  %v3481_v24 = vld [vmem:[#allocation3 + $0x348] sm:$0xff] }
 0x8a4   :  { %4270 = vmatmul.mubr.bf16.vlgmr.msra.gmra.mrb[28].mxu1 %v9371_v13  ;;  %4475 = vmatmul.mubr.bf16.vlgmr.msra.gmra.mrb[28].mxu0 %v9371_v13 }
 0x8a5   :  { %4484 = vmatpush1.bf16.msra.mxu1 %v3380_v29  ;;  %4689 = vmatpush1.bf16.msra.mxu0 %v3382_v42  ;;  %v3489_v29 = vld [vmem:[#allocation3 + $0x388] sm:$0xff]  ;;  %v3491_v42 = vld [vmem:[#allocation3 + $0x398] sm:$0xff] }
 0x8a6   :  { %4485 = vmatprep.subr.bf16.mxu1 %v3390_v6  ;;  %4690 = vmatprep.subr.bf16.mxu0 %v3392_v2  ;;  %v3488_v6 = vld [vmem:[#allocation3 + $0x380] sm:$0xff]  ;;  %v3490_v2 = vld [vmem:[#allocation3 + $0x390] sm:$0xff] }
 0x8a7   :  { %4515 = vmatprep.mubr.bf16.mxu1 %v9350_v49  ;;  %4720 = vmatprep.mubr.bf16.mxu0 %v9350_v49 }
 0x8a9   :  { %4486 = vmatpush1.bf16.msra.mxu1 %v3389_v61  ;;  %4691 = vmatpush1.bf16.msra.mxu0 %v3391_v4  ;;  %v3498_v61 = vld [vmem:[#allocation3 + $0x3d0] sm:$0xff]  ;;  %v3500_v4 = vld [vmem:[#allocation3 + $0x3e0] sm:$0xff] }
 0x8aa   :  { %4487 = vmatprep.subr.bf16.mxu1 %v3399_v48  ;;  %4692 = vmatprep.subr.bf16.mxu0 %v3401_v16  ;;  %v3497_v48 = vld [vmem:[#allocation3 + $0x3c8] sm:$0xff]  ;;  %v3499_v16 = vld [vmem:[#allocation3 + $0x3d8] sm:$0xff] }
 0x8ad   :  { %4488 = vmatpush1.bf16.msra.mxu1 %v3398_v39  ;;  %4693 = vmatpush1.bf16.msra.mxu0 %v3400_v53  ;;  %v3507_v39 = vld [vmem:[#allocation3 + $0x418] sm:$0xff]  ;;  %v3509_v53 = vld [vmem:[#allocation3 + $0x428] sm:$0xff] }
 0x8ae   :  { %4489 = vmatprep.subr.bf16.mxu1 %v3408_v55  ;;  %4694 = vmatprep.subr.bf16.mxu0 %v3410_v63  ;;  %v3506_v55 = vld [vmem:[#allocation3 + $0x410] sm:$0xff]  ;;  %v3508_v63 = vld [vmem:[#allocation3 + $0x420] sm:$0xff] }
 0x8b1   :  { %4490 = vmatpush1.bf16.msra.mxu1 %v3407_v47  ;;  %4695 = vmatpush1.bf16.msra.mxu0 %v3409_v9  ;;  %v3516_v47 = vld [vmem:[#allocation3 + $0x460] sm:$0xff]  ;;  %v3518_v9 = vld [vmem:[#allocation3 + $0x470] sm:$0xff] }
 0x8b2   :  { %4491 = vmatprep.subr.bf16.mxu1 %v3417_v54  ;;  %4696 = vmatprep.subr.bf16.mxu0 %v3419_v23  ;;  %v3515_v54 = vld [vmem:[#allocation3 + $0x458] sm:$0xff]  ;;  %v3517_v23 = vld [vmem:[#allocation3 + $0x468] sm:$0xff] }
 0x8b5   :  { %4492 = vmatpush1.bf16.msra.mxu1 %v3416_v44  ;;  %4697 = vmatpush1.bf16.msra.mxu0 %v3418_v58  ;;  %v3525_v44 = vld [vmem:[#allocation3 + $0x4a8] sm:$0xff]  ;;  %v3527_v58 = vld [vmem:[#allocation3 + $0x4b8] sm:$0xff] }
 0x8b6   :  { %4493 = vmatprep.subr.bf16.mxu1 %v3426_v10  ;;  %4698 = vmatprep.subr.bf16.mxu0 %v3428_v56  ;;  %v3524_v10 = vld [vmem:[#allocation3 + $0x4a0] sm:$0xff]  ;;  %v3526_v56 = vld [vmem:[#allocation3 + $0x4b0] sm:$0xff] }
 0x8b9   :  { %4494 = vmatpush1.bf16.msra.mxu1 %v3425_v57  ;;  %4699 = vmatpush1.bf16.msra.mxu0 %v3427_v17  ;;  %v3534_v57 = vld [vmem:[#allocation3 + $0x4f0] sm:$0xff]  ;;  %v3536_v17 = vld [vmem:[#allocation3 + $0x500] sm:$0xff] }
 0x8ba   :  { %4495 = vmatprep.subr.bf16.mxu1 %v3435_v11  ;;  %4700 = vmatprep.subr.bf16.mxu0 %v3437_v33  ;;  %v3533_v11 = vld [vmem:[#allocation3 + $0x4e8] sm:$0xff]  ;;  %v3535_v33 = vld [vmem:[#allocation3 + $0x4f8] sm:$0xff] }
 0x8bd   :  { %4496 = vmatpush1.bf16.msra.mxu1 %v3434_v14  ;;  %4701 = vmatpush1.bf16.msra.mxu0 %v3436_v38  ;;  %v3543_v14 = vld [vmem:[#allocation3 + $0x538] sm:$0xff]  ;;  %v3545_v38 = vld [vmem:[#allocation3 + $0x548] sm:$0xff] }
 0x8be   :  { %4497 = vmatprep.subr.bf16.mxu1 %v3444_v36  ;;  %4702 = vmatprep.subr.bf16.mxu0 %v3446_v60  ;;  %v3542_v36 = vld [vmem:[#allocation3 + $0x530] sm:$0xff]  ;;  %v3544_v60 = vld [vmem:[#allocation3 + $0x540] sm:$0xff] }
 0x8c1   :  { %4498 = vmatpush1.bf16.msra.mxu1 %v3443_v20  ;;  %4703 = vmatpush1.bf16.msra.mxu0 %v3445_v59  ;;  %v3552_v20 = vld [vmem:[#allocation3 + $0x580] sm:$0xff]  ;;  %v3554_v59 = vld [vmem:[#allocation3 + $0x590] sm:$0xff] }
 0x8c2   :  { %4499 = vmatprep.subr.bf16.mxu1 %v3453_v22  ;;  %4704 = vmatprep.subr.bf16.mxu0 %v3455_v40  ;;  %v3551_v22 = vld [vmem:[#allocation3 + $0x578] sm:$0xff]  ;;  %v3553_v40 = vld [vmem:[#allocation3 + $0x588] sm:$0xff] }
 0x8c5   :  { %4500 = vmatpush1.bf16.msra.mxu1 %v3452_v43  ;;  %4705 = vmatpush1.bf16.msra.mxu0 %v3454_v62  ;;  %v3561_v43 = vld [vmem:[#allocation3 + $0x5c8] sm:$0xff]  ;;  %v3563_v62 = vld [vmem:[#allocation3 + $0x5d8] sm:$0xff] }
 0x8c6   :  { %4501 = vmatprep.subr.bf16.mxu1 %v3462_v45  ;;  %4706 = vmatprep.subr.bf16.mxu0 %v3464_v37  ;;  %v3560_v45 = vld [vmem:[#allocation3 + $0x5c0] sm:$0xff]  ;;  %v3562_v37 = vld [vmem:[#allocation3 + $0x5d0] sm:$0xff] }
 0x8c9   :  { %4502 = vmatpush1.bf16.msra.mxu1 %v3461_v46  ;;  %4707 = vmatpush1.bf16.msra.mxu0 %v3463_v15  ;;  %v3570_v46 = vld [vmem:[#allocation3 + $0x610] sm:$0xff]  ;;  %v3572_v15 = vld [vmem:[#allocation3 + $0x620] sm:$0xff] }
 0x8ca   :  { %4503 = vmatprep.subr.bf16.mxu1 %v3471_v18  ;;  %4708 = vmatprep.subr.bf16.mxu0 %v3473_v21  ;;  %v3569_v18 = vld [vmem:[#allocation3 + $0x608] sm:$0xff]  ;;  %v3571_v21 = vld [vmem:[#allocation3 + $0x618] sm:$0xff] }
 0x8cd   :  { %4504 = vmatpush1.bf16.msra.mxu1 %v3470_v25  ;;  %4709 = vmatpush1.bf16.msra.mxu0 %v3472_v28  ;;  %v3579_v25 = vld [vmem:[#allocation3 + $0x658] sm:$0xff]  ;;  %v3581_v28 = vld [vmem:[#allocation3 + $0x668] sm:$0xff] }
 0x8ce   :  { %4505 = vmatprep.subr.bf16.mxu1 %v3480_v5  ;;  %4710 = vmatprep.subr.bf16.mxu0 %v3482_v31  ;;  %v3578_v5 = vld [vmem:[#allocation3 + $0x650] sm:$0xff]  ;;  %v3580_v31 = vld [vmem:[#allocation3 + $0x660] sm:$0xff] }
 0x8d1   :  { %4506 = vmatpush1.bf16.msra.mxu1 %v3479_v34  ;;  %4711 = vmatpush1.bf16.msra.mxu0 %v3481_v24  ;;  %v3588_v34 = vld [vmem:[#allocation3 + $0x6a0] sm:$0xff]  ;;  %v3590_v24 = vld [vmem:[#allocation3 + $0x6b0] sm:$0xff] }
 0x8d2   :  { %4507 = vmatprep.subr.bf16.mxu1 %v3489_v29  ;;  %4712 = vmatprep.subr.bf16.mxu0 %v3491_v42  ;;  %v3587_v29 = vld [vmem:[#allocation3 + $0x698] sm:$0xff]  ;;  %v3589_v42 = vld [vmem:[#allocation3 + $0x6a8] sm:$0xff] }
 0x8d5   :  { %4508 = vmatpush1.bf16.msra.mxu1 %v3488_v6  ;;  %4713 = vmatpush1.bf16.msra.mxu0 %v3490_v2  ;;  %v3597_v6 = vld [vmem:[#allocation3 + $0x6e8] sm:$0xff]  ;;  %v3599_v2 = vld [vmem:[#allocation3 + $0x6f8] sm:$0xff] }
 0x8d6   :  { %4509 = vmatprep.subr.bf16.mxu1 %v3498_v61  ;;  %4714 = vmatprep.subr.bf16.mxu0 %v3500_v4  ;;  %v3596_v61 = vld [vmem:[#allocation3 + $0x6e0] sm:$0xff]  ;;  %v3598_v4 = vld [vmem:[#allocation3 + $0x6f0] sm:$0xff] }
 0x8d9   :  { %4510 = vmatpush1.bf16.msra.mxu1 %v3497_v48  ;;  %4715 = vmatpush1.bf16.msra.mxu0 %v3499_v16  ;;  %v3606_v48 = vld [vmem:[#allocation3 + $0x730] sm:$0xff]  ;;  %v3608_v16 = vld [vmem:[#allocation3 + $0x740] sm:$0xff] }
 0x8da   :  { %4511 = vmatprep.subr.bf16.mxu1 %v3507_v39  ;;  %4716 = vmatprep.subr.bf16.mxu0 %v3509_v53  ;;  %v3605_v39 = vld [vmem:[#allocation3 + $0x728] sm:$0xff]  ;;  %v3607_v53 = vld [vmem:[#allocation3 + $0x738] sm:$0xff] }
 0x8dd   :  { %4512 = vmatpush1.bf16.msra.mxu1 %v3506_v55  ;;  %4717 = vmatpush1.bf16.msra.mxu0 %v3508_v63  ;;  %v3615_v55 = vld [vmem:[#allocation3 + $0x778] sm:$0xff]  ;;  %v3617_v63 = vld [vmem:[#allocation3 + $0x788] sm:$0xff] }
 0x8de   :  { %4513 = vmatprep.subr.bf16.mxu1 %v3516_v47  ;;  %4718 = vmatprep.subr.bf16.mxu0 %v3518_v9  ;;  %v3614_v47 = vld [vmem:[#allocation3 + $0x770] sm:$0xff]  ;;  %v3616_v9 = vld [vmem:[#allocation3 + $0x780] sm:$0xff] }
 0x8e1   :  { %4514 = vmatpush1.bf16.msra.mxu1 %v3515_v54  ;;  %4719 = vmatpush1.bf16.msra.mxu0 %v3517_v23  ;;  %v3624_v54 = vld [vmem:[#allocation3 + $0x7c0] sm:$0xff]  ;;  %v3626_v23 = vld [vmem:[#allocation3 + $0x7d0] sm:$0xff] }
 0x8e2   :  { %4524 = vmatprep.subr.bf16.mxu1 %v3525_v44  ;;  %4729 = vmatprep.subr.bf16.mxu0 %v3527_v58  ;;  %v3623_v44 = vld [vmem:[#allocation3 + $0x7b8] sm:$0xff]  ;;  %v3625_v58 = vld [vmem:[#allocation3 + $0x7c8] sm:$0xff] }
 0x8e4   :  { %4516 = vmatmul.mubr.bf16.vlgmr.msra.gmra.mrb[32].mxu1 %v9347_v50  ;;  %4721 = vmatmul.mubr.bf16.vlgmr.msra.gmra.mrb[32].mxu0 %v9347_v50 }
 0x8e5   :  { %4525 = vmatpush1.bf16.msra.mxu1 %v3524_v10  ;;  %4730 = vmatpush1.bf16.msra.mxu0 %v3526_v56  ;;  %v3633_v10 = vld [vmem:[#allocation3 + $0x808] sm:$0xff]  ;;  %v3635_v56 = vld [vmem:[#allocation3 + $0x818] sm:$0xff] }
 0x8e6   :  { %4526 = vmatprep.subr.bf16.mxu1 %v3534_v57  ;;  %4731 = vmatprep.subr.bf16.mxu0 %v3536_v17  ;;  %v3632_v57 = vld [vmem:[#allocation3 + $0x800] sm:$0xff]  ;;  %v3634_v17 = vld [vmem:[#allocation3 + $0x810] sm:$0xff] }
 0x8e7   :  { %4556 = vmatprep.mubr.bf16.mxu1 %v9356_v27  ;;  %4761 = vmatprep.mubr.bf16.mxu0 %v9356_v27 }
 0x8e9   :  { %4527 = vmatpush1.bf16.msra.mxu1 %v3533_v11  ;;  %4732 = vmatpush1.bf16.msra.mxu0 %v3535_v33  ;;  %v3642_v11 = vld [vmem:[#allocation3 + $0x850] sm:$0xff]  ;;  %v3644_v33 = vld [vmem:[#allocation3 + $0x860] sm:$0xff] }
 0x8ea   :  { %4528 = vmatprep.subr.bf16.mxu1 %v3543_v14  ;;  %4733 = vmatprep.subr.bf16.mxu0 %v3545_v38  ;;  %v3641_v14 = vld [vmem:[#allocation3 + $0x848] sm:$0xff]  ;;  %v3643_v38 = vld [vmem:[#allocation3 + $0x858] sm:$0xff] }
 0x8ed   :  { %4529 = vmatpush1.bf16.msra.mxu1 %v3542_v36  ;;  %4734 = vmatpush1.bf16.msra.mxu0 %v3544_v60  ;;  %v3651_v36 = vld [vmem:[#allocation3 + $0x898] sm:$0xff]  ;;  %v3653_v60 = vld [vmem:[#allocation3 + $0x8a8] sm:$0xff] }
 0x8ee   :  { %4530 = vmatprep.subr.bf16.mxu1 %v3552_v20  ;;  %4735 = vmatprep.subr.bf16.mxu0 %v3554_v59  ;;  %v3650_v20 = vld [vmem:[#allocation3 + $0x890] sm:$0xff]  ;;  %v3652_v59 = vld [vmem:[#allocation3 + $0x8a0] sm:$0xff] }
 0x8f1   :  { %4531 = vmatpush1.bf16.msra.mxu1 %v3551_v22  ;;  %4736 = vmatpush1.bf16.msra.mxu0 %v3553_v40  ;;  %v3660_v22 = vld [vmem:[#allocation3 + $0x8e0] sm:$0xff]  ;;  %v3662_v40 = vld [vmem:[#allocation3 + $0x8f0] sm:$0xff] }
 0x8f2   :  { %4532 = vmatprep.subr.bf16.mxu1 %v3561_v43  ;;  %4737 = vmatprep.subr.bf16.mxu0 %v3563_v62  ;;  %v3659_v43 = vld [vmem:[#allocation3 + $0x8d8] sm:$0xff]  ;;  %v3661_v62 = vld [vmem:[#allocation3 + $0x8e8] sm:$0xff] }
 0x8f5   :  { %4533 = vmatpush1.bf16.msra.mxu1 %v3560_v45  ;;  %4738 = vmatpush1.bf16.msra.mxu0 %v3562_v37  ;;  %v3669_v45 = vld [vmem:[#allocation3 + $0x928] sm:$0xff]  ;;  %v3671_v37 = vld [vmem:[#allocation3 + $0x938] sm:$0xff] }
 0x8f6   :  { %4534 = vmatprep.subr.bf16.mxu1 %v3570_v46  ;;  %4739 = vmatprep.subr.bf16.mxu0 %v3572_v15  ;;  %v3668_v46 = vld [vmem:[#allocation3 + $0x920] sm:$0xff]  ;;  %v3670_v15 = vld [vmem:[#allocation3 + $0x930] sm:$0xff] }
 0x8f9   :  { %4535 = vmatpush1.bf16.msra.mxu1 %v3569_v18  ;;  %4740 = vmatpush1.bf16.msra.mxu0 %v3571_v21  ;;  %v3678_v18 = vld [vmem:[#allocation3 + $0x970] sm:$0xff]  ;;  %v3680_v21 = vld [vmem:[#allocation3 + $0x980] sm:$0xff] }
 0x8fa   :  { %4536 = vmatprep.subr.bf16.mxu1 %v3579_v25  ;;  %4741 = vmatprep.subr.bf16.mxu0 %v3581_v28  ;;  %v3677_v25 = vld [vmem:[#allocation3 + $0x968] sm:$0xff]  ;;  %v3679_v28 = vld [vmem:[#allocation3 + $0x978] sm:$0xff] }
 0x8fd   :  { %4537 = vmatpush1.bf16.msra.mxu1 %v3578_v5  ;;  %4742 = vmatpush1.bf16.msra.mxu0 %v3580_v31  ;;  %v3687_v5 = vld [vmem:[#allocation3 + $0x9b8] sm:$0xff]  ;;  %v3689_v31 = vld [vmem:[#allocation3 + $0x9c8] sm:$0xff] }
 0x8fe   :  { %4538 = vmatprep.subr.bf16.mxu1 %v3588_v34  ;;  %4743 = vmatprep.subr.bf16.mxu0 %v3590_v24  ;;  %v3686_v34 = vld [vmem:[#allocation3 + $0x9b0] sm:$0xff]  ;;  %v3688_v24 = vld [vmem:[#allocation3 + $0x9c0] sm:$0xff] }
 0x901   :  { %4539 = vmatpush1.bf16.msra.mxu1 %v3587_v29  ;;  %4744 = vmatpush1.bf16.msra.mxu0 %v3589_v42  ;;  %v3696_v29 = vld [vmem:[#allocation3 + $0xa00] sm:$0xff]  ;;  %v3698_v42 = vld [vmem:[#allocation3 + $0xa10] sm:$0xff] }
 0x902   :  { %4540 = vmatprep.subr.bf16.mxu1 %v3597_v6  ;;  %4745 = vmatprep.subr.bf16.mxu0 %v3599_v2  ;;  %v3695_v6 = vld [vmem:[#allocation3 + $0x9f8] sm:$0xff]  ;;  %v3697_v2 = vld [vmem:[#allocation3 + $0xa08] sm:$0xff] }
 0x905   :  { %4541 = vmatpush1.bf16.msra.mxu1 %v3596_v61  ;;  %4746 = vmatpush1.bf16.msra.mxu0 %v3598_v4  ;;  %v3705_v61 = vld [vmem:[#allocation3 + $0xa48] sm:$0xff]  ;;  %v3707_v4 = vld [vmem:[#allocation3 + $0xa58] sm:$0xff] }
 0x906   :  { %4542 = vmatprep.subr.bf16.mxu1 %v3606_v48  ;;  %4747 = vmatprep.subr.bf16.mxu0 %v3608_v16  ;;  %v3704_v48 = vld [vmem:[#allocation3 + $0xa40] sm:$0xff]  ;;  %v3706_v16 = vld [vmem:[#allocation3 + $0xa50] sm:$0xff] }
 0x909   :  { %4543 = vmatpush1.bf16.msra.mxu1 %v3605_v39  ;;  %4748 = vmatpush1.bf16.msra.mxu0 %v3607_v53  ;;  %v3714_v39 = vld [vmem:[#allocation3 + $0xa90] sm:$0xff]  ;;  %v3716_v53 = vld [vmem:[#allocation3 + $0xaa0] sm:$0xff] }
 0x90a   :  { %4544 = vmatprep.subr.bf16.mxu1 %v3615_v55  ;;  %4749 = vmatprep.subr.bf16.mxu0 %v3617_v63  ;;  %v3713_v55 = vld [vmem:[#allocation3 + $0xa88] sm:$0xff]  ;;  %v3715_v63 = vld [vmem:[#allocation3 + $0xa98] sm:$0xff] }
 0x90d   :  { %4545 = vmatpush1.bf16.msra.mxu1 %v3614_v47  ;;  %4750 = vmatpush1.bf16.msra.mxu0 %v3616_v9  ;;  %v3723_v47 = vld [vmem:[#allocation3 + $0xad8] sm:$0xff]  ;;  %v3725_v9 = vld [vmem:[#allocation3 + $0xae8] sm:$0xff] }
 0x90e   :  { %4546 = vmatprep.subr.bf16.mxu1 %v3624_v54  ;;  %4751 = vmatprep.subr.bf16.mxu0 %v3626_v23  ;;  %v3722_v54 = vld [vmem:[#allocation3 + $0xad0] sm:$0xff]  ;;  %v3724_v23 = vld [vmem:[#allocation3 + $0xae0] sm:$0xff] }
 0x911   :  { %4547 = vmatpush1.bf16.msra.mxu1 %v3623_v44  ;;  %4752 = vmatpush1.bf16.msra.mxu0 %v3625_v58  ;;  %v3732_v44 = vld [vmem:[#allocation3 + $0xb20] sm:$0xff]  ;;  %v3734_v58 = vld [vmem:[#allocation3 + $0xb30] sm:$0xff] }
 0x912   :  { %4548 = vmatprep.subr.bf16.mxu1 %v3633_v10  ;;  %4753 = vmatprep.subr.bf16.mxu0 %v3635_v56  ;;  %v3731_v10 = vld [vmem:[#allocation3 + $0xb18] sm:$0xff]  ;;  %v3733_v56 = vld [vmem:[#allocation3 + $0xb28] sm:$0xff] }
 0x915   :  { %4549 = vmatpush1.bf16.msra.mxu1 %v3632_v57  ;;  %4754 = vmatpush1.bf16.msra.mxu0 %v3634_v17  ;;  %v3741_v57 = vld [vmem:[#allocation3 + $0xb68] sm:$0xff]  ;;  %v3743_v17 = vld [vmem:[#allocation3 + $0xb78] sm:$0xff] }
 0x916   :  { %4550 = vmatprep.subr.bf16.mxu1 %v3642_v11  ;;  %4755 = vmatprep.subr.bf16.mxu0 %v3644_v33  ;;  %v3740_v11 = vld [vmem:[#allocation3 + $0xb60] sm:$0xff]  ;;  %v3742_v33 = vld [vmem:[#allocation3 + $0xb70] sm:$0xff] }
 0x919   :  { %4551 = vmatpush1.bf16.msra.mxu1 %v3641_v14  ;;  %4756 = vmatpush1.bf16.msra.mxu0 %v3643_v38  ;;  %v3750_v14 = vld [vmem:[#allocation3 + $0xbb0] sm:$0xff]  ;;  %v3752_v38 = vld [vmem:[#allocation3 + $0xbc0] sm:$0xff] }
 0x91a   :  { %4552 = vmatprep.subr.bf16.mxu1 %v3651_v36  ;;  %4757 = vmatprep.subr.bf16.mxu0 %v3653_v60  ;;  %v3749_v36 = vld [vmem:[#allocation3 + $0xba8] sm:$0xff]  ;;  %v3751_v60 = vld [vmem:[#allocation3 + $0xbb8] sm:$0xff] }
 0x91d   :  { %4553 = vmatpush1.bf16.msra.mxu1 %v3650_v20  ;;  %4758 = vmatpush1.bf16.msra.mxu0 %v3652_v59  ;;  %v3759_v20 = vld [vmem:[#allocation3 + $0xbf8] sm:$0xff]  ;;  %v3761_v59 = vld [vmem:[#allocation3 + $0xc08] sm:$0xff] }
 0x91e   :  { %4554 = vmatprep.subr.bf16.mxu1 %v3660_v22  ;;  %4759 = vmatprep.subr.bf16.mxu0 %v3662_v40  ;;  %v3758_v22 = vld [vmem:[#allocation3 + $0xbf0] sm:$0xff]  ;;  %v3760_v40 = vld [vmem:[#allocation3 + $0xc00] sm:$0xff] }
 0x921   :  { %4555 = vmatpush1.bf16.msra.mxu1 %v3659_v43  ;;  %4760 = vmatpush1.bf16.msra.mxu0 %v3661_v62  ;;  %v3768_v43 = vld [vmem:[#allocation3 + $0xc40] sm:$0xff]  ;;  %v3770_v62 = vld [vmem:[#allocation3 + $0xc50] sm:$0xff] }
 0x922   :  { %4565 = vmatprep.subr.bf16.mxu1 %v3669_v45  ;;  %4770 = vmatprep.subr.bf16.mxu0 %v3671_v37  ;;  %v3767_v45 = vld [vmem:[#allocation3 + $0xc38] sm:$0xff]  ;;  %v3769_v37 = vld [vmem:[#allocation3 + $0xc48] sm:$0xff] }
 0x924   :  { %4557 = vmatmul.mubr.bf16.vlgmr.msra.gmra.mrb[32].mxu1 %v9353_v52  ;;  %4762 = vmatmul.mubr.bf16.vlgmr.msra.gmra.mrb[32].mxu0 %v9353_v52 }
 0x925   :  { %4566 = vmatpush1.bf16.msra.mxu1 %v3668_v46  ;;  %4771 = vmatpush1.bf16.msra.mxu0 %v3670_v15  ;;  %v3777_v46 = vld [vmem:[#allocation3 + $0xc88] sm:$0xff]  ;;  %v3779_v15 = vld [vmem:[#allocation3 + $0xc98] sm:$0xff] }
 0x926   :  { %4567 = vmatprep.subr.bf16.mxu1 %v3678_v18  ;;  %4772 = vmatprep.subr.bf16.mxu0 %v3680_v21  ;;  %v3776_v18 = vld [vmem:[#allocation3 + $0xc80] sm:$0xff]  ;;  %v3778_v21 = vld [vmem:[#allocation3 + $0xc90] sm:$0xff] }
 0x927   :  { %4597 = vmatprep.mubr.bf16.mxu1 %v9362_v0  ;;  %4802 = vmatprep.mubr.bf16.mxu0 %v9362_v0 }
 0x929   :  { %4568 = vmatpush1.bf16.msra.mxu1 %v3677_v25  ;;  %4773 = vmatpush1.bf16.msra.mxu0 %v3679_v28  ;;  %v3786_v25 = vld [vmem:[#allocation3 + $0xcd0] sm:$0xff]  ;;  %v3788_v28 = vld [vmem:[#allocation3 + $0xce0] sm:$0xff] }
 0x92a   :  { %4569 = vmatprep.subr.bf16.mxu1 %v3687_v5  ;;  %4774 = vmatprep.subr.bf16.mxu0 %v3689_v31  ;;  %v3785_v5 = vld [vmem:[#allocation3 + $0xcc8] sm:$0xff]  ;;  %v3787_v31 = vld [vmem:[#allocation3 + $0xcd8] sm:$0xff] }
 0x92d   :  { %4570 = vmatpush1.bf16.msra.mxu1 %v3686_v34  ;;  %4775 = vmatpush1.bf16.msra.mxu0 %v3688_v24  ;;  %v3795_v34 = vld [vmem:[#allocation3 + $0xd18] sm:$0xff]  ;;  %v3797_v24 = vld [vmem:[#allocation3 + $0xd28] sm:$0xff] }
 0x92e   :  { %4571 = vmatprep.subr.bf16.mxu1 %v3696_v29  ;;  %4776 = vmatprep.subr.bf16.mxu0 %v3698_v42  ;;  %v3794_v29 = vld [vmem:[#allocation3 + $0xd10] sm:$0xff]  ;;  %v3796_v42 = vld [vmem:[#allocation3 + $0xd20] sm:$0xff] }
 0x931   :  { %4572 = vmatpush1.bf16.msra.mxu1 %v3695_v6  ;;  %4777 = vmatpush1.bf16.msra.mxu0 %v3697_v2  ;;  %v3804_v6 = vld [vmem:[#allocation3 + $0xd60] sm:$0xff]  ;;  %v3806_v2 = vld [vmem:[#allocation3 + $0xd70] sm:$0xff] }
 0x932   :  { %4573 = vmatprep.subr.bf16.mxu1 %v3705_v61  ;;  %4778 = vmatprep.subr.bf16.mxu0 %v3707_v4  ;;  %v3803_v61 = vld [vmem:[#allocation3 + $0xd58] sm:$0xff]  ;;  %v3805_v4 = vld [vmem:[#allocation3 + $0xd68] sm:$0xff] }
 0x935   :  { %4574 = vmatpush1.bf16.msra.mxu1 %v3704_v48  ;;  %4779 = vmatpush1.bf16.msra.mxu0 %v3706_v16  ;;  %v3813_v48 = vld [vmem:[#allocation3 + $0xda8] sm:$0xff]  ;;  %v3815_v16 = vld [vmem:[#allocation3 + $0xdb8] sm:$0xff] }
 0x936   :  { %4575 = vmatprep.subr.bf16.mxu1 %v3714_v39  ;;  %4780 = vmatprep.subr.bf16.mxu0 %v3716_v53  ;;  %v3812_v39 = vld [vmem:[#allocation3 + $0xda0] sm:$0xff]  ;;  %v3814_v53 = vld [vmem:[#allocation3 + $0xdb0] sm:$0xff] }
 0x939   :  { %4576 = vmatpush1.bf16.msra.mxu1 %v3713_v55  ;;  %4781 = vmatpush1.bf16.msra.mxu0 %v3715_v63  ;;  %v3822_v55 = vld [vmem:[#allocation3 + $0xdf0] sm:$0xff]  ;;  %v3824_v63 = vld [vmem:[#allocation3 + $0xe00] sm:$0xff] }
 0x93a   :  { %4577 = vmatprep.subr.bf16.mxu1 %v3723_v47  ;;  %4782 = vmatprep.subr.bf16.mxu0 %v3725_v9  ;;  %v3821_v47 = vld [vmem:[#allocation3 + $0xde8] sm:$0xff]  ;;  %v3823_v9 = vld [vmem:[#allocation3 + $0xdf8] sm:$0xff] }
 0x93d   :  { %4578 = vmatpush1.bf16.msra.mxu1 %v3722_v54  ;;  %4783 = vmatpush1.bf16.msra.mxu0 %v3724_v23  ;;  %v3831_v54 = vld [vmem:[#allocation3 + $0xe38] sm:$0xff]  ;;  %v3833_v23 = vld [vmem:[#allocation3 + $0xe48] sm:$0xff] }
 0x93e   :  { %4579 = vmatprep.subr.bf16.mxu1 %v3732_v44  ;;  %4784 = vmatprep.subr.bf16.mxu0 %v3734_v58  ;;  %v3830_v44 = vld [vmem:[#allocation3 + $0xe30] sm:$0xff]  ;;  %v3832_v58 = vld [vmem:[#allocation3 + $0xe40] sm:$0xff] }
 0x941   :  { %4580 = vmatpush1.bf16.msra.mxu1 %v3731_v10  ;;  %4785 = vmatpush1.bf16.msra.mxu0 %v3733_v56  ;;  %v3840_v10 = vld [vmem:[#allocation3 + $0xe80] sm:$0xff]  ;;  %v3842_v56 = vld [vmem:[#allocation3 + $0xe90] sm:$0xff] }
 0x942   :  { %4581 = vmatprep.subr.bf16.mxu1 %v3741_v57  ;;  %4786 = vmatprep.subr.bf16.mxu0 %v3743_v17  ;;  %v3839_v57 = vld [vmem:[#allocation3 + $0xe78] sm:$0xff]  ;;  %v3841_v17 = vld [vmem:[#allocation3 + $0xe88] sm:$0xff] }
 0x945   :  { %4582 = vmatpush1.bf16.msra.mxu1 %v3740_v11  ;;  %4787 = vmatpush1.bf16.msra.mxu0 %v3742_v33  ;;  %v3849_v11 = vld [vmem:[#allocation3 + $0xec8] sm:$0xff]  ;;  %v3851_v33 = vld [vmem:[#allocation3 + $0xed8] sm:$0xff] }
 0x946   :  { %4583 = vmatprep.subr.bf16.mxu1 %v3750_v14  ;;  %4788 = vmatprep.subr.bf16.mxu0 %v3752_v38  ;;  %v3848_v14 = vld [vmem:[#allocation3 + $0xec0] sm:$0xff]  ;;  %v3850_v38 = vld [vmem:[#allocation3 + $0xed0] sm:$0xff] }
 0x949   :  { %4584 = vmatpush1.bf16.msra.mxu1 %v3749_v36  ;;  %4789 = vmatpush1.bf16.msra.mxu0 %v3751_v60  ;;  %v3858_v36 = vld [vmem:[#allocation3 + $0xf10] sm:$0xff]  ;;  %v3860_v60 = vld [vmem:[#allocation3 + $0xf20] sm:$0xff] }
 0x94a   :  { %4585 = vmatprep.subr.bf16.mxu1 %v3759_v20  ;;  %4790 = vmatprep.subr.bf16.mxu0 %v3761_v59  ;;  %v3857_v20 = vld [vmem:[#allocation3 + $0xf08] sm:$0xff]  ;;  %v3859_v59 = vld [vmem:[#allocation3 + $0xf18] sm:$0xff] }
 0x94d   :  { %4586 = vmatpush1.bf16.msra.mxu1 %v3758_v22  ;;  %4791 = vmatpush1.bf16.msra.mxu0 %v3760_v40 }
 0x94e   :  { %4587 = vmatprep.subr.bf16.mxu1 %v3768_v43  ;;  %4792 = vmatprep.subr.bf16.mxu0 %v3770_v62  ;;  %v3867_v43 = vld [vmem:[#allocation3 + $0xf58] sm:$0xff]  ;;  %v3869_v62 = vld [vmem:[#allocation3 + $0xf68] sm:$0xff] }
 0x951   :  { %4588 = vmatpush1.bf16.msra.mxu1 %v3767_v45  ;;  %4793 = vmatpush1.bf16.msra.mxu0 %v3769_v37 }
 0x952   :  { %4589 = vmatprep.subr.bf16.mxu1 %v3777_v46  ;;  %4794 = vmatprep.subr.bf16.mxu0 %v3779_v15 }
 0x955   :  { %4590 = vmatpush1.bf16.msra.mxu1 %v3776_v18  ;;  %4795 = vmatpush1.bf16.msra.mxu0 %v3778_v21 }
 0x956   :  { %4591 = vmatprep.subr.bf16.mxu1 %v3786_v25  ;;  %4796 = vmatprep.subr.bf16.mxu0 %v3788_v28  ;;  %v3866_v25 = vld [vmem:[#allocation3 + $0xf50] sm:$0xff]  ;;  %v3868_v28 = vld [vmem:[#allocation3 + $0xf60] sm:$0xff] }
 0x959   :  { %4592 = vmatpush1.bf16.msra.mxu1 %v3785_v5  ;;  %4797 = vmatpush1.bf16.msra.mxu0 %v3787_v31  ;;  %v3876_v5 = vld [vmem:[#allocation3 + $0xfa0] sm:$0xff]  ;;  %v3878_v31 = vld [vmem:[#allocation3 + $0xfb0] sm:$0xff] }
 0x95a   :  { %4593 = vmatprep.subr.bf16.mxu1 %v3795_v34  ;;  %4798 = vmatprep.subr.bf16.mxu0 %v3797_v24  ;;  %v3875_v34 = vld [vmem:[#allocation3 + $0xf98] sm:$0xff]  ;;  %v3877_v24 = vld [vmem:[#allocation3 + $0xfa8] sm:$0xff] }
 0x95d   :  { %4594 = vmatpush1.bf16.msra.mxu1 %v3794_v29  ;;  %4799 = vmatpush1.bf16.msra.mxu0 %v3796_v42  ;;  %v3885_v29 = vld [vmem:[#allocation3 + $0xfe8] sm:$0xff]  ;;  %v3887_v42 = vld [vmem:[#allocation3 + $0xff8] sm:$0xff] }
 0x95e   :  { %4595 = vmatprep.subr.bf16.mxu1 %v3804_v6  ;;  %4800 = vmatprep.subr.bf16.mxu0 %v3806_v2  ;;  %v3884_v6 = vld [vmem:[#allocation3 + $0xfe0] sm:$0xff]  ;;  %v3886_v2 = vld [vmem:[#allocation3 + $0xff0] sm:$0xff] }
 0x961   :  { %4596 = vmatpush1.bf16.msra.mxu1 %v3803_v61  ;;  %4801 = vmatpush1.bf16.msra.mxu0 %v3805_v4  ;;  %v3894_v61 = vld [vmem:[#allocation3 + $0x1030] sm:$0xff]  ;;  %v3896_v4 = vld [vmem:[#allocation3 + $0x1040] sm:$0xff] }
 0x962   :  { %4606 = vmatprep.subr.bf16.mxu1 %v3813_v48  ;;  %4811 = vmatprep.subr.bf16.mxu0 %v3815_v16  ;;  %v3893_v48 = vld [vmem:[#allocation3 + $0x1028] sm:$0xff]  ;;  %v3895_v16 = vld [vmem:[#allocation3 + $0x1038] sm:$0xff] }
 0x964   :  { %4598 = vmatmul.mubr.bf16.vlgmr.msra.gmra.mrb[32].mxu1 %v9359_v41  ;;  %4803 = vmatmul.mubr.bf16.vlgmr.msra.gmra.mrb[32].mxu0 %v9359_v41 }
 0x965   :  { %4607 = vmatpush1.bf16.msra.mxu1 %v3812_v39  ;;  %4812 = vmatpush1.bf16.msra.mxu0 %v3814_v53  ;;  %v3903_v39 = vld [vmem:[#allocation3 + $0x1078] sm:$0xff]  ;;  %v3905_v53 = vld [vmem:[#allocation3 + $0x1088] sm:$0xff] }
 0x966   :  { %4608 = vmatprep.subr.bf16.mxu1 %v3822_v55  ;;  %4813 = vmatprep.subr.bf16.mxu0 %v3824_v63  ;;  %v3902_v55 = vld [vmem:[#allocation3 + $0x1070] sm:$0xff]  ;;  %v3904_v63 = vld [vmem:[#allocation3 + $0x1080] sm:$0xff] }
 0x967   :  { %4638 = vmatprep.mubr.bf16.mxu1 %v9368_v32  ;;  %4843 = vmatprep.mubr.bf16.mxu0 %v9368_v32 }
 0x969   :  { %4609 = vmatpush1.bf16.msra.mxu1 %v3821_v47  ;;  %4814 = vmatpush1.bf16.msra.mxu0 %v3823_v9  ;;  %v3912_v47 = vld [vmem:[#allocation3 + $0x10c0] sm:$0xff]  ;;  %v3914_v9 = vld [vmem:[#allocation3 + $0x10d0] sm:$0xff] }
 0x96a   :  { %4610 = vmatprep.subr.bf16.mxu1 %v3831_v54  ;;  %4815 = vmatprep.subr.bf16.mxu0 %v3833_v23  ;;  %v3911_v54 = vld [vmem:[#allocation3 + $0x10b8] sm:$0xff]  ;;  %v3913_v23 = vld [vmem:[#allocation3 + $0x10c8] sm:$0xff] }
 0x96d   :  { %4611 = vmatpush1.bf16.msra.mxu1 %v3830_v44  ;;  %4816 = vmatpush1.bf16.msra.mxu0 %v3832_v58  ;;  %v3921_v44 = vld [vmem:[#allocation3 + $0x1108] sm:$0xff]  ;;  %v3923_v58 = vld [vmem:[#allocation3 + $0x1118] sm:$0xff] }
 0x96e   :  { %4612 = vmatprep.subr.bf16.mxu1 %v3840_v10  ;;  %4817 = vmatprep.subr.bf16.mxu0 %v3842_v56  ;;  %v3920_v10 = vld [vmem:[#allocation3 + $0x1100] sm:$0xff]  ;;  %v3922_v56 = vld [vmem:[#allocation3 + $0x1110] sm:$0xff] }
 0x971   :  { %4613 = vmatpush1.bf16.msra.mxu1 %v3839_v57  ;;  %4818 = vmatpush1.bf16.msra.mxu0 %v3841_v17  ;;  %v3930_v57 = vld [vmem:[#allocation3 + $0x1150] sm:$0xff]  ;;  %v3932_v17 = vld [vmem:[#allocation3 + $0x1160] sm:$0xff] }
 0x972   :  { %4614 = vmatprep.subr.bf16.mxu1 %v3849_v11  ;;  %4819 = vmatprep.subr.bf16.mxu0 %v3851_v33  ;;  %v3929_v11 = vld [vmem:[#allocation3 + $0x1148] sm:$0xff]  ;;  %v3931_v33 = vld [vmem:[#allocation3 + $0x1158] sm:$0xff] }
 0x975   :  { %4615 = vmatpush1.bf16.msra.mxu1 %v3848_v14  ;;  %4820 = vmatpush1.bf16.msra.mxu0 %v3850_v38  ;;  %v3939_v14 = vld [vmem:[#allocation3 + $0x1198] sm:$0xff]  ;;  %v3941_v38 = vld [vmem:[#allocation3 + $0x11a8] sm:$0xff] }
 0x976   :  { %4616 = vmatprep.subr.bf16.mxu1 %v3858_v36  ;;  %4821 = vmatprep.subr.bf16.mxu0 %v3860_v60  ;;  %v3938_v36 = vld [vmem:[#allocation3 + $0x1190] sm:$0xff]  ;;  %v3940_v60 = vld [vmem:[#allocation3 + $0x11a0] sm:$0xff] }
 0x977   :  { %v9407_v22 = vpop.f32.mrb[28].mxu1  ;;  %v9409_v40 = vpop.f32.mrb[28].mxu0 }
 0x978   :  { %v9411_v45 = vpop.f32.mrb[29].mxu1  ;;  %v9413_v37 = vpop.f32.mrb[29].mxu0 }
 0x979   :  { %v4275_v46 = vpop.f32.mrb[30].mxu1  ;;  %v4480_v15 = vpop.f32.mrb[30].mxu0  ;;  %4617 = vmatpush1.bf16.msra.mxu1 %v3857_v20  ;;  %4822 = vmatpush1.bf16.msra.mxu0 %v3859_v59  ;;  %v3948_v20 = vld [vmem:[#allocation3 + $0x11e0] sm:$0xff]  ;;  %v3950_v59 = vld [vmem:[#allocation3 + $0x11f0] sm:$0xff] }
 0x97a   :  { %v4276_v18 = vpop.f32.mrb[31].mxu1  ;;  %v4481_v21 = vpop.f32.mrb[31].mxu0  ;;  %4618 = vmatprep.subr.bf16.mxu1 %v3867_v43  ;;  %4823 = vmatprep.subr.bf16.mxu0 %v3869_v62  ;;  %v3947_v43 = vld [vmem:[#allocation3 + $0x11d8] sm:$0xff]  ;;  %v3949_v62 = vld [vmem:[#allocation3 + $0x11e8] sm:$0xff] }
 0x97b   :  { %v3957_v46 = vld [vmem:[#allocation3 + $0x1228] sm:$0xff]  ;;  %v3959_v15 = vld [vmem:[#allocation3 + $0x1238] sm:$0xff]  ;;  %v3956_v18 = vld [vmem:[#allocation3 + $0x1220] sm:$0xff] }
 0x97c   :  { %v3958_v21 = vld [vmem:[#allocation3 + $0x1230] sm:$0xff] }
 0x97d   :  { %4619 = vmatpush1.bf16.msra.mxu1 %v3866_v25  ;;  %4824 = vmatpush1.bf16.msra.mxu0 %v3868_v28  ;;  %v3966_v25 = vld [vmem:[#allocation3 + $0x1270] sm:$0xff]  ;;  %v3968_v28 = vld [vmem:[#allocation3 + $0x1280] sm:$0xff] }
 0x97e   :  { %4620 = vmatprep.subr.bf16.mxu1 %v3876_v5  ;;  %4825 = vmatprep.subr.bf16.mxu0 %v3878_v31  ;;  %v3965_v5 = vld [vmem:[#allocation3 + $0x1268] sm:$0xff]  ;;  %v3967_v31 = vld [vmem:[#allocation3 + $0x1278] sm:$0xff] }
 0x981   :  { %4621 = vmatpush1.bf16.msra.mxu1 %v3875_v34  ;;  %4826 = vmatpush1.bf16.msra.mxu0 %v3877_v24  ;;  %v3975_v34 = vld [vmem:[#allocation3 + $0x12b8] sm:$0xff]  ;;  %v3977_v24 = vld [vmem:[#allocation3 + $0x12c8] sm:$0xff] }
 0x982   :  { %4622 = vmatprep.subr.bf16.mxu1 %v3885_v29  ;;  %4827 = vmatprep.subr.bf16.mxu0 %v3887_v42  ;;  %v3974_v29 = vld [vmem:[#allocation3 + $0x12b0] sm:$0xff]  ;;  %v3976_v42 = vld [vmem:[#allocation3 + $0x12c0] sm:$0xff] }
 0x985   :  { %4623 = vmatpush1.bf16.msra.mxu1 %v3884_v6  ;;  %4828 = vmatpush1.bf16.msra.mxu0 %v3886_v2  ;;  %v3984_v6 = vld [vmem:[#allocation3 + $0x1300] sm:$0xff]  ;;  %v3986_v2 = vld [vmem:[#allocation3 + $0x1310] sm:$0xff] }
 0x986   :  { %4624 = vmatprep.subr.bf16.mxu1 %v3894_v61  ;;  %4829 = vmatprep.subr.bf16.mxu0 %v3896_v4  ;;  %v3983_v61 = vld [vmem:[#allocation3 + $0x12f8] sm:$0xff]  ;;  %v3985_v4 = vld [vmem:[#allocation3 + $0x1308] sm:$0xff] }
 0x989   :  { %4625 = vmatpush1.bf16.msra.mxu1 %v3893_v48  ;;  %4830 = vmatpush1.bf16.msra.mxu0 %v3895_v16  ;;  %v3993_v48 = vld [vmem:[#allocation3 + $0x1348] sm:$0xff]  ;;  %v3995_v16 = vld [vmem:[#allocation3 + $0x1358] sm:$0xff] }
 0x98a   :  { %4626 = vmatprep.subr.bf16.mxu1 %v3903_v39  ;;  %4831 = vmatprep.subr.bf16.mxu0 %v3905_v53  ;;  %v3992_v39 = vld [vmem:[#allocation3 + $0x1340] sm:$0xff]  ;;  %v3994_v53 = vld [vmem:[#allocation3 + $0x1350] sm:$0xff] }
 0x98d   :  { %4627 = vmatpush1.bf16.msra.mxu1 %v3902_v55  ;;  %4832 = vmatpush1.bf16.msra.mxu0 %v3904_v63  ;;  %v4002_v55 = vld [vmem:[#allocation3 + $0x1390] sm:$0xff]  ;;  %v4004_v63 = vld [vmem:[#allocation3 + $0x13a0] sm:$0xff] }
 0x98e   :  { %4628 = vmatprep.subr.bf16.mxu1 %v3912_v47  ;;  %4833 = vmatprep.subr.bf16.mxu0 %v3914_v9  ;;  %v4001_v47 = vld [vmem:[#allocation3 + $0x1388] sm:$0xff]  ;;  %v4003_v9 = vld [vmem:[#allocation3 + $0x1398] sm:$0xff] }
 0x991   :  { %4629 = vmatpush1.bf16.msra.mxu1 %v3911_v54  ;;  %4834 = vmatpush1.bf16.msra.mxu0 %v3913_v23  ;;  %v4011_v54 = vld [vmem:[#allocation3 + $0x13d8] sm:$0xff]  ;;  %v4013_v23 = vld [vmem:[#allocation3 + $0x13e8] sm:$0xff] }
 0x992   :  { %4630 = vmatprep.subr.bf16.mxu1 %v3921_v44  ;;  %4835 = vmatprep.subr.bf16.mxu0 %v3923_v58  ;;  %v4010_v44 = vld [vmem:[#allocation3 + $0x13d0] sm:$0xff]  ;;  %v4012_v58 = vld [vmem:[#allocation3 + $0x13e0] sm:$0xff] }
 0x995   :  { %4631 = vmatpush1.bf16.msra.mxu1 %v3920_v10  ;;  %4836 = vmatpush1.bf16.msra.mxu0 %v3922_v56  ;;  %v4020_v10 = vld [vmem:[#allocation3 + $0x1420] sm:$0xff]  ;;  %v4022_v56 = vld [vmem:[#allocation3 + $0x1430] sm:$0xff] }
 0x996   :  { %4632 = vmatprep.subr.bf16.mxu1 %v3930_v57  ;;  %4837 = vmatprep.subr.bf16.mxu0 %v3932_v17  ;;  %v4019_v57 = vld [vmem:[#allocation3 + $0x1418] sm:$0xff]  ;;  %v4021_v17 = vld [vmem:[#allocation3 + $0x1428] sm:$0xff] }
 0x999   :  { %4633 = vmatpush1.bf16.msra.mxu1 %v3929_v11  ;;  %4838 = vmatpush1.bf16.msra.mxu0 %v3931_v33  ;;  %v3456_v11 = vld [vmem:[#allocation3 + $0x280] sm:$0xff] }
 0x99a   :  { %4634 = vmatprep.subr.bf16.mxu1 %v3939_v14  ;;  %4839 = vmatprep.subr.bf16.mxu0 %v3941_v38  ;;  %v3600_v33 = vld [vmem:[#allocation3 + $0x700] sm:$0xff] }
 0x99b   :  { %v3384_v14 = vld [vmem:[#allocation3 + $0x40] sm:$0xff] }
 0x99c   :  { %v3528_v38 = vld [vmem:[#allocation3 + $0x4c0] sm:$0xff] }
 0x99d   :  { %4635 = vmatpush1.bf16.msra.mxu1 %v3938_v36  ;;  %4840 = vmatpush1.bf16.msra.mxu0 %v3940_v60  ;;  %v3465_v36 = vld [vmem:[#allocation3 + $0x2c8] sm:$0xff] }
 0x99e   :  { %4636 = vmatprep.subr.bf16.mxu1 %v3948_v20  ;;  %4841 = vmatprep.subr.bf16.mxu0 %v3950_v59  ;;  %v3609_v60 = vld [vmem:[#allocation3 + $0x748] sm:$0xff] }
 0x99f   :  { %v3393_v20 = vld [vmem:[#allocation3 + $0x88] sm:$0xff] }
 0x9a0   :  { %v3537_v59 = vld [vmem:[#allocation3 + $0x508] sm:$0xff] }
 0x9a1   :  { %4637 = vmatpush1.bf16.msra.mxu1 %v3947_v43  ;;  %4842 = vmatpush1.bf16.msra.mxu0 %v3949_v62  ;;  %v3474_v43 = vld [vmem:[#allocation3 + $0x310] sm:$0xff] }
 0x9a2   :  { %4647 = vmatprep.subr.bf16.mxu1 %v3957_v46  ;;  %4852 = vmatprep.subr.bf16.mxu0 %v3959_v15  ;;  %v3618_v62 = vld [vmem:[#allocation3 + $0x790] sm:$0xff] }
 0x9a3   :  { %v3402_v46 = vld [vmem:[#allocation3 + $0xd0] sm:$0xff] }
 0x9a4   :  { %4639 = vmatmul.mubr.bf16.vlgmr.msra.gmra.mrb[32].mxu1 %v9365_v1  ;;  %4844 = vmatmul.mubr.bf16.vlgmr.msra.gmra.mrb[32].mxu0 %v9365_v1  ;;  %v3546_v15 = vld [vmem:[#allocation3 + $0x550] sm:$0xff] }
 0x9a5   :  { %4648 = vmatpush1.bf16.msra.mxu1 %v3956_v18  ;;  %4853 = vmatpush1.bf16.msra.mxu0 %v3958_v21  ;;  %v3483_v18 = vld [vmem:[#allocation3 + $0x358] sm:$0xff] }
 0x9a6   :  { %4649 = vmatprep.subr.bf16.mxu1 %v3966_v25  ;;  %4854 = vmatprep.subr.bf16.mxu0 %v3968_v28  ;;  %v3627_v21 = vld [vmem:[#allocation3 + $0x7d8] sm:$0xff] }
 0x9a7   :  { %4679 = vmatprep.mubr.bf16.mxu1 %v9690_v35  ;;  %4884 = vmatprep.mubr.bf16.mxu0 %v9690_v35  ;;  %v3411_v25 = vld [vmem:[#allocation3 + $0x118] sm:$0xff] }
 0x9a8   :  { %v3555_v28 = vld [vmem:[#allocation3 + $0x598] sm:$0xff] }
 0x9a9   :  { %4650 = vmatpush1.bf16.msra.mxu1 %v3965_v5  ;;  %4855 = vmatpush1.bf16.msra.mxu0 %v3967_v31  ;;  %v3492_v5 = vld [vmem:[#allocation3 + $0x3a0] sm:$0xff] }
 0x9aa   :  { %4651 = vmatprep.subr.bf16.mxu1 %v3975_v34  ;;  %4856 = vmatprep.subr.bf16.mxu0 %v3977_v24  ;;  %v3636_v31 = vld [vmem:[#allocation3 + $0x820] sm:$0xff]  ;;  %v3501_v34 = vld [vmem:[#allocation3 + $0x3e8] sm:$0xff] }
 0x9ab   :  { %v3645_v24 = vld [vmem:[#allocation3 + $0x868] sm:$0xff] }
 0x9ad   :  { %4652 = vmatpush1.bf16.msra.mxu1 %v3974_v29  ;;  %4857 = vmatpush1.bf16.msra.mxu0 %v3976_v42  ;;  %v3429_v29 = vld [vmem:[#allocation3 + $0x1a8] sm:$0xff] }
 0x9ae   :  { %4653 = vmatprep.subr.bf16.mxu1 %v3984_v6  ;;  %4858 = vmatprep.subr.bf16.mxu0 %v3986_v2  ;;  %v3573_v42 = vld [vmem:[#allocation3 + $0x628] sm:$0xff]  ;;  %v3510_v6 = vld [vmem:[#allocation3 + $0x430] sm:$0xff] }
 0x9af   :  { %v3654_v2 = vld [vmem:[#allocation3 + $0x8b0] sm:$0xff] }
 0x9b1   :  { %4654 = vmatpush1.bf16.msra.mxu1 %v3983_v61  ;;  %4859 = vmatpush1.bf16.msra.mxu0 %v3985_v4  ;;  %v3438_v61 = vld [vmem:[#allocation3 + $0x1f0] sm:$0xff] }
 0x9b2   :  { %4655 = vmatprep.subr.bf16.mxu1 %v3993_v48  ;;  %4860 = vmatprep.subr.bf16.mxu0 %v3995_v16  ;;  %v3582_v4 = vld [vmem:[#allocation3 + $0x670] sm:$0xff]  ;;  %v3519_v48 = vld [vmem:[#allocation3 + $0x478] sm:$0xff] }
 0x9b3   :  { %v3663_v16 = vld [vmem:[#allocation3 + $0x8f8] sm:$0xff] }
 0x9b5   :  { %4656 = vmatpush1.bf16.msra.mxu1 %v3992_v39  ;;  %4861 = vmatpush1.bf16.msra.mxu0 %v3994_v53  ;;  %v3447_v39 = vld [vmem:[#allocation3 + $0x238] sm:$0xff] }
 0x9b6   :  { %4657 = vmatprep.subr.bf16.mxu1 %v4002_v55  ;;  %4862 = vmatprep.subr.bf16.mxu0 %v4004_v63  ;;  %v3591_v53 = vld [vmem:[#allocation3 + $0x6b8] sm:$0xff]  ;;  %v3744_v55 = vld [vmem:[#allocation3 + $0xb80] sm:$0xff] }
 0x9b7   :  { %v3888_v63 = vld [vmem:[#allocation3 + $0x1000] sm:$0xff] }
 0x9b9   :  { %4658 = vmatpush1.bf16.msra.mxu1 %v4001_v47  ;;  %4863 = vmatpush1.bf16.msra.mxu0 %v4003_v9  ;;  %v3672_v47 = vld [vmem:[#allocation3 + $0x940] sm:$0xff] }
 0x9ba   :  { %4659 = vmatprep.subr.bf16.mxu1 %v4011_v54  ;;  %4864 = vmatprep.subr.bf16.mxu0 %v4013_v23  ;;  %v3816_v9 = vld [vmem:[#allocation3 + $0xdc0] sm:$0xff]  ;;  %v3753_v54 = vld [vmem:[#allocation3 + $0xbc8] sm:$0xff] }
 0x9bb   :  { %v3897_v23 = vld [vmem:[#allocation3 + $0x1048] sm:$0xff] }
 0x9bd   :  { %4660 = vmatpush1.bf16.msra.mxu1 %v4010_v44  ;;  %4865 = vmatpush1.bf16.msra.mxu0 %v4012_v58  ;;  %v3681_v44 = vld [vmem:[#allocation3 + $0x988] sm:$0xff] }
 0x9be   :  { %4661 = vmatprep.subr.bf16.mxu1 %v4020_v10  ;;  %4866 = vmatprep.subr.bf16.mxu0 %v4022_v56  ;;  %v3825_v58 = vld [vmem:[#allocation3 + $0xe08] sm:$0xff]  ;;  %v3762_v10 = vld [vmem:[#allocation3 + $0xc10] sm:$0xff] }
 0x9bf   :  { %v3906_v56 = vld [vmem:[#allocation3 + $0x1090] sm:$0xff] }
 0x9c1   :  { %4662 = vmatpush1.bf16.msra.mxu1 %v4019_v57  ;;  %4867 = vmatpush1.bf16.msra.mxu0 %v4021_v17  ;;  %v3690_v57 = vld [vmem:[#allocation3 + $0x9d0] sm:$0xff]  ;;  %v3771_v17 = vld [vmem:[#allocation3 + $0xc58] sm:$0xff] }
 0x9c2   :  { %7593 = vmatprep.subr.bf16.mxu1 %v3456_v11  ;;  %7615 = vmatprep.subr.bf16.mxu0 %v3600_v33  ;;  %v3699_v11 = vld [vmem:[#allocation3 + $0xa18] sm:$0xff] }
 0x9c3   :  { %v3843_v33 = vld [vmem:[#allocation3 + $0xe98] sm:$0xff] }
 0x9c4   :  { %4680 = vmatmul.mubr.bf16.vlgmr.msra.gmra.mrb[32].mxu1 %v9371_v13  ;;  %4885 = vmatmul.mubr.bf16.vlgmr.msra.gmra.mrb[32].mxu0 %v9371_v13 }
 0x9c5   :  { %7594 = vmatpush3.bf16.msra.mxu1 %v3384_v14  ;;  %7616 = vmatpush3.bf16.msra.mxu0 %v3528_v38  ;;  %v3780_v14 = vld [vmem:[#allocation3 + $0xca0] sm:$0xff] }
 0x9c6   :  { %7595 = vmatprep.subr.bf16.mxu1 %v3465_v36  ;;  %7617 = vmatprep.subr.bf16.mxu0 %v3609_v60  ;;  %v3924_v38 = vld [vmem:[#allocation3 + $0x1120] sm:$0xff]  ;;  %v3789_v36 = vld [vmem:[#allocation3 + $0xce8] sm:$0xff] }
 0x9c7   :  { %4925 = vmatprep.mubr.bf16.mxu1 %v9350_v49  ;;  %4965 = vmatprep.mubr.bf16.mxu0 %v9356_v27  ;;  %v3420_v49 = vld [vmem:[#allocation3 + $0x160] sm:$0xff]  ;;  %v3933_v60 = vld [vmem:[#allocation3 + $0x1168] sm:$0xff] }
 0x9c8   :  { %v3564_v27 = vld [vmem:[#allocation3 + $0x5e0] sm:$0xff] }
 0x9c9   :  { %7596 = vmatpush3.bf16.msra.mxu1 %v3393_v20  ;;  %7618 = vmatpush3.bf16.msra.mxu0 %v3537_v59  ;;  %v3717_v20 = vld [vmem:[#allocation3 + $0xaa8] sm:$0xff] }
 0x9ca   :  { %7597 = vmatprep.subr.bf16.mxu1 %v3474_v43  ;;  %7619 = vmatprep.subr.bf16.mxu0 %v3618_v62  ;;  %v3861_v59 = vld [vmem:[#allocation3 + $0xf28] sm:$0xff]  ;;  %v3798_v43 = vld [vmem:[#allocation3 + $0xd30] sm:$0xff] }
 0x9cb   :  { %v3942_v62 = vld [vmem:[#allocation3 + $0x11b0] sm:$0xff] }
 0x9cd   :  { %7598 = vmatpush3.bf16.msra.mxu1 %v3402_v46  ;;  %7620 = vmatpush3.bf16.msra.mxu0 %v3546_v15  ;;  %v3726_v46 = vld [vmem:[#allocation3 + $0xaf0] sm:$0xff] }
 0x9ce   :  { %7599 = vmatprep.subr.bf16.mxu1 %v3483_v18  ;;  %7621 = vmatprep.subr.bf16.mxu0 %v3627_v21  ;;  %v3870_v15 = vld [vmem:[#allocation3 + $0xf70] sm:$0xff]  ;;  %v3807_v18 = vld [vmem:[#allocation3 + $0xd78] sm:$0xff] }
 0x9cf   :  { %v3951_v21 = vld [vmem:[#allocation3 + $0x11f8] sm:$0xff] }
 0x9d1   :  { %7600 = vmatpush3.bf16.msra.mxu1 %v3411_v25  ;;  %7622 = vmatpush3.bf16.msra.mxu0 %v3555_v28  ;;  %v3735_v25 = vld [vmem:[#allocation3 + $0xb38] sm:$0xff] }
 0x9d2   :  { %7601 = vmatprep.subr.bf16.mxu1 %v3492_v5  ;;  %7623 = vmatprep.subr.bf16.mxu0 %v3636_v31  ;;  %v3879_v28 = vld [vmem:[#allocation3 + $0xfb8] sm:$0xff]  ;;  %v9691_v5 = vmov 0.0   ;;  %v3960_v31 = vld [vmem:[#allocation3 + $0x1240] sm:$0xff] }
 0x9d5   :  { %7602 = vmatpush3.bf16.msra.mxu1 %v3420_v49  ;;  %7624 = vmatpush3.bf16.msra.mxu0 %v3564_v27  ;;  %v3969_v49 = vld [vmem:[#allocation3 + $0x1288] sm:$0xff]  ;;  %v3978_v27 = vld [vmem:[#allocation3 + $0x12d0] sm:$0xff] }
 0x9d6   :  { %7603 = vmatprep.subr.bf16.mxu1 %v3501_v34  ;;  %7625 = vmatprep.subr.bf16.mxu0 %v3645_v24  ;;  %v3987_v34 = vld [vmem:[#allocation3 + $0x1318] sm:$0xff]  ;;  %v4014_v24 = vld [vmem:[#allocation3 + $0x13f0] sm:$0xff] }
 0x9d9   :  { %7604 = vmatpush3.bf16.msra.mxu1 %v3429_v29  ;;  %7626 = vmatpush3.bf16.msra.mxu0 %v3573_v42  ;;  %v4023_v29 = vld [vmem:[#allocation3 + $0x1438] sm:$0xff] }
 0x9da   :  { %7605 = vmatprep.subr.bf16.mxu1 %v3510_v6  ;;  %7627 = vmatprep.subr.bf16.mxu0 %v3654_v2 }
 0x9dd   :  { %7606 = vmatpush3.bf16.msra.mxu1 %v3438_v61  ;;  %7628 = vmatpush3.bf16.msra.mxu0 %v3582_v4 }
 0x9de   :  { %7607 = vmatprep.subr.bf16.mxu1 %v3519_v48  ;;  %7629 = vmatprep.subr.bf16.mxu0 %v3663_v16 }
 0x9e1   :  { %7608 = vmatpush3.bf16.msra.mxu1 %v3447_v39  ;;  %7630 = vmatpush3.bf16.msra.mxu0 %v3591_v53 }
 0x9e2   :  { %7637 = vmatprep.subr.bf16.mxu1 %v3744_v55  ;;  %7659 = vmatprep.subr.bf16.mxu0 %v3888_v63  ;;  %v7487_v63 = vld [vmem:[#allocation21 + $0x8] ss:$0 sm:$0xff] }
 0x9e4   :  { %4926 = vmatmul.mubr.bf16.vlgmr.msra.gmra.mrb[36].mxu1 %v9347_v50  ;;  %4966 = vmatmul.mubr.bf16.vlgmr.msra.gmra.mrb[36].mxu0 %v9353_v52  ;;  %v3834_v50 = vld [vmem:[#allocation3 + $0xe50] sm:$0xff]  ;;  %v3915_v52 = vld [vmem:[#allocation3 + $0x10d8] sm:$0xff] }
 0x9e5   :  { %7638 = vmatpush3.bf16.msra.mxu1 %v3672_v47  ;;  %7660 = vmatpush3.bf16.msra.mxu0 %v3816_v9 }
 0x9e6   :  { %7639 = vmatprep.subr.bf16.mxu1 %v3753_v54  ;;  %7661 = vmatprep.subr.bf16.mxu0 %v3897_v23 }
 0x9e7   :  { %5005 = vmatprep.mubr.bf16.mxu1 %v9362_v0  ;;  %5045 = vmatprep.mubr.bf16.mxu0 %v9368_v32  ;;  %v3708_v0 = vld [vmem:[#allocation3 + $0xa60] sm:$0xff] }
 0x9e8   :  { %v3852_v32 = vld [vmem:[#allocation3 + $0xee0] sm:$0xff] }
 0x9e9   :  { %7640 = vmatpush3.bf16.msra.mxu1 %v3681_v44  ;;  %7662 = vmatpush3.bf16.msra.mxu0 %v3825_v58 }
 0x9ea   :  { %7641 = vmatprep.subr.bf16.mxu1 %v3762_v10  ;;  %7663 = vmatprep.subr.bf16.mxu0 %v3906_v56 }
 0x9ed   :  { %7642 = vmatpush3.bf16.msra.mxu1 %v3690_v57  ;;  %7664 = vmatpush3.bf16.msra.mxu0 %v3834_v50  ;;  %v4024_v50 = vld [vmem:[#allocation21] sm:$0xff] }
 0x9ee   :  { %7643 = vmatprep.subr.bf16.mxu1 %v3771_v17  ;;  %7665 = vmatprep.subr.bf16.mxu0 %v3915_v52 }
 0x9f1   :  { %7644 = vmatpush3.bf16.msra.mxu1 %v3699_v11  ;;  %7666 = vmatpush3.bf16.msra.mxu0 %v3843_v33 }
 0x9f2   :  { %7645 = vmatprep.subr.bf16.mxu1 %v3780_v14  ;;  %7667 = vmatprep.subr.bf16.mxu0 %v3924_v38 }
 0x9f5   :  { %7646 = vmatpush3.bf16.msra.mxu1 %v3708_v0  ;;  %7668 = vmatpush3.bf16.msra.mxu0 %v3852_v32 }
 0x9f6   :  { %7647 = vmatprep.subr.bf16.mxu1 %v3789_v36  ;;  %7669 = vmatprep.subr.bf16.mxu0 %v3933_v60  ;;  %v4031_v36 = vrot.slane %v4024_v50, %v9100_v3  ;;  %v4035_v60 = vrot.slane %v4024_v50, %v9102_v51 }
 0x9f9   :  { %7648 = vmatpush3.bf16.msra.mxu1 %v3717_v20  ;;  %7670 = vmatpush3.bf16.msra.mxu0 %v3861_v59 }
 0x9fa   :  { %7649 = vmatprep.subr.bf16.mxu1 %v3798_v43  ;;  %7671 = vmatprep.subr.bf16.mxu0 %v3942_v62 }
 0x9fd   :  { %7650 = vmatpush3.bf16.msra.mxu1 %v3726_v46  ;;  %7672 = vmatpush3.bf16.msra.mxu0 %v3870_v15  ;;  %v9445_v46 = vadd.f32 %v9407_v22, %v4031_v36  ;;  %v9448_v15 = vadd.f32 %v9411_v45, %v4035_v60  ;;  %v4043_v22 = vrot.slane %v4024_v50, %v9108_v8 }
 0x9fe   :  { %7651 = vmatprep.subr.bf16.mxu1 %v3807_v18  ;;  %7673 = vmatprep.subr.bf16.mxu0 %v3951_v21  ;;  %v4039_v18 = vrot.slane %v4024_v50, %v9106_v7 }
 0x9ff   :  { %v5107_v21 = vmul.f32 %v9445_v46, %v9445_v46 }
 0xa01   :  { %7652 = vmatpush3.bf16.msra.mxu1 %v3735_v25  ;;  %7674 = vmatpush3.bf16.msra.mxu0 %v3879_v28  ;;  %v5097_v25 = vadd.f32 %v9448_v15, %v9445_v46  ;;  %v5108_v28 = vmul.f32 %v9448_v15, %v9448_v15 }
 0xa02   :  { %7904 = vmatprep.subr.bf16.mxu1 %v9691_v5 }
 0xa03   :  { %v5116_v45 = vadd.f32 %v5108_v28, %v5107_v21 }
 0xa04   :  { %5006 = vmatmul.mubr.bf16.vlgmr.msra.gmra.mrb[40].mxu1 %v9359_v41  ;;  %5046 = vmatmul.mubr.bf16.vlgmr.msra.gmra.mrb[40].mxu0 %v9365_v1  ;;  %v3996_v41 = vld [vmem:[#allocation3 + $0x1360] sm:$0xff]  ;;  %v4005_v1 = vld [vmem:[#allocation3 + $0x13a8] sm:$0xff] }
 0xa05   :  { %7905 = vmatpush3.bf16.msra.mxu1 %v3960_v31  ;;  %7920 = vmatprep.mubr.msk.bf16.mxu1 %vm8768_vm1, %v9691_v5  ;;  %v9458_v31 = vadd.f32 %v9409_v40, %v4039_v18 }
 0xa06   :  { %7906 = vmatprep.subr.bf16.mxu1 %v9691_v5 }
 0xa09   :  { %7907 = vmatpush3.bf16.msra.mxu1 %v3969_v49  ;;  %v4047_v49 = vrot.slane %v4024_v50, %v9115_v12 }
 0xa0a   :  { %7908 = vmatprep.subr.bf16.mxu1 %v9691_v5 }
 0xa0d   :  { %7909 = vmatpush3.bf16.msra.mxu1 %v3978_v27  ;;  %v5098_v27 = vadd.f32 %v9458_v31, %v5097_v25 }
 0xa0e   :  { %7910 = vmatprep.subr.bf16.mxu1 %v9691_v5 }
 0xa11   :  { %7911 = vmatpush3.bf16.msra.mxu1 %v3987_v34  ;;  %v5109_v34 = vmul.f32 %v9458_v31, %v9458_v31 }
 0xa12   :  { %7912 = vmatprep.subr.bf16.mxu1 %v9691_v5 }
 0xa15   :  { %7913 = vmatpush3.bf16.msra.mxu1 %v3996_v41  ;;  %v9466_v41 = vadd.f32 %v9413_v37, %v4043_v22  ;;  %v4055_v37 = vrot.slane %v4024_v50, %v9137_v26 }
 0xa16   :  { %7914 = vmatprep.subr.bf16.mxu1 %v9691_v5 }
 0xa17   :  { %v5099_v40 = vadd.f32 %v9466_v41, %v5098_v27 }
 0xa19   :  { %7915 = vmatpush3.bf16.msra.mxu1 %v4005_v1 }
 0xa1a   :  { %7916 = vmatprep.subr.bf16.mxu1 %v9691_v5 }
 0xa1d   :  { %7917 = vmatpush3.bf16.msra.mxu1 %v4014_v24  ;;  %v4051_v24 = vrot.slane %v4024_v50, %v9127_v19 }
 0xa1e   :  { %7918 = vmatprep.subr.bf16.mxu1 %v9691_v5 }
 0xa21   :  { %7919 = vmatpush3.bf16.msra.mxu1 %v4023_v29  ;;  %v5117_v29 = vadd.f32 %v5116_v45, %v5109_v34 }
 0xa24   :  { %7921 = vmatmul.mubr.bf16.vlgmr.msra.gmra.mrb[44].mxu1 %v9371_v13 }
 0xa97   :  { %v4681_v42 = vpop.f32.mrb[32].mxu1  ;;  %v4886_v6 = vpop.f32.mrb[32].mxu0 }
 0xa98   :  { %v4683_v2 = vpop.f32.mrb[33].mxu1  ;;  %v9440_v61 = vpop.f32.mrb[33].mxu0  ;;  %v9468_v1 = vadd.f32 %v4681_v42, %v4047_v49 }
 0xa99   :  { %v4685_v4 = vpop.f32.mrb[34].mxu1  ;;  %v4890_v48 = vpop.f32.mrb[34].mxu0 }
 0xa9a   :  { %v4686_v16 = vpop.f32.mrb[35].mxu1  ;;  %v4891_v39 = vpop.f32.mrb[35].mxu0  ;;  %v5110_v4 = vmul.f32 %v9466_v41, %v9466_v41  ;;  %v5100_v48 = vadd.f32 %v9468_v1, %v5099_v40 }
 0xa9b   :  { %v5111_v16 = vmul.f32 %v9468_v1, %v9468_v1  ;;  %v9477_v39 = vadd.f32 %v4683_v2, %v4051_v24 }
 0xab7   :  { %v7609_v53 = vpop.f32.mrb[36].mxu1  ;;  %v7631_v55 = vpop.f32.mrb[36].mxu0 }
 0xab8   :  { %v7610_v47 = vpop.f32.mrb[37].mxu1  ;;  %v7632_v9 = vpop.f32.mrb[37].mxu0 }
 0xab9   :  { %v7611_v54 = vadd.f32 %v7610_v47, %v7609_v53  ;;  %v7612_v23 = vpop.f32.mrb[38].mxu1  ;;  %v7633_v44 = vadd.f32 %v7632_v9, %v7631_v55  ;;  %v7634_v58 = vpop.f32.mrb[38].mxu0  ;;  %v5118_v53 = vadd.f32 %v5117_v29, %v5110_v4  ;;  %v5101_v55 = vadd.f32 %v9477_v39, %v5100_v48 }
 0xaba   :  { %v7613_v10 = vpop.f32.mrb[39].mxu1  ;;  %v7635_v13 = vpop.f32.mrb[39].mxu0  ;;  %v9483_v47 = vadd.f32 %v4886_v6, %v4055_v37  ;;  %v4059_v9 = vrot.slane %v4024_v50, %v9142_v30 }
 0xabb   :  { %v4928_v56 = vadd.f32 %v7611_v54, %v7487_v63  ;;  %v5119_v42 = vadd.f32 %v5118_v53, %v5111_v16  ;;  %v5112_v63 = vmul.f32 %v9477_v39, %v9477_v39 }
 0xabc   :  { %v5102_v23 = vadd.f32 %v9483_v47, %v5101_v55  ;;  %v5113_v2 = vmul.f32 %v9483_v47, %v9483_v47 }
 0xabd   :  { %v4968_v57 = vadd.f32 %v7633_v44, %v4928_v56  ;;  %v5120_v54 = vadd.f32 %v5119_v42, %v5112_v63  ;;  %v7979_v44 = vadd.f32 %v9440_v61, %v4059_v9 }
 0xabf   :  { %v5103_v56 = vadd.f32 %v7979_v44, %v5102_v23 }
 0xad7   :  { %v7653_v17 = vpop.f32.mrb[40].mxu1  ;;  %v7675_v52 = vpop.f32.mrb[40].mxu0 }
 0xad8   :  { %v7654_v11 = vpop.f32.mrb[41].mxu1  ;;  %v7676_v33 = vpop.f32.mrb[41].mxu0 }
 0xad9   :  { %v7655_v14 = vadd.f32 %v7654_v11, %v7653_v17  ;;  %v7656_v38 = vpop.f32.mrb[42].mxu1  ;;  %v7677_v0 = vadd.f32 %v7676_v33, %v7675_v52  ;;  %v7678_v32 = vpop.f32.mrb[42].mxu0  ;;  %v5114_v52 = vmul.f32 %v7979_v44, %v7979_v44 }
 0xada   :  { %v7657_v20 = vpop.f32.mrb[43].mxu1  ;;  %v7679_v59 = vpop.f32.mrb[43].mxu0 }
 0xadb   :  { %v5008_v43 = vadd.f32 %v7655_v14, %v4968_v57  ;;  %v5121_v57 = vadd.f32 %v5120_v54, %v5113_v2 }
 0xadd   :  { %v5048_v62 = vadd.f32 %v7677_v0, %v5008_v43  ;;  %v5122_v50 = vadd.f32 %v5121_v57, %v5114_v52  ;;  %v5093_v43 = vld [vmem:[#allocation22] sm:$0xff]  ;;  %v7488_v52 = vld [vmem:[#allocation22 + $0x8] ss:$0 sm:$0xff] }
 0xade   :  { %v5156_v18 = vrot.slane %v5093_v43, %v9100_v3  ;;  %v5160_v21 = vrot.slane %v5093_v43, %v9102_v51  ;;  %v5164_v25 = vrot.slane %v5093_v43, %v9106_v7  ;;  %v5168_v28 = vrot.slane %v5093_v43, %v9108_v8 }
 0xadf   :  { %v5172_v22 = vrot.slane %v5093_v43, %v9115_v12  ;;  %v5176_v49 = vrot.slane %v5093_v43, %v9127_v19  ;;  %v5180_v45 = vrot.slane %v5093_v43, %v9137_v26  ;;  %v5184_v27 = vrot.slane %v5093_v43, %v9142_v30 }
 0xaf7   :  { %v5087_v58 = vpop.f32.mrb[44].mxu1 }
 0xaf8   :  { %v5088_v10 = vadd.f32 %v5087_v58, %v5048_v62  ;;  %v7922_v13 = vpop.f32.mrb[45].mxu1  ;;  %v5095_v62 = vld [vmem:[#allocation24] sm:$0xff] }
 0xaf9   :  { %v5090_v17 = vpop.f32.mrb[46].mxu1  ;;  %v5212_v34 = vrot.slane %v5095_v62, %v9100_v3  ;;  %v5216_v24 = vrot.slane %v5095_v62, %v9102_v51  ;;  %v5220_v40 = vrot.slane %v5095_v62, %v9106_v7  ;;  %v5224_v29 = vrot.slane %v5095_v62, %v9108_v8 }
 0xafa   :  { %v7923_v11 = vpop.f32.mrb[47].mxu1  ;;  %v5104_v6 = vadd.f32 %v5103_v56, %v5088_v10  ;;  %v5115_v33 = vmul.f32 %v5088_v10, %v5088_v10  ;;  %v5228_v4 = vrot.slane %v5095_v62, %v9115_v12  ;;  %v5232_v16 = vrot.slane %v5095_v62, %v9127_v19 }
 0xafb   :  { %v5236_v53 = vrot.slane %v5095_v62, %v9137_v26  ;;  %v5240_v37 = vrot.slane %v5095_v62, %v9142_v30 }
 0xafc   :  { %5105 = vadd.xlane.f32.xlu0 %v5104_v6  ;;  %v5123_v14 = vadd.f32 %v5122_v50, %v5115_v33 }
 0xb00   :  { %5124 = vadd.xlane.f32.xlu0 %v5123_v14  ;;  %v7489_v14 = vld [vmem:[#allocation24 + $0x8] ss:$0 sm:$0xff] }
 0xb89   :  { %v5106_v38 = vpop.xlane.xlu0 %5105 }
 0xb8a   :  { %v5126_v0 = vmul.f32 0.00097276265, %v5106_v38 }
 0xb8c   :  { %v5128_v36 = vmul.f32 %v5126_v0, %v5126_v0  ;;  %v5133_v48 = vsub.f32 %v9445_v46, %v5126_v0  ;;  %v5134_v42 = vsub.f32 %v9448_v15, %v5126_v0  ;;  %v5135_v55 = vsub.f32 %v9458_v31, %v5126_v0 }
 0xb8d   :  { %v5125_v32 = vpop.xlane.xlu0 %5124  ;;  %v5136_v63 = vsub.f32 %v9466_v41, %v5126_v0  ;;  %v5137_v9 = vsub.f32 %v9468_v1, %v5126_v0  ;;  %v5138_v23 = vsub.f32 %v9477_v39, %v5126_v0  ;;  %v5139_v2 = vsub.f32 %v9483_v47, %v5126_v0 }
 0xb8e   :  { %v5127_v60 = vmul.f32 0.00097276265, %v5125_v32  ;;  %v5140_v46 = vsub.f32 %v7979_v44, %v5126_v0  ;;  %v5141_v58 = vsub.f32 %v5088_v10, %v5126_v0 }
 0xb90   :  { %v5129_v61 = vsub.f32 %v5127_v60, %v5128_v36 }
 0xb92   :  { %v5130_v20 = vmax.f32 %v5129_v61, 0.0 }
 0xb94   :  { %v5131_v59 = vadd.f32 1e-05, %v5130_v20 }
 0xb96   :  { %8378 = vrsqrt.f32 %v5131_v59 }
 0xba0   :  { %v8379_v54 = vpop.eup %8378 }
 0xba1   :  { %v5142_v13 = vmul.f32 %v8379_v54, %v5133_v48  ;;  %v5143_v56 = vmul.f32 %v8379_v54, %v5134_v42  ;;  %v5144_v57 = vmul.f32 %v8379_v54, %v5135_v55  ;;  %v5145_v17 = vmul.f32 %v8379_v54, %v5136_v63 }
 0xba2   :  { %v5146_v11 = vmul.f32 %v8379_v54, %v5137_v9  ;;  %v5147_v15 = vmul.f32 %v8379_v54, %v5138_v23  ;;  %v5148_v6 = vmul.f32 %v8379_v54, %v5139_v2  ;;  %v5149_v31 = vmul.f32 %v8379_v54, %v5140_v46 }
 0xba3   :  { %v5150_v33 = vmul.f32 %v8379_v54, %v5141_v58  ;;  %v5198_v41 = vmul.f32 %v5156_v18, %v5142_v13  ;;  %v5199_v50 = vmul.f32 %v5160_v21, %v5143_v56  ;;  %v5200_v1 = vmul.f32 %v5164_v25, %v5144_v57 }
 0xba4   :  { %v5201_v38 = vmul.f32 %v5168_v28, %v5145_v17  ;;  %v5202_v39 = vmul.f32 %v5172_v22, %v5146_v11  ;;  %v5203_v32 = vmul.f32 %v5176_v49, %v5147_v15  ;;  %v5204_v47 = vmul.f32 %v5180_v45, %v5148_v6 }
 0xba5   :  { %v5205_v44 = vmul.f32 %v5184_v27, %v5149_v31  ;;  %v5206_v10 = vmul.f32 %v7488_v52, %v5150_v33  ;;  %v5254_v0 = vadd.f32 %v5212_v34, %v5198_v41  ;;  %v5255_v36 = vadd.f32 %v5216_v24, %v5199_v50 }
 0xba6   :  { %v5256_v60 = vadd.f32 %v5220_v40, %v5200_v1  ;;  %v5257_v61 = vadd.f32 %v5224_v29, %v5201_v38  ;;  %v5258_v20 = vadd.f32 %v5228_v4, %v5202_v39  ;;  %v5259_v59 = vadd.f32 %v5232_v16, %v5203_v32 }
 0xba7   :  { %v5260_v43 = vadd.f32 %v5236_v53, %v5204_v47  ;;  %v5261_v62 = vadd.f32 %v5240_v37, %v5205_v44  ;;  %v5262_v48 = vadd.f32 %v7489_v14, %v5206_v10  ;;  %v5263_v42 = vmax.f32 %v5254_v0, 0.0 }
 0xba8   :  { %v5264_v18 = vmax.f32 %v5255_v36, 0.0  ;;  %v5265_v21 = vmax.f32 %v5256_v60, 0.0  ;;  %v5266_v25 = vmax.f32 %v5257_v61, 0.0  ;;  %v5267_v55 = vmax.f32 %v5258_v20, 0.0 }
 0xba9   :  { %v5268_v28 = vmax.f32 %v5259_v59, 0.0  ;;  %v5269_v22 = vmax.f32 %v5260_v43, 0.0  ;;  %v5270_v49 = vmax.f32 %v5261_v62, 0.0  ;;  %v5271_v45 = vmax.f32 %v5262_v48, 0.0 }
 0xbaa   :  { %v9513_v27 = vpack.c.bf16 %v5263_v42, %v5263_v42  ;;  %v9515_v34 = vpack.c.bf16 %v5264_v18, %v5264_v18  ;;  %v9517_v24 = vpack.c.bf16 %v5265_v21, %v5265_v21  ;;  %v9519_v40 = vpack.c.bf16 %v5266_v25, %v5266_v25 }
 0xbab   :  { %v9521_v29 = vpack.c.bf16 %v5267_v55, %v5267_v55  ;;  %v9523_v4 = vpack.c.bf16 %v5268_v28, %v5268_v28  ;;  %v9525_v16 = vpack.c.bf16 %v5269_v22, %v5269_v22  ;;  %v9527_v53 = vpack.c.bf16 %v5270_v49, %v5270_v49 }
 0xbac   :  { %v9529_v37 = vpack.c.bf16 %v5271_v45, %v5271_v45 }
 0xbad   :  { %8728 = dma.done.wait [#allocation6 + $0x2], 82944 }
 0xbae   :  { %8729 = vsyncadd [#allocation6 + $0x2], 4294884352  ;;  %6018 = vmatprep.mubr.bf16.mxu0 %v9515_v34  ;;  %6223 = vmatprep.mubr.bf16.mxu1 %v9515_v34  ;;  %v5290_v63 = vld [vmem:[#allocation4 + $0x8] sm:$0xff]  ;;  %v5292_v9 = vld [vmem:[#allocation4 + $0x18] sm:$0xff] }
 0xbaf   :  { %v5289_v54 = vld [vmem:[#allocation4] sm:$0xff]  ;;  %5986 = vmatprep.subr.bf16.mxu0 %v5290_v63  ;;  %6191 = vmatprep.subr.bf16.mxu1 %v5292_v9  ;;  %v5291_v23 = vld [vmem:[#allocation4 + $0x10] sm:$0xff]  ;;  %v5298_v58 = vld [vmem:[#allocation4 + $0x48] sm:$0xff] }
 0xbb0   :  { %v5299_v2 = vld [vmem:[#allocation4 + $0x50] sm:$0xff]  ;;  %v5301_v46 = vld [vmem:[#allocation4 + $0x60] sm:$0xff]  ;;  %5987 = vmatpush1.bf16.msra.mxu0 %v5289_v54  ;;  %6192 = vmatpush1.bf16.msra.mxu1 %v5291_v23  ;;  %v5300_v13 = vld [vmem:[#allocation4 + $0x58] sm:$0xff] }
 0xbb1   :  { %5988 = vmatprep.subr.bf16.mxu0 %v5299_v2  ;;  %6193 = vmatprep.subr.bf16.mxu1 %v5301_v46  ;;  %v5308_v56 = vld [vmem:[#allocation4 + $0x98] sm:$0xff]  ;;  %v5310_v57 = vld [vmem:[#allocation4 + $0xa8] sm:$0xff]  ;;  %v5307_v17 = vld [vmem:[#allocation4 + $0x90] sm:$0xff] }
 0xbb2   :  { %v5309_v52 = vld [vmem:[#allocation4 + $0xa0] sm:$0xff]  ;;  %v5319_v15 = vld [vmem:[#allocation4 + $0xf0] sm:$0xff]  ;;  %v5316_v6 = vld [vmem:[#allocation4 + $0xd8] sm:$0xff] }
 0xbb3   :  { %v5317_v11 = vld [vmem:[#allocation4 + $0xe0] sm:$0xff]  ;;  %v5318_v31 = vld [vmem:[#allocation4 + $0xe8] sm:$0xff]  ;;  %v5328_v41 = vld [vmem:[#allocation4 + $0x138] sm:$0xff] }
 0xbb4   :  { %5989 = vmatpush1.bf16.msra.mxu0 %v5298_v58  ;;  %6194 = vmatpush1.bf16.msra.mxu1 %v5300_v13  ;;  %v5326_v33 = vld [vmem:[#allocation4 + $0x128] sm:$0xff]  ;;  %v5325_v50 = vld [vmem:[#allocation4 + $0x120] sm:$0xff]  ;;  %v5327_v1 = vld [vmem:[#allocation4 + $0x130] sm:$0xff] }
 0xbb5   :  { %5990 = vmatprep.subr.bf16.mxu0 %v5308_v56  ;;  %6195 = vmatprep.subr.bf16.mxu1 %v5310_v57  ;;  %v5335_v14 = vld [vmem:[#allocation4 + $0x170] sm:$0xff]  ;;  %v5337_v38 = vld [vmem:[#allocation4 + $0x180] sm:$0xff]  ;;  %v5334_v39 = vld [vmem:[#allocation4 + $0x168] sm:$0xff] }
 0xbb6   :  { %v5336_v32 = vld [vmem:[#allocation4 + $0x178] sm:$0xff]  ;;  %v5346_v44 = vld [vmem:[#allocation4 + $0x1c8] sm:$0xff]  ;;  %v5343_v10 = vld [vmem:[#allocation4 + $0x1b0] sm:$0xff] }
 0xbb7   :  { %v5344_v47 = vld [vmem:[#allocation4 + $0x1b8] sm:$0xff]  ;;  %v5345_v0 = vld [vmem:[#allocation4 + $0x1c0] sm:$0xff]  ;;  %v5355_v60 = vld [vmem:[#allocation4 + $0x210] sm:$0xff] }
 0xbb8   :  { %5991 = vmatpush1.bf16.msra.mxu0 %v5307_v17  ;;  %6196 = vmatpush1.bf16.msra.mxu1 %v5309_v52  ;;  %v5353_v36 = vld [vmem:[#allocation4 + $0x200] sm:$0xff]  ;;  %v5352_v61 = vld [vmem:[#allocation4 + $0x1f8] sm:$0xff]  ;;  %v5354_v20 = vld [vmem:[#allocation4 + $0x208] sm:$0xff] }
 0xbb9   :  { %5992 = vmatprep.subr.bf16.mxu0 %v5317_v11  ;;  %6197 = vmatprep.subr.bf16.mxu1 %v5319_v15  ;;  %v5362_v59 = vld [vmem:[#allocation4 + $0x248] sm:$0xff]  ;;  %v5364_v43 = vld [vmem:[#allocation4 + $0x258] sm:$0xff]  ;;  %v5361_v62 = vld [vmem:[#allocation4 + $0x240] sm:$0xff] }
 0xbba   :  { %v5363_v48 = vld [vmem:[#allocation4 + $0x250] sm:$0xff]  ;;  %v5373_v18 = vld [vmem:[#allocation4 + $0x2a0] sm:$0xff]  ;;  %v5370_v21 = vld [vmem:[#allocation4 + $0x288] sm:$0xff] }
 0xbbb   :  { %v5371_v42 = vld [vmem:[#allocation4 + $0x290] sm:$0xff]  ;;  %v5372_v25 = vld [vmem:[#allocation4 + $0x298] sm:$0xff]  ;;  %v5382_v28 = vld [vmem:[#allocation4 + $0x2e8] sm:$0xff] }
 0xbbc   :  { %5993 = vmatpush1.bf16.msra.mxu0 %v5316_v6  ;;  %6198 = vmatpush1.bf16.msra.mxu1 %v5318_v31  ;;  %v5380_v55 = vld [vmem:[#allocation4 + $0x2d8] sm:$0xff]  ;;  %v5379_v22 = vld [vmem:[#allocation4 + $0x2d0] sm:$0xff]  ;;  %v5381_v49 = vld [vmem:[#allocation4 + $0x2e0] sm:$0xff] }
 0xbbd   :  { %5994 = vmatprep.subr.bf16.mxu0 %v5326_v33  ;;  %6199 = vmatprep.subr.bf16.mxu1 %v5328_v41  ;;  %v5389_v45 = vld [vmem:[#allocation4 + $0x320] sm:$0xff]  ;;  %v5391_v63 = vld [vmem:[#allocation4 + $0x330] sm:$0xff]  ;;  %v5388_v9 = vld [vmem:[#allocation4 + $0x318] sm:$0xff] }
 0xbbe   :  { %v5390_v54 = vld [vmem:[#allocation4 + $0x328] sm:$0xff]  ;;  %v5400_v2 = vld [vmem:[#allocation4 + $0x378] sm:$0xff]  ;;  %v5397_v46 = vld [vmem:[#allocation4 + $0x360] sm:$0xff] }
 0xbbf   :  { %v5398_v23 = vld [vmem:[#allocation4 + $0x368] sm:$0xff]  ;;  %v5399_v58 = vld [vmem:[#allocation4 + $0x370] sm:$0xff]  ;;  %v5409_v56 = vld [vmem:[#allocation4 + $0x3c0] sm:$0xff] }
 0xbc0   :  { %5995 = vmatpush1.bf16.msra.mxu0 %v5325_v50  ;;  %6200 = vmatpush1.bf16.msra.mxu1 %v5327_v1  ;;  %v5407_v13 = vld [vmem:[#allocation4 + $0x3b0] sm:$0xff]  ;;  %v5406_v57 = vld [vmem:[#allocation4 + $0x3a8] sm:$0xff]  ;;  %v5408_v17 = vld [vmem:[#allocation4 + $0x3b8] sm:$0xff] }
 0xbc1   :  { %5996 = vmatprep.subr.bf16.mxu0 %v5335_v14  ;;  %6201 = vmatprep.subr.bf16.mxu1 %v5337_v38  ;;  %v5416_v52 = vld [vmem:[#allocation4 + $0x3f8] sm:$0xff]  ;;  %v5418_v11 = vld [vmem:[#allocation4 + $0x408] sm:$0xff]  ;;  %v5415_v15 = vld [vmem:[#allocation4 + $0x3f0] sm:$0xff] }
 0xbc2   :  { %v5417_v6 = vld [vmem:[#allocation4 + $0x400] sm:$0xff]  ;;  %v5427_v33 = vld [vmem:[#allocation4 + $0x450] sm:$0xff]  ;;  %v5424_v41 = vld [vmem:[#allocation4 + $0x438] sm:$0xff] }
 0xbc3   :  { %v5425_v31 = vld [vmem:[#allocation4 + $0x440] sm:$0xff]  ;;  %v5426_v50 = vld [vmem:[#allocation4 + $0x448] sm:$0xff]  ;;  %v5436_v14 = vld [vmem:[#allocation4 + $0x498] sm:$0xff] }
 0xbc4   :  { %5997 = vmatpush1.bf16.msra.mxu0 %v5334_v39  ;;  %6202 = vmatpush1.bf16.msra.mxu1 %v5336_v32  ;;  %v5434_v1 = vld [vmem:[#allocation4 + $0x488] sm:$0xff]  ;;  %v5433_v38 = vld [vmem:[#allocation4 + $0x480] sm:$0xff]  ;;  %v5435_v39 = vld [vmem:[#allocation4 + $0x490] sm:$0xff] }
 0xbc5   :  { %5998 = vmatprep.subr.bf16.mxu0 %v5344_v47  ;;  %6203 = vmatprep.subr.bf16.mxu1 %v5346_v44  ;;  %v5443_v32 = vld [vmem:[#allocation4 + $0x4d0] sm:$0xff]  ;;  %v5445_v47 = vld [vmem:[#allocation4 + $0x4e0] sm:$0xff]  ;;  %v5442_v44 = vld [vmem:[#allocation4 + $0x4c8] sm:$0xff] }
 0xbc8   :  { %5999 = vmatpush1.bf16.msra.mxu0 %v5343_v10  ;;  %6204 = vmatpush1.bf16.msra.mxu1 %v5345_v0  ;;  %v5444_v10 = vld [vmem:[#allocation4 + $0x4d8] sm:$0xff] }
 0xbc9   :  { %6000 = vmatprep.subr.bf16.mxu0 %v5353_v36  ;;  %6205 = vmatprep.subr.bf16.mxu1 %v5355_v60  ;;  %v5452_v0 = vld [vmem:[#allocation4 + $0x518] sm:$0xff]  ;;  %v5454_v36 = vld [vmem:[#allocation4 + $0x528] sm:$0xff]  ;;  %v5451_v60 = vld [vmem:[#allocation4 + $0x510] sm:$0xff] }
 0xbcc   :  { %6001 = vmatpush1.bf16.msra.mxu0 %v5352_v61  ;;  %6206 = vmatpush1.bf16.msra.mxu1 %v5354_v20  ;;  %v5453_v61 = vld [vmem:[#allocation4 + $0x520] sm:$0xff] }
 0xbcd   :  { %6002 = vmatprep.subr.bf16.mxu0 %v5362_v59  ;;  %6207 = vmatprep.subr.bf16.mxu1 %v5364_v43  ;;  %v5461_v20 = vld [vmem:[#allocation4 + $0x560] sm:$0xff]  ;;  %v5463_v59 = vld [vmem:[#allocation4 + $0x570] sm:$0xff]  ;;  %v5460_v43 = vld [vmem:[#allocation4 + $0x558] sm:$0xff] }
 0xbd0   :  { %6003 = vmatpush1.bf16.msra.mxu0 %v5361_v62  ;;  %6208 = vmatpush1.bf16.msra.mxu1 %v5363_v48  ;;  %v5462_v62 = vld [vmem:[#allocation4 + $0x568] sm:$0xff] }
 0xbd1   :  { %6004 = vmatprep.subr.bf16.mxu0 %v5371_v42  ;;  %6209 = vmatprep.subr.bf16.mxu1 %v5373_v18  ;;  %v5470_v48 = vld [vmem:[#allocation4 + $0x5a8] sm:$0xff]  ;;  %v5472_v42 = vld [vmem:[#allocation4 + $0x5b8] sm:$0xff]  ;;  %v5469_v18 = vld [vmem:[#allocation4 + $0x5a0] sm:$0xff] }
 0xbd4   :  { %6005 = vmatpush1.bf16.msra.mxu0 %v5370_v21  ;;  %6210 = vmatpush1.bf16.msra.mxu1 %v5372_v25  ;;  %v5471_v21 = vld [vmem:[#allocation4 + $0x5b0] sm:$0xff] }
 0xbd5   :  { %6006 = vmatprep.subr.bf16.mxu0 %v5380_v55  ;;  %6211 = vmatprep.subr.bf16.mxu1 %v5382_v28  ;;  %v5479_v25 = vld [vmem:[#allocation4 + $0x5f0] sm:$0xff]  ;;  %v5481_v55 = vld [vmem:[#allocation4 + $0x600] sm:$0xff]  ;;  %v5478_v28 = vld [vmem:[#allocation4 + $0x5e8] sm:$0xff] }
 0xbd8   :  { %6007 = vmatpush1.bf16.msra.mxu0 %v5379_v22  ;;  %6212 = vmatpush1.bf16.msra.mxu1 %v5381_v49  ;;  %v5480_v22 = vld [vmem:[#allocation4 + $0x5f8] sm:$0xff] }
 0xbd9   :  { %6008 = vmatprep.subr.bf16.mxu0 %v5389_v45  ;;  %6213 = vmatprep.subr.bf16.mxu1 %v5391_v63  ;;  %v5488_v49 = vld [vmem:[#allocation4 + $0x638] sm:$0xff]  ;;  %v5490_v45 = vld [vmem:[#allocation4 + $0x648] sm:$0xff]  ;;  %v5487_v63 = vld [vmem:[#allocation4 + $0x630] sm:$0xff] }
 0xbdc   :  { %6009 = vmatpush1.bf16.msra.mxu0 %v5388_v9  ;;  %6214 = vmatpush1.bf16.msra.mxu1 %v5390_v54  ;;  %v5489_v9 = vld [vmem:[#allocation4 + $0x640] sm:$0xff] }
 0xbdd   :  { %6010 = vmatprep.subr.bf16.mxu0 %v5398_v23  ;;  %6215 = vmatprep.subr.bf16.mxu1 %v5400_v2  ;;  %v5497_v54 = vld [vmem:[#allocation4 + $0x680] sm:$0xff]  ;;  %v5499_v23 = vld [vmem:[#allocation4 + $0x690] sm:$0xff]  ;;  %v5496_v2 = vld [vmem:[#allocation4 + $0x678] sm:$0xff] }
 0xbe0   :  { %6011 = vmatpush1.bf16.msra.mxu0 %v5397_v46  ;;  %6216 = vmatpush1.bf16.msra.mxu1 %v5399_v58  ;;  %v5498_v46 = vld [vmem:[#allocation4 + $0x688] sm:$0xff] }
 0xbe1   :  { %6012 = vmatprep.subr.bf16.mxu0 %v5407_v13  ;;  %6217 = vmatprep.subr.bf16.mxu1 %v5409_v56  ;;  %v5506_v58 = vld [vmem:[#allocation4 + $0x6c8] sm:$0xff]  ;;  %v5508_v13 = vld [vmem:[#allocation4 + $0x6d8] sm:$0xff]  ;;  %v5505_v56 = vld [vmem:[#allocation4 + $0x6c0] sm:$0xff] }
 0xbe4   :  { %6013 = vmatpush1.bf16.msra.mxu0 %v5406_v57  ;;  %6218 = vmatpush1.bf16.msra.mxu1 %v5408_v17  ;;  %v5507_v57 = vld [vmem:[#allocation4 + $0x6d0] sm:$0xff] }
 0xbe5   :  { %6014 = vmatprep.subr.bf16.mxu0 %v5416_v52  ;;  %6219 = vmatprep.subr.bf16.mxu1 %v5418_v11  ;;  %v5515_v17 = vld [vmem:[#allocation4 + $0x710] sm:$0xff]  ;;  %v5517_v52 = vld [vmem:[#allocation4 + $0x720] sm:$0xff]  ;;  %v5514_v11 = vld [vmem:[#allocation4 + $0x708] sm:$0xff] }
 0xbe8   :  { %6015 = vmatpush1.bf16.msra.mxu0 %v5415_v15  ;;  %6220 = vmatpush1.bf16.msra.mxu1 %v5417_v6  ;;  %v5516_v15 = vld [vmem:[#allocation4 + $0x718] sm:$0xff] }
 0xbe9   :  { %6016 = vmatprep.subr.bf16.mxu0 %v5425_v31  ;;  %6221 = vmatprep.subr.bf16.mxu1 %v5427_v33  ;;  %v5524_v6 = vld [vmem:[#allocation4 + $0x758] sm:$0xff]  ;;  %v5526_v31 = vld [vmem:[#allocation4 + $0x768] sm:$0xff]  ;;  %v5523_v33 = vld [vmem:[#allocation4 + $0x750] sm:$0xff] }
 0xbec   :  { %6017 = vmatpush1.bf16.msra.mxu0 %v5424_v41  ;;  %6222 = vmatpush1.bf16.msra.mxu1 %v5426_v50  ;;  %v5525_v41 = vld [vmem:[#allocation4 + $0x760] sm:$0xff] }
 0xbed   :  { %6027 = vmatprep.subr.bf16.mxu0 %v5434_v1  ;;  %6232 = vmatprep.subr.bf16.mxu1 %v5436_v14  ;;  %v5533_v50 = vld [vmem:[#allocation4 + $0x7a0] sm:$0xff]  ;;  %v5535_v1 = vld [vmem:[#allocation4 + $0x7b0] sm:$0xff]  ;;  %v5532_v14 = vld [vmem:[#allocation4 + $0x798] sm:$0xff] }
 0xbef   :  { %6019 = vmatmul.mubr.bf16.vlgmr.msra.gmra.mrb[44].mxu0 %v9513_v27  ;;  %6224 = vmatmul.mubr.bf16.vlgmr.msra.gmra.mrb[48].mxu1 %v9513_v27 }
 0xbf0   :  { %6028 = vmatpush1.bf16.msra.mxu0 %v5433_v38  ;;  %6233 = vmatpush1.bf16.msra.mxu1 %v5435_v39  ;;  %v5534_v38 = vld [vmem:[#allocation4 + $0x7a8] sm:$0xff] }
 0xbf1   :  { %6029 = vmatprep.subr.bf16.mxu0 %v5443_v32  ;;  %6234 = vmatprep.subr.bf16.mxu1 %v5445_v47  ;;  %v5542_v39 = vld [vmem:[#allocation4 + $0x7e8] sm:$0xff]  ;;  %v5544_v32 = vld [vmem:[#allocation4 + $0x7f8] sm:$0xff]  ;;  %v5541_v47 = vld [vmem:[#allocation4 + $0x7e0] sm:$0xff] }
 0xbf2   :  { %6059 = vmatprep.mubr.bf16.mxu0 %v9519_v40  ;;  %6264 = vmatprep.mubr.bf16.mxu1 %v9519_v40 }
 0xbf4   :  { %6030 = vmatpush1.bf16.msra.mxu0 %v5442_v44  ;;  %6235 = vmatpush1.bf16.msra.mxu1 %v5444_v10  ;;  %v5543_v44 = vld [vmem:[#allocation4 + $0x7f0] sm:$0xff] }
 0xbf5   :  { %6031 = vmatprep.subr.bf16.mxu0 %v5452_v0  ;;  %6236 = vmatprep.subr.bf16.mxu1 %v5454_v36  ;;  %v5551_v10 = vld [vmem:[#allocation4 + $0x830] sm:$0xff]  ;;  %v5553_v0 = vld [vmem:[#allocation4 + $0x840] sm:$0xff]  ;;  %v5550_v36 = vld [vmem:[#allocation4 + $0x828] sm:$0xff] }
 0xbf8   :  { %6032 = vmatpush1.bf16.msra.mxu0 %v5451_v60  ;;  %6237 = vmatpush1.bf16.msra.mxu1 %v5453_v61  ;;  %v5552_v60 = vld [vmem:[#allocation4 + $0x838] sm:$0xff] }
 0xbf9   :  { %6033 = vmatprep.subr.bf16.mxu0 %v5461_v20  ;;  %6238 = vmatprep.subr.bf16.mxu1 %v5463_v59  ;;  %v5560_v61 = vld [vmem:[#allocation4 + $0x878] sm:$0xff]  ;;  %v5562_v20 = vld [vmem:[#allocation4 + $0x888] sm:$0xff]  ;;  %v5559_v59 = vld [vmem:[#allocation4 + $0x870] sm:$0xff] }
 0xbfc   :  { %6034 = vmatpush1.bf16.msra.mxu0 %v5460_v43  ;;  %6239 = vmatpush1.bf16.msra.mxu1 %v5462_v62  ;;  %v5561_v43 = vld [vmem:[#allocation4 + $0x880] sm:$0xff] }
 0xbfd   :  { %6035 = vmatprep.subr.bf16.mxu0 %v5470_v48  ;;  %6240 = vmatprep.subr.bf16.mxu1 %v5472_v42  ;;  %v5569_v62 = vld [vmem:[#allocation4 + $0x8c0] sm:$0xff]  ;;  %v5571_v48 = vld [vmem:[#allocation4 + $0x8d0] sm:$0xff]  ;;  %v5568_v42 = vld [vmem:[#allocation4 + $0x8b8] sm:$0xff] }
 0xc00   :  { %6036 = vmatpush1.bf16.msra.mxu0 %v5469_v18  ;;  %6241 = vmatpush1.bf16.msra.mxu1 %v5471_v21  ;;  %v5570_v18 = vld [vmem:[#allocation4 + $0x8c8] sm:$0xff] }
 0xc01   :  { %6037 = vmatprep.subr.bf16.mxu0 %v5479_v25  ;;  %6242 = vmatprep.subr.bf16.mxu1 %v5481_v55  ;;  %v5578_v21 = vld [vmem:[#allocation4 + $0x908] sm:$0xff]  ;;  %v5580_v25 = vld [vmem:[#allocation4 + $0x918] sm:$0xff]  ;;  %v5577_v55 = vld [vmem:[#allocation4 + $0x900] sm:$0xff] }
 0xc04   :  { %6038 = vmatpush1.bf16.msra.mxu0 %v5478_v28  ;;  %6243 = vmatpush1.bf16.msra.mxu1 %v5480_v22  ;;  %v5579_v28 = vld [vmem:[#allocation4 + $0x910] sm:$0xff] }
 0xc05   :  { %6039 = vmatprep.subr.bf16.mxu0 %v5488_v49  ;;  %6244 = vmatprep.subr.bf16.mxu1 %v5490_v45  ;;  %v5587_v22 = vld [vmem:[#allocation4 + $0x950] sm:$0xff]  ;;  %v5589_v49 = vld [vmem:[#allocation4 + $0x960] sm:$0xff]  ;;  %v5586_v45 = vld [vmem:[#allocation4 + $0x948] sm:$0xff] }
 0xc08   :  { %6040 = vmatpush1.bf16.msra.mxu0 %v5487_v63  ;;  %6245 = vmatpush1.bf16.msra.mxu1 %v5489_v9  ;;  %v5588_v63 = vld [vmem:[#allocation4 + $0x958] sm:$0xff] }
 0xc09   :  { %6041 = vmatprep.subr.bf16.mxu0 %v5497_v54  ;;  %6246 = vmatprep.subr.bf16.mxu1 %v5499_v23  ;;  %v5596_v9 = vld [vmem:[#allocation4 + $0x998] sm:$0xff]  ;;  %v5598_v54 = vld [vmem:[#allocation4 + $0x9a8] sm:$0xff]  ;;  %v5595_v23 = vld [vmem:[#allocation4 + $0x990] sm:$0xff] }
 0xc0c   :  { %6042 = vmatpush1.bf16.msra.mxu0 %v5496_v2  ;;  %6247 = vmatpush1.bf16.msra.mxu1 %v5498_v46  ;;  %v5597_v2 = vld [vmem:[#allocation4 + $0x9a0] sm:$0xff] }
 0xc0d   :  { %6043 = vmatprep.subr.bf16.mxu0 %v5506_v58  ;;  %6248 = vmatprep.subr.bf16.mxu1 %v5508_v13  ;;  %v5605_v46 = vld [vmem:[#allocation4 + $0x9e0] sm:$0xff]  ;;  %v5607_v58 = vld [vmem:[#allocation4 + $0x9f0] sm:$0xff]  ;;  %v5604_v13 = vld [vmem:[#allocation4 + $0x9d8] sm:$0xff] }
 0xc10   :  { %6044 = vmatpush1.bf16.msra.mxu0 %v5505_v56  ;;  %6249 = vmatpush1.bf16.msra.mxu1 %v5507_v57  ;;  %v5606_v56 = vld [vmem:[#allocation4 + $0x9e8] sm:$0xff] }
 0xc11   :  { %6045 = vmatprep.subr.bf16.mxu0 %v5515_v17  ;;  %6250 = vmatprep.subr.bf16.mxu1 %v5517_v52  ;;  %v5614_v57 = vld [vmem:[#allocation4 + $0xa28] sm:$0xff]  ;;  %v5616_v17 = vld [vmem:[#allocation4 + $0xa38] sm:$0xff]  ;;  %v5613_v52 = vld [vmem:[#allocation4 + $0xa20] sm:$0xff] }
 0xc14   :  { %6046 = vmatpush1.bf16.msra.mxu0 %v5514_v11  ;;  %6251 = vmatpush1.bf16.msra.mxu1 %v5516_v15  ;;  %v5615_v11 = vld [vmem:[#allocation4 + $0xa30] sm:$0xff] }
 0xc15   :  { %6047 = vmatprep.subr.bf16.mxu0 %v5524_v6  ;;  %6252 = vmatprep.subr.bf16.mxu1 %v5526_v31  ;;  %v5623_v15 = vld [vmem:[#allocation4 + $0xa70] sm:$0xff]  ;;  %v5625_v6 = vld [vmem:[#allocation4 + $0xa80] sm:$0xff]  ;;  %v5622_v31 = vld [vmem:[#allocation4 + $0xa68] sm:$0xff] }
 0xc18   :  { %6048 = vmatpush1.bf16.msra.mxu0 %v5523_v33  ;;  %6253 = vmatpush1.bf16.msra.mxu1 %v5525_v41  ;;  %v5624_v33 = vld [vmem:[#allocation4 + $0xa78] sm:$0xff] }
 0xc19   :  { %6049 = vmatprep.subr.bf16.mxu0 %v5533_v50  ;;  %6254 = vmatprep.subr.bf16.mxu1 %v5535_v1  ;;  %v5632_v41 = vld [vmem:[#allocation4 + $0xab8] sm:$0xff]  ;;  %v5634_v50 = vld [vmem:[#allocation4 + $0xac8] sm:$0xff]  ;;  %v5631_v1 = vld [vmem:[#allocation4 + $0xab0] sm:$0xff] }
 0xc1c   :  { %6050 = vmatpush1.bf16.msra.mxu0 %v5532_v14  ;;  %6255 = vmatpush1.bf16.msra.mxu1 %v5534_v38  ;;  %v5633_v14 = vld [vmem:[#allocation4 + $0xac0] sm:$0xff] }
 0xc1d   :  { %6051 = vmatprep.subr.bf16.mxu0 %v5542_v39  ;;  %6256 = vmatprep.subr.bf16.mxu1 %v5544_v32  ;;  %v5641_v38 = vld [vmem:[#allocation4 + $0xb00] sm:$0xff]  ;;  %v5643_v39 = vld [vmem:[#allocation4 + $0xb10] sm:$0xff]  ;;  %v5640_v32 = vld [vmem:[#allocation4 + $0xaf8] sm:$0xff] }
 0xc20   :  { %6052 = vmatpush1.bf16.msra.mxu0 %v5541_v47  ;;  %6257 = vmatpush1.bf16.msra.mxu1 %v5543_v44  ;;  %v5642_v47 = vld [vmem:[#allocation4 + $0xb08] sm:$0xff] }
 0xc21   :  { %6053 = vmatprep.subr.bf16.mxu0 %v5551_v10  ;;  %6258 = vmatprep.subr.bf16.mxu1 %v5553_v0  ;;  %v5650_v44 = vld [vmem:[#allocation4 + $0xb48] sm:$0xff]  ;;  %v5652_v10 = vld [vmem:[#allocation4 + $0xb58] sm:$0xff]  ;;  %v5649_v0 = vld [vmem:[#allocation4 + $0xb40] sm:$0xff] }
 0xc24   :  { %6054 = vmatpush1.bf16.msra.mxu0 %v5550_v36  ;;  %6259 = vmatpush1.bf16.msra.mxu1 %v5552_v60  ;;  %v5651_v36 = vld [vmem:[#allocation4 + $0xb50] sm:$0xff] }
 0xc25   :  { %6055 = vmatprep.subr.bf16.mxu0 %v5560_v61  ;;  %6260 = vmatprep.subr.bf16.mxu1 %v5562_v20  ;;  %v5659_v60 = vld [vmem:[#allocation4 + $0xb90] sm:$0xff]  ;;  %v5661_v61 = vld [vmem:[#allocation4 + $0xba0] sm:$0xff]  ;;  %v5658_v20 = vld [vmem:[#allocation4 + $0xb88] sm:$0xff] }
 0xc28   :  { %6056 = vmatpush1.bf16.msra.mxu0 %v5559_v59  ;;  %6261 = vmatpush1.bf16.msra.mxu1 %v5561_v43  ;;  %v5660_v59 = vld [vmem:[#allocation4 + $0xb98] sm:$0xff] }
 0xc29   :  { %6057 = vmatprep.subr.bf16.mxu0 %v5569_v62  ;;  %6262 = vmatprep.subr.bf16.mxu1 %v5571_v48  ;;  %v5668_v43 = vld [vmem:[#allocation4 + $0xbd8] sm:$0xff]  ;;  %v5670_v62 = vld [vmem:[#allocation4 + $0xbe8] sm:$0xff]  ;;  %v5667_v48 = vld [vmem:[#allocation4 + $0xbd0] sm:$0xff] }
 0xc2c   :  { %6058 = vmatpush1.bf16.msra.mxu0 %v5568_v42  ;;  %6263 = vmatpush1.bf16.msra.mxu1 %v5570_v18  ;;  %v5669_v42 = vld [vmem:[#allocation4 + $0xbe0] sm:$0xff] }
 0xc2d   :  { %6068 = vmatprep.subr.bf16.mxu0 %v5578_v21  ;;  %6273 = vmatprep.subr.bf16.mxu1 %v5580_v25  ;;  %v5677_v18 = vld [vmem:[#allocation4 + $0xc20] sm:$0xff]  ;;  %v5679_v21 = vld [vmem:[#allocation4 + $0xc30] sm:$0xff]  ;;  %v5676_v25 = vld [vmem:[#allocation4 + $0xc18] sm:$0xff] }
 0xc2f   :  { %6060 = vmatmul.mubr.bf16.vlgmr.msra.gmra.mrb[44].mxu0 %v9517_v24  ;;  %6265 = vmatmul.mubr.bf16.vlgmr.msra.gmra.mrb[48].mxu1 %v9517_v24 }
 0xc30   :  { %6069 = vmatpush1.bf16.msra.mxu0 %v5577_v55  ;;  %6274 = vmatpush1.bf16.msra.mxu1 %v5579_v28  ;;  %v5678_v55 = vld [vmem:[#allocation4 + $0xc28] sm:$0xff] }
 0xc31   :  { %6070 = vmatprep.subr.bf16.mxu0 %v5587_v22  ;;  %6275 = vmatprep.subr.bf16.mxu1 %v5589_v49  ;;  %v5686_v28 = vld [vmem:[#allocation4 + $0xc68] sm:$0xff]  ;;  %v5688_v22 = vld [vmem:[#allocation4 + $0xc78] sm:$0xff]  ;;  %v5685_v49 = vld [vmem:[#allocation4 + $0xc60] sm:$0xff] }
 0xc32   :  { %6100 = vmatprep.mubr.bf16.mxu0 %v9523_v4  ;;  %6305 = vmatprep.mubr.bf16.mxu1 %v9523_v4 }
 0xc34   :  { %6071 = vmatpush1.bf16.msra.mxu0 %v5586_v45  ;;  %6276 = vmatpush1.bf16.msra.mxu1 %v5588_v63  ;;  %v5687_v45 = vld [vmem:[#allocation4 + $0xc70] sm:$0xff] }
 0xc35   :  { %6072 = vmatprep.subr.bf16.mxu0 %v5596_v9  ;;  %6277 = vmatprep.subr.bf16.mxu1 %v5598_v54  ;;  %v5695_v63 = vld [vmem:[#allocation4 + $0xcb0] sm:$0xff]  ;;  %v5697_v9 = vld [vmem:[#allocation4 + $0xcc0] sm:$0xff]  ;;  %v5694_v54 = vld [vmem:[#allocation4 + $0xca8] sm:$0xff] }
 0xc38   :  { %6073 = vmatpush1.bf16.msra.mxu0 %v5595_v23  ;;  %6278 = vmatpush1.bf16.msra.mxu1 %v5597_v2  ;;  %v5696_v23 = vld [vmem:[#allocation4 + $0xcb8] sm:$0xff] }
 0xc39   :  { %6074 = vmatprep.subr.bf16.mxu0 %v5605_v46  ;;  %6279 = vmatprep.subr.bf16.mxu1 %v5607_v58  ;;  %v5704_v2 = vld [vmem:[#allocation4 + $0xcf8] sm:$0xff]  ;;  %v5706_v46 = vld [vmem:[#allocation4 + $0xd08] sm:$0xff]  ;;  %v5703_v58 = vld [vmem:[#allocation4 + $0xcf0] sm:$0xff] }
 0xc3c   :  { %6075 = vmatpush1.bf16.msra.mxu0 %v5604_v13  ;;  %6280 = vmatpush1.bf16.msra.mxu1 %v5606_v56  ;;  %v5705_v13 = vld [vmem:[#allocation4 + $0xd00] sm:$0xff] }
 0xc3d   :  { %6076 = vmatprep.subr.bf16.mxu0 %v5614_v57  ;;  %6281 = vmatprep.subr.bf16.mxu1 %v5616_v17  ;;  %v5713_v56 = vld [vmem:[#allocation4 + $0xd40] sm:$0xff]  ;;  %v5715_v57 = vld [vmem:[#allocation4 + $0xd50] sm:$0xff]  ;;  %v5712_v17 = vld [vmem:[#allocation4 + $0xd38] sm:$0xff] }
 0xc40   :  { %6077 = vmatpush1.bf16.msra.mxu0 %v5613_v52  ;;  %6282 = vmatpush1.bf16.msra.mxu1 %v5615_v11  ;;  %v5714_v52 = vld [vmem:[#allocation4 + $0xd48] sm:$0xff] }
 0xc41   :  { %6078 = vmatprep.subr.bf16.mxu0 %v5623_v15  ;;  %6283 = vmatprep.subr.bf16.mxu1 %v5625_v6  ;;  %v5722_v11 = vld [vmem:[#allocation4 + $0xd88] sm:$0xff]  ;;  %v5724_v15 = vld [vmem:[#allocation4 + $0xd98] sm:$0xff]  ;;  %v5721_v6 = vld [vmem:[#allocation4 + $0xd80] sm:$0xff] }
 0xc44   :  { %6079 = vmatpush1.bf16.msra.mxu0 %v5622_v31  ;;  %6284 = vmatpush1.bf16.msra.mxu1 %v5624_v33  ;;  %v5723_v31 = vld [vmem:[#allocation4 + $0xd90] sm:$0xff] }
 0xc45   :  { %6080 = vmatprep.subr.bf16.mxu0 %v5632_v41  ;;  %6285 = vmatprep.subr.bf16.mxu1 %v5634_v50  ;;  %v5731_v33 = vld [vmem:[#allocation4 + $0xdd0] sm:$0xff]  ;;  %v5733_v41 = vld [vmem:[#allocation4 + $0xde0] sm:$0xff]  ;;  %v5730_v50 = vld [vmem:[#allocation4 + $0xdc8] sm:$0xff] }
 0xc48   :  { %6081 = vmatpush1.bf16.msra.mxu0 %v5631_v1  ;;  %6286 = vmatpush1.bf16.msra.mxu1 %v5633_v14  ;;  %v5732_v1 = vld [vmem:[#allocation4 + $0xdd8] sm:$0xff] }
 0xc49   :  { %6082 = vmatprep.subr.bf16.mxu0 %v5641_v38  ;;  %6287 = vmatprep.subr.bf16.mxu1 %v5643_v39  ;;  %v5740_v14 = vld [vmem:[#allocation4 + $0xe18] sm:$0xff]  ;;  %v5742_v38 = vld [vmem:[#allocation4 + $0xe28] sm:$0xff]  ;;  %v5739_v39 = vld [vmem:[#allocation4 + $0xe10] sm:$0xff] }
 0xc4c   :  { %6083 = vmatpush1.bf16.msra.mxu0 %v5640_v32  ;;  %6288 = vmatpush1.bf16.msra.mxu1 %v5642_v47  ;;  %v5741_v32 = vld [vmem:[#allocation4 + $0xe20] sm:$0xff] }
 0xc4d   :  { %6084 = vmatprep.subr.bf16.mxu0 %v5650_v44  ;;  %6289 = vmatprep.subr.bf16.mxu1 %v5652_v10  ;;  %v5749_v47 = vld [vmem:[#allocation4 + $0xe60] sm:$0xff]  ;;  %v5751_v44 = vld [vmem:[#allocation4 + $0xe70] sm:$0xff]  ;;  %v5748_v10 = vld [vmem:[#allocation4 + $0xe58] sm:$0xff] }
 0xc50   :  { %6085 = vmatpush1.bf16.msra.mxu0 %v5649_v0  ;;  %6290 = vmatpush1.bf16.msra.mxu1 %v5651_v36  ;;  %v5750_v0 = vld [vmem:[#allocation4 + $0xe68] sm:$0xff] }
 0xc51   :  { %6086 = vmatprep.subr.bf16.mxu0 %v5659_v60  ;;  %6291 = vmatprep.subr.bf16.mxu1 %v5661_v61  ;;  %v5758_v36 = vld [vmem:[#allocation4 + $0xea8] sm:$0xff]  ;;  %v5760_v60 = vld [vmem:[#allocation4 + $0xeb8] sm:$0xff]  ;;  %v5757_v61 = vld [vmem:[#allocation4 + $0xea0] sm:$0xff] }
 0xc54   :  { %6087 = vmatpush1.bf16.msra.mxu0 %v5658_v20  ;;  %6292 = vmatpush1.bf16.msra.mxu1 %v5660_v59  ;;  %v5759_v20 = vld [vmem:[#allocation4 + $0xeb0] sm:$0xff] }
 0xc55   :  { %6088 = vmatprep.subr.bf16.mxu0 %v5668_v43  ;;  %6293 = vmatprep.subr.bf16.mxu1 %v5670_v62  ;;  %v5767_v59 = vld [vmem:[#allocation4 + $0xef0] sm:$0xff]  ;;  %v5769_v43 = vld [vmem:[#allocation4 + $0xf00] sm:$0xff]  ;;  %v5766_v62 = vld [vmem:[#allocation4 + $0xee8] sm:$0xff] }
 0xc58   :  { %6089 = vmatpush1.bf16.msra.mxu0 %v5667_v48  ;;  %6294 = vmatpush1.bf16.msra.mxu1 %v5669_v42  ;;  %v5768_v48 = vld [vmem:[#allocation4 + $0xef8] sm:$0xff] }
 0xc59   :  { %6090 = vmatprep.subr.bf16.mxu0 %v5677_v18  ;;  %6295 = vmatprep.subr.bf16.mxu1 %v5679_v21  ;;  %v5776_v42 = vld [vmem:[#allocation4 + $0xf38] sm:$0xff]  ;;  %v5778_v18 = vld [vmem:[#allocation4 + $0xf48] sm:$0xff]  ;;  %v5775_v21 = vld [vmem:[#allocation4 + $0xf30] sm:$0xff] }
 0xc5c   :  { %6091 = vmatpush1.bf16.msra.mxu0 %v5676_v25  ;;  %6296 = vmatpush1.bf16.msra.mxu1 %v5678_v55  ;;  %v5777_v25 = vld [vmem:[#allocation4 + $0xf40] sm:$0xff] }
 0xc5d   :  { %6092 = vmatprep.subr.bf16.mxu0 %v5686_v28  ;;  %6297 = vmatprep.subr.bf16.mxu1 %v5688_v22  ;;  %v5785_v55 = vld [vmem:[#allocation4 + $0xf80] sm:$0xff]  ;;  %v5787_v28 = vld [vmem:[#allocation4 + $0xf90] sm:$0xff]  ;;  %v5784_v22 = vld [vmem:[#allocation4 + $0xf78] sm:$0xff] }
 0xc60   :  { %6093 = vmatpush1.bf16.msra.mxu0 %v5685_v49  ;;  %6298 = vmatpush1.bf16.msra.mxu1 %v5687_v45  ;;  %v5786_v49 = vld [vmem:[#allocation4 + $0xf88] sm:$0xff] }
 0xc61   :  { %6094 = vmatprep.subr.bf16.mxu0 %v5695_v63  ;;  %6299 = vmatprep.subr.bf16.mxu1 %v5697_v9  ;;  %v5794_v45 = vld [vmem:[#allocation4 + $0xfc8] sm:$0xff]  ;;  %v5796_v63 = vld [vmem:[#allocation4 + $0xfd8] sm:$0xff]  ;;  %v5793_v9 = vld [vmem:[#allocation4 + $0xfc0] sm:$0xff] }
 0xc64   :  { %6095 = vmatpush1.bf16.msra.mxu0 %v5694_v54  ;;  %6300 = vmatpush1.bf16.msra.mxu1 %v5696_v23  ;;  %v5795_v54 = vld [vmem:[#allocation4 + $0xfd0] sm:$0xff] }
 0xc65   :  { %6096 = vmatprep.subr.bf16.mxu0 %v5704_v2  ;;  %6301 = vmatprep.subr.bf16.mxu1 %v5706_v46  ;;  %v5803_v23 = vld [vmem:[#allocation4 + $0x1010] sm:$0xff]  ;;  %v5805_v2 = vld [vmem:[#allocation4 + $0x1020] sm:$0xff]  ;;  %v5802_v46 = vld [vmem:[#allocation4 + $0x1008] sm:$0xff] }
 0xc68   :  { %6097 = vmatpush1.bf16.msra.mxu0 %v5703_v58  ;;  %6302 = vmatpush1.bf16.msra.mxu1 %v5705_v13  ;;  %v5804_v58 = vld [vmem:[#allocation4 + $0x1018] sm:$0xff] }
 0xc69   :  { %6098 = vmatprep.subr.bf16.mxu0 %v5713_v56  ;;  %6303 = vmatprep.subr.bf16.mxu1 %v5715_v57  ;;  %v5812_v13 = vld [vmem:[#allocation4 + $0x1058] sm:$0xff]  ;;  %v5814_v56 = vld [vmem:[#allocation4 + $0x1068] sm:$0xff]  ;;  %v5811_v57 = vld [vmem:[#allocation4 + $0x1050] sm:$0xff] }
 0xc6c   :  { %6099 = vmatpush1.bf16.msra.mxu0 %v5712_v17  ;;  %6304 = vmatpush1.bf16.msra.mxu1 %v5714_v52  ;;  %v5813_v17 = vld [vmem:[#allocation4 + $0x1060] sm:$0xff] }
 0xc6d   :  { %6109 = vmatprep.subr.bf16.mxu0 %v5722_v11  ;;  %6314 = vmatprep.subr.bf16.mxu1 %v5724_v15  ;;  %v5821_v52 = vld [vmem:[#allocation4 + $0x10a0] sm:$0xff]  ;;  %v5823_v11 = vld [vmem:[#allocation4 + $0x10b0] sm:$0xff]  ;;  %v5820_v15 = vld [vmem:[#allocation4 + $0x1098] sm:$0xff] }
 0xc6f   :  { %6101 = vmatmul.mubr.bf16.vlgmr.msra.gmra.mrb[44].mxu0 %v9521_v29  ;;  %6306 = vmatmul.mubr.bf16.vlgmr.msra.gmra.mrb[48].mxu1 %v9521_v29 }
 0xc70   :  { %6110 = vmatpush1.bf16.msra.mxu0 %v5721_v6  ;;  %6315 = vmatpush1.bf16.msra.mxu1 %v5723_v31  ;;  %v5822_v6 = vld [vmem:[#allocation4 + $0x10a8] sm:$0xff] }
 0xc71   :  { %6111 = vmatprep.subr.bf16.mxu0 %v5731_v33  ;;  %6316 = vmatprep.subr.bf16.mxu1 %v5733_v41  ;;  %v5830_v31 = vld [vmem:[#allocation4 + $0x10e8] sm:$0xff]  ;;  %v5832_v33 = vld [vmem:[#allocation4 + $0x10f8] sm:$0xff]  ;;  %v5829_v41 = vld [vmem:[#allocation4 + $0x10e0] sm:$0xff] }
 0xc72   :  { %6141 = vmatprep.mubr.bf16.mxu0 %v9527_v53  ;;  %6346 = vmatprep.mubr.bf16.mxu1 %v9527_v53 }
 0xc74   :  { %6112 = vmatpush1.bf16.msra.mxu0 %v5730_v50  ;;  %6317 = vmatpush1.bf16.msra.mxu1 %v5732_v1  ;;  %v5831_v50 = vld [vmem:[#allocation4 + $0x10f0] sm:$0xff] }
 0xc75   :  { %6113 = vmatprep.subr.bf16.mxu0 %v5740_v14  ;;  %6318 = vmatprep.subr.bf16.mxu1 %v5742_v38  ;;  %v5839_v1 = vld [vmem:[#allocation4 + $0x1130] sm:$0xff]  ;;  %v5841_v14 = vld [vmem:[#allocation4 + $0x1140] sm:$0xff]  ;;  %v5838_v38 = vld [vmem:[#allocation4 + $0x1128] sm:$0xff] }
 0xc78   :  { %6114 = vmatpush1.bf16.msra.mxu0 %v5739_v39  ;;  %6319 = vmatpush1.bf16.msra.mxu1 %v5741_v32  ;;  %v5840_v39 = vld [vmem:[#allocation4 + $0x1138] sm:$0xff] }
 0xc79   :  { %6115 = vmatprep.subr.bf16.mxu0 %v5749_v47  ;;  %6320 = vmatprep.subr.bf16.mxu1 %v5751_v44  ;;  %v5848_v32 = vld [vmem:[#allocation4 + $0x1178] sm:$0xff]  ;;  %v5850_v47 = vld [vmem:[#allocation4 + $0x1188] sm:$0xff]  ;;  %v5847_v44 = vld [vmem:[#allocation4 + $0x1170] sm:$0xff] }
 0xc7c   :  { %6116 = vmatpush1.bf16.msra.mxu0 %v5748_v10  ;;  %6321 = vmatpush1.bf16.msra.mxu1 %v5750_v0  ;;  %v5849_v10 = vld [vmem:[#allocation4 + $0x1180] sm:$0xff] }
 0xc7d   :  { %6117 = vmatprep.subr.bf16.mxu0 %v5758_v36  ;;  %6322 = vmatprep.subr.bf16.mxu1 %v5760_v60  ;;  %v5857_v0 = vld [vmem:[#allocation4 + $0x11c0] sm:$0xff]  ;;  %v5859_v36 = vld [vmem:[#allocation4 + $0x11d0] sm:$0xff]  ;;  %v5856_v60 = vld [vmem:[#allocation4 + $0x11b8] sm:$0xff] }
 0xc80   :  { %6118 = vmatpush1.bf16.msra.mxu0 %v5757_v61  ;;  %6323 = vmatpush1.bf16.msra.mxu1 %v5759_v20  ;;  %v5858_v61 = vld [vmem:[#allocation4 + $0x11c8] sm:$0xff] }
 0xc81   :  { %6119 = vmatprep.subr.bf16.mxu0 %v5767_v59  ;;  %6324 = vmatprep.subr.bf16.mxu1 %v5769_v43  ;;  %v5866_v20 = vld [vmem:[#allocation4 + $0x1208] sm:$0xff]  ;;  %v5868_v59 = vld [vmem:[#allocation4 + $0x1218] sm:$0xff]  ;;  %v5865_v43 = vld [vmem:[#allocation4 + $0x1200] sm:$0xff] }
 0xc84   :  { %6120 = vmatpush1.bf16.msra.mxu0 %v5766_v62  ;;  %6325 = vmatpush1.bf16.msra.mxu1 %v5768_v48  ;;  %v5867_v62 = vld [vmem:[#allocation4 + $0x1210] sm:$0xff] }
 0xc85   :  { %6121 = vmatprep.subr.bf16.mxu0 %v5776_v42  ;;  %6326 = vmatprep.subr.bf16.mxu1 %v5778_v18  ;;  %v5875_v48 = vld [vmem:[#allocation4 + $0x1250] sm:$0xff]  ;;  %v5877_v42 = vld [vmem:[#allocation4 + $0x1260] sm:$0xff]  ;;  %v5874_v18 = vld [vmem:[#allocation4 + $0x1248] sm:$0xff] }
 0xc88   :  { %6122 = vmatpush1.bf16.msra.mxu0 %v5775_v21  ;;  %6327 = vmatpush1.bf16.msra.mxu1 %v5777_v25  ;;  %v5876_v21 = vld [vmem:[#allocation4 + $0x1258] sm:$0xff] }
 0xc89   :  { %6123 = vmatprep.subr.bf16.mxu0 %v5785_v55  ;;  %6328 = vmatprep.subr.bf16.mxu1 %v5787_v28  ;;  %v5884_v25 = vld [vmem:[#allocation4 + $0x1298] sm:$0xff]  ;;  %v5886_v55 = vld [vmem:[#allocation4 + $0x12a8] sm:$0xff]  ;;  %v5883_v28 = vld [vmem:[#allocation4 + $0x1290] sm:$0xff] }
 0xc8c   :  { %6124 = vmatpush1.bf16.msra.mxu0 %v5784_v22  ;;  %6329 = vmatpush1.bf16.msra.mxu1 %v5786_v49  ;;  %v5885_v22 = vld [vmem:[#allocation4 + $0x12a0] sm:$0xff] }
 0xc8d   :  { %6125 = vmatprep.subr.bf16.mxu0 %v5794_v45  ;;  %6330 = vmatprep.subr.bf16.mxu1 %v5796_v63  ;;  %v5893_v49 = vld [vmem:[#allocation4 + $0x12e0] sm:$0xff]  ;;  %v5895_v45 = vld [vmem:[#allocation4 + $0x12f0] sm:$0xff]  ;;  %v5892_v63 = vld [vmem:[#allocation4 + $0x12d8] sm:$0xff] }
 0xc90   :  { %6126 = vmatpush1.bf16.msra.mxu0 %v5793_v9  ;;  %6331 = vmatpush1.bf16.msra.mxu1 %v5795_v54  ;;  %v5894_v9 = vld [vmem:[#allocation4 + $0x12e8] sm:$0xff] }
 0xc91   :  { %6127 = vmatprep.subr.bf16.mxu0 %v5803_v23  ;;  %6332 = vmatprep.subr.bf16.mxu1 %v5805_v2  ;;  %v5902_v54 = vld [vmem:[#allocation4 + $0x1328] sm:$0xff]  ;;  %v5904_v23 = vld [vmem:[#allocation4 + $0x1338] sm:$0xff]  ;;  %v5901_v2 = vld [vmem:[#allocation4 + $0x1320] sm:$0xff] }
 0xc94   :  { %6128 = vmatpush1.bf16.msra.mxu0 %v5802_v46  ;;  %6333 = vmatpush1.bf16.msra.mxu1 %v5804_v58  ;;  %v5903_v46 = vld [vmem:[#allocation4 + $0x1330] sm:$0xff] }
 0xc95   :  { %6129 = vmatprep.subr.bf16.mxu0 %v5812_v13  ;;  %6334 = vmatprep.subr.bf16.mxu1 %v5814_v56  ;;  %v5911_v58 = vld [vmem:[#allocation4 + $0x1370] sm:$0xff]  ;;  %v5913_v13 = vld [vmem:[#allocation4 + $0x1380] sm:$0xff]  ;;  %v5910_v56 = vld [vmem:[#allocation4 + $0x1368] sm:$0xff] }
 0xc98   :  { %6130 = vmatpush1.bf16.msra.mxu0 %v5811_v57  ;;  %6335 = vmatpush1.bf16.msra.mxu1 %v5813_v17  ;;  %v5912_v57 = vld [vmem:[#allocation4 + $0x1378] sm:$0xff] }
 0xc99   :  { %6131 = vmatprep.subr.bf16.mxu0 %v5821_v52  ;;  %6336 = vmatprep.subr.bf16.mxu1 %v5823_v11  ;;  %v5920_v17 = vld [vmem:[#allocation4 + $0x13b8] sm:$0xff]  ;;  %v5922_v52 = vld [vmem:[#allocation4 + $0x13c8] sm:$0xff]  ;;  %v5919_v11 = vld [vmem:[#allocation4 + $0x13b0] sm:$0xff] }
 0xc9c   :  { %6132 = vmatpush1.bf16.msra.mxu0 %v5820_v15  ;;  %6337 = vmatpush1.bf16.msra.mxu1 %v5822_v6  ;;  %v5921_v15 = vld [vmem:[#allocation4 + $0x13c0] sm:$0xff] }
 0xc9d   :  { %6133 = vmatprep.subr.bf16.mxu0 %v5830_v31  ;;  %6338 = vmatprep.subr.bf16.mxu1 %v5832_v33  ;;  %v5929_v6 = vld [vmem:[#allocation4 + $0x1400] sm:$0xff]  ;;  %v5931_v31 = vld [vmem:[#allocation4 + $0x1410] sm:$0xff]  ;;  %v5928_v33 = vld [vmem:[#allocation4 + $0x13f8] sm:$0xff] }
 0xca0   :  { %6134 = vmatpush1.bf16.msra.mxu0 %v5829_v41  ;;  %6339 = vmatpush1.bf16.msra.mxu1 %v5831_v50  ;;  %v5930_v41 = vld [vmem:[#allocation4 + $0x1408] sm:$0xff] }
 0xca1   :  { %6135 = vmatprep.subr.bf16.mxu0 %v5839_v1  ;;  %6340 = vmatprep.subr.bf16.mxu1 %v5841_v14  ;;  %v5294_v50 = vld [vmem:[#allocation4 + $0x28] sm:$0xff]  ;;  %v5296_v1 = vld [vmem:[#allocation4 + $0x38] sm:$0xff]  ;;  %v5293_v14 = vld [vmem:[#allocation4 + $0x20] sm:$0xff] }
 0xca4   :  { %6136 = vmatpush1.bf16.msra.mxu0 %v5838_v38  ;;  %6341 = vmatpush1.bf16.msra.mxu1 %v5840_v39  ;;  %v5295_v38 = vld [vmem:[#allocation4 + $0x30] sm:$0xff] }
 0xca5   :  { %6137 = vmatprep.subr.bf16.mxu0 %v5848_v32  ;;  %6342 = vmatprep.subr.bf16.mxu1 %v5850_v47  ;;  %v5303_v39 = vld [vmem:[#allocation4 + $0x70] sm:$0xff]  ;;  %v5305_v32 = vld [vmem:[#allocation4 + $0x80] sm:$0xff]  ;;  %v5302_v47 = vld [vmem:[#allocation4 + $0x68] sm:$0xff] }
 0xca8   :  { %6138 = vmatpush1.bf16.msra.mxu0 %v5847_v44  ;;  %6343 = vmatpush1.bf16.msra.mxu1 %v5849_v10  ;;  %v5304_v44 = vld [vmem:[#allocation4 + $0x78] sm:$0xff] }
 0xca9   :  { %6139 = vmatprep.subr.bf16.mxu0 %v5857_v0  ;;  %6344 = vmatprep.subr.bf16.mxu1 %v5859_v36  ;;  %v5312_v10 = vld [vmem:[#allocation4 + $0xb8] sm:$0xff]  ;;  %v5314_v0 = vld [vmem:[#allocation4 + $0xc8] sm:$0xff]  ;;  %v5311_v36 = vld [vmem:[#allocation4 + $0xb0] sm:$0xff] }
 0xcac   :  { %6140 = vmatpush1.bf16.msra.mxu0 %v5856_v60  ;;  %6345 = vmatpush1.bf16.msra.mxu1 %v5858_v61  ;;  %v5313_v60 = vld [vmem:[#allocation4 + $0xc0] sm:$0xff] }
 0xcad   :  { %6150 = vmatprep.subr.bf16.mxu0 %v5866_v20  ;;  %6355 = vmatprep.subr.bf16.mxu1 %v5868_v59  ;;  %v5321_v61 = vld [vmem:[#allocation4 + $0x100] sm:$0xff]  ;;  %v5323_v20 = vld [vmem:[#allocation4 + $0x110] sm:$0xff]  ;;  %v5320_v59 = vld [vmem:[#allocation4 + $0xf8] sm:$0xff] }
 0xcaf   :  { %6142 = vmatmul.mubr.bf16.vlgmr.msra.gmra.mrb[44].mxu0 %v9525_v16  ;;  %6347 = vmatmul.mubr.bf16.vlgmr.msra.gmra.mrb[48].mxu1 %v9525_v16 }
 0xcb0   :  { %6151 = vmatpush1.bf16.msra.mxu0 %v5865_v43  ;;  %6356 = vmatpush1.bf16.msra.mxu1 %v5867_v62  ;;  %v5322_v43 = vld [vmem:[#allocation4 + $0x108] sm:$0xff] }
 0xcb1   :  { %6152 = vmatprep.subr.bf16.mxu0 %v5875_v48  ;;  %6357 = vmatprep.subr.bf16.mxu1 %v5877_v42  ;;  %v5330_v62 = vld [vmem:[#allocation4 + $0x148] sm:$0xff]  ;;  %v5332_v48 = vld [vmem:[#allocation4 + $0x158] sm:$0xff]  ;;  %v5329_v42 = vld [vmem:[#allocation4 + $0x140] sm:$0xff] }
 0xcb2   :  { %6182 = vmatprep.mubr.bf16.mxu0 %v9690_v35  ;;  %6387 = vmatprep.mubr.bf16.mxu1 %v9690_v35 }
 0xcb4   :  { %6153 = vmatpush1.bf16.msra.mxu0 %v5874_v18  ;;  %6358 = vmatpush1.bf16.msra.mxu1 %v5876_v21  ;;  %v5331_v18 = vld [vmem:[#allocation4 + $0x150] sm:$0xff] }
 0xcb5   :  { %6154 = vmatprep.subr.bf16.mxu0 %v5884_v25  ;;  %6359 = vmatprep.subr.bf16.mxu1 %v5886_v55  ;;  %v5339_v21 = vld [vmem:[#allocation4 + $0x190] sm:$0xff]  ;;  %v5341_v25 = vld [vmem:[#allocation4 + $0x1a0] sm:$0xff]  ;;  %v5338_v55 = vld [vmem:[#allocation4 + $0x188] sm:$0xff] }
 0xcb8   :  { %6155 = vmatpush1.bf16.msra.mxu0 %v5883_v28  ;;  %6360 = vmatpush1.bf16.msra.mxu1 %v5885_v22  ;;  %v5340_v28 = vld [vmem:[#allocation4 + $0x198] sm:$0xff] }
 0xcb9   :  { %6156 = vmatprep.subr.bf16.mxu0 %v5893_v49  ;;  %6361 = vmatprep.subr.bf16.mxu1 %v5895_v45  ;;  %v5348_v22 = vld [vmem:[#allocation4 + $0x1d8] sm:$0xff]  ;;  %v5350_v49 = vld [vmem:[#allocation4 + $0x1e8] sm:$0xff]  ;;  %v5347_v45 = vld [vmem:[#allocation4 + $0x1d0] sm:$0xff] }
 0xcbc   :  { %6157 = vmatpush1.bf16.msra.mxu0 %v5892_v63  ;;  %6362 = vmatpush1.bf16.msra.mxu1 %v5894_v9  ;;  %v5349_v63 = vld [vmem:[#allocation4 + $0x1e0] sm:$0xff] }
 0xcbd   :  { %6158 = vmatprep.subr.bf16.mxu0 %v5902_v54  ;;  %6363 = vmatprep.subr.bf16.mxu1 %v5904_v23  ;;  %v5357_v9 = vld [vmem:[#allocation4 + $0x220] sm:$0xff]  ;;  %v5359_v54 = vld [vmem:[#allocation4 + $0x230] sm:$0xff]  ;;  %v5356_v23 = vld [vmem:[#allocation4 + $0x218] sm:$0xff] }
 0xcc0   :  { %6159 = vmatpush1.bf16.msra.mxu0 %v5901_v2  ;;  %6364 = vmatpush1.bf16.msra.mxu1 %v5903_v46  ;;  %v5358_v2 = vld [vmem:[#allocation4 + $0x228] sm:$0xff] }
 0xcc1   :  { %6160 = vmatprep.subr.bf16.mxu0 %v5911_v58  ;;  %6365 = vmatprep.subr.bf16.mxu1 %v5913_v13  ;;  %v5366_v46 = vld [vmem:[#allocation4 + $0x268] sm:$0xff]  ;;  %v5368_v58 = vld [vmem:[#allocation4 + $0x278] sm:$0xff]  ;;  %v5365_v13 = vld [vmem:[#allocation4 + $0x260] sm:$0xff] }
 0xcc4   :  { %6161 = vmatpush1.bf16.msra.mxu0 %v5910_v56  ;;  %6366 = vmatpush1.bf16.msra.mxu1 %v5912_v57  ;;  %v5367_v56 = vld [vmem:[#allocation4 + $0x270] sm:$0xff] }
 0xcc5   :  { %6162 = vmatprep.subr.bf16.mxu0 %v5920_v17  ;;  %6367 = vmatprep.subr.bf16.mxu1 %v5922_v52  ;;  %v5375_v57 = vld [vmem:[#allocation4 + $0x2b0] sm:$0xff]  ;;  %v5377_v17 = vld [vmem:[#allocation4 + $0x2c0] sm:$0xff]  ;;  %v5374_v52 = vld [vmem:[#allocation4 + $0x2a8] sm:$0xff] }
 0xcc8   :  { %6163 = vmatpush1.bf16.msra.mxu0 %v5919_v11  ;;  %6368 = vmatpush1.bf16.msra.mxu1 %v5921_v15  ;;  %v5376_v11 = vld [vmem:[#allocation4 + $0x2b8] sm:$0xff] }
 0xcc9   :  { %6164 = vmatprep.subr.bf16.mxu0 %v5929_v6  ;;  %6369 = vmatprep.subr.bf16.mxu1 %v5931_v31  ;;  %v5384_v15 = vld [vmem:[#allocation4 + $0x2f8] sm:$0xff]  ;;  %v5386_v6 = vld [vmem:[#allocation4 + $0x308] sm:$0xff]  ;;  %v5383_v31 = vld [vmem:[#allocation4 + $0x2f0] sm:$0xff] }
 0xccc   :  { %6165 = vmatpush1.bf16.msra.mxu0 %v5928_v33  ;;  %6370 = vmatpush1.bf16.msra.mxu1 %v5930_v41  ;;  %v5385_v33 = vld [vmem:[#allocation4 + $0x300] sm:$0xff] }
 0xccd   :  { %6396 = vmatprep.subr.bf16.mxu0 %v5294_v50  ;;  %6601 = vmatprep.subr.bf16.mxu1 %v5296_v1  ;;  %v5393_v41 = vld [vmem:[#allocation4 + $0x340] sm:$0xff]  ;;  %v5395_v50 = vld [vmem:[#allocation4 + $0x350] sm:$0xff]  ;;  %v5392_v1 = vld [vmem:[#allocation4 + $0x338] sm:$0xff] }
 0xccf   :  { %6183 = vmatmul.mubr.bf16.vlgmr.msra.gmra.mrb[44].mxu0 %v9529_v37  ;;  %6388 = vmatmul.mubr.bf16.vlgmr.msra.gmra.mrb[48].mxu1 %v9529_v37 }
 0xcd0   :  { %6397 = vmatpush1.bf16.msra.mxu0 %v5293_v14  ;;  %6602 = vmatpush1.bf16.msra.mxu1 %v5295_v38  ;;  %v5394_v14 = vld [vmem:[#allocation4 + $0x348] sm:$0xff] }
 0xcd1   :  { %6398 = vmatprep.subr.bf16.mxu0 %v5303_v39  ;;  %6603 = vmatprep.subr.bf16.mxu1 %v5305_v32  ;;  %v5402_v38 = vld [vmem:[#allocation4 + $0x388] sm:$0xff]  ;;  %v5404_v39 = vld [vmem:[#allocation4 + $0x398] sm:$0xff]  ;;  %v5401_v32 = vld [vmem:[#allocation4 + $0x380] sm:$0xff] }
 0xcd2   :  { %6428 = vmatprep.mubr.bf16.mxu0 %v9515_v34  ;;  %6633 = vmatprep.mubr.bf16.mxu1 %v9515_v34 }
 0xcd4   :  { %6399 = vmatpush1.bf16.msra.mxu0 %v5302_v47  ;;  %6604 = vmatpush1.bf16.msra.mxu1 %v5304_v44  ;;  %v5403_v47 = vld [vmem:[#allocation4 + $0x390] sm:$0xff] }
 0xcd5   :  { %6400 = vmatprep.subr.bf16.mxu0 %v5312_v10  ;;  %6605 = vmatprep.subr.bf16.mxu1 %v5314_v0  ;;  %v5411_v44 = vld [vmem:[#allocation4 + $0x3d0] sm:$0xff]  ;;  %v5413_v10 = vld [vmem:[#allocation4 + $0x3e0] sm:$0xff]  ;;  %v5410_v0 = vld [vmem:[#allocation4 + $0x3c8] sm:$0xff] }
 0xcd8   :  { %6401 = vmatpush1.bf16.msra.mxu0 %v5311_v36  ;;  %6606 = vmatpush1.bf16.msra.mxu1 %v5313_v60  ;;  %v5412_v36 = vld [vmem:[#allocation4 + $0x3d8] sm:$0xff] }
 0xcd9   :  { %6402 = vmatprep.subr.bf16.mxu0 %v5321_v61  ;;  %6607 = vmatprep.subr.bf16.mxu1 %v5323_v20  ;;  %v5420_v60 = vld [vmem:[#allocation4 + $0x418] sm:$0xff]  ;;  %v5422_v61 = vld [vmem:[#allocation4 + $0x428] sm:$0xff]  ;;  %v5419_v20 = vld [vmem:[#allocation4 + $0x410] sm:$0xff] }
 0xcdc   :  { %6403 = vmatpush1.bf16.msra.mxu0 %v5320_v59  ;;  %6608 = vmatpush1.bf16.msra.mxu1 %v5322_v43  ;;  %v5421_v59 = vld [vmem:[#allocation4 + $0x420] sm:$0xff] }
 0xcdd   :  { %6404 = vmatprep.subr.bf16.mxu0 %v5330_v62  ;;  %6609 = vmatprep.subr.bf16.mxu1 %v5332_v48  ;;  %v5429_v43 = vld [vmem:[#allocation4 + $0x460] sm:$0xff]  ;;  %v5431_v62 = vld [vmem:[#allocation4 + $0x470] sm:$0xff]  ;;  %v5428_v48 = vld [vmem:[#allocation4 + $0x458] sm:$0xff] }
 0xce0   :  { %6405 = vmatpush1.bf16.msra.mxu0 %v5329_v42  ;;  %6610 = vmatpush1.bf16.msra.mxu1 %v5331_v18  ;;  %v5430_v42 = vld [vmem:[#allocation4 + $0x468] sm:$0xff] }
 0xce1   :  { %6406 = vmatprep.subr.bf16.mxu0 %v5339_v21  ;;  %6611 = vmatprep.subr.bf16.mxu1 %v5341_v25  ;;  %v5438_v18 = vld [vmem:[#allocation4 + $0x4a8] sm:$0xff]  ;;  %v5440_v21 = vld [vmem:[#allocation4 + $0x4b8] sm:$0xff]  ;;  %v5437_v25 = vld [vmem:[#allocation4 + $0x4a0] sm:$0xff] }
 0xce4   :  { %6407 = vmatpush1.bf16.msra.mxu0 %v5338_v55  ;;  %6612 = vmatpush1.bf16.msra.mxu1 %v5340_v28  ;;  %v5439_v55 = vld [vmem:[#allocation4 + $0x4b0] sm:$0xff] }
 0xce5   :  { %6408 = vmatprep.subr.bf16.mxu0 %v5348_v22  ;;  %6613 = vmatprep.subr.bf16.mxu1 %v5350_v49  ;;  %v5447_v28 = vld [vmem:[#allocation4 + $0x4f0] sm:$0xff]  ;;  %v5449_v22 = vld [vmem:[#allocation4 + $0x500] sm:$0xff]  ;;  %v5446_v49 = vld [vmem:[#allocation4 + $0x4e8] sm:$0xff] }
 0xce8   :  { %6409 = vmatpush1.bf16.msra.mxu0 %v5347_v45  ;;  %6614 = vmatpush1.bf16.msra.mxu1 %v5349_v63  ;;  %v5448_v45 = vld [vmem:[#allocation4 + $0x4f8] sm:$0xff] }
 0xce9   :  { %6410 = vmatprep.subr.bf16.mxu0 %v5357_v9  ;;  %6615 = vmatprep.subr.bf16.mxu1 %v5359_v54  ;;  %v5456_v63 = vld [vmem:[#allocation4 + $0x538] sm:$0xff]  ;;  %v5458_v9 = vld [vmem:[#allocation4 + $0x548] sm:$0xff]  ;;  %v5455_v54 = vld [vmem:[#allocation4 + $0x530] sm:$0xff] }
 0xcec   :  { %6411 = vmatpush1.bf16.msra.mxu0 %v5356_v23  ;;  %6616 = vmatpush1.bf16.msra.mxu1 %v5358_v2  ;;  %v5457_v23 = vld [vmem:[#allocation4 + $0x540] sm:$0xff] }
 0xced   :  { %6412 = vmatprep.subr.bf16.mxu0 %v5366_v46  ;;  %6617 = vmatprep.subr.bf16.mxu1 %v5368_v58  ;;  %v5465_v2 = vld [vmem:[#allocation4 + $0x580] sm:$0xff]  ;;  %v5467_v46 = vld [vmem:[#allocation4 + $0x590] sm:$0xff]  ;;  %v5464_v58 = vld [vmem:[#allocation4 + $0x578] sm:$0xff] }
 0xcf0   :  { %6413 = vmatpush1.bf16.msra.mxu0 %v5365_v13  ;;  %6618 = vmatpush1.bf16.msra.mxu1 %v5367_v56  ;;  %v5466_v13 = vld [vmem:[#allocation4 + $0x588] sm:$0xff] }
 0xcf1   :  { %6414 = vmatprep.subr.bf16.mxu0 %v5375_v57  ;;  %6619 = vmatprep.subr.bf16.mxu1 %v5377_v17  ;;  %v5474_v56 = vld [vmem:[#allocation4 + $0x5c8] sm:$0xff]  ;;  %v5476_v57 = vld [vmem:[#allocation4 + $0x5d8] sm:$0xff]  ;;  %v5473_v17 = vld [vmem:[#allocation4 + $0x5c0] sm:$0xff] }
 0xcf4   :  { %6415 = vmatpush1.bf16.msra.mxu0 %v5374_v52  ;;  %6620 = vmatpush1.bf16.msra.mxu1 %v5376_v11  ;;  %v5475_v52 = vld [vmem:[#allocation4 + $0x5d0] sm:$0xff] }
 0xcf5   :  { %6416 = vmatprep.subr.bf16.mxu0 %v5384_v15  ;;  %6621 = vmatprep.subr.bf16.mxu1 %v5386_v6  ;;  %v5483_v11 = vld [vmem:[#allocation4 + $0x610] sm:$0xff]  ;;  %v5485_v15 = vld [vmem:[#allocation4 + $0x620] sm:$0xff]  ;;  %v5482_v6 = vld [vmem:[#allocation4 + $0x608] sm:$0xff] }
 0xcf8   :  { %6417 = vmatpush1.bf16.msra.mxu0 %v5383_v31  ;;  %6622 = vmatpush1.bf16.msra.mxu1 %v5385_v33  ;;  %v5484_v31 = vld [vmem:[#allocation4 + $0x618] sm:$0xff] }
 0xcf9   :  { %6418 = vmatprep.subr.bf16.mxu0 %v5393_v41  ;;  %6623 = vmatprep.subr.bf16.mxu1 %v5395_v50  ;;  %v5492_v33 = vld [vmem:[#allocation4 + $0x658] sm:$0xff]  ;;  %v5494_v41 = vld [vmem:[#allocation4 + $0x668] sm:$0xff]  ;;  %v5491_v50 = vld [vmem:[#allocation4 + $0x650] sm:$0xff] }
 0xcfc   :  { %6419 = vmatpush1.bf16.msra.mxu0 %v5392_v1  ;;  %6624 = vmatpush1.bf16.msra.mxu1 %v5394_v14  ;;  %v5493_v1 = vld [vmem:[#allocation4 + $0x660] sm:$0xff] }
 0xcfd   :  { %6420 = vmatprep.subr.bf16.mxu0 %v5402_v38  ;;  %6625 = vmatprep.subr.bf16.mxu1 %v5404_v39  ;;  %v5501_v14 = vld [vmem:[#allocation4 + $0x6a0] sm:$0xff]  ;;  %v5503_v38 = vld [vmem:[#allocation4 + $0x6b0] sm:$0xff]  ;;  %v5500_v39 = vld [vmem:[#allocation4 + $0x698] sm:$0xff] }
 0xd00   :  { %6421 = vmatpush1.bf16.msra.mxu0 %v5401_v32  ;;  %6626 = vmatpush1.bf16.msra.mxu1 %v5403_v47  ;;  %v5502_v32 = vld [vmem:[#allocation4 + $0x6a8] sm:$0xff] }
 0xd01   :  { %6422 = vmatprep.subr.bf16.mxu0 %v5411_v44  ;;  %6627 = vmatprep.subr.bf16.mxu1 %v5413_v10  ;;  %v5510_v47 = vld [vmem:[#allocation4 + $0x6e8] sm:$0xff]  ;;  %v5512_v44 = vld [vmem:[#allocation4 + $0x6f8] sm:$0xff]  ;;  %v5509_v10 = vld [vmem:[#allocation4 + $0x6e0] sm:$0xff] }
 0xd04   :  { %6423 = vmatpush1.bf16.msra.mxu0 %v5410_v0  ;;  %6628 = vmatpush1.bf16.msra.mxu1 %v5412_v36  ;;  %v5511_v0 = vld [vmem:[#allocation4 + $0x6f0] sm:$0xff] }
 0xd05   :  { %6424 = vmatprep.subr.bf16.mxu0 %v5420_v60  ;;  %6629 = vmatprep.subr.bf16.mxu1 %v5422_v61  ;;  %v5519_v36 = vld [vmem:[#allocation4 + $0x730] sm:$0xff]  ;;  %v5521_v60 = vld [vmem:[#allocation4 + $0x740] sm:$0xff]  ;;  %v5518_v61 = vld [vmem:[#allocation4 + $0x728] sm:$0xff] }
 0xd08   :  { %6425 = vmatpush1.bf16.msra.mxu0 %v5419_v20  ;;  %6630 = vmatpush1.bf16.msra.mxu1 %v5421_v59  ;;  %v5520_v20 = vld [vmem:[#allocation4 + $0x738] sm:$0xff] }
 0xd09   :  { %6426 = vmatprep.subr.bf16.mxu0 %v5429_v43  ;;  %6631 = vmatprep.subr.bf16.mxu1 %v5431_v62  ;;  %v5528_v59 = vld [vmem:[#allocation4 + $0x778] sm:$0xff]  ;;  %v5530_v43 = vld [vmem:[#allocation4 + $0x788] sm:$0xff]  ;;  %v5527_v62 = vld [vmem:[#allocation4 + $0x770] sm:$0xff] }
 0xd0c   :  { %6427 = vmatpush1.bf16.msra.mxu0 %v5428_v48  ;;  %6632 = vmatpush1.bf16.msra.mxu1 %v5430_v42  ;;  %v5529_v48 = vld [vmem:[#allocation4 + $0x780] sm:$0xff] }
 0xd0d   :  { %6437 = vmatprep.subr.bf16.mxu0 %v5438_v18  ;;  %6642 = vmatprep.subr.bf16.mxu1 %v5440_v21  ;;  %v5537_v42 = vld [vmem:[#allocation4 + $0x7c0] sm:$0xff]  ;;  %v5539_v18 = vld [vmem:[#allocation4 + $0x7d0] sm:$0xff]  ;;  %v5536_v21 = vld [vmem:[#allocation4 + $0x7b8] sm:$0xff] }
 0xd0f   :  { %6429 = vmatmul.mubr.bf16.vlgmr.msra.gmra.mrb[48].mxu0 %v9513_v27  ;;  %6634 = vmatmul.mubr.bf16.vlgmr.msra.gmra.mrb[52].mxu1 %v9513_v27 }
 0xd10   :  { %6438 = vmatpush1.bf16.msra.mxu0 %v5437_v25  ;;  %6643 = vmatpush1.bf16.msra.mxu1 %v5439_v55  ;;  %v5538_v25 = vld [vmem:[#allocation4 + $0x7c8] sm:$0xff] }
 0xd11   :  { %6439 = vmatprep.subr.bf16.mxu0 %v5447_v28  ;;  %6644 = vmatprep.subr.bf16.mxu1 %v5449_v22  ;;  %v5546_v55 = vld [vmem:[#allocation4 + $0x808] sm:$0xff]  ;;  %v5548_v28 = vld [vmem:[#allocation4 + $0x818] sm:$0xff]  ;;  %v5545_v22 = vld [vmem:[#allocation4 + $0x800] sm:$0xff] }
 0xd12   :  { %6469 = vmatprep.mubr.bf16.mxu0 %v9519_v40  ;;  %6674 = vmatprep.mubr.bf16.mxu1 %v9519_v40 }
 0xd14   :  { %6440 = vmatpush1.bf16.msra.mxu0 %v5446_v49  ;;  %6645 = vmatpush1.bf16.msra.mxu1 %v5448_v45  ;;  %v5547_v49 = vld [vmem:[#allocation4 + $0x810] sm:$0xff] }
 0xd15   :  { %6441 = vmatprep.subr.bf16.mxu0 %v5456_v63  ;;  %6646 = vmatprep.subr.bf16.mxu1 %v5458_v9  ;;  %v5555_v45 = vld [vmem:[#allocation4 + $0x850] sm:$0xff]  ;;  %v5557_v63 = vld [vmem:[#allocation4 + $0x860] sm:$0xff]  ;;  %v5554_v9 = vld [vmem:[#allocation4 + $0x848] sm:$0xff] }
 0xd18   :  { %6442 = vmatpush1.bf16.msra.mxu0 %v5455_v54  ;;  %6647 = vmatpush1.bf16.msra.mxu1 %v5457_v23  ;;  %v5556_v54 = vld [vmem:[#allocation4 + $0x858] sm:$0xff] }
 0xd19   :  { %6443 = vmatprep.subr.bf16.mxu0 %v5465_v2  ;;  %6648 = vmatprep.subr.bf16.mxu1 %v5467_v46  ;;  %v5564_v23 = vld [vmem:[#allocation4 + $0x898] sm:$0xff]  ;;  %v5566_v2 = vld [vmem:[#allocation4 + $0x8a8] sm:$0xff]  ;;  %v5563_v46 = vld [vmem:[#allocation4 + $0x890] sm:$0xff] }
 0xd1c   :  { %6444 = vmatpush1.bf16.msra.mxu0 %v5464_v58  ;;  %6649 = vmatpush1.bf16.msra.mxu1 %v5466_v13  ;;  %v5565_v58 = vld [vmem:[#allocation4 + $0x8a0] sm:$0xff] }
 0xd1d   :  { %6445 = vmatprep.subr.bf16.mxu0 %v5474_v56  ;;  %6650 = vmatprep.subr.bf16.mxu1 %v5476_v57  ;;  %v5573_v13 = vld [vmem:[#allocation4 + $0x8e0] sm:$0xff]  ;;  %v5575_v56 = vld [vmem:[#allocation4 + $0x8f0] sm:$0xff]  ;;  %v5572_v57 = vld [vmem:[#allocation4 + $0x8d8] sm:$0xff] }
 0xd20   :  { %6446 = vmatpush1.bf16.msra.mxu0 %v5473_v17  ;;  %6651 = vmatpush1.bf16.msra.mxu1 %v5475_v52  ;;  %v5574_v17 = vld [vmem:[#allocation4 + $0x8e8] sm:$0xff] }
 0xd21   :  { %6447 = vmatprep.subr.bf16.mxu0 %v5483_v11  ;;  %6652 = vmatprep.subr.bf16.mxu1 %v5485_v15  ;;  %v5582_v52 = vld [vmem:[#allocation4 + $0x928] sm:$0xff]  ;;  %v5584_v11 = vld [vmem:[#allocation4 + $0x938] sm:$0xff]  ;;  %v5581_v15 = vld [vmem:[#allocation4 + $0x920] sm:$0xff] }
 0xd24   :  { %6448 = vmatpush1.bf16.msra.mxu0 %v5482_v6  ;;  %6653 = vmatpush1.bf16.msra.mxu1 %v5484_v31  ;;  %v5583_v6 = vld [vmem:[#allocation4 + $0x930] sm:$0xff] }
 0xd25   :  { %6449 = vmatprep.subr.bf16.mxu0 %v5492_v33  ;;  %6654 = vmatprep.subr.bf16.mxu1 %v5494_v41  ;;  %v5591_v31 = vld [vmem:[#allocation4 + $0x970] sm:$0xff]  ;;  %v5593_v33 = vld [vmem:[#allocation4 + $0x980] sm:$0xff]  ;;  %v5590_v41 = vld [vmem:[#allocation4 + $0x968] sm:$0xff] }
 0xd28   :  { %6450 = vmatpush1.bf16.msra.mxu0 %v5491_v50  ;;  %6655 = vmatpush1.bf16.msra.mxu1 %v5493_v1  ;;  %v5592_v50 = vld [vmem:[#allocation4 + $0x978] sm:$0xff] }
 0xd29   :  { %6451 = vmatprep.subr.bf16.mxu0 %v5501_v14  ;;  %6656 = vmatprep.subr.bf16.mxu1 %v5503_v38  ;;  %v5600_v1 = vld [vmem:[#allocation4 + $0x9b8] sm:$0xff]  ;;  %v5602_v14 = vld [vmem:[#allocation4 + $0x9c8] sm:$0xff]  ;;  %v5599_v38 = vld [vmem:[#allocation4 + $0x9b0] sm:$0xff] }
 0xd2c   :  { %6452 = vmatpush1.bf16.msra.mxu0 %v5500_v39  ;;  %6657 = vmatpush1.bf16.msra.mxu1 %v5502_v32  ;;  %v5601_v39 = vld [vmem:[#allocation4 + $0x9c0] sm:$0xff] }
 0xd2d   :  { %6453 = vmatprep.subr.bf16.mxu0 %v5510_v47  ;;  %6658 = vmatprep.subr.bf16.mxu1 %v5512_v44  ;;  %v5609_v32 = vld [vmem:[#allocation4 + $0xa00] sm:$0xff]  ;;  %v5611_v47 = vld [vmem:[#allocation4 + $0xa10] sm:$0xff]  ;;  %v5608_v44 = vld [vmem:[#allocation4 + $0x9f8] sm:$0xff] }
 0xd30   :  { %6454 = vmatpush1.bf16.msra.mxu0 %v5509_v10  ;;  %6659 = vmatpush1.bf16.msra.mxu1 %v5511_v0  ;;  %v5610_v10 = vld [vmem:[#allocation4 + $0xa08] sm:$0xff] }
 0xd31   :  { %6455 = vmatprep.subr.bf16.mxu0 %v5519_v36  ;;  %6660 = vmatprep.subr.bf16.mxu1 %v5521_v60  ;;  %v5618_v0 = vld [vmem:[#allocation4 + $0xa48] sm:$0xff]  ;;  %v5620_v36 = vld [vmem:[#allocation4 + $0xa58] sm:$0xff]  ;;  %v5617_v60 = vld [vmem:[#allocation4 + $0xa40] sm:$0xff] }
 0xd34   :  { %6456 = vmatpush1.bf16.msra.mxu0 %v5518_v61  ;;  %6661 = vmatpush1.bf16.msra.mxu1 %v5520_v20  ;;  %v5619_v61 = vld [vmem:[#allocation4 + $0xa50] sm:$0xff] }
 0xd35   :  { %6457 = vmatprep.subr.bf16.mxu0 %v5528_v59  ;;  %6662 = vmatprep.subr.bf16.mxu1 %v5530_v43  ;;  %v5627_v20 = vld [vmem:[#allocation4 + $0xa90] sm:$0xff]  ;;  %v5629_v59 = vld [vmem:[#allocation4 + $0xaa0] sm:$0xff]  ;;  %v5626_v43 = vld [vmem:[#allocation4 + $0xa88] sm:$0xff] }
 0xd38   :  { %6458 = vmatpush1.bf16.msra.mxu0 %v5527_v62  ;;  %6663 = vmatpush1.bf16.msra.mxu1 %v5529_v48  ;;  %v5628_v62 = vld [vmem:[#allocation4 + $0xa98] sm:$0xff] }
 0xd39   :  { %6459 = vmatprep.subr.bf16.mxu0 %v5537_v42  ;;  %6664 = vmatprep.subr.bf16.mxu1 %v5539_v18  ;;  %v5636_v48 = vld [vmem:[#allocation4 + $0xad8] sm:$0xff]  ;;  %v5638_v42 = vld [vmem:[#allocation4 + $0xae8] sm:$0xff]  ;;  %v5635_v18 = vld [vmem:[#allocation4 + $0xad0] sm:$0xff] }
 0xd3c   :  { %6460 = vmatpush1.bf16.msra.mxu0 %v5536_v21  ;;  %6665 = vmatpush1.bf16.msra.mxu1 %v5538_v25  ;;  %v5637_v21 = vld [vmem:[#allocation4 + $0xae0] sm:$0xff] }
 0xd3d   :  { %6461 = vmatprep.subr.bf16.mxu0 %v5546_v55  ;;  %6666 = vmatprep.subr.bf16.mxu1 %v5548_v28  ;;  %v5645_v25 = vld [vmem:[#allocation4 + $0xb20] sm:$0xff]  ;;  %v5647_v55 = vld [vmem:[#allocation4 + $0xb30] sm:$0xff]  ;;  %v5644_v28 = vld [vmem:[#allocation4 + $0xb18] sm:$0xff] }
 0xd40   :  { %6462 = vmatpush1.bf16.msra.mxu0 %v5545_v22  ;;  %6667 = vmatpush1.bf16.msra.mxu1 %v5547_v49  ;;  %v5646_v22 = vld [vmem:[#allocation4 + $0xb28] sm:$0xff] }
 0xd41   :  { %6463 = vmatprep.subr.bf16.mxu0 %v5555_v45  ;;  %6668 = vmatprep.subr.bf16.mxu1 %v5557_v63  ;;  %v5654_v49 = vld [vmem:[#allocation4 + $0xb68] sm:$0xff]  ;;  %v5656_v45 = vld [vmem:[#allocation4 + $0xb78] sm:$0xff]  ;;  %v5653_v63 = vld [vmem:[#allocation4 + $0xb60] sm:$0xff] }
 0xd44   :  { %6464 = vmatpush1.bf16.msra.mxu0 %v5554_v9  ;;  %6669 = vmatpush1.bf16.msra.mxu1 %v5556_v54  ;;  %v5655_v9 = vld [vmem:[#allocation4 + $0xb70] sm:$0xff] }
 0xd45   :  { %6465 = vmatprep.subr.bf16.mxu0 %v5564_v23  ;;  %6670 = vmatprep.subr.bf16.mxu1 %v5566_v2  ;;  %v5663_v54 = vld [vmem:[#allocation4 + $0xbb0] sm:$0xff]  ;;  %v5665_v23 = vld [vmem:[#allocation4 + $0xbc0] sm:$0xff]  ;;  %v5662_v2 = vld [vmem:[#allocation4 + $0xba8] sm:$0xff] }
 0xd48   :  { %6466 = vmatpush1.bf16.msra.mxu0 %v5563_v46  ;;  %6671 = vmatpush1.bf16.msra.mxu1 %v5565_v58  ;;  %v5664_v46 = vld [vmem:[#allocation4 + $0xbb8] sm:$0xff] }
 0xd49   :  { %6467 = vmatprep.subr.bf16.mxu0 %v5573_v13  ;;  %6672 = vmatprep.subr.bf16.mxu1 %v5575_v56  ;;  %v5672_v58 = vld [vmem:[#allocation4 + $0xbf8] sm:$0xff]  ;;  %v5674_v13 = vld [vmem:[#allocation4 + $0xc08] sm:$0xff]  ;;  %v5671_v56 = vld [vmem:[#allocation4 + $0xbf0] sm:$0xff] }
 0xd4c   :  { %6468 = vmatpush1.bf16.msra.mxu0 %v5572_v57  ;;  %6673 = vmatpush1.bf16.msra.mxu1 %v5574_v17  ;;  %v5673_v57 = vld [vmem:[#allocation4 + $0xc00] sm:$0xff] }
 0xd4d   :  { %6478 = vmatprep.subr.bf16.mxu0 %v5582_v52  ;;  %6683 = vmatprep.subr.bf16.mxu1 %v5584_v11  ;;  %v5681_v17 = vld [vmem:[#allocation4 + $0xc40] sm:$0xff]  ;;  %v5683_v52 = vld [vmem:[#allocation4 + $0xc50] sm:$0xff]  ;;  %v5680_v11 = vld [vmem:[#allocation4 + $0xc38] sm:$0xff] }
 0xd4f   :  { %6470 = vmatmul.mubr.bf16.vlgmr.msra.gmra.mrb[48].mxu0 %v9517_v24  ;;  %6675 = vmatmul.mubr.bf16.vlgmr.msra.gmra.mrb[52].mxu1 %v9517_v24 }
 0xd50   :  { %6479 = vmatpush1.bf16.msra.mxu0 %v5581_v15  ;;  %6684 = vmatpush1.bf16.msra.mxu1 %v5583_v6  ;;  %v5682_v15 = vld [vmem:[#allocation4 + $0xc48] sm:$0xff] }
 0xd51   :  { %6480 = vmatprep.subr.bf16.mxu0 %v5591_v31  ;;  %6685 = vmatprep.subr.bf16.mxu1 %v5593_v33  ;;  %v5690_v6 = vld [vmem:[#allocation4 + $0xc88] sm:$0xff]  ;;  %v5692_v31 = vld [vmem:[#allocation4 + $0xc98] sm:$0xff]  ;;  %v5689_v33 = vld [vmem:[#allocation4 + $0xc80] sm:$0xff] }
 0xd52   :  { %6510 = vmatprep.mubr.bf16.mxu0 %v9523_v4  ;;  %6715 = vmatprep.mubr.bf16.mxu1 %v9523_v4 }
 0xd54   :  { %6481 = vmatpush1.bf16.msra.mxu0 %v5590_v41  ;;  %6686 = vmatpush1.bf16.msra.mxu1 %v5592_v50  ;;  %v5691_v41 = vld [vmem:[#allocation4 + $0xc90] sm:$0xff] }
 0xd55   :  { %6482 = vmatprep.subr.bf16.mxu0 %v5600_v1  ;;  %6687 = vmatprep.subr.bf16.mxu1 %v5602_v14  ;;  %v5699_v50 = vld [vmem:[#allocation4 + $0xcd0] sm:$0xff]  ;;  %v5701_v1 = vld [vmem:[#allocation4 + $0xce0] sm:$0xff]  ;;  %v5698_v14 = vld [vmem:[#allocation4 + $0xcc8] sm:$0xff] }
 0xd58   :  { %6483 = vmatpush1.bf16.msra.mxu0 %v5599_v38  ;;  %6688 = vmatpush1.bf16.msra.mxu1 %v5601_v39  ;;  %v5700_v38 = vld [vmem:[#allocation4 + $0xcd8] sm:$0xff] }
 0xd59   :  { %6484 = vmatprep.subr.bf16.mxu0 %v5609_v32  ;;  %6689 = vmatprep.subr.bf16.mxu1 %v5611_v47  ;;  %v5708_v39 = vld [vmem:[#allocation4 + $0xd18] sm:$0xff]  ;;  %v5710_v32 = vld [vmem:[#allocation4 + $0xd28] sm:$0xff]  ;;  %v5707_v47 = vld [vmem:[#allocation4 + $0xd10] sm:$0xff] }
 0xd5c   :  { %6485 = vmatpush1.bf16.msra.mxu0 %v5608_v44  ;;  %6690 = vmatpush1.bf16.msra.mxu1 %v5610_v10  ;;  %v5709_v44 = vld [vmem:[#allocation4 + $0xd20] sm:$0xff] }
 0xd5d   :  { %6486 = vmatprep.subr.bf16.mxu0 %v5618_v0  ;;  %6691 = vmatprep.subr.bf16.mxu1 %v5620_v36  ;;  %v5717_v10 = vld [vmem:[#allocation4 + $0xd60] sm:$0xff]  ;;  %v5719_v0 = vld [vmem:[#allocation4 + $0xd70] sm:$0xff]  ;;  %v5716_v36 = vld [vmem:[#allocation4 + $0xd58] sm:$0xff] }
 0xd60   :  { %6487 = vmatpush1.bf16.msra.mxu0 %v5617_v60  ;;  %6692 = vmatpush1.bf16.msra.mxu1 %v5619_v61  ;;  %v5718_v60 = vld [vmem:[#allocation4 + $0xd68] sm:$0xff] }
 0xd61   :  { %6488 = vmatprep.subr.bf16.mxu0 %v5627_v20  ;;  %6693 = vmatprep.subr.bf16.mxu1 %v5629_v59  ;;  %v5726_v61 = vld [vmem:[#allocation4 + $0xda8] sm:$0xff]  ;;  %v5728_v20 = vld [vmem:[#allocation4 + $0xdb8] sm:$0xff]  ;;  %v5725_v59 = vld [vmem:[#allocation4 + $0xda0] sm:$0xff] }
 0xd64   :  { %6489 = vmatpush1.bf16.msra.mxu0 %v5626_v43  ;;  %6694 = vmatpush1.bf16.msra.mxu1 %v5628_v62  ;;  %v5727_v43 = vld [vmem:[#allocation4 + $0xdb0] sm:$0xff] }
 0xd65   :  { %6490 = vmatprep.subr.bf16.mxu0 %v5636_v48  ;;  %6695 = vmatprep.subr.bf16.mxu1 %v5638_v42  ;;  %v5735_v62 = vld [vmem:[#allocation4 + $0xdf0] sm:$0xff]  ;;  %v5737_v48 = vld [vmem:[#allocation4 + $0xe00] sm:$0xff]  ;;  %v5734_v42 = vld [vmem:[#allocation4 + $0xde8] sm:$0xff] }
 0xd68   :  { %6491 = vmatpush1.bf16.msra.mxu0 %v5635_v18  ;;  %6696 = vmatpush1.bf16.msra.mxu1 %v5637_v21  ;;  %v5736_v18 = vld [vmem:[#allocation4 + $0xdf8] sm:$0xff] }
 0xd69   :  { %6492 = vmatprep.subr.bf16.mxu0 %v5645_v25  ;;  %6697 = vmatprep.subr.bf16.mxu1 %v5647_v55  ;;  %v5744_v21 = vld [vmem:[#allocation4 + $0xe38] sm:$0xff]  ;;  %v5746_v25 = vld [vmem:[#allocation4 + $0xe48] sm:$0xff]  ;;  %v5743_v55 = vld [vmem:[#allocation4 + $0xe30] sm:$0xff] }
 0xd6c   :  { %6493 = vmatpush1.bf16.msra.mxu0 %v5644_v28  ;;  %6698 = vmatpush1.bf16.msra.mxu1 %v5646_v22  ;;  %v5745_v28 = vld [vmem:[#allocation4 + $0xe40] sm:$0xff] }
 0xd6d   :  { %6494 = vmatprep.subr.bf16.mxu0 %v5654_v49  ;;  %6699 = vmatprep.subr.bf16.mxu1 %v5656_v45  ;;  %v5753_v22 = vld [vmem:[#allocation4 + $0xe80] sm:$0xff]  ;;  %v5755_v49 = vld [vmem:[#allocation4 + $0xe90] sm:$0xff]  ;;  %v5752_v45 = vld [vmem:[#allocation4 + $0xe78] sm:$0xff] }
 0xd70   :  { %6495 = vmatpush1.bf16.msra.mxu0 %v5653_v63  ;;  %6700 = vmatpush1.bf16.msra.mxu1 %v5655_v9  ;;  %v5754_v63 = vld [vmem:[#allocation4 + $0xe88] sm:$0xff] }
 0xd71   :  { %6496 = vmatprep.subr.bf16.mxu0 %v5663_v54  ;;  %6701 = vmatprep.subr.bf16.mxu1 %v5665_v23  ;;  %v5762_v9 = vld [vmem:[#allocation4 + $0xec8] sm:$0xff]  ;;  %v5764_v54 = vld [vmem:[#allocation4 + $0xed8] sm:$0xff] }
 0xd72   :  { %v9565_v23 = vld [vmem:[#allocation25] sm:$0xff] }
 0xd74   :  { %6497 = vmatpush1.bf16.msra.mxu0 %v5662_v2  ;;  %6702 = vmatpush1.bf16.msra.mxu1 %v5664_v46  ;;  %v5761_v2 = vld [vmem:[#allocation4 + $0xec0] sm:$0xff]  ;;  %v5763_v46 = vld [vmem:[#allocation4 + $0xed0] sm:$0xff] }
 0xd75   :  { %6498 = vmatprep.subr.bf16.mxu0 %v5672_v58  ;;  %6703 = vmatprep.subr.bf16.mxu1 %v5674_v13  ;;  %v5771_v58 = vld [vmem:[#allocation4 + $0xf10] sm:$0xff]  ;;  %v5773_v13 = vld [vmem:[#allocation4 + $0xf20] sm:$0xff] }
 0xd78   :  { %6499 = vmatpush1.bf16.msra.mxu0 %v5671_v56  ;;  %6704 = vmatpush1.bf16.msra.mxu1 %v5673_v57  ;;  %v5944_v56 = vrot.slane %v9565_v23, %v9100_v3  ;;  %v5952_v57 = vrot.slane %v9565_v23, %v9106_v7 }
 0xd79   :  { %6500 = vmatprep.subr.bf16.mxu0 %v5681_v17  ;;  %6705 = vmatprep.subr.bf16.mxu1 %v5683_v52  ;;  %v5948_v17 = vrot.slane %v9565_v23, %v9102_v51  ;;  %v5956_v52 = vrot.slane %v9565_v23, %v9108_v8 }
 0xd7c   :  { %6501 = vmatpush1.bf16.msra.mxu0 %v5680_v11  ;;  %6706 = vmatpush1.bf16.msra.mxu1 %v5682_v15  ;;  %v5770_v11 = vld [vmem:[#allocation4 + $0xf08] sm:$0xff]  ;;  %v5772_v15 = vld [vmem:[#allocation4 + $0xf18] sm:$0xff] }
 0xd7d   :  { %6502 = vmatprep.subr.bf16.mxu0 %v5690_v6  ;;  %6707 = vmatprep.subr.bf16.mxu1 %v5692_v31 }
 0xd80   :  { %6503 = vmatpush1.bf16.msra.mxu0 %v5689_v33  ;;  %6708 = vmatpush1.bf16.msra.mxu1 %v5691_v41  ;;  %v5780_v33 = vld [vmem:[#allocation4 + $0xf58] sm:$0xff]  ;;  %v5782_v41 = vld [vmem:[#allocation4 + $0xf68] sm:$0xff] }
 0xd81   :  { %6504 = vmatprep.subr.bf16.mxu0 %v5699_v50  ;;  %6709 = vmatprep.subr.bf16.mxu1 %v5701_v1 }
 0xd84   :  { %6505 = vmatpush1.bf16.msra.mxu0 %v5698_v14  ;;  %6710 = vmatpush1.bf16.msra.mxu1 %v5700_v38 }
 0xd85   :  { %6506 = vmatprep.subr.bf16.mxu0 %v5708_v39  ;;  %6711 = vmatprep.subr.bf16.mxu1 %v5710_v32 }
 0xd88   :  { %6507 = vmatpush1.bf16.msra.mxu0 %v5707_v47  ;;  %6712 = vmatpush1.bf16.msra.mxu1 %v5709_v44 }
 0xd89   :  { %6508 = vmatprep.subr.bf16.mxu0 %v5717_v10  ;;  %6713 = vmatprep.subr.bf16.mxu1 %v5719_v0  ;;  %v5779_v10 = vld [vmem:[#allocation4 + $0xf50] sm:$0xff]  ;;  %v5781_v0 = vld [vmem:[#allocation4 + $0xf60] sm:$0xff] }
 0xd8c   :  { %6509 = vmatpush1.bf16.msra.mxu0 %v5716_v36  ;;  %6714 = vmatpush1.bf16.msra.mxu1 %v5718_v60 }
 0xd8d   :  { %6519 = vmatprep.subr.bf16.mxu0 %v5726_v61  ;;  %6724 = vmatprep.subr.bf16.mxu1 %v5728_v20  ;;  %v5789_v61 = vld [vmem:[#allocation4 + $0xfa0] sm:$0xff]  ;;  %v5791_v20 = vld [vmem:[#allocation4 + $0xfb0] sm:$0xff] }
 0xd8f   :  { %6511 = vmatmul.mubr.bf16.vlgmr.msra.gmra.mrb[48].mxu0 %v9521_v29  ;;  %6716 = vmatmul.mubr.bf16.vlgmr.msra.gmra.mrb[52].mxu1 %v9521_v29 }
 0xd90   :  { %6520 = vmatpush1.bf16.msra.mxu0 %v5725_v59  ;;  %6725 = vmatpush1.bf16.msra.mxu1 %v5727_v43 }
 0xd91   :  { %6521 = vmatprep.subr.bf16.mxu0 %v5735_v62  ;;  %6726 = vmatprep.subr.bf16.mxu1 %v5737_v48 }
 0xd92   :  { %6551 = vmatprep.mubr.bf16.mxu0 %v9527_v53  ;;  %6756 = vmatprep.mubr.bf16.mxu1 %v9527_v53 }
 0xd94   :  { %6522 = vmatpush1.bf16.msra.mxu0 %v5734_v42  ;;  %6727 = vmatpush1.bf16.msra.mxu1 %v5736_v18  ;;  %v5788_v42 = vld [vmem:[#allocation4 + $0xf98] sm:$0xff]  ;;  %v5790_v18 = vld [vmem:[#allocation4 + $0xfa8] sm:$0xff] }
 0xd95   :  { %6523 = vmatprep.subr.bf16.mxu0 %v5744_v21  ;;  %6728 = vmatprep.subr.bf16.mxu1 %v5746_v25  ;;  %v5798_v21 = vld [vmem:[#allocation4 + $0xfe8] sm:$0xff]  ;;  %v5800_v25 = vld [vmem:[#allocation4 + $0xff8] sm:$0xff] }
 0xd98   :  { %6524 = vmatpush1.bf16.msra.mxu0 %v5743_v55  ;;  %6729 = vmatpush1.bf16.msra.mxu1 %v5745_v28  ;;  %v5797_v55 = vld [vmem:[#allocation4 + $0xfe0] sm:$0xff]  ;;  %v5799_v28 = vld [vmem:[#allocation4 + $0xff0] sm:$0xff] }
 0xd99   :  { %6525 = vmatprep.subr.bf16.mxu0 %v5753_v22  ;;  %6730 = vmatprep.subr.bf16.mxu1 %v5755_v49  ;;  %v5807_v22 = vld [vmem:[#allocation4 + $0x1030] sm:$0xff]  ;;  %v5809_v49 = vld [vmem:[#allocation4 + $0x1040] sm:$0xff] }
 0xd9c   :  { %6526 = vmatpush1.bf16.msra.mxu0 %v5752_v45  ;;  %6731 = vmatpush1.bf16.msra.mxu1 %v5754_v63  ;;  %v5806_v45 = vld [vmem:[#allocation4 + $0x1028] sm:$0xff]  ;;  %v5808_v63 = vld [vmem:[#allocation4 + $0x1038] sm:$0xff] }
 0xd9d   :  { %6527 = vmatprep.subr.bf16.mxu0 %v5762_v9  ;;  %6732 = vmatprep.subr.bf16.mxu1 %v5764_v54  ;;  %v5816_v9 = vld [vmem:[#allocation4 + $0x1078] sm:$0xff]  ;;  %v5818_v54 = vld [vmem:[#allocation4 + $0x1088] sm:$0xff] }
 0xda0   :  { %6528 = vmatpush1.bf16.msra.mxu0 %v5761_v2  ;;  %6733 = vmatpush1.bf16.msra.mxu1 %v5763_v46  ;;  %v5815_v2 = vld [vmem:[#allocation4 + $0x1070] sm:$0xff]  ;;  %v5817_v46 = vld [vmem:[#allocation4 + $0x1080] sm:$0xff] }
 0xda1   :  { %6529 = vmatprep.subr.bf16.mxu0 %v5771_v58  ;;  %6734 = vmatprep.subr.bf16.mxu1 %v5773_v13  ;;  %v5825_v58 = vld [vmem:[#allocation4 + $0x10c0] sm:$0xff]  ;;  %v5827_v13 = vld [vmem:[#allocation4 + $0x10d0] sm:$0xff] }
 0xda2   :  { %v6184_v6 = vpop.f32.mrb[44].mxu0  ;;  %v6389_v31 = vpop.f32.mrb[48].mxu1 }
 0xda3   :  { %v7980_v3 = vadd.f32 %v6184_v6, %v5944_v56  ;;  %v7982_v50 = vadd.f32 %v6389_v31, %v5952_v57  ;;  %v6186_v1 = vpop.f32.mrb[45].mxu0  ;;  %v6391_v7 = vpop.f32.mrb[49].mxu1  ;;  %v5824_v56 = vld [vmem:[#allocation4 + $0x10b8] sm:$0xff]  ;;  %v5826_v57 = vld [vmem:[#allocation4 + $0x10c8] sm:$0xff]  ;;  %v5843_v6 = vld [vmem:[#allocation4 + $0x1150] sm:$0xff] }
 0xda4   :  { %v7981_v14 = vadd.f32 %v6186_v1, %v5948_v17  ;;  %v7983_v38 = vadd.f32 %v6391_v7, %v5956_v52  ;;  %v6188_v39 = vpop.f32.mrb[46].mxu0  ;;  %v6393_v32 = vpop.f32.mrb[50].mxu1  ;;  %6530 = vmatpush1.bf16.msra.mxu0 %v5770_v11  ;;  %6735 = vmatpush1.bf16.msra.mxu1 %v5772_v15  ;;  %v5834_v17 = vld [vmem:[#allocation4 + $0x1108] sm:$0xff]  ;;  %v5836_v52 = vld [vmem:[#allocation4 + $0x1118] sm:$0xff]  ;;  %v5833_v11 = vld [vmem:[#allocation4 + $0x1100] sm:$0xff] }
 0xda5   :  { %v7006_v51 = vmax.f32 %v7980_v3, 0.0  ;;  %v7008_v8 = vmax.f32 %v7982_v50, 0.0  ;;  %v6189_v47 = vpop.f32.mrb[47].mxu0  ;;  %v6394_v44 = vpop.f32.mrb[51].mxu1  ;;  %6531 = vmatprep.subr.bf16.mxu0 %v5780_v33  ;;  %6736 = vmatprep.subr.bf16.mxu1 %v5782_v41  ;;  %v5835_v15 = vld [vmem:[#allocation4 + $0x1110] sm:$0xff]  ;;  %v5845_v31 = vld [vmem:[#allocation4 + $0x1160] sm:$0xff] }
 0xda6   :  { %v7007_v36 = vmax.f32 %v7981_v14, 0.0  ;;  %v7009_v60 = vmax.f32 %v7983_v38, 0.0  ;;  %v5842_v33 = vld [vmem:[#allocation4 + $0x1148] sm:$0xff]  ;;  %v5844_v41 = vld [vmem:[#allocation4 + $0x1158] sm:$0xff]  ;;  %v5851_v1 = vld [vmem:[#allocation4 + $0x1190] sm:$0xff] }
 0xda7   :  { %v9575_v59 = vpack.c.bf16 %v7006_v51, %v7006_v51  ;;  %v9577_v43 = vpack.c.bf16 %v7008_v8, %v7008_v8  ;;  %v5852_v3 = vld [vmem:[#allocation4 + $0x1198] sm:$0xff]  ;;  %v5854_v50 = vld [vmem:[#allocation4 + $0x11a8] sm:$0xff]  ;;  %v5853_v7 = vld [vmem:[#allocation4 + $0x11a0] sm:$0xff] }
 0xda8   :  { %v9579_v62 = vpack.c.bf16 %v7007_v36, %v7007_v36  ;;  %v9581_v48 = vpack.c.bf16 %v7009_v60, %v7009_v60  ;;  %6532 = vmatpush1.bf16.msra.mxu0 %v5779_v10  ;;  %6737 = vmatpush1.bf16.msra.mxu1 %v5781_v0  ;;  %v5861_v14 = vld [vmem:[#allocation4 + $0x11e0] sm:$0xff]  ;;  %v5863_v38 = vld [vmem:[#allocation4 + $0x11f0] sm:$0xff]  ;;  %v5860_v39 = vld [vmem:[#allocation4 + $0x11d8] sm:$0xff] }
 0xda9   :  { %6533 = vmatprep.subr.bf16.mxu0 %v5789_v61  ;;  %6738 = vmatprep.subr.bf16.mxu1 %v5791_v20  ;;  %v5862_v32 = vld [vmem:[#allocation4 + $0x11e8] sm:$0xff]  ;;  %v5872_v8 = vld [vmem:[#allocation4 + $0x1238] sm:$0xff]  ;;  %v5869_v47 = vld [vmem:[#allocation4 + $0x1220] sm:$0xff] }
 0xdaa   :  { %v5870_v51 = vld [vmem:[#allocation4 + $0x1228] sm:$0xff]  ;;  %v5871_v44 = vld [vmem:[#allocation4 + $0x1230] sm:$0xff]  ;;  %v5881_v0 = vld [vmem:[#allocation4 + $0x1280] sm:$0xff] }
 0xdab   :  { %v5879_v10 = vld [vmem:[#allocation4 + $0x1270] sm:$0xff]  ;;  %v5878_v36 = vld [vmem:[#allocation4 + $0x1268] sm:$0xff]  ;;  %v5880_v60 = vld [vmem:[#allocation4 + $0x1278] sm:$0xff] }
 0xdac   :  { %6534 = vmatpush1.bf16.msra.mxu0 %v5788_v42  ;;  %6739 = vmatpush1.bf16.msra.mxu1 %v5790_v18  ;;  %v5888_v61 = vld [vmem:[#allocation4 + $0x12b8] sm:$0xff]  ;;  %v5890_v20 = vld [vmem:[#allocation4 + $0x12c8] sm:$0xff]  ;;  %v5887_v42 = vld [vmem:[#allocation4 + $0x12b0] sm:$0xff] }
 0xdad   :  { %6535 = vmatprep.subr.bf16.mxu0 %v5798_v21  ;;  %6740 = vmatprep.subr.bf16.mxu1 %v5800_v25  ;;  %v5889_v18 = vld [vmem:[#allocation4 + $0x12c0] sm:$0xff]  ;;  %v5899_v25 = vld [vmem:[#allocation4 + $0x1310] sm:$0xff] }
 0xdae   :  { %v5897_v21 = vld [vmem:[#allocation4 + $0x1300] sm:$0xff] }
 0xdb0   :  { %6536 = vmatpush1.bf16.msra.mxu0 %v5797_v55  ;;  %6741 = vmatpush1.bf16.msra.mxu1 %v5799_v28  ;;  %v5896_v55 = vld [vmem:[#allocation4 + $0x12f8] sm:$0xff]  ;;  %v5898_v28 = vld [vmem:[#allocation4 + $0x1308] sm:$0xff] }
 0xdb1   :  { %6537 = vmatprep.subr.bf16.mxu0 %v5807_v22  ;;  %6742 = vmatprep.subr.bf16.mxu1 %v5809_v49  ;;  %v5906_v22 = vld [vmem:[#allocation4 + $0x1348] sm:$0xff]  ;;  %v5908_v49 = vld [vmem:[#allocation4 + $0x1358] sm:$0xff] }
 0xdb4   :  { %6538 = vmatpush1.bf16.msra.mxu0 %v5806_v45  ;;  %6743 = vmatpush1.bf16.msra.mxu1 %v5808_v63  ;;  %v5907_v45 = vld [vmem:[#allocation4 + $0x1350] sm:$0xff] }
 0xdb5   :  { %6539 = vmatprep.subr.bf16.mxu0 %v5816_v9  ;;  %6744 = vmatprep.subr.bf16.mxu1 %v5818_v54  ;;  %v5915_v63 = vld [vmem:[#allocation4 + $0x1390] sm:$0xff]  ;;  %v5917_v9 = vld [vmem:[#allocation4 + $0x13a0] sm:$0xff]  ;;  %v5914_v54 = vld [vmem:[#allocation4 + $0x1388] sm:$0xff] }
 0xdb8   :  { %6540 = vmatpush1.bf16.msra.mxu0 %v5815_v2  ;;  %6745 = vmatpush1.bf16.msra.mxu1 %v5817_v46  ;;  %v5916_v2 = vld [vmem:[#allocation4 + $0x1398] sm:$0xff] }
 0xdb9   :  { %6541 = vmatprep.subr.bf16.mxu0 %v5825_v58  ;;  %6746 = vmatprep.subr.bf16.mxu1 %v5827_v13  ;;  %v5924_v46 = vld [vmem:[#allocation4 + $0x13d8] sm:$0xff]  ;;  %v5926_v58 = vld [vmem:[#allocation4 + $0x13e8] sm:$0xff]  ;;  %v5923_v13 = vld [vmem:[#allocation4 + $0x13d0] sm:$0xff] }
 0xdbc   :  { %6542 = vmatpush1.bf16.msra.mxu0 %v5824_v56  ;;  %6747 = vmatpush1.bf16.msra.mxu1 %v5826_v57  ;;  %v5925_v56 = vld [vmem:[#allocation4 + $0x13e0] sm:$0xff] }
 0xdbd   :  { %6543 = vmatprep.subr.bf16.mxu0 %v5834_v17  ;;  %6748 = vmatprep.subr.bf16.mxu1 %v5836_v52  ;;  %v5933_v57 = vld [vmem:[#allocation4 + $0x1420] sm:$0xff]  ;;  %v5935_v17 = vld [vmem:[#allocation4 + $0x1430] sm:$0xff]  ;;  %v5932_v52 = vld [vmem:[#allocation4 + $0x1418] sm:$0xff] }
 0xdc0   :  { %6544 = vmatpush1.bf16.msra.mxu0 %v5833_v11  ;;  %6749 = vmatpush1.bf16.msra.mxu1 %v5835_v15  ;;  %v5934_v11 = vld [vmem:[#allocation4 + $0x1428] sm:$0xff]  ;;  %v5369_v15 = vld [vmem:[#allocation4 + $0x280] sm:$0xff] }
 0xdc1   :  { %6545 = vmatprep.subr.bf16.mxu0 %v5843_v6  ;;  %6750 = vmatprep.subr.bf16.mxu1 %v5845_v31  ;;  %v5513_v6 = vld [vmem:[#allocation4 + $0x700] sm:$0xff] }
 0xdc2   :  { %v5297_v31 = vld [vmem:[#allocation4 + $0x40] sm:$0xff] }
 0xdc4   :  { %6546 = vmatpush1.bf16.msra.mxu0 %v5842_v33  ;;  %6751 = vmatpush1.bf16.msra.mxu1 %v5844_v41  ;;  %v5441_v33 = vld [vmem:[#allocation4 + $0x4c0] sm:$0xff]  ;;  %v5378_v41 = vld [vmem:[#allocation4 + $0x2c8] sm:$0xff] }
 0xdc5   :  { %6547 = vmatprep.subr.bf16.mxu0 %v5852_v3  ;;  %6752 = vmatprep.subr.bf16.mxu1 %v5854_v50  ;;  %v5522_v3 = vld [vmem:[#allocation4 + $0x748] sm:$0xff] }
 0xdc6   :  { %v5306_v50 = vld [vmem:[#allocation4 + $0x88] sm:$0xff] }
 0xdc8   :  { %6548 = vmatpush1.bf16.msra.mxu0 %v5851_v1  ;;  %6753 = vmatpush1.bf16.msra.mxu1 %v5853_v7  ;;  %v5450_v1 = vld [vmem:[#allocation4 + $0x508] sm:$0xff]  ;;  %v5387_v7 = vld [vmem:[#allocation4 + $0x310] sm:$0xff] }
 0xdc9   :  { %6549 = vmatprep.subr.bf16.mxu0 %v5861_v14  ;;  %6754 = vmatprep.subr.bf16.mxu1 %v5863_v38  ;;  %v5531_v14 = vld [vmem:[#allocation4 + $0x790] sm:$0xff] }
 0xdca   :  { %v5315_v38 = vld [vmem:[#allocation4 + $0xd0] sm:$0xff] }
 0xdcc   :  { %6550 = vmatpush1.bf16.msra.mxu0 %v5860_v39  ;;  %6755 = vmatpush1.bf16.msra.mxu1 %v5862_v32  ;;  %v5459_v39 = vld [vmem:[#allocation4 + $0x550] sm:$0xff]  ;;  %v5396_v32 = vld [vmem:[#allocation4 + $0x358] sm:$0xff] }
 0xdcd   :  { %6560 = vmatprep.subr.bf16.mxu0 %v5870_v51  ;;  %6765 = vmatprep.subr.bf16.mxu1 %v5872_v8  ;;  %v5540_v51 = vld [vmem:[#allocation4 + $0x7d8] sm:$0xff] }
 0xdce   :  { %v5324_v8 = vld [vmem:[#allocation4 + $0x118] sm:$0xff] }
 0xdcf   :  { %6552 = vmatmul.mubr.bf16.vlgmr.msra.gmra.mrb[48].mxu0 %v9525_v16  ;;  %6757 = vmatmul.mubr.bf16.vlgmr.msra.gmra.mrb[52].mxu1 %v9525_v16 }
 0xdd0   :  { %6561 = vmatpush1.bf16.msra.mxu0 %v5869_v47  ;;  %6766 = vmatpush1.bf16.msra.mxu1 %v5871_v44  ;;  %v5468_v47 = vld [vmem:[#allocation4 + $0x598] sm:$0xff]  ;;  %v5405_v44 = vld [vmem:[#allocation4 + $0x3a0] sm:$0xff] }
 0xdd1   :  { %6562 = vmatprep.subr.bf16.mxu0 %v5879_v10  ;;  %6767 = vmatprep.subr.bf16.mxu1 %v5881_v0  ;;  %v5549_v10 = vld [vmem:[#allocation4 + $0x820] sm:$0xff]  ;;  %v5414_v0 = vld [vmem:[#allocation4 + $0x3e8] sm:$0xff] }
 0xdd2   :  { %6592 = vmatprep.mubr.bf16.mxu0 %v9690_v35  ;;  %6797 = vmatprep.mubr.bf16.mxu1 %v9690_v35  ;;  %v5905_v35 = vld [vmem:[#allocation4 + $0x1340] sm:$0xff] }
 0xdd4   :  { %6563 = vmatpush1.bf16.msra.mxu0 %v5878_v36  ;;  %6768 = vmatpush1.bf16.msra.mxu1 %v5880_v60  ;;  %v5558_v36 = vld [vmem:[#allocation4 + $0x868] sm:$0xff] }
 0xdd5   :  { %6564 = vmatprep.subr.bf16.mxu0 %v5888_v61  ;;  %6769 = vmatprep.subr.bf16.mxu1 %v5890_v20  ;;  %v5342_v60 = vld [vmem:[#allocation4 + $0x1a8] sm:$0xff]  ;;  %v5423_v20 = vld [vmem:[#allocation4 + $0x430] sm:$0xff] }
 0xdd6   :  { %v5486_v61 = vld [vmem:[#allocation4 + $0x628] sm:$0xff] }
 0xdd8   :  { %6565 = vmatpush1.bf16.msra.mxu0 %v5887_v42  ;;  %6770 = vmatpush1.bf16.msra.mxu1 %v5889_v18  ;;  %v5567_v42 = vld [vmem:[#allocation4 + $0x8b0] sm:$0xff] }
 0xdd9   :  { %6566 = vmatprep.subr.bf16.mxu0 %v5897_v21  ;;  %6771 = vmatprep.subr.bf16.mxu1 %v5899_v25  ;;  %v5351_v18 = vld [vmem:[#allocation4 + $0x1f0] sm:$0xff]  ;;  %v5432_v25 = vld [vmem:[#allocation4 + $0x478] sm:$0xff] }
 0xdda   :  { %v5495_v21 = vld [vmem:[#allocation4 + $0x670] sm:$0xff] }
 0xddc   :  { %6567 = vmatpush1.bf16.msra.mxu0 %v5896_v55  ;;  %6772 = vmatpush1.bf16.msra.mxu1 %v5898_v28  ;;  %v5576_v55 = vld [vmem:[#allocation4 + $0x8f8] sm:$0xff] }
 0xddd   :  { %6568 = vmatprep.subr.bf16.mxu0 %v5906_v22  ;;  %6773 = vmatprep.subr.bf16.mxu1 %v5908_v49  ;;  %v5360_v28 = vld [vmem:[#allocation4 + $0x238] sm:$0xff]  ;;  %v5657_v49 = vld [vmem:[#allocation4 + $0xb80] sm:$0xff] }
 0xdde   :  { %v5504_v22 = vld [vmem:[#allocation4 + $0x6b8] sm:$0xff] }
 0xde0   :  { %6569 = vmatpush1.bf16.msra.mxu0 %v5905_v35  ;;  %6774 = vmatpush1.bf16.msra.mxu1 %v5907_v45  ;;  %v5801_v35 = vld [vmem:[#allocation4 + $0x1000] sm:$0xff] }
 0xde1   :  { %6570 = vmatprep.subr.bf16.mxu0 %v5915_v63  ;;  %6775 = vmatprep.subr.bf16.mxu1 %v5917_v9  ;;  %v5585_v45 = vld [vmem:[#allocation4 + $0x940] sm:$0xff]  ;;  %v5666_v9 = vld [vmem:[#allocation4 + $0xbc8] sm:$0xff] }
 0xde2   :  { %v5729_v63 = vld [vmem:[#allocation4 + $0xdc0] sm:$0xff] }
 0xde4   :  { %6571 = vmatpush1.bf16.msra.mxu0 %v5914_v54  ;;  %6776 = vmatpush1.bf16.msra.mxu1 %v5916_v2  ;;  %v5810_v54 = vld [vmem:[#allocation4 + $0x1048] sm:$0xff] }
 0xde5   :  { %6572 = vmatprep.subr.bf16.mxu0 %v5924_v46  ;;  %6777 = vmatprep.subr.bf16.mxu1 %v5926_v58  ;;  %v5594_v2 = vld [vmem:[#allocation4 + $0x988] sm:$0xff]  ;;  %v5675_v58 = vld [vmem:[#allocation4 + $0xc10] sm:$0xff] }
 0xde6   :  { %v5738_v46 = vld [vmem:[#allocation4 + $0xe08] sm:$0xff] }
 0xde8   :  { %6573 = vmatpush1.bf16.msra.mxu0 %v5923_v13  ;;  %6778 = vmatpush1.bf16.msra.mxu1 %v5925_v56  ;;  %v5819_v13 = vld [vmem:[#allocation4 + $0x1090] sm:$0xff] }
 0xde9   :  { %6574 = vmatprep.subr.bf16.mxu0 %v5933_v57  ;;  %6779 = vmatprep.subr.bf16.mxu1 %v5935_v17  ;;  %v5603_v56 = vld [vmem:[#allocation4 + $0x9d0] sm:$0xff]  ;;  %v5684_v57 = vld [vmem:[#allocation4 + $0xc58] sm:$0xff] }
 0xdea   :  { %v5612_v17 = vld [vmem:[#allocation4 + $0xa18] sm:$0xff] }
 0xdec   :  { %6575 = vmatpush1.bf16.msra.mxu0 %v5932_v52  ;;  %6780 = vmatpush1.bf16.msra.mxu1 %v5934_v11  ;;  %v5756_v52 = vld [vmem:[#allocation4 + $0xe98] sm:$0xff]  ;;  %v5693_v11 = vld [vmem:[#allocation4 + $0xca0] sm:$0xff] }
 0xded   :  { %7690 = vmatprep.subr.bf16.mxu0 %v5369_v15  ;;  %7712 = vmatprep.subr.bf16.mxu1 %v5513_v6  ;;  %v5837_v15 = vld [vmem:[#allocation4 + $0x1120] sm:$0xff]  ;;  %v5702_v6 = vld [vmem:[#allocation4 + $0xce8] sm:$0xff] }
 0xdef   :  { %6593 = vmatmul.mubr.bf16.vlgmr.msra.gmra.mrb[48].mxu0 %v9529_v37  ;;  %6798 = vmatmul.mubr.bf16.vlgmr.msra.gmra.mrb[52].mxu1 %v9529_v37 }
 0xdf0   :  { %7691 = vmatpush3.bf16.msra.mxu0 %v5297_v31  ;;  %7713 = vmatpush3.bf16.msra.mxu1 %v5441_v33  ;;  %v5846_v31 = vld [vmem:[#allocation4 + $0x1168] sm:$0xff] }
 0xdf1   :  { %7692 = vmatprep.subr.bf16.mxu0 %v5378_v41  ;;  %7714 = vmatprep.subr.bf16.mxu1 %v5522_v3  ;;  %v5630_v33 = vld [vmem:[#allocation4 + $0xaa8] sm:$0xff]  ;;  %v5711_v3 = vld [vmem:[#allocation4 + $0xd30] sm:$0xff] }
 0xdf2   :  { %6838 = vmatprep.mubr.bf16.mxu0 %v9515_v34  ;;  %6878 = vmatprep.mubr.bf16.mxu1 %v9519_v40  ;;  %v5333_v34 = vld [vmem:[#allocation4 + $0x160] sm:$0xff]  ;;  %v5774_v41 = vld [vmem:[#allocation4 + $0xf28] sm:$0xff] }
 0xdf3   :  { %v5477_v40 = vld [vmem:[#allocation4 + $0x5e0] sm:$0xff] }
 0xdf4   :  { %7693 = vmatpush3.bf16.msra.mxu0 %v5306_v50  ;;  %7715 = vmatpush3.bf16.msra.mxu1 %v5450_v1  ;;  %v5855_v50 = vld [vmem:[#allocation4 + $0x11b0] sm:$0xff] }
 0xdf5   :  { %7694 = vmatprep.subr.bf16.mxu0 %v5387_v7  ;;  %7716 = vmatprep.subr.bf16.mxu1 %v5531_v14  ;;  %v5639_v1 = vld [vmem:[#allocation4 + $0xaf0] sm:$0xff]  ;;  %v5720_v14 = vld [vmem:[#allocation4 + $0xd78] sm:$0xff] }
 0xdf6   :  { %v5783_v7 = vld [vmem:[#allocation4 + $0xf70] sm:$0xff] }
 0xdf8   :  { %7695 = vmatpush3.bf16.msra.mxu0 %v5315_v38  ;;  %7717 = vmatpush3.bf16.msra.mxu1 %v5459_v39  ;;  %v5864_v38 = vld [vmem:[#allocation4 + $0x11f8] sm:$0xff] }
 0xdf9   :  { %7696 = vmatprep.subr.bf16.mxu0 %v5396_v32  ;;  %7718 = vmatprep.subr.bf16.mxu1 %v5540_v51  ;;  %v5648_v39 = vld [vmem:[#allocation4 + $0xb38] sm:$0xff]  ;;  %v5873_v51 = vld [vmem:[#allocation4 + $0x1240] sm:$0xff] }
 0xdfa   :  { %v5792_v32 = vld [vmem:[#allocation4 + $0xfb8] sm:$0xff] }
 0xdfc   :  { %7697 = vmatpush3.bf16.msra.mxu0 %v5324_v8  ;;  %7719 = vmatpush3.bf16.msra.mxu1 %v5468_v47  ;;  %v5882_v8 = vld [vmem:[#allocation4 + $0x1288] sm:$0xff]  ;;  %v5891_v47 = vld [vmem:[#allocation4 + $0x12d0] sm:$0xff] }
 0xdfd   :  { %7698 = vmatprep.subr.bf16.mxu0 %v5405_v44  ;;  %7720 = vmatprep.subr.bf16.mxu1 %v5549_v10  ;;  %v5900_v44 = vld [vmem:[#allocation4 + $0x1318] sm:$0xff]  ;;  %v5927_v10 = vld [vmem:[#allocation4 + $0x13f0] sm:$0xff] }
 0xe00   :  { %7699 = vmatpush3.bf16.msra.mxu0 %v5333_v34  ;;  %7721 = vmatpush3.bf16.msra.mxu1 %v5477_v40  ;;  %v5936_v34 = vld [vmem:[#allocation4 + $0x1438] sm:$0xff]  ;;  %v5960_v40 = vrot.slane %v9565_v23, %v9115_v12 }
 0xe01   :  { %7700 = vmatprep.subr.bf16.mxu0 %v5414_v0  ;;  %7722 = vmatprep.subr.bf16.mxu1 %v5558_v36  ;;  %v5968_v0 = vrot.slane %v9565_v23, %v9137_v26  ;;  %v5964_v36 = vrot.slane %v9565_v23, %v9127_v19 }
 0xe04   :  { %7701 = vmatpush3.bf16.msra.mxu0 %v5342_v60  ;;  %7723 = vmatpush3.bf16.msra.mxu1 %v5486_v61  ;;  %v5972_v60 = vrot.slane %v9565_v23, %v9142_v30 }
 0xe05   :  { %7702 = vmatprep.subr.bf16.mxu0 %v5423_v20  ;;  %7724 = vmatprep.subr.bf16.mxu1 %v5567_v42 }
 0xe08   :  { %7703 = vmatpush3.bf16.msra.mxu0 %v5351_v18  ;;  %7725 = vmatpush3.bf16.msra.mxu1 %v5495_v21 }
 0xe09   :  { %7704 = vmatprep.subr.bf16.mxu0 %v5432_v25  ;;  %7726 = vmatprep.subr.bf16.mxu1 %v5576_v55 }
 0xe0c   :  { %7705 = vmatpush3.bf16.msra.mxu0 %v5360_v28  ;;  %7727 = vmatpush3.bf16.msra.mxu1 %v5504_v22 }
 0xe0d   :  { %7734 = vmatprep.subr.bf16.mxu0 %v5657_v49  ;;  %7756 = vmatprep.subr.bf16.mxu1 %v5801_v35 }
 0xe0f   :  { %6839 = vmatmul.mubr.bf16.vlgmr.msra.gmra.mrb[52].mxu0 %v9513_v27  ;;  %6879 = vmatmul.mubr.bf16.vlgmr.msra.gmra.mrb[56].mxu1 %v9517_v24  ;;  %v5747_v27 = vld [vmem:[#allocation4 + $0xe50] sm:$0xff]  ;;  %v5828_v24 = vld [vmem:[#allocation4 + $0x10d8] sm:$0xff] }
 0xe10   :  { %7735 = vmatpush3.bf16.msra.mxu0 %v5585_v45  ;;  %7757 = vmatpush3.bf16.msra.mxu1 %v5729_v63 }
 0xe11   :  { %7736 = vmatprep.subr.bf16.mxu0 %v5666_v9  ;;  %7758 = vmatprep.subr.bf16.mxu1 %v5810_v54 }
 0xe12   :  { %6918 = vmatprep.mubr.bf16.mxu0 %v9523_v4  ;;  %6958 = vmatprep.mubr.bf16.mxu1 %v9527_v53  ;;  %v5621_v4 = vld [vmem:[#allocation4 + $0xa60] sm:$0xff] }
 0xe13   :  { %v5765_v53 = vld [vmem:[#allocation4 + $0xee0] sm:$0xff] }
 0xe14   :  { %7737 = vmatpush3.bf16.msra.mxu0 %v5594_v2  ;;  %7759 = vmatpush3.bf16.msra.mxu1 %v5738_v46  ;;  %v7490_v46 = vld [vmem:[#allocation25 + $0x8] ss:$0 sm:$0xff] }
 0xe15   :  { %7738 = vmatprep.subr.bf16.mxu0 %v5675_v58  ;;  %7760 = vmatprep.subr.bf16.mxu1 %v5819_v13 }
 0xe18   :  { %7739 = vmatpush3.bf16.msra.mxu0 %v5603_v56  ;;  %7761 = vmatpush3.bf16.msra.mxu1 %v5747_v27 }
 0xe19   :  { %7740 = vmatprep.subr.bf16.mxu0 %v5684_v57  ;;  %7762 = vmatprep.subr.bf16.mxu1 %v5828_v24 }
 0xe1c   :  { %7741 = vmatpush3.bf16.msra.mxu0 %v5612_v17  ;;  %7763 = vmatpush3.bf16.msra.mxu1 %v5756_v52 }
 0xe1d   :  { %7742 = vmatprep.subr.bf16.mxu0 %v5693_v11  ;;  %7764 = vmatprep.subr.bf16.mxu1 %v5837_v15 }
 0xe20   :  { %7743 = vmatpush3.bf16.msra.mxu0 %v5621_v4  ;;  %7765 = vmatpush3.bf16.msra.mxu1 %v5765_v53 }
 0xe21   :  { %7744 = vmatprep.subr.bf16.mxu0 %v5702_v6  ;;  %7766 = vmatprep.subr.bf16.mxu1 %v5846_v31 }
 0xe24   :  { %7745 = vmatpush3.bf16.msra.mxu0 %v5630_v33  ;;  %7767 = vmatpush3.bf16.msra.mxu1 %v5774_v41 }
 0xe25   :  { %7746 = vmatprep.subr.bf16.mxu0 %v5711_v3  ;;  %7768 = vmatprep.subr.bf16.mxu1 %v5855_v50 }
 0xe28   :  { %7747 = vmatpush3.bf16.msra.mxu0 %v5639_v1  ;;  %7769 = vmatpush3.bf16.msra.mxu1 %v5783_v7 }
 0xe29   :  { %7748 = vmatprep.subr.bf16.mxu0 %v5720_v14  ;;  %7770 = vmatprep.subr.bf16.mxu1 %v5864_v38 }
 0xe2c   :  { %7749 = vmatpush3.bf16.msra.mxu0 %v5648_v39  ;;  %7771 = vmatpush3.bf16.msra.mxu1 %v5792_v32 }
 0xe2d   :  { %7924 = vmatprep.subr.bf16.mxu0 %v9691_v5 }
 0xe2f   :  { %6919 = vmatmul.mubr.bf16.vlgmr.msra.gmra.mrb[56].mxu0 %v9521_v29  ;;  %6959 = vmatmul.mubr.bf16.vlgmr.msra.gmra.mrb[60].mxu1 %v9525_v16  ;;  %v5909_v29 = vld [vmem:[#allocation4 + $0x1360] sm:$0xff]  ;;  %v5918_v16 = vld [vmem:[#allocation4 + $0x13a8] sm:$0xff] }
 0xe30   :  { %7925 = vmatpush3.bf16.msra.mxu0 %v5873_v51  ;;  %7940 = vmatprep.mubr.msk.bf16.mxu0 %vm8768_vm1, %v9691_v5 }
 0xe31   :  { %7926 = vmatprep.subr.bf16.mxu0 %v9691_v5 }
 0xe34   :  { %7927 = vmatpush3.bf16.msra.mxu0 %v5882_v8 }
 0xe35   :  { %7928 = vmatprep.subr.bf16.mxu0 %v9691_v5 }
 0xe38   :  { %7929 = vmatpush3.bf16.msra.mxu0 %v5891_v47 }
 0xe39   :  { %7930 = vmatprep.subr.bf16.mxu0 %v9691_v5 }
 0xe3c   :  { %7931 = vmatpush3.bf16.msra.mxu0 %v5900_v44 }
 0xe3d   :  { %7932 = vmatprep.subr.bf16.mxu0 %v9691_v5 }
 0xe40   :  { %7933 = vmatpush3.bf16.msra.mxu0 %v5909_v29 }
 0xe41   :  { %7934 = vmatprep.subr.bf16.mxu0 %v9691_v5 }
 0xe44   :  { %7935 = vmatpush3.bf16.msra.mxu0 %v5918_v16 }
 0xe45   :  { %7936 = vmatprep.subr.bf16.mxu0 %v9691_v5 }
 0xe48   :  { %7937 = vmatpush3.bf16.msra.mxu0 %v5927_v10 }
 0xe49   :  { %7938 = vmatprep.subr.bf16.mxu0 %v9691_v5 }
 0xe4c   :  { %7939 = vmatpush3.bf16.msra.mxu0 %v5936_v34 }
 0xe4f   :  { %7941 = vmatmul.mubr.bf16.vlgmr.msra.gmra.mrb[60].mxu0 %v9529_v37 }
 0xec2   :  { %v6594_v61 = vpop.f32.mrb[48].mxu0  ;;  %v6799_v20 = vpop.f32.mrb[52].mxu1 }
 0xec3   :  { %v7984_v42 = vadd.f32 %v6594_v61, %v5960_v40  ;;  %v7986_v18 = vadd.f32 %v6799_v20, %v5968_v0  ;;  %v6596_v21 = vpop.f32.mrb[49].mxu0  ;;  %v6801_v25 = vpop.f32.mrb[53].mxu1 }
 0xec4   :  { %v7985_v55 = vadd.f32 %v6596_v21, %v5964_v36  ;;  %v7987_v37 = vadd.f32 %v6801_v25, %v5972_v60  ;;  %v6598_v28 = vpop.f32.mrb[50].mxu0  ;;  %v6803_v22 = vpop.f32.mrb[54].mxu1 }
 0xec5   :  { %v7010_v12 = vmax.f32 %v7984_v42, 0.0  ;;  %v7012_v49 = vmax.f32 %v7986_v18, 0.0  ;;  %v6599_v35 = vpop.f32.mrb[51].mxu0  ;;  %v6804_v26 = vpop.f32.mrb[55].mxu1 }
 0xec6   :  { %v7011_v45 = vmax.f32 %v7985_v55, 0.0  ;;  %v7013_v63 = vmax.f32 %v7987_v37, 0.0 }
 0xec7   :  { %v9616_v19 = vpack.c.bf16 %v7010_v12, %v7010_v12  ;;  %v9618_v9 = vpack.c.bf16 %v7012_v49, %v7012_v49 }
 0xec8   :  { %v9620_v30 = vpack.c.bf16 %v7011_v45, %v7011_v45  ;;  %v9622_v23 = vpack.c.bf16 %v7013_v63, %v7013_v63 }
 0xee2   :  { %v7706_v54 = vpop.f32.mrb[52].mxu0  ;;  %v7728_v2 = vpop.f32.mrb[56].mxu1 }
 0xee3   :  { %v7707_v58 = vpop.f32.mrb[53].mxu0  ;;  %v7729_v13 = vpop.f32.mrb[57].mxu1 }
 0xee4   :  { %v7708_v56 = vadd.f32 %v7707_v58, %v7706_v54  ;;  %v7709_v27 = vpop.f32.mrb[54].mxu0  ;;  %v7730_v57 = vadd.f32 %v7729_v13, %v7728_v2  ;;  %v7731_v24 = vpop.f32.mrb[58].mxu1 }
 0xee5   :  { %v7710_v17 = vpop.f32.mrb[55].mxu0  ;;  %v7732_v52 = vpop.f32.mrb[59].mxu1 }
 0xee6   :  { %v6841_v11 = vadd.f32 %v7708_v56, %v7490_v46 }
 0xee8   :  { %v6881_v15 = vadd.f32 %v7730_v57, %v6841_v11 }
 0xf02   :  { %v7750_v4 = vpop.f32.mrb[56].mxu0  ;;  %v7772_v53 = vpop.f32.mrb[60].mxu1 }
 0xf03   :  { %v7751_v6 = vpop.f32.mrb[57].mxu0  ;;  %v7773_v31 = vpop.f32.mrb[61].mxu1 }
 0xf04   :  { %v7752_v33 = vadd.f32 %v7751_v6, %v7750_v4  ;;  %v7753_v41 = vpop.f32.mrb[58].mxu0  ;;  %v7774_v3 = vadd.f32 %v7773_v31, %v7772_v53  ;;  %v7775_v50 = vpop.f32.mrb[62].mxu1 }
 0xf05   :  { %v7754_v1 = vpop.f32.mrb[59].mxu0  ;;  %v7776_v7 = vpop.f32.mrb[63].mxu1 }
 0xf06   :  { %v6921_v14 = vadd.f32 %v7752_v33, %v6881_v15 }
 0xf08   :  { %v6961_v38 = vadd.f32 %v7774_v3, %v6921_v14 }
 0xf22   :  { %v7000_v39 = vpop.f32.mrb[60].mxu0 }
 0xf23   :  { %v7001_v32 = vadd.f32 %v7000_v39, %v6961_v38  ;;  %v7942_v51 = vpop.f32.mrb[61].mxu0 }
 0xf24   :  { %v7003_v8 = vpop.f32.mrb[62].mxu0 }
 0xf25   :  { %v7014_v47 = vmax.f32 %v7001_v32, 0.0  ;;  %v7943_v44 = vpop.f32.mrb[63].mxu0 }
 0xf27   :  { %v9624_v29 = vpack.c.bf16 %v7014_v47, %v7014_v47 }
 0xf28   :  { %8730 = dma.done.wait [#allocation6 + $0x3], 9216 }
 0xf29   :  { %8731 = vsyncadd [#allocation6 + $0x3], 4294958080  ;;  %7143 = vmatprep.mubr.bf16.mxu1 %v9579_v62  ;;  %7183 = vmatprep.mubr.bf16.mxu0 %v9581_v48  ;;  %v7040_v16 = vld [vmem:[#allocation5 + $0x40] sm:$0xff]  ;;  %v7041_v0 = vld [vmem:[#allocation5 + $0x48] sm:$0xff]  ;;  %s8769_s22 = smov [#allocation28]  }
 0xf2a   :  { %v7032_v10 = vld [vmem:[#allocation5] sm:$0xff]  ;;  %7787 = vmatprep.subr.bf16.mxu1 %v7040_v16  ;;  %v7057_v36 = vld [vmem:[#allocation5 + $0xc8] sm:$0xff]  ;;  %v7042_v20 = vld [vmem:[#allocation5 + $0x50] sm:$0xff]  ;;  %s7318_s4 = sshll.u32 %s8769_s22, 4  ;;  %s7319_s4 = int_to_ptr.vmem [resolvable:$true] %s7318_s4 }
 0xf2b   :  { %v7056_v34 = vld [vmem:[#allocation5 + $0xc0] sm:$0xff]  ;;  %7788 = vmatpush3.bf16.msra.mxu1 %v7032_v10  ;;  %v7033_v60 = vld [vmem:[#allocation5 + $0x8] sm:$0xff]  ;;  %v7058_v42 = vld [vmem:[#allocation5 + $0xd0] sm:$0xff]  ;;  %s8688_s30 = scalar_lea.vmem %s7319_s4, 128  ;;  %p8693_p1 = scmp.lt.s32.totalorder %s7319_s4, %s7319_s4 }
 0xf2c   :  { %7809 = vmatprep.subr.bf16.mxu0 %v7056_v34  ;;  %v7048_v40 = vld [vmem:[#allocation5 + $0x80] sm:$0xff]  ;;  %7789 = vmatprep.subr.bf16.mxu1 %v7041_v0  ;;  %v7049_v61 = vld [vmem:[#allocation5 + $0x88] sm:$0xff]  ;;  %v7034_v62 = vld [vmem:[#allocation5 + $0x10] sm:$0xff]  ;;  %p8689_p0 = scmp.ne.s32.totalorder %s7319_s4, %s8688_s30  ;;  %p8694_p2 = scmp.lt.s32.totalorder %s8688_s30, %s8688_s30 }
 0xf2d   :  { %7810 = vmatpush3.bf16.msra.mxu0 %v7048_v40  ;;  %v7050_v48 = vld [vmem:[#allocation5 + $0x90] sm:$0xff]  ;;  %v7043_v18 = vld [vmem:[#allocation5 + $0x58] sm:$0xff]  ;;  %v7044_v37 = vld [vmem:[#allocation5 + $0x60] sm:$0xff] }
 0xf2e   :  { %7811 = vmatprep.subr.bf16.mxu0 %v7057_v36  ;;  %v7059_v21 = vld [vmem:[#allocation5 + $0xd8] sm:$0xff]  ;;  %v7060_v28 = vld [vmem:[#allocation5 + $0xe0] sm:$0xff]  ;;  %v7045_v49 = vld [vmem:[#allocation5 + $0x68] sm:$0xff]  ;;  %p8695_p3 = por %p8694_p2, %p8693_p1 }
 0xf2f   :  { %7790 = vmatpush3.bf16.msra.mxu1 %v7033_v60  ;;  %v7035_v25 = vld [vmem:[#allocation5 + $0x18] sm:$0xff]  ;;  %v7036_v22 = vld [vmem:[#allocation5 + $0x20] sm:$0xff]  ;;  %v7061_v35 = vld [vmem:[#allocation5 + $0xe8] sm:$0xff] }
 0xf30   :  { %7791 = vmatprep.subr.bf16.mxu1 %v7042_v20  ;;  %v7051_v55 = vld [vmem:[#allocation5 + $0x98] sm:$0xff]  ;;  %v7052_v12 = vld [vmem:[#allocation5 + $0xa0] sm:$0xff]  ;;  %v7037_v26 = vld [vmem:[#allocation5 + $0x28] sm:$0xff]  ;;  %p8696_p4 = pnand %p8695_p3, %p8689_p0 }
 0xf31   :  { %7812 = vmatpush3.bf16.msra.mxu0 %v7049_v61  ;;  %v7053_v45 = vld [vmem:[#allocation5 + $0xa8] sm:$0xff]  ;;  %v7046_v63 = vld [vmem:[#allocation5 + $0x70] sm:$0xff]  ;;  %v7047_v58 = vld [vmem:[#allocation5 + $0x78] sm:$0xff] }
 0xf32   :  { %7813 = vmatprep.subr.bf16.mxu0 %v7058_v42  ;;  %v7062_v54 = vld [vmem:[#allocation5 + $0xf0] sm:$0xff]  ;;  %v7063_v13 = vld [vmem:[#allocation5 + $0xf8] sm:$0xff]  ;;  %v7072_v57 = vld [vmem:[#allocation5 + $0x140] sm:$0xff] }
 0xf33   :  { %7792 = vmatpush3.bf16.msra.mxu1 %v7034_v62  ;;  %v7038_v2 = vld [vmem:[#allocation5 + $0x30] sm:$0xff]  ;;  %v7039_v56 = vld [vmem:[#allocation5 + $0x38] sm:$0xff]  ;;  %v7088_v24 = vld [vmem:[#allocation5 + $0x1c0] sm:$0xff] }
 0xf34   :  { %7793 = vmatprep.subr.bf16.mxu1 %v7043_v18  ;;  %v7054_v46 = vld [vmem:[#allocation5 + $0xb0] sm:$0xff]  ;;  %v7055_v27 = vld [vmem:[#allocation5 + $0xb8] sm:$0xff]  ;;  %v7064_v17 = vld [vmem:[#allocation5 + $0x100] sm:$0xff] }
 0xf35   :  { %7814 = vmatpush3.bf16.msra.mxu0 %v7050_v48  ;;  %v7080_v52 = vld [vmem:[#allocation5 + $0x180] sm:$0xff]  ;;  %v7073_v11 = vld [vmem:[#allocation5 + $0x148] sm:$0xff]  ;;  %v7074_v6 = vld [vmem:[#allocation5 + $0x150] sm:$0xff] }
 0xf36   :  { %7815 = vmatprep.subr.bf16.mxu0 %v7059_v21  ;;  %v7089_v15 = vld [vmem:[#allocation5 + $0x1c8] sm:$0xff]  ;;  %v7090_v31 = vld [vmem:[#allocation5 + $0x1d0] sm:$0xff]  ;;  %v7075_v41 = vld [vmem:[#allocation5 + $0x158] sm:$0xff] }
 0xf37   :  { %7794 = vmatpush3.bf16.msra.mxu1 %v7035_v25  ;;  %v7065_v4 = vld [vmem:[#allocation5 + $0x108] sm:$0xff]  ;;  %v7066_v33 = vld [vmem:[#allocation5 + $0x110] sm:$0xff]  ;;  %v7067_v3 = vld [vmem:[#allocation5 + $0x118] sm:$0xff] }
 0xf38   :  { %7795 = vmatprep.subr.bf16.mxu1 %v7044_v37  ;;  %v7081_v53 = vld [vmem:[#allocation5 + $0x188] sm:$0xff]  ;;  %v7083_v50 = vld [vmem:[#allocation5 + $0x198] sm:$0xff]  ;;  %v7076_v1 = vld [vmem:[#allocation5 + $0x160] sm:$0xff] }
 0xf39   :  { %7816 = vmatpush3.bf16.msra.mxu0 %v7051_v55  ;;  %v7092_v7 = vld [vmem:[#allocation5 + $0x1e0] sm:$0xff]  ;;  %v7077_v14 = vld [vmem:[#allocation5 + $0x168] sm:$0xff]  ;;  %v7078_v51 = vld [vmem:[#allocation5 + $0x170] sm:$0xff] }
 0xf3a   :  { %7817 = vmatprep.subr.bf16.mxu0 %v7060_v28  ;;  %v7093_v38 = vld [vmem:[#allocation5 + $0x1e8] sm:$0xff]  ;;  %v7094_v8 = vld [vmem:[#allocation5 + $0x1f0] sm:$0xff]  ;;  %v7079_v16 = vld [vmem:[#allocation5 + $0x178] sm:$0xff] }
 0xf3b   :  { %7796 = vmatpush3.bf16.msra.mxu1 %v7036_v22  ;;  %v7069_v39 = vld [vmem:[#allocation5 + $0x128] sm:$0xff]  ;;  %v7070_v47 = vld [vmem:[#allocation5 + $0x130] sm:$0xff]  ;;  %v7095_v10 = vld [vmem:[#allocation5 + $0x1f8] sm:$0xff] }
 0xf3c   :  { %7797 = vmatprep.subr.bf16.mxu1 %v7045_v49  ;;  %v7085_v32 = vld [vmem:[#allocation5 + $0x1a8] sm:$0xff]  ;;  %v7086_v44 = vld [vmem:[#allocation5 + $0x1b0] sm:$0xff]  ;;  %v7071_v34 = vld [vmem:[#allocation5 + $0x138] sm:$0xff] }
 0xf3d   :  { %7818 = vmatpush3.bf16.msra.mxu0 %v7052_v12  ;;  %v7087_v40 = vld [vmem:[#allocation5 + $0x1b8] sm:$0xff]  ;;  %v7096_v0 = vld [vmem:[#allocation5 + $0x200] sm:$0xff]  ;;  %v7097_v36 = vld [vmem:[#allocation5 + $0x208] sm:$0xff] }
 0xf3e   :  { %7819 = vmatprep.subr.bf16.mxu0 %v7061_v35  ;;  %v7098_v60 = vld [vmem:[#allocation5 + $0x210] sm:$0xff]  ;;  %v7099_v61 = vld [vmem:[#allocation5 + $0x218] sm:$0xff]  ;;  %v7491_v18 = vld [vmem:[#allocation27] ss:$0 sm:$0xff] }
 0xf3f   :  { %7798 = vmatpush3.bf16.msra.mxu1 %v7037_v26  ;;  %v7102_v20 = vld [vmem:[#allocation5 + $0x230] sm:$0xff]  ;;  %v7103_v42 = vld [vmem:[#allocation5 + $0x238] sm:$0xff] }
 0xf40   :  { %7799 = vmatprep.subr.bf16.mxu1 %v7046_v63 }
 0xf41   :  { %7820 = vmatpush3.bf16.msra.mxu0 %v7053_v45 }
 0xf42   :  { %7821 = vmatprep.subr.bf16.mxu0 %v7062_v54 }
 0xf43   :  { %7800 = vmatpush3.bf16.msra.mxu1 %v7038_v2 }
 0xf44   :  { %7801 = vmatprep.subr.bf16.mxu1 %v7047_v58 }
 0xf45   :  { %7822 = vmatpush3.bf16.msra.mxu0 %v7054_v46 }
 0xf46   :  { %7823 = vmatprep.subr.bf16.mxu0 %v7063_v13 }
 0xf47   :  { %7802 = vmatpush3.bf16.msra.mxu1 %v7039_v56 }
 0xf48   :  { %7831 = vmatprep.subr.bf16.mxu1 %v7072_v57 }
 0xf49   :  { %7824 = vmatpush3.bf16.msra.mxu0 %v7055_v27 }
 0xf4a   :  { %7853 = vmatprep.subr.bf16.mxu0 %v7088_v24  ;;  %7144 = vmatmul.mubr.bf16.vlgmr.msra.gmra.mrb[64].mxu1 %v9575_v59  ;;  %v7082_v59 = vld [vmem:[#allocation5 + $0x190] sm:$0xff] }
 0xf4b   :  { %7832 = vmatpush3.bf16.msra.mxu1 %v7064_v17  ;;  %7223 = vmatprep.mubr.bf16.mxu1 %v9620_v30  ;;  %v7068_v30 = vld [vmem:[#allocation5 + $0x120] sm:$0xff] }
 0xf4c   :  { %7184 = vmatmul.mubr.bf16.vlgmr.msra.gmra.mrb[64].mxu0 %v9577_v43  ;;  %7833 = vmatprep.subr.bf16.mxu1 %v7073_v11  ;;  %v7091_v43 = vld [vmem:[#allocation5 + $0x1d8] sm:$0xff] }
 0xf4d   :  { %7854 = vmatpush3.bf16.msra.mxu0 %v7080_v52  ;;  %7263 = vmatprep.mubr.bf16.mxu0 %v9622_v23  ;;  %v7084_v23 = vld [vmem:[#allocation5 + $0x1a0] sm:$0xff] }
 0xf4e   :  { %7855 = vmatprep.subr.bf16.mxu0 %v7089_v15 }
 0xf4f   :  { %7834 = vmatpush3.bf16.msra.mxu1 %v7065_v4 }
 0xf50   :  { %7835 = vmatprep.subr.bf16.mxu1 %v7074_v6 }
 0xf51   :  { %7856 = vmatpush3.bf16.msra.mxu0 %v7081_v53 }
 0xf52   :  { %7857 = vmatprep.subr.bf16.mxu0 %v7090_v31 }
 0xf53   :  { %7836 = vmatpush3.bf16.msra.mxu1 %v7066_v33 }
 0xf54   :  { %7837 = vmatprep.subr.bf16.mxu1 %v7075_v41 }
 0xf55   :  { %7858 = vmatpush3.bf16.msra.mxu0 %v7082_v59 }
 0xf56   :  { %7859 = vmatprep.subr.bf16.mxu0 %v7091_v43 }
 0xf57   :  { %7838 = vmatpush3.bf16.msra.mxu1 %v7067_v3 }
 0xf58   :  { %7839 = vmatprep.subr.bf16.mxu1 %v7076_v1 }
 0xf59   :  { %7860 = vmatpush3.bf16.msra.mxu0 %v7083_v50 }
 0xf5a   :  { %7861 = vmatprep.subr.bf16.mxu0 %v7092_v7 }
 0xf5b   :  { %7840 = vmatpush3.bf16.msra.mxu1 %v7068_v30 }
 0xf5c   :  { %7841 = vmatprep.subr.bf16.mxu1 %v7077_v14 }
 0xf5d   :  { %7862 = vmatpush3.bf16.msra.mxu0 %v7084_v23 }
 0xf5e   :  { %7863 = vmatprep.subr.bf16.mxu0 %v7093_v38 }
 0xf5f   :  { %7842 = vmatpush3.bf16.msra.mxu1 %v7069_v39 }
 0xf60   :  { %7843 = vmatprep.subr.bf16.mxu1 %v7078_v51 }
 0xf61   :  { %7864 = vmatpush3.bf16.msra.mxu0 %v7085_v32 }
 0xf62   :  { %7865 = vmatprep.subr.bf16.mxu0 %v7094_v8 }
 0xf63   :  { %7844 = vmatpush3.bf16.msra.mxu1 %v7070_v47 }
 0xf64   :  { %7845 = vmatprep.subr.bf16.mxu1 %v7079_v16 }
 0xf65   :  { %7866 = vmatpush3.bf16.msra.mxu0 %v7086_v44 }
 0xf66   :  { %7867 = vmatprep.subr.bf16.mxu0 %v7095_v10 }
 0xf67   :  { %7846 = vmatpush3.bf16.msra.mxu1 %v7071_v34 }
 0xf68   :  { %7944 = vmatprep.subr.bf16.mxu1 %v9691_v5 }
 0xf69   :  { %7868 = vmatpush3.bf16.msra.mxu0 %v7087_v40 }
 0xf6a   :  { %7224 = vmatmul.mubr.bf16.vlgmr.msra.gmra.mrb[68].mxu1 %v9616_v19  ;;  %v7100_v19 = vld [vmem:[#allocation5 + $0x220] sm:$0xff] }
 0xf6b   :  { %7945 = vmatpush3.bf16.msra.mxu1 %v7096_v0  ;;  %7960 = vmatprep.mubr.msk.bf16.mxu1 %vm8768_vm1, %v9691_v5 }
 0xf6c   :  { %7264 = vmatmul.mubr.bf16.vlgmr.msra.gmra.mrb[68].mxu0 %v9618_v9  ;;  %7946 = vmatprep.subr.bf16.mxu1 %v9691_v5  ;;  %v7101_v9 = vld [vmem:[#allocation5 + $0x228] sm:$0xff] }
 0xf6f   :  { %7947 = vmatpush3.bf16.msra.mxu1 %v7097_v36 }
 0xf70   :  { %7948 = vmatprep.subr.bf16.mxu1 %v9691_v5 }
 0xf73   :  { %7949 = vmatpush3.bf16.msra.mxu1 %v7098_v60 }
 0xf74   :  { %7950 = vmatprep.subr.bf16.mxu1 %v9691_v5 }
 0xf77   :  { %7951 = vmatpush3.bf16.msra.mxu1 %v7099_v61 }
 0xf78   :  { %7952 = vmatprep.subr.bf16.mxu1 %v9691_v5 }
 0xf7b   :  { %7953 = vmatpush3.bf16.msra.mxu1 %v7100_v19 }
 0xf7c   :  { %7954 = vmatprep.subr.bf16.mxu1 %v9691_v5 }
 0xf7f   :  { %7955 = vmatpush3.bf16.msra.mxu1 %v7101_v9 }
 0xf80   :  { %7956 = vmatprep.subr.bf16.mxu1 %v9691_v5 }
 0xf83   :  { %7957 = vmatpush3.bf16.msra.mxu1 %v7102_v20 }
 0xf84   :  { %7958 = vmatprep.subr.bf16.mxu1 %v9691_v5 }
 0xf87   :  { %7959 = vmatpush3.bf16.msra.mxu1 %v7103_v42 }
 0xf8a   :  { %7961 = vmatmul.mubr.bf16.vlgmr.msra.gmra.mrb[72].mxu1 %v9624_v29 }
0x101d   :  { %v7803_v62 = vpop.f32.mrb[64].mxu1 }
0x101e   :  { %v7804_v21 = vpop.f32.mrb[65].mxu1 }
0x101f   :  { %v7825_v48 = vpop.f32.mrb[64].mxu0  ;;  %v7805_v55 = vadd.f32 %v7804_v21, %v7803_v62  ;;  %v7806_v37 = vpop.f32.mrb[66].mxu1 }
0x1020   :  { %v7826_v25 = vpop.f32.mrb[65].mxu0  ;;  %v7807_v12 = vpop.f32.mrb[67].mxu1 }
0x1021   :  { %v7827_v28 = vadd.f32 %v7826_v25, %v7825_v48  ;;  %v7828_v22 = vpop.f32.mrb[66].mxu0  ;;  %v7146_v35 = vadd.f32 %v7805_v55, %v7491_v18 }
0x1022   :  { %v7829_v49 = vpop.f32.mrb[67].mxu0 }
0x1023   :  { %v7186_v26 = vadd.f32 %v7827_v28, %v7146_v35 }
0x103d   :  { %v7847_v45 = vpop.f32.mrb[68].mxu1 }
0x103e   :  { %v7848_v5 = vpop.f32.mrb[69].mxu1 }
0x103f   :  { %v7869_v63 = vpop.f32.mrb[68].mxu0  ;;  %v7849_v2 = vadd.f32 %v7848_v5, %v7847_v45  ;;  %v7850_v46 = vpop.f32.mrb[70].mxu1 }
0x1040   :  { %v7870_v54 = vpop.f32.mrb[69].mxu0  ;;  %v7851_v13 = vpop.f32.mrb[71].mxu1 }
0x1041   :  { %v7871_v29 = vadd.f32 %v7870_v54, %v7869_v63  ;;  %v7872_v58 = vpop.f32.mrb[70].mxu0  ;;  %v7226_v27 = vadd.f32 %v7849_v2, %v7186_v26 }
0x1042   :  { %v7873_v56 = vpop.f32.mrb[71].mxu0 }
0x1043   :  { %v7266_v57 = vadd.f32 %v7871_v29, %v7226_v27 }
0x105d   :  { %v7305_v24 = vpop.f32.mrb[72].mxu1 }
0x105e   :  { %v7306_v17 = vadd.f32 %v7305_v24, %v7266_v57  ;;  %v7962_v52 = vpop.f32.mrb[73].mxu1 }
0x105f   :  { %v7308_v11 = vpop.f32.mrb[74].mxu1 }
0x1060   :  { %7311 = vst [vmem:[#allocation28] sm:$0xff] %v7306_v17  ;;  %v7963_v15 = vpop.f32.mrb[75].mxu1 }
0x1061   :  { %8699 = shalt.err (!%p8696_p4)
}
0x1062   :  { %s9692_s7 = sld [smem:[#allocation54_spill]] }
0x1068   :  { %s8700_s1 = scalar_lea.hbm %s9692_s7, 128 }
0x1069   :  { %p8701_p5 = scmp.ne.s32.totalorder %s9692_s7, %s8700_s1  ;;  %p8704_p6 = scmp.lt.u32.totalorder %s8700_s1, %s9692_s7 }
0x106b   :  { %p8706_p7 = pnand %p8704_p6, %p8701_p5 }
0x106d   :  { %8709 = shalt.err (!%p8706_p7)
}
0x106e   :  { %7321 = dma.vmem_to_hbm [thread:$0]  %s7319_s4, 128, %s9692_s7, [#allocation9]  }
0x106f   :  { %8732 = dma.done.wait [#allocation9], 128  }
0x1070   :  { %8733 = vsyncadd [#allocation9], 4294967168 }
0x1071   :  { %7325 = vsyncpa [#allocation8], 1 }
0x1072   :  { %7326 = vsyncpa [#allocation11], 1 }
0x1073   :  { %7327 = vsyncpa [#allocation14], 1 }
0x1074   :  { %7328 = vsyncpa [#allocation17], 1 }
0x1075   :  { %7329 = vsyncpa [#allocation20], 1 }
0x1076   :  { %7330 = vsyncpa [#allocation23], 1 }
0x1077   :  { %7331 = vsyncpa [#allocation26], 1 }
0x1078   :  { %7332 = vsyncpa [#allocation9], 1 }
0x1079   :  { %7333 = vsyncmov [#allocation6] }
0x107c   :  { %s7334_s29 = vpop.sfrf %7333 }
0x107d   :  { %p7492_p8 = scmp.ne.s32.totalorder %s7334_s29, 0 }
0x107f   :  { %7338 = shalt.err (%p7492_p8)  }
0x1080   :  { %7340 = vsyncmov [#allocation6 + $0x1] }
0x1083   :  { %s7341_s0 = vpop.sfrf %7340 }
0x1084   :  { %p7493_p9 = scmp.ne.s32.totalorder %s7341_s0, 0 }
0x1086   :  { %7345 = shalt.err (%p7493_p9)  }
0x1087   :  { %7347 = vsyncmov [#allocation6 + $0x2] }
0x108a   :  { %s7348_s2 = vpop.sfrf %7347 }
0x108b   :  { %p7494_p10 = scmp.ne.s32.totalorder %s7348_s2, 0 }
0x108d   :  { %7352 = shalt.err (%p7494_p10)  }
0x108e   :  { %7354 = vsyncmov [#allocation6 + $0x3] }
0x1091   :  { %s7355_s14 = vpop.sfrf %7354 }
0x1092   :  { %p7495_p11 = scmp.ne.s32.totalorder %s7355_s14, 0 }
0x1094   :  { %7359 = shalt.err (%p7495_p11)  }

</bundles_post_ra>
